<compile_context>
chip_gen: v7x
topology: tpu7x:2x2x1
jax: 0.10.0
libtpu: 0.0.40
codegen_flags: <defaults>
</compile_context>

<pallas_src>
import functools
import math

import jax
import jax.numpy as jnp
from jax import lax
from jax.experimental import pallas as pl
from jax.experimental.pallas import tpu as pltpu


# ----------------------------- config -----------------------------

class Config:
    batch = 2
    in_channels = 4
    image = 16
    patch = 4                      # 4x4 patches -> 16 tokens
    enc_dim = 128                  # encoder_input_size (encoder feature dim)
    token_dim = 128                # decoder_token_size
    vocab = 50                     # vocab_size == LSTM hidden size
    depth = 2                      # decoder_depth (num LSTM layers)
    kind = "lstm"
    bp = 8                         # padded batch   (sublane multiple of 8)
    h_pad = 128                    # padded hidden  (lane multiple of 128)
    cpp_pad = 128                  # padded patch-embed input dim (lane multiple of 128)

    @property
    def seq(self):
        g = self.image // self.patch
        return g * g


_SQRT1_2 = 0.7071067811865476


def _gelu_exact(y):
    # torch.nn.GELU() default (exact erf form)
    return 0.5 * y * (1.0 + lax.erf(y * _SQRT1_2))


def _lstm_gates(g, H):
    # kernel gate layout (i, f, o, g): one sigmoid over 3H contiguous lanes, one tanh over H
    s = jax.nn.sigmoid(g[:, :3 * H])
    return s[:, :H], s[:, H:2 * H], s[:, 2 * H:3 * H], jnp.tanh(g[:, 3 * H:])


# ----------------------------- Pallas kernels -----------------------------

def _decoder_kernel_depth2(p_ref, enc_w_ref, enc_b_ref, proj_w_ref, proj_b_ref,
                           w_ih0_ref, w_hh0_ref, b0_ref, w1_ref, b1_ref,
                           proj_out_ref, seq_out_ref, hn_ref, cn_ref,
                           xg_ref, *, S, BP, CPP, E, T, H):
    """Fused encoder stand-in + projection + exact GELU + wavefront-pipelined 2-layer LSTM."""
    f32, bf16 = jnp.float32, jnp.bfloat16

    # ---- encoder stand-in: patch-embed linear ----
    # TODO(synk): the real encoder is a constructor-injected black-box nn.Module; it is stood
    # in by a single patch-embed linear producing 'features' of shape (S, B, enc_dim).
    xp = p_ref[...].reshape(S * BP, CPP)
    feat = jnp.dot(xp.astype(bf16), enc_w_ref[...], preferred_element_type=f32) + enc_b_ref[...]

    # ---- projection + exact GELU (the module's returned 'features') ----
    y = jnp.dot(feat.astype(bf16), proj_w_ref[...], preferred_element_type=f32) + proj_b_ref[...]
    y = _gelu_exact(y)
    proj_out_ref[...] = y.reshape(S, BP, T)

    # ---- layer-0 input->gates for ALL timesteps in one MXU matmul ----
    xg = jnp.dot(y.astype(bf16), w_ih0_ref[...], preferred_element_type=f32) + b0_ref[...]
    xg_ref[...] = xg.reshape(S, BP, 4 * H)

    zeros = jnp.zeros((BP, H), f32)

    # ---- wavefront-pipelined recurrence: iteration t = layer-0 step t + layer-1 step t-1 ----
    # prologue: layer-0 step 0 (h0 = c0 = 0 -> gates are just xg[0])
    i0, f0, o0, g0 = _lstm_gates(xg_ref[0], H)
    c0 = i0 * g0
    h0 = o0 * jnp.tanh(c0)

    def step(t, carry):
        h0, c0, h1, c1 = carry
        # layer-1 @ timestep t-1: single K=2H dot against stacked [W_ih1; W_hh1]
        x1 = jnp.concatenate([h0, h1], axis=-1)                                   # (BP, 2H)
        g1 = jnp.dot(x1.astype(bf16), w1_ref[...], preferred_element_type=f32) + b1_ref[...]
        # layer-0 @ timestep t (independent of the layer-1 dot -> MXU overlap)
        gl0 = xg_ref[t] + jnp.dot(h0.astype(bf16), w_hh0_ref[...], preferred_element_type=f32)

        i1, f1, o1, c1g = _lstm_gates(g1, H)
        c1n = f1 * c1 + i1 * c1g
        h1n = o1 * jnp.tanh(c1n)
        seq_out_ref[t - 1] = h1n                       # last layer writes output directly

        i0_, f0_, o0_, c0g = _lstm_gates(gl0, H)
        c0n = f0_ * c0 + i0_ * c0g
        h0n = o0_ * jnp.tanh(c0n)
        return (h0n, c0n, h1n, c1n)

    h0, c0, h1, c1 = lax.fori_loop(1, S, step, (h0, c0, zeros, zeros), unroll=True)

    # epilogue: layer-1 last step (timestep S-1)
    x1 = jnp.concatenate([h0, h1], axis=-1)
    g1 = jnp.dot(x1.astype(bf16), w1_ref[...], preferred_element_type=f32) + b1_ref[...]
    i1, f1, o1, c1g = _lstm_gates(g1, H)
    c1 = f1 * c1 + i1 * c1g
    h1 = o1 * jnp.tanh(c1)
    seq_out_ref[S - 1] = h1

    hn_ref[0] = h0
    cn_ref[0] = c0
    hn_ref[1] = h1
    cn_ref[1] = c1


def _decoder_kernel_general(*refs, S, BP, CPP, E, T, H, L):
    """Generic-depth fallback: layer-sequential stacked LSTM (same fused prologue)."""
    p_ref, enc_w_ref, enc_b_ref, proj_w_ref, proj_b_ref = refs[:5]
    layer_refs = [refs[5 + 3 * l: 5 + 3 * (l + 1)] for l in range(L)]
    base = 5 + 3 * L
    proj_out_ref, seq_out_ref, hn_ref, cn_ref = refs[base:base + 4]
    xg_ref, seq_ref = refs[base + 4], refs[base + 5]
    f32, bf16 = jnp.float32, jnp.bfloat16

    xp = p_ref[...].reshape(S * BP, CPP)
    feat = jnp.dot(xp.astype(bf16), enc_w_ref[...], preferred_element_type=f32) + enc_b_ref[...]
    y = jnp.dot(feat.astype(bf16), proj_w_ref[...], preferred_element_type=f32) + proj_b_ref[...]
    y = _gelu_exact(y)
    proj_out_ref[...] = y.reshape(S, BP, T)

    zeros = jnp.zeros((BP, H), f32)
    x_in = y.astype(bf16)                                             # (S*BP, in_dim)
    for l in range(L):
        w_ih_ref, w_hh_ref, b_ref = layer_refs[l]
        xg = jnp.dot(x_in, w_ih_ref[...], preferred_element_type=f32) + b_ref[...]
        xg_ref[...] = xg.reshape(S, BP, 4 * H)
        last = (l == L - 1)

        def step(t, carry, _last=last, _w_hh_ref=w_hh_ref):
            h, c = carry
            g = xg_ref[t] + jnp.dot(h.astype(bf16), _w_hh_ref[...], preferred_element_type=f32)
            i_g, f_g, o_g, g_g = _lstm_gates(g, H)
            c_new = f_g * c + i_g * g_g
            h_new = o_g * jnp.tanh(c_new)
            if _last:
                seq_out_ref[t] = h_new                 # last layer: write output directly
            else:
                seq_ref[t] = h_new.astype(bf16)        # intermediate layers: bf16 scratch
            return (h_new, c_new)

        h_fin, c_fin = lax.fori_loop(0, S, step, (zeros, zeros), unroll=True)
        hn_ref[l] = h_fin
        cn_ref[l] = c_fin
        if not last:
            x_in = seq_ref[...].reshape(S * BP, H)


# ----------------------------- parameter synthesis -----------------------------

GATE_PERM = (0, 1, 3, 2)   # PyTorch gate order (i, f, g, o) -> kernel layout (i, f, o, g)


def _reorder_pad_gates_w(w, V, H, in_dim, in_pad):
    """PyTorch-layout weight (4V, in_dim) -> kernel layout (in_pad, 4H).

    Gate blocks reordered to (i,f,o,g); hidden padded V->H and input padded in_dim->in_pad
    with zeros (exact: padded hidden lanes keep h = c = 0 forever)."""
    w4 = w.reshape(4, V, in_dim)
    w4 = jnp.stack([w4[g] for g in GATE_PERM])
    w4 = jnp.pad(w4, ((0, 0), (0, H - V), (0, in_pad - in_dim)))
    return w4.reshape(4 * H, in_pad).T


def _reorder_pad_gates_b(b, V, H):
    b4 = b.reshape(4, V)
    b4 = jnp.stack([b4[g] for g in GATE_PERM])
    return jnp.pad(b4, ((0, 0), (0, H - V))).reshape(1, 4 * H)


def init_params(cfg):
    key = jax.random.PRNGKey(0)

    def take(shape, scale):
        nonlocal key
        key, sub = jax.random.split(key)
        return scale * jax.random.normal(sub, shape, dtype=jnp.float32)

    E, T, V, L, H = cfg.enc_dim, cfg.token_dim, cfg.vocab, cfg.depth, cfg.h_pad
    CPP = cfg.in_channels * cfg.patch * cfg.patch
    CPPp = cfg.cpp_pad

    params = {
        # encoder stand-in (patch-embed linear); extra padded input rows are zero
        "enc_w": jnp.pad(take((CPP, E), 0.02), ((0, CPPp - CPP), (0, 0))).astype(jnp.bfloat16),
        "enc_b": jnp.zeros((1, E), jnp.float32),
        # nn.Linear(encoder_input_size -> decoder_token_size)
        "proj_w": take((E, T), 1.0 / math.sqrt(E)).astype(jnp.bfloat16),
        "proj_b": take((1, T), 1.0 / math.sqrt(E)),
        "lstm": [],
    }

    stdv = 1.0 / math.sqrt(V)
    in_dim, in_pad = T, T
    for _ in range(L):
        # logical PyTorch params: weight_ih (4V, in), weight_hh (4V, V), biases (4V,)
        w_ih = take((4 * V, in_dim), stdv)
        w_hh = take((4 * V, V), stdv)
        b_ih = take((4 * V,), stdv)
        b_hh = take((4 * V,), stdv)
        params["lstm"].append({
            "w_ih": _reorder_pad_gates_w(w_ih, V, H, in_dim, in_pad).astype(jnp.bfloat16),  # (in_pad, 4H)
            "w_hh": _reorder_pad_gates_w(w_hh, V, H, V, H).astype(jnp.bfloat16),            # (H, 4H)
            "b": _reorder_pad_gates_b(b_ih + b_hh, V, H),                                   # (1, 4H) f32
        })
        in_dim, in_pad = V, H           # layers >= 1: logical input = vocab, zero-padded to H

    # stacked [W_ih ; W_hh] per layer >= 1 for the wavefront's single K=2H dot
    for lp in params["lstm"][1:]:
        lp["w_stacked"] = jnp.concatenate([lp["w_ih"], lp["w_hh"]], axis=0)     # (2H, 4H) bf16
    return params


# ----------------------------- wrapper -----------------------------

def _extract_patches(x, cfg):
    B, C, Hh, Ww = x.shape
    P = cfg.patch
    gh, gw = Hh // P, Ww // P
    S = gh * gw
    CPP = C * P * P
    # one-time XLA layout plumbing: patches, seq-major, pad batch -> 8 sublanes, CPP -> 128 lanes
    p = x.reshape(B, C, gh, P, gw, P).transpose(2, 4, 0, 1, 3, 5).reshape(S, B, CPP)
    p = jnp.pad(p, ((0, 0), (0, cfg.bp - B), (0, cfg.cpp_pad - CPP)))
    return p, S


def rnn_decoder_forward(params, x, cfg):
    assert cfg.kind == "lstm"   # TODO(synk): 'gru' / 'rnn' recurrent variants not implemented
    p, S = _extract_patches(x, cfg)
    BP, CPPp = cfg.bp, cfg.cpp_pad
    E, T, H, L, V, B = cfg.enc_dim, cfg.token_dim, cfg.h_pad, cfg.depth, cfg.vocab, cfg.batch

    def full(shape):
        nd = len(shape)
        return pl.BlockSpec(shape, lambda i, _nd=nd: (0,) * _nd)

    in_specs = [full((S, BP, CPPp)), full((CPPp, E)), full((1, E)),
                full((E, T)), full((1, T))]
    args = [p, params["enc_w"], params["enc_b"], params["proj_w"], params["proj_b"]]

    if L == 2:
        l0, l1 = params["lstm"]
        in_specs += [full((T, 4 * H)), full((H, 4 * H)), full((1, 4 * H)),
                     full((2 * H, 4 * H)), full((1, 4 * H))]
        args += [l0["w_ih"], l0["w_hh"], l0["b"], l1["w_stacked"], l1["b"]]
        kernel = functools.partial(_decoder_kernel_depth2,
                                   S=S, BP=BP, CPP=CPPp, E=E, T=T, H=H)
        scratch = [pltpu.VMEM((S, BP, 4 * H), jnp.float32)]       # layer-0 gate pre-activations
    else:
        for lp in params["lstm"]:
            in_dim = lp["w_ih"].shape[0]
            in_specs += [full((in_dim, 4 * H)), full((H, 4 * H)), full((1, 4 * H))]
            args += [lp["w_ih"], lp["w_hh"], lp["b"]]
        kernel = functools.partial(_decoder_kernel_general,
                                   S=S, BP=BP, CPP=CPPp, E=E, T=T, H=H, L=L)
        scratch = [pltpu.VMEM((S, BP, 4 * H), jnp.float32),
                   pltpu.VMEM((S, BP, H), jnp.bfloat16)]          # intermediate layer outputs

    out_shapes = (jax.ShapeDtypeStruct((S, BP, T), jnp.float32),  # projected features
                  jax.ShapeDtypeStruct((S, BP, H), jnp.float32),  # LSTM output sequence (padded)
                  jax.ShapeDtypeStruct((L, BP, H), jnp.float32),  # hn
                  jax.ShapeDtypeStruct((L, BP, H), jnp.float32))  # cn
    out_specs = (full((S, BP, T)), full((S, BP, H)),
                 full((L, BP, H)), full((L, BP, H)))

    proj, seq, hn, cn = pl.pallas_call(
        kernel,
        out_shape=out_shapes,
        grid=(1,),
        in_specs=in_specs,
        out_specs=out_specs,
        scratch_shapes=scratch,
        compiler_params=pltpu.CompilerParams(dimension_semantics=("arbitrary",)),
    )(*args)

    # strip batch / hidden padding once, in the XLA wrapper
    return {
        "features": proj[:, :B, :],                                # (S, B, T)
        "language_head_output": seq[:, :B, :V],                    # (S, B, vocab)
        "hidden_states": (hn[:, :B, :V], cn[:, :B, :V]),           # each (depth, B, vocab)
    }


# ----------------------------- main -----------------------------

if __name__ == "__main__":
    cfg = Config()
    params = init_params(cfg)

    x = jax.random.normal(jax.random.PRNGKey(0),
                          (cfg.batch, cfg.in_channels, cfg.image, cfg.image),
                          dtype=jnp.float32)

    fwd = jax.jit(functools.partial(rnn_decoder_forward, cfg=cfg))
    out = fwd(params, x)
    jax.block_until_ready(out)

    S = cfg.seq
    assert out["features"].shape == (S, cfg.batch, cfg.token_dim)
    assert out["language_head_output"].shape == (S, cfg.batch, cfg.vocab)
    assert out["hidden_states"][0].shape == (cfg.depth, cfg.batch, cfg.vocab)
    assert out["hidden_states"][1].shape == (cfg.depth, cfg.batch, cfg.vocab)
    assert bool(jnp.all(jnp.isfinite(out["language_head_output"])))
    print("KERNEL_OK")
</pallas_src>

<mosaic_0001>
module attributes {stable_mosaic.version = 11 : i64} {
  func.func @_decoder_kernel_depth2(%arg0: i32, %arg1: memref<16x8x128xf32, #tpu.memory_space<vmem>>, %arg2: memref<128x128xbf16, #tpu.memory_space<vmem>>, %arg3: memref<1x128xf32, #tpu.memory_space<vmem>>, %arg4: memref<128x128xbf16, #tpu.memory_space<vmem>>, %arg5: memref<1x128xf32, #tpu.memory_space<vmem>>, %arg6: memref<128x512xbf16, #tpu.memory_space<vmem>>, %arg7: memref<128x512xbf16, #tpu.memory_space<vmem>>, %arg8: memref<1x512xf32, #tpu.memory_space<vmem>>, %arg9: memref<256x512xbf16, #tpu.memory_space<vmem>>, %arg10: memref<1x512xf32, #tpu.memory_space<vmem>>, %arg11: memref<16x8x128xf32, #tpu.memory_space<vmem>>, %arg12: memref<16x8x128xf32, #tpu.memory_space<vmem>>, %arg13: memref<2x8x128xf32, #tpu.memory_space<vmem>>, %arg14: memref<2x8x128xf32, #tpu.memory_space<vmem>>, %arg15: memref<16x8x512xf32, #tpu.memory_space<vmem>>) attributes {dimension_semantics = [#tpu.dimension_semantics<arbitrary>], iteration_bounds = array<i64: 1>, scalar_prefetch = 0 : i64, scratch_operands = 1 : i64, tpu.core_type = #tpu.core_type<tc>, window_params = [{pipeline_mode = #tpu.pipeline_mode<synchronous>, transform_indices = @transform_0, window_bounds = array<i64: 16, 8, 128>}, {pipeline_mode = #tpu.pipeline_mode<synchronous>, transform_indices = @transform_1, window_bounds = array<i64: 128, 128>}, {pipeline_mode = #tpu.pipeline_mode<synchronous>, transform_indices = @transform_2, window_bounds = array<i64: 1, 128>}, {pipeline_mode = #tpu.pipeline_mode<synchronous>, transform_indices = @transform_3, window_bounds = array<i64: 128, 128>}, {pipeline_mode = #tpu.pipeline_mode<synchronous>, transform_indices = @transform_4, window_bounds = array<i64: 1, 128>}, {pipeline_mode = #tpu.pipeline_mode<synchronous>, transform_indices = @transform_5, window_bounds = array<i64: 128, 512>}, {pipeline_mode = #tpu.pipeline_mode<synchronous>, transform_indices = @transform_6, window_bounds = array<i64: 128, 512>}, {pipeline_mode = #tpu.pipeline_mode<synchronous>, transform_indices = @transform_7, window_bounds = array<i64: 1, 512>}, {pipeline_mode = #tpu.pipeline_mode<synchronous>, transform_indices = @transform_8, window_bounds = array<i64: 256, 512>}, {pipeline_mode = #tpu.pipeline_mode<synchronous>, transform_indices = @transform_9, window_bounds = array<i64: 1, 512>}, {pipeline_mode = #tpu.pipeline_mode<synchronous>, transform_indices = @transform_10, window_bounds = array<i64: 16, 8, 128>}, {pipeline_mode = #tpu.pipeline_mode<synchronous>, transform_indices = @transform_11, window_bounds = array<i64: 16, 8, 128>}, {pipeline_mode = #tpu.pipeline_mode<synchronous>, transform_indices = @transform_12, window_bounds = array<i64: 2, 8, 128>}, {pipeline_mode = #tpu.pipeline_mode<synchronous>, transform_indices = @transform_13, window_bounds = array<i64: 2, 8, 128>}]} {
    %c0 = arith.constant 0 : index
    %c0_0 = arith.constant 0 : index
    %c0_1 = arith.constant 0 : index
    %0 = vector.load %arg1[%c0, %c0_0, %c0_1] : memref<16x8x128xf32, #tpu.memory_space<vmem>>, vector<16x8x128xf32>
    %1 = vector.shape_cast %0 : vector<16x8x128xf32> to vector<128x128xf32>
    %2 = arith.truncf %1 : vector<128x128xf32> to vector<128x128xbf16>
    %c0_2 = arith.constant 0 : index
    %c0_3 = arith.constant 0 : index
    %3 = vector.load %arg2[%c0_2, %c0_3] : memref<128x128xbf16, #tpu.memory_space<vmem>>, vector<128x128xbf16>
    %cst = arith.constant dense<0.000000e+00> : vector<128x128xf32>
    %4 = tpu.matmul %2, %3, %cst {dimension_numbers = #tpu.dot_dimension_numbers<[1], [0], [0], [1], [0, 0, 1, 1], [], []>} : vector<128x128xbf16>, vector<128x128xbf16>, vector<128x128xf32> -> vector<128x128xf32>
    %c0_4 = arith.constant 0 : index
    %c0_5 = arith.constant 0 : index
    %5 = vector.load %arg3[%c0_4, %c0_5] : memref<1x128xf32, #tpu.memory_space<vmem>>, vector<1x128xf32>
    %6 = vector.broadcast %5 : vector<1x128xf32> to vector<128x128xf32>
    %7 = arith.addf %4, %6 : vector<128x128xf32>
    %8 = arith.truncf %7 : vector<128x128xf32> to vector<128x128xbf16>
    %c0_6 = arith.constant 0 : index
    %c0_7 = arith.constant 0 : index
    %9 = vector.load %arg4[%c0_6, %c0_7] : memref<128x128xbf16, #tpu.memory_space<vmem>>, vector<128x128xbf16>
    %cst_8 = arith.constant dense<0.000000e+00> : vector<128x128xf32>
    %10 = tpu.matmul %8, %9, %cst_8 {dimension_numbers = #tpu.dot_dimension_numbers<[1], [0], [0], [1], [0, 0, 1, 1], [], []>} : vector<128x128xbf16>, vector<128x128xbf16>, vector<128x128xf32> -> vector<128x128xf32>
    %c0_9 = arith.constant 0 : index
    %c0_10 = arith.constant 0 : index
    %11 = vector.load %arg5[%c0_9, %c0_10] : memref<1x128xf32, #tpu.memory_space<vmem>>, vector<1x128xf32>
    %12 = vector.broadcast %11 : vector<1x128xf32> to vector<128x128xf32>
    %13 = arith.addf %10, %12 : vector<128x128xf32>
    %cst_11 = arith.constant 5.000000e-01 : f32
    %14 = vector.broadcast %cst_11 : f32 to vector<128x128xf32>
    %15 = arith.mulf %14, %13 : vector<128x128xf32>
    %cst_12 = arith.constant 0.707106769 : f32
    %16 = vector.broadcast %cst_12 : f32 to vector<128x128xf32>
    %17 = arith.mulf %13, %16 : vector<128x128xf32>
    %18 = math.erf %17 : vector<128x128xf32>
    %cst_13 = arith.constant 1.000000e+00 : f32
    %19 = vector.broadcast %cst_13 : f32 to vector<128x128xf32>
    %20 = arith.addf %19, %18 : vector<128x128xf32>
    %21 = arith.mulf %15, %20 : vector<128x128xf32>
    %22 = vector.shape_cast %21 : vector<128x128xf32> to vector<16x8x128xf32>
    %c0_14 = arith.constant 0 : index
    %c0_15 = arith.constant 0 : index
    %c0_16 = arith.constant 0 : index
    %23 = vector.load %arg11[%c0_14, %c0_15, %c0_16] : memref<16x8x128xf32, #tpu.memory_space<vmem>>, vector<16x8x128xf32>
    tpu.vector_store %arg11[%c0_14, %c0_15, %c0_16], %22 {strides = array<i32>} : memref<16x8x128xf32, #tpu.memory_space<vmem>>, vector<16x8x128xf32>,
    %24 = arith.truncf %21 : vector<128x128xf32> to vector<128x128xbf16>
    %c0_17 = arith.constant 0 : index
    %c0_18 = arith.constant 0 : index
    %25 = vector.load %arg6[%c0_17, %c0_18] : memref<128x512xbf16, #tpu.memory_space<vmem>>, vector<128x512xbf16>
    %cst_19 = arith.constant dense<0.000000e+00> : vector<128x512xf32>
    %26 = tpu.matmul %24, %25, %cst_19 {dimension_numbers = #tpu.dot_dimension_numbers<[1], [0], [0], [1], [0, 0, 1, 1], [], []>} : vector<128x128xbf16>, vector<128x512xbf16>, vector<128x512xf32> -> vector<128x512xf32>
    %c0_20 = arith.constant 0 : index
    %c0_21 = arith.constant 0 : index
    %27 = vector.load %arg8[%c0_20, %c0_21] : memref<1x512xf32, #tpu.memory_space<vmem>>, vector<1x512xf32>
    %28 = vector.broadcast %27 : vector<1x512xf32> to vector<128x512xf32>
    %29 = arith.addf %26, %28 : vector<128x512xf32>
    %30 = vector.shape_cast %29 : vector<128x512xf32> to vector<16x8x512xf32>
    %c0_22 = arith.constant 0 : index
    %c0_23 = arith.constant 0 : index
    %c0_24 = arith.constant 0 : index
    %31 = vector.load %arg15[%c0_22, %c0_23, %c0_24] : memref<16x8x512xf32, #tpu.memory_space<vmem>>, vector<16x8x512xf32>
    tpu.vector_store %arg15[%c0_22, %c0_23, %c0_24], %30 {strides = array<i32>} : memref<16x8x512xf32, #tpu.memory_space<vmem>>, vector<16x8x512xf32>,
    %cst_25 = arith.constant 0.000000e+00 : f32
    %32 = vector.broadcast %cst_25 : f32 to vector<8x128xf32>
    %c0_26 = arith.constant 0 : index
    %c0_27 = arith.constant 0 : index
    %c0_28 = arith.constant 0 : index
    %33 = vector.load %arg15[%c0_26, %c0_27, %c0_28] : memref<16x8x512xf32, #tpu.memory_space<vmem>>, vector<1x8x512xf32>
    %34 = vector.shape_cast %33 : vector<1x8x512xf32> to vector<8x512xf32>
    %35 = vector.extract_strided_slice %34 {offsets = [0, 0], sizes = [8, 384], strides = [1, 1]} : vector<8x512xf32> to vector<8x384xf32>
    %36 = arith.negf %35 : vector<8x384xf32>
    %37 = math.exp %36 : vector<8x384xf32>
    %cst_29 = arith.constant 1.000000e+00 : f32
    %38 = vector.broadcast %cst_29 : f32 to vector<8x384xf32>
    %39 = arith.addf %38, %37 : vector<8x384xf32>
    %40 = arith.divf %38, %39 : vector<8x384xf32>
    %41 = vector.extract_strided_slice %40 {offsets = [0, 0], sizes = [8, 128], strides = [1, 1]} : vector<8x384xf32> to vector<8x128xf32>
    %42 = vector.extract_strided_slice %40 {offsets = [0, 256], sizes = [8, 128], strides = [1, 1]} : vector<8x384xf32> to vector<8x128xf32>
    %43 = vector.extract_strided_slice %34 {offsets = [0, 384], sizes = [8, 128], strides = [1, 1]} : vector<8x512xf32> to vector<8x128xf32>
    %44 = math.tanh %43 : vector<8x128xf32>
    %45 = arith.mulf %41, %44 : vector<8x128xf32>
    %46 = math.tanh %45 : vector<8x128xf32>
    %47 = arith.mulf %42, %46 : vector<8x128xf32>
    %c1_i32 = arith.constant 1 : i32
    %48 = tpu.concatenate %47, %32 in 1 : vector<8x128xf32>, vector<8x128xf32> -> vector<8x256xf32>
    %49 = arith.truncf %48 : vector<8x256xf32> to vector<8x256xbf16>
    %c0_30 = arith.constant 0 : index
    %c0_31 = arith.constant 0 : index
    %50 = vector.load %arg9[%c0_30, %c0_31] : memref<256x512xbf16, #tpu.memory_space<vmem>>, vector<256x512xbf16>
    %cst_32 = arith.constant dense<0.000000e+00> : vector<8x512xf32>
    %51 = tpu.matmul %49, %50, %cst_32 {dimension_numbers = #tpu.dot_dimension_numbers<[1], [0], [0], [1], [0, 0, 1, 1], [], []>} : vector<8x256xbf16>, vector<256x512xbf16>, vector<8x512xf32> -> vector<8x512xf32>
    %c0_33 = arith.constant 0 : index
    %c0_34 = arith.constant 0 : index
    %52 = vector.load %arg10[%c0_33, %c0_34] : memref<1x512xf32, #tpu.memory_space<vmem>>, vector<1x512xf32>
    %53 = vector.broadcast %52 : vector<1x512xf32> to vector<8x512xf32>
    %54 = arith.addf %51, %53 : vector<8x512xf32>
    %55 = arith.index_cast %c1_i32 : i32 to index
    %c0_35 = arith.constant 0 : index
    %c0_36 = arith.constant 0 : index
    %56 = vector.load %arg15[%55, %c0_35, %c0_36] : memref<16x8x512xf32, #tpu.memory_space<vmem>>, vector<1x8x512xf32>
    %57 = vector.shape_cast %56 : vector<1x8x512xf32> to vector<8x512xf32>
    %58 = arith.truncf %47 : vector<8x128xf32> to vector<8x128xbf16>
    %c0_37 = arith.constant 0 : index
    %c0_38 = arith.constant 0 : index
    %59 = vector.load %arg7[%c0_37, %c0_38] : memref<128x512xbf16, #tpu.memory_space<vmem>>, vector<128x512xbf16>
    %cst_39 = arith.constant dense<0.000000e+00> : vector<8x512xf32>
    %60 = tpu.matmul %58, %59, %cst_39 {dimension_numbers = #tpu.dot_dimension_numbers<[1], [0], [0], [1], [0, 0, 1, 1], [], []>} : vector<8x128xbf16>, vector<128x512xbf16>, vector<8x512xf32> -> vector<8x512xf32>
    %61 = arith.addf %57, %60 : vector<8x512xf32>
    %62 = vector.extract_strided_slice %54 {offsets = [0, 0], sizes = [8, 384], strides = [1, 1]} : vector<8x512xf32> to vector<8x384xf32>
    %63 = arith.negf %62 : vector<8x384xf32>
    %64 = math.exp %63 : vector<8x384xf32>
    %cst_40 = arith.constant 1.000000e+00 : f32
    %65 = vector.broadcast %cst_40 : f32 to vector<8x384xf32>
    %66 = arith.addf %65, %64 : vector<8x384xf32>
    %67 = arith.divf %65, %66 : vector<8x384xf32>
    %68 = vector.extract_strided_slice %67 {offsets = [0, 0], sizes = [8, 128], strides = [1, 1]} : vector<8x384xf32> to vector<8x128xf32>
    %69 = vector.extract_strided_slice %67 {offsets = [0, 128], sizes = [8, 128], strides = [1, 1]} : vector<8x384xf32> to vector<8x128xf32>
    %70 = vector.extract_strided_slice %67 {offsets = [0, 256], sizes = [8, 128], strides = [1, 1]} : vector<8x384xf32> to vector<8x128xf32>
    %71 = vector.extract_strided_slice %54 {offsets = [0, 384], sizes = [8, 128], strides = [1, 1]} : vector<8x512xf32> to vector<8x128xf32>
    %72 = math.tanh %71 : vector<8x128xf32>
    %73 = arith.mulf %69, %32 : vector<8x128xf32>
    %74 = arith.mulf %68, %72 : vector<8x128xf32>
    %75 = arith.addf %73, %74 : vector<8x128xf32>
    %76 = math.tanh %75 : vector<8x128xf32>
    %77 = arith.mulf %70, %76 : vector<8x128xf32>
    %c1_i32_41 = arith.constant 1 : i32
    %78 = arith.subi %c1_i32, %c1_i32_41 : i32
    %79 = arith.index_cast %78 : i32 to index
    %c0_42 = arith.constant 0 : index
    %c0_43 = arith.constant 0 : index
    %80 = vector.load %arg12[%79, %c0_42, %c0_43] : memref<16x8x128xf32, #tpu.memory_space<vmem>>, vector<1x8x128xf32>
    %81 = vector.shape_cast %80 : vector<1x8x128xf32> to vector<8x128xf32>
    %82 = vector.shape_cast %77 : vector<8x128xf32> to vector<1x8x128xf32>
    tpu.vector_store %arg12[%79, %c0_42, %c0_43], %82 {strides = array<i32>} : memref<16x8x128xf32, #tpu.memory_space<vmem>>, vector<1x8x128xf32>,
    %83 = vector.extract_strided_slice %61 {offsets = [0, 0], sizes = [8, 384], strides = [1, 1]} : vector<8x512xf32> to vector<8x384xf32>
    %84 = arith.negf %83 : vector<8x384xf32>
    %85 = math.exp %84 : vector<8x384xf32>
    %cst_44 = arith.constant 1.000000e+00 : f32
    %86 = vector.broadcast %cst_44 : f32 to vector<8x384xf32>
    %87 = arith.addf %86, %85 : vector<8x384xf32>
    %88 = arith.divf %86, %87 : vector<8x384xf32>
    %89 = vector.extract_strided_slice %88 {offsets = [0, 0], sizes = [8, 128], strides = [1, 1]} : vector<8x384xf32> to vector<8x128xf32>
    %90 = vector.extract_strided_slice %88 {offsets = [0, 128], sizes = [8, 128], strides = [1, 1]} : vector<8x384xf32> to vector<8x128xf32>
    %91 = vector.extract_strided_slice %88 {offsets = [0, 256], sizes = [8, 128], strides = [1, 1]} : vector<8x384xf32> to vector<8x128xf32>
    %92 = vector.extract_strided_slice %61 {offsets = [0, 384], sizes = [8, 128], strides = [1, 1]} : vector<8x512xf32> to vector<8x128xf32>
    %93 = math.tanh %92 : vector<8x128xf32>
    %94 = arith.mulf %90, %45 : vector<8x128xf32>
    %95 = arith.mulf %89, %93 : vector<8x128xf32>
    %96 = arith.addf %94, %95 : vector<8x128xf32>
    %97 = math.tanh %96 : vector<8x128xf32>
    %98 = arith.mulf %91, %97 : vector<8x128xf32>
    %c2_i32 = arith.constant 2 : i32
    %99 = tpu.concatenate %98, %77 in 1 : vector<8x128xf32>, vector<8x128xf32> -> vector<8x256xf32>
    %100 = arith.truncf %99 : vector<8x256xf32> to vector<8x256xbf16>
    %c0_45 = arith.constant 0 : index
    %c0_46 = arith.constant 0 : index
    %101 = vector.load %arg9[%c0_45, %c0_46] : memref<256x512xbf16, #tpu.memory_space<vmem>>, vector<256x512xbf16>
    %cst_47 = arith.constant dense<0.000000e+00> : vector<8x512xf32>
    %102 = tpu.matmul %100, %101, %cst_47 {dimension_numbers = #tpu.dot_dimension_numbers<[1], [0], [0], [1], [0, 0, 1, 1], [], []>} : vector<8x256xbf16>, vector<256x512xbf16>, vector<8x512xf32> -> vector<8x512xf32>
    %c0_48 = arith.constant 0 : index
    %c0_49 = arith.constant 0 : index
    %103 = vector.load %arg10[%c0_48, %c0_49] : memref<1x512xf32, #tpu.memory_space<vmem>>, vector<1x512xf32>
    %104 = vector.broadcast %103 : vector<1x512xf32> to vector<8x512xf32>
    %105 = arith.addf %102, %104 : vector<8x512xf32>
    %106 = arith.index_cast %c2_i32 : i32 to index
    %c0_50 = arith.constant 0 : index
    %c0_51 = arith.constant 0 : index
    %107 = vector.load %arg15[%106, %c0_50, %c0_51] : memref<16x8x512xf32, #tpu.memory_space<vmem>>, vector<1x8x512xf32>
    %108 = vector.shape_cast %107 : vector<1x8x512xf32> to vector<8x512xf32>
    %109 = arith.truncf %98 : vector<8x128xf32> to vector<8x128xbf16>
    %c0_52 = arith.constant 0 : index
    %c0_53 = arith.constant 0 : index
    %110 = vector.load %arg7[%c0_52, %c0_53] : memref<128x512xbf16, #tpu.memory_space<vmem>>, vector<128x512xbf16>
    %cst_54 = arith.constant dense<0.000000e+00> : vector<8x512xf32>
    %111 = tpu.matmul %109, %110, %cst_54 {dimension_numbers = #tpu.dot_dimension_numbers<[1], [0], [0], [1], [0, 0, 1, 1], [], []>} : vector<8x128xbf16>, vector<128x512xbf16>, vector<8x512xf32> -> vector<8x512xf32>
    %112 = arith.addf %108, %111 : vector<8x512xf32>
    %113 = vector.extract_strided_slice %105 {offsets = [0, 0], sizes = [8, 384], strides = [1, 1]} : vector<8x512xf32> to vector<8x384xf32>
    %114 = arith.negf %113 : vector<8x384xf32>
    %115 = math.exp %114 : vector<8x384xf32>
    %cst_55 = arith.constant 1.000000e+00 : f32
    %116 = vector.broadcast %cst_55 : f32 to vector<8x384xf32>
    %117 = arith.addf %116, %115 : vector<8x384xf32>
    %118 = arith.divf %116, %117 : vector<8x384xf32>
    %119 = vector.extract_strided_slice %118 {offsets = [0, 0], sizes = [8, 128], strides = [1, 1]} : vector<8x384xf32> to vector<8x128xf32>
    %120 = vector.extract_strided_slice %118 {offsets = [0, 128], sizes = [8, 128], strides = [1, 1]} : vector<8x384xf32> to vector<8x128xf32>
    %121 = vector.extract_strided_slice %118 {offsets = [0, 256], sizes = [8, 128], strides = [1, 1]} : vector<8x384xf32> to vector<8x128xf32>
    %122 = vector.extract_strided_slice %105 {offsets = [0, 384], sizes = [8, 128], strides = [1, 1]} : vector<8x512xf32> to vector<8x128xf32>
    %123 = math.tanh %122 : vector<8x128xf32>
    %124 = arith.mulf %120, %75 : vector<8x128xf32>
    %125 = arith.mulf %119, %123 : vector<8x128xf32>
    %126 = arith.addf %124, %125 : vector<8x128xf32>
    %127 = math.tanh %126 : vector<8x128xf32>
    %128 = arith.mulf %121, %127 : vector<8x128xf32>
    %c1_i32_56 = arith.constant 1 : i32
    %129 = arith.subi %c2_i32, %c1_i32_56 : i32
    %130 = arith.index_cast %129 : i32 to index
    %c0_57 = arith.constant 0 : index
    %c0_58 = arith.constant 0 : index
    %131 = vector.load %arg12[%130, %c0_57, %c0_58] : memref<16x8x128xf32, #tpu.memory_space<vmem>>, vector<1x8x128xf32>
    %132 = vector.shape_cast %131 : vector<1x8x128xf32> to vector<8x128xf32>
    %133 = vector.shape_cast %128 : vector<8x128xf32> to vector<1x8x128xf32>
    tpu.vector_store %arg12[%130, %c0_57, %c0_58], %133 {strides = array<i32>} : memref<16x8x128xf32, #tpu.memory_space<vmem>>, vector<1x8x128xf32>,
    %134 = vector.extract_strided_slice %112 {offsets = [0, 0], sizes = [8, 384], strides = [1, 1]} : vector<8x512xf32> to vector<8x384xf32>
    %135 = arith.negf %134 : vector<8x384xf32>
    %136 = math.exp %135 : vector<8x384xf32>
    %cst_59 = arith.constant 1.000000e+00 : f32
    %137 = vector.broadcast %cst_59 : f32 to vector<8x384xf32>
    %138 = arith.addf %137, %136 : vector<8x384xf32>
    %139 = arith.divf %137, %138 : vector<8x384xf32>
    %140 = vector.extract_strided_slice %139 {offsets = [0, 0], sizes = [8, 128], strides = [1, 1]} : vector<8x384xf32> to vector<8x128xf32>
    %141 = vector.extract_strided_slice %139 {offsets = [0, 128], sizes = [8, 128], strides = [1, 1]} : vector<8x384xf32> to vector<8x128xf32>
    %142 = vector.extract_strided_slice %139 {offsets = [0, 256], sizes = [8, 128], strides = [1, 1]} : vector<8x384xf32> to vector<8x128xf32>
    %143 = vector.extract_strided_slice %112 {offsets = [0, 384], sizes = [8, 128], strides = [1, 1]} : vector<8x512xf32> to vector<8x128xf32>
    %144 = math.tanh %143 : vector<8x128xf32>
    %145 = arith.mulf %141, %96 : vector<8x128xf32>
    %146 = arith.mulf %140, %144 : vector<8x128xf32>
    %147 = arith.addf %145, %146 : vector<8x128xf32>
    %148 = math.tanh %147 : vector<8x128xf32>
    %149 = arith.mulf %142, %148 : vector<8x128xf32>
    %c3_i32 = arith.constant 3 : i32
    %150 = tpu.concatenate %149, %128 in 1 : vector<8x128xf32>, vector<8x128xf32> -> vector<8x256xf32>
    %151 = arith.truncf %150 : vector<8x256xf32> to vector<8x256xbf16>
    %c0_60 = arith.constant 0 : index
    %c0_61 = arith.constant 0 : index
    %152 = vector.load %arg9[%c0_60, %c0_61] : memref<256x512xbf16, #tpu.memory_space<vmem>>, vector<256x512xbf16>
    %cst_62 = arith.constant dense<0.000000e+00> : vector<8x512xf32>
    %153 = tpu.matmul %151, %152, %cst_62 {dimension_numbers = #tpu.dot_dimension_numbers<[1], [0], [0], [1], [0, 0, 1, 1], [], []>} : vector<8x256xbf16>, vector<256x512xbf16>, vector<8x512xf32> -> vector<8x512xf32>
    %c0_63 = arith.constant 0 : index
    %c0_64 = arith.constant 0 : index
    %154 = vector.load %arg10[%c0_63, %c0_64] : memref<1x512xf32, #tpu.memory_space<vmem>>, vector<1x512xf32>
    %155 = vector.broadcast %154 : vector<1x512xf32> to vector<8x512xf32>
    %156 = arith.addf %153, %155 : vector<8x512xf32>
    %157 = arith.index_cast %c3_i32 : i32 to index
    %c0_65 = arith.constant 0 : index
    %c0_66 = arith.constant 0 : index
    %158 = vector.load %arg15[%157, %c0_65, %c0_66] : memref<16x8x512xf32, #tpu.memory_space<vmem>>, vector<1x8x512xf32>
    %159 = vector.shape_cast %158 : vector<1x8x512xf32> to vector<8x512xf32>
    %160 = arith.truncf %149 : vector<8x128xf32> to vector<8x128xbf16>
    %c0_67 = arith.constant 0 : index
    %c0_68 = arith.constant 0 : index
    %161 = vector.load %arg7[%c0_67, %c0_68] : memref<128x512xbf16, #tpu.memory_space<vmem>>, vector<128x512xbf16>
    %cst_69 = arith.constant dense<0.000000e+00> : vector<8x512xf32>
    %162 = tpu.matmul %160, %161, %cst_69 {dimension_numbers = #tpu.dot_dimension_numbers<[1], [0], [0], [1], [0, 0, 1, 1], [], []>} : vector<8x128xbf16>, vector<128x512xbf16>, vector<8x512xf32> -> vector<8x512xf32>
    %163 = arith.addf %159, %162 : vector<8x512xf32>
    %164 = vector.extract_strided_slice %156 {offsets = [0, 0], sizes = [8, 384], strides = [1, 1]} : vector<8x512xf32> to vector<8x384xf32>
    %165 = arith.negf %164 : vector<8x384xf32>
    %166 = math.exp %165 : vector<8x384xf32>
    %cst_70 = arith.constant 1.000000e+00 : f32
    %167 = vector.broadcast %cst_70 : f32 to vector<8x384xf32>
    %168 = arith.addf %167, %166 : vector<8x384xf32>
    %169 = arith.divf %167, %168 : vector<8x384xf32>
    %170 = vector.extract_strided_slice %169 {offsets = [0, 0], sizes = [8, 128], strides = [1, 1]} : vector<8x384xf32> to vector<8x128xf32>
    %171 = vector.extract_strided_slice %169 {offsets = [0, 128], sizes = [8, 128], strides = [1, 1]} : vector<8x384xf32> to vector<8x128xf32>
    %172 = vector.extract_strided_slice %169 {offsets = [0, 256], sizes = [8, 128], strides = [1, 1]} : vector<8x384xf32> to vector<8x128xf32>
    %173 = vector.extract_strided_slice %156 {offsets = [0, 384], sizes = [8, 128], strides = [1, 1]} : vector<8x512xf32> to vector<8x128xf32>
    %174 = math.tanh %173 : vector<8x128xf32>
    %175 = arith.mulf %171, %126 : vector<8x128xf32>
    %176 = arith.mulf %170, %174 : vector<8x128xf32>
    %177 = arith.addf %175, %176 : vector<8x128xf32>
    %178 = math.tanh %177 : vector<8x128xf32>
    %179 = arith.mulf %172, %178 : vector<8x128xf32>
    %c1_i32_71 = arith.constant 1 : i32
    %180 = arith.subi %c3_i32, %c1_i32_71 : i32
    %181 = arith.index_cast %180 : i32 to index
    %c0_72 = arith.constant 0 : index
    %c0_73 = arith.constant 0 : index
    %182 = vector.load %arg12[%181, %c0_72, %c0_73] : memref<16x8x128xf32, #tpu.memory_space<vmem>>, vector<1x8x128xf32>
    %183 = vector.shape_cast %182 : vector<1x8x128xf32> to vector<8x128xf32>
    %184 = vector.shape_cast %179 : vector<8x128xf32> to vector<1x8x128xf32>
    tpu.vector_store %arg12[%181, %c0_72, %c0_73], %184 {strides = array<i32>} : memref<16x8x128xf32, #tpu.memory_space<vmem>>, vector<1x8x128xf32>,
    %185 = vector.extract_strided_slice %163 {offsets = [0, 0], sizes = [8, 384], strides = [1, 1]} : vector<8x512xf32> to vector<8x384xf32>
    %186 = arith.negf %185 : vector<8x384xf32>
    %187 = math.exp %186 : vector<8x384xf32>
    %cst_74 = arith.constant 1.000000e+00 : f32
    %188 = vector.broadcast %cst_74 : f32 to vector<8x384xf32>
    %189 = arith.addf %188, %187 : vector<8x384xf32>
    %190 = arith.divf %188, %189 : vector<8x384xf32>
    %191 = vector.extract_strided_slice %190 {offsets = [0, 0], sizes = [8, 128], strides = [1, 1]} : vector<8x384xf32> to vector<8x128xf32>
    %192 = vector.extract_strided_slice %190 {offsets = [0, 128], sizes = [8, 128], strides = [1, 1]} : vector<8x384xf32> to vector<8x128xf32>
    %193 = vector.extract_strided_slice %190 {offsets = [0, 256], sizes = [8, 128], strides = [1, 1]} : vector<8x384xf32> to vector<8x128xf32>
    %194 = vector.extract_strided_slice %163 {offsets = [0, 384], sizes = [8, 128], strides = [1, 1]} : vector<8x512xf32> to vector<8x128xf32>
    %195 = math.tanh %194 : vector<8x128xf32>
    %196 = arith.mulf %192, %147 : vector<8x128xf32>
    %197 = arith.mulf %191, %195 : vector<8x128xf32>
    %198 = arith.addf %196, %197 : vector<8x128xf32>
    %199 = math.tanh %198 : vector<8x128xf32>
    %200 = arith.mulf %193, %199 : vector<8x128xf32>
    %c4_i32 = arith.constant 4 : i32
    %201 = tpu.concatenate %200, %179 in 1 : vector<8x128xf32>, vector<8x128xf32> -> vector<8x256xf32>
    %202 = arith.truncf %201 : vector<8x256xf32> to vector<8x256xbf16>
    %c0_75 = arith.constant 0 : index
    %c0_76 = arith.constant 0 : index
    %203 = vector.load %arg9[%c0_75, %c0_76] : memref<256x512xbf16, #tpu.memory_space<vmem>>, vector<256x512xbf16>
    %cst_77 = arith.constant dense<0.000000e+00> : vector<8x512xf32>
    %204 = tpu.matmul %202, %203, %cst_77 {dimension_numbers = #tpu.dot_dimension_numbers<[1], [0], [0], [1], [0, 0, 1, 1], [], []>} : vector<8x256xbf16>, vector<256x512xbf16>, vector<8x512xf32> -> vector<8x512xf32>
    %c0_78 = arith.constant 0 : index
    %c0_79 = arith.constant 0 : index
    %205 = vector.load %arg10[%c0_78, %c0_79] : memref<1x512xf32, #tpu.memory_space<vmem>>, vector<1x512xf32>
    %206 = vector.broadcast %205 : vector<1x512xf32> to vector<8x512xf32>
    %207 = arith.addf %204, %206 : vector<8x512xf32>
    %208 = arith.index_cast %c4_i32 : i32 to index
    %c0_80 = arith.constant 0 : index
    %c0_81 = arith.constant 0 : index
    %209 = vector.load %arg15[%208, %c0_80, %c0_81] : memref<16x8x512xf32, #tpu.memory_space<vmem>>, vector<1x8x512xf32>
    %210 = vector.shape_cast %209 : vector<1x8x512xf32> to vector<8x512xf32>
    %211 = arith.truncf %200 : vector<8x128xf32> to vector<8x128xbf16>
    %c0_82 = arith.constant 0 : index
    %c0_83 = arith.constant 0 : index
    %212 = vector.load %arg7[%c0_82, %c0_83] : memref<128x512xbf16, #tpu.memory_space<vmem>>, vector<128x512xbf16>
    %cst_84 = arith.constant dense<0.000000e+00> : vector<8x512xf32>
    %213 = tpu.matmul %211, %212, %cst_84 {dimension_numbers = #tpu.dot_dimension_numbers<[1], [0], [0], [1], [0, 0, 1, 1], [], []>} : vector<8x128xbf16>, vector<128x512xbf16>, vector<8x512xf32> -> vector<8x512xf32>
    %214 = arith.addf %210, %213 : vector<8x512xf32>
    %215 = vector.extract_strided_slice %207 {offsets = [0, 0], sizes = [8, 384], strides = [1, 1]} : vector<8x512xf32> to vector<8x384xf32>
    %216 = arith.negf %215 : vector<8x384xf32>
    %217 = math.exp %216 : vector<8x384xf32>
    %cst_85 = arith.constant 1.000000e+00 : f32
    %218 = vector.broadcast %cst_85 : f32 to vector<8x384xf32>
    %219 = arith.addf %218, %217 : vector<8x384xf32>
    %220 = arith.divf %218, %219 : vector<8x384xf32>
    %221 = vector.extract_strided_slice %220 {offsets = [0, 0], sizes = [8, 128], strides = [1, 1]} : vector<8x384xf32> to vector<8x128xf32>
    %222 = vector.extract_strided_slice %220 {offsets = [0, 128], sizes = [8, 128], strides = [1, 1]} : vector<8x384xf32> to vector<8x128xf32>
    %223 = vector.extract_strided_slice %220 {offsets = [0, 256], sizes = [8, 128], strides = [1, 1]} : vector<8x384xf32> to vector<8x128xf32>
    %224 = vector.extract_strided_slice %207 {offsets = [0, 384], sizes = [8, 128], strides = [1, 1]} : vector<8x512xf32> to vector<8x128xf32>
    %225 = math.tanh %224 : vector<8x128xf32>
    %226 = arith.mulf %222, %177 : vector<8x128xf32>
    %227 = arith.mulf %221, %225 : vector<8x128xf32>
    %228 = arith.addf %226, %227 : vector<8x128xf32>
    %229 = math.tanh %228 : vector<8x128xf32>
    %230 = arith.mulf %223, %229 : vector<8x128xf32>
    %c1_i32_86 = arith.constant 1 : i32
    %231 = arith.subi %c4_i32, %c1_i32_86 : i32
    %232 = arith.index_cast %231 : i32 to index
    %c0_87 = arith.constant 0 : index
    %c0_88 = arith.constant 0 : index
    %233 = vector.load %arg12[%232, %c0_87, %c0_88] : memref<16x8x128xf32, #tpu.memory_space<vmem>>, vector<1x8x128xf32>
    %234 = vector.shape_cast %233 : vector<1x8x128xf32> to vector<8x128xf32>
    %235 = vector.shape_cast %230 : vector<8x128xf32> to vector<1x8x128xf32>
    tpu.vector_store %arg12[%232, %c0_87, %c0_88], %235 {strides = array<i32>} : memref<16x8x128xf32, #tpu.memory_space<vmem>>, vector<1x8x128xf32>,
    %236 = vector.extract_strided_slice %214 {offsets = [0, 0], sizes = [8, 384], strides = [1, 1]} : vector<8x512xf32> to vector<8x384xf32>
    %237 = arith.negf %236 : vector<8x384xf32>
    %238 = math.exp %237 : vector<8x384xf32>
    %cst_89 = arith.constant 1.000000e+00 : f32
    %239 = vector.broadcast %cst_89 : f32 to vector<8x384xf32>
    %240 = arith.addf %239, %238 : vector<8x384xf32>
    %241 = arith.divf %239, %240 : vector<8x384xf32>
    %242 = vector.extract_strided_slice %241 {offsets = [0, 0], sizes = [8, 128], strides = [1, 1]} : vector<8x384xf32> to vector<8x128xf32>
    %243 = vector.extract_strided_slice %241 {offsets = [0, 128], sizes = [8, 128], strides = [1, 1]} : vector<8x384xf32> to vector<8x128xf32>
    %244 = vector.extract_strided_slice %241 {offsets = [0, 256], sizes = [8, 128], strides = [1, 1]} : vector<8x384xf32> to vector<8x128xf32>
    %245 = vector.extract_strided_slice %214 {offsets = [0, 384], sizes = [8, 128], strides = [1, 1]} : vector<8x512xf32> to vector<8x128xf32>
    %246 = math.tanh %245 : vector<8x128xf32>
    %247 = arith.mulf %243, %198 : vector<8x128xf32>
    %248 = arith.mulf %242, %246 : vector<8x128xf32>
    %249 = arith.addf %247, %248 : vector<8x128xf32>
    %250 = math.tanh %249 : vector<8x128xf32>
    %251 = arith.mulf %244, %250 : vector<8x128xf32>
    %c5_i32 = arith.constant 5 : i32
    %252 = tpu.concatenate %251, %230 in 1 : vector<8x128xf32>, vector<8x128xf32> -> vector<8x256xf32>
    %253 = arith.truncf %252 : vector<8x256xf32> to vector<8x256xbf16>
    %c0_90 = arith.constant 0 : index
    %c0_91 = arith.constant 0 : index
    %254 = vector.load %arg9[%c0_90, %c0_91] : memref<256x512xbf16, #tpu.memory_space<vmem>>, vector<256x512xbf16>
    %cst_92 = arith.constant dense<0.000000e+00> : vector<8x512xf32>
    %255 = tpu.matmul %253, %254, %cst_92 {dimension_numbers = #tpu.dot_dimension_numbers<[1], [0], [0], [1], [0, 0, 1, 1], [], []>} : vector<8x256xbf16>, vector<256x512xbf16>, vector<8x512xf32> -> vector<8x512xf32>
    %c0_93 = arith.constant 0 : index
    %c0_94 = arith.constant 0 : index
    %256 = vector.load %arg10[%c0_93, %c0_94] : memref<1x512xf32, #tpu.memory_space<vmem>>, vector<1x512xf32>
    %257 = vector.broadcast %256 : vector<1x512xf32> to vector<8x512xf32>
    %258 = arith.addf %255, %257 : vector<8x512xf32>
    %259 = arith.index_cast %c5_i32 : i32 to index
    %c0_95 = arith.constant 0 : index
    %c0_96 = arith.constant 0 : index
    %260 = vector.load %arg15[%259, %c0_95, %c0_96] : memref<16x8x512xf32, #tpu.memory_space<vmem>>, vector<1x8x512xf32>
    %261 = vector.shape_cast %260 : vector<1x8x512xf32> to vector<8x512xf32>
    %262 = arith.truncf %251 : vector<8x128xf32> to vector<8x128xbf16>
    %c0_97 = arith.constant 0 : index
    %c0_98 = arith.constant 0 : index
    %263 = vector.load %arg7[%c0_97, %c0_98] : memref<128x512xbf16, #tpu.memory_space<vmem>>, vector<128x512xbf16>
    %cst_99 = arith.constant dense<0.000000e+00> : vector<8x512xf32>
    %264 = tpu.matmul %262, %263, %cst_99 {dimension_numbers = #tpu.dot_dimension_numbers<[1], [0], [0], [1], [0, 0, 1, 1], [], []>} : vector<8x128xbf16>, vector<128x512xbf16>, vector<8x512xf32> -> vector<8x512xf32>
    %265 = arith.addf %261, %264 : vector<8x512xf32>
    %266 = vector.extract_strided_slice %258 {offsets = [0, 0], sizes = [8, 384], strides = [1, 1]} : vector<8x512xf32> to vector<8x384xf32>
    %267 = arith.negf %266 : vector<8x384xf32>
    %268 = math.exp %267 : vector<8x384xf32>
    %cst_100 = arith.constant 1.000000e+00 : f32
    %269 = vector.broadcast %cst_100 : f32 to vector<8x384xf32>
    %270 = arith.addf %269, %268 : vector<8x384xf32>
    %271 = arith.divf %269, %270 : vector<8x384xf32>
    %272 = vector.extract_strided_slice %271 {offsets = [0, 0], sizes = [8, 128], strides = [1, 1]} : vector<8x384xf32> to vector<8x128xf32>
    %273 = vector.extract_strided_slice %271 {offsets = [0, 128], sizes = [8, 128], strides = [1, 1]} : vector<8x384xf32> to vector<8x128xf32>
    %274 = vector.extract_strided_slice %271 {offsets = [0, 256], sizes = [8, 128], strides = [1, 1]} : vector<8x384xf32> to vector<8x128xf32>
    %275 = vector.extract_strided_slice %258 {offsets = [0, 384], sizes = [8, 128], strides = [1, 1]} : vector<8x512xf32> to vector<8x128xf32>
    %276 = math.tanh %275 : vector<8x128xf32>
    %277 = arith.mulf %273, %228 : vector<8x128xf32>
    %278 = arith.mulf %272, %276 : vector<8x128xf32>
    %279 = arith.addf %277, %278 : vector<8x128xf32>
    %280 = math.tanh %279 : vector<8x128xf32>
    %281 = arith.mulf %274, %280 : vector<8x128xf32>
    %c1_i32_101 = arith.constant 1 : i32
    %282 = arith.subi %c5_i32, %c1_i32_101 : i32
    %283 = arith.index_cast %282 : i32 to index
    %c0_102 = arith.constant 0 : index
    %c0_103 = arith.constant 0 : index
    %284 = vector.load %arg12[%283, %c0_102, %c0_103] : memref<16x8x128xf32, #tpu.memory_space<vmem>>, vector<1x8x128xf32>
    %285 = vector.shape_cast %284 : vector<1x8x128xf32> to vector<8x128xf32>
    %286 = vector.shape_cast %281 : vector<8x128xf32> to vector<1x8x128xf32>
    tpu.vector_store %arg12[%283, %c0_102, %c0_103], %286 {strides = array<i32>} : memref<16x8x128xf32, #tpu.memory_space<vmem>>, vector<1x8x128xf32>,
    %287 = vector.extract_strided_slice %265 {offsets = [0, 0], sizes = [8, 384], strides = [1, 1]} : vector<8x512xf32> to vector<8x384xf32>
    %288 = arith.negf %287 : vector<8x384xf32>
    %289 = math.exp %288 : vector<8x384xf32>
    %cst_104 = arith.constant 1.000000e+00 : f32
    %290 = vector.broadcast %cst_104 : f32 to vector<8x384xf32>
    %291 = arith.addf %290, %289 : vector<8x384xf32>
    %292 = arith.divf %290, %291 : vector<8x384xf32>
    %293 = vector.extract_strided_slice %292 {offsets = [0, 0], sizes = [8, 128], strides = [1, 1]} : vector<8x384xf32> to vector<8x128xf32>
    %294 = vector.extract_strided_slice %292 {offsets = [0, 128], sizes = [8, 128], strides = [1, 1]} : vector<8x384xf32> to vector<8x128xf32>
    %295 = vector.extract_strided_slice %292 {offsets = [0, 256], sizes = [8, 128], strides = [1, 1]} : vector<8x384xf32> to vector<8x128xf32>
    %296 = vector.extract_strided_slice %265 {offsets = [0, 384], sizes = [8, 128], strides = [1, 1]} : vector<8x512xf32> to vector<8x128xf32>
    %297 = math.tanh %296 : vector<8x128xf32>
    %298 = arith.mulf %294, %249 : vector<8x128xf32>
    %299 = arith.mulf %293, %297 : vector<8x128xf32>
    %300 = arith.addf %298, %299 : vector<8x128xf32>
    %301 = math.tanh %300 : vector<8x128xf32>
    %302 = arith.mulf %295, %301 : vector<8x128xf32>
    %c6_i32 = arith.constant 6 : i32
    %303 = tpu.concatenate %302, %281 in 1 : vector<8x128xf32>, vector<8x128xf32> -> vector<8x256xf32>
    %304 = arith.truncf %303 : vector<8x256xf32> to vector<8x256xbf16>
    %c0_105 = arith.constant 0 : index
    %c0_106 = arith.constant 0 : index
    %305 = vector.load %arg9[%c0_105, %c0_106] : memref<256x512xbf16, #tpu.memory_space<vmem>>, vector<256x512xbf16>
    %cst_107 = arith.constant dense<0.000000e+00> : vector<8x512xf32>
    %306 = tpu.matmul %304, %305, %cst_107 {dimension_numbers = #tpu.dot_dimension_numbers<[1], [0], [0], [1], [0, 0, 1, 1], [], []>} : vector<8x256xbf16>, vector<256x512xbf16>, vector<8x512xf32> -> vector<8x512xf32>
    %c0_108 = arith.constant 0 : index
    %c0_109 = arith.constant 0 : index
    %307 = vector.load %arg10[%c0_108, %c0_109] : memref<1x512xf32, #tpu.memory_space<vmem>>, vector<1x512xf32>
    %308 = vector.broadcast %307 : vector<1x512xf32> to vector<8x512xf32>
    %309 = arith.addf %306, %308 : vector<8x512xf32>
    %310 = arith.index_cast %c6_i32 : i32 to index
    %c0_110 = arith.constant 0 : index
    %c0_111 = arith.constant 0 : index
    %311 = vector.load %arg15[%310, %c0_110, %c0_111] : memref<16x8x512xf32, #tpu.memory_space<vmem>>, vector<1x8x512xf32>
    %312 = vector.shape_cast %311 : vector<1x8x512xf32> to vector<8x512xf32>
    %313 = arith.truncf %302 : vector<8x128xf32> to vector<8x128xbf16>
    %c0_112 = arith.constant 0 : index
    %c0_113 = arith.constant 0 : index
    %314 = vector.load %arg7[%c0_112, %c0_113] : memref<128x512xbf16, #tpu.memory_space<vmem>>, vector<128x512xbf16>
    %cst_114 = arith.constant dense<0.000000e+00> : vector<8x512xf32>
    %315 = tpu.matmul %313, %314, %cst_114 {dimension_numbers = #tpu.dot_dimension_numbers<[1], [0], [0], [1], [0, 0, 1, 1], [], []>} : vector<8x128xbf16>, vector<128x512xbf16>, vector<8x512xf32> -> vector<8x512xf32>
    %316 = arith.addf %312, %315 : vector<8x512xf32>
    %317 = vector.extract_strided_slice %309 {offsets = [0, 0], sizes = [8, 384], strides = [1, 1]} : vector<8x512xf32> to vector<8x384xf32>
    %318 = arith.negf %317 : vector<8x384xf32>
    %319 = math.exp %318 : vector<8x384xf32>
    %cst_115 = arith.constant 1.000000e+00 : f32
    %320 = vector.broadcast %cst_115 : f32 to vector<8x384xf32>
    %321 = arith.addf %320, %319 : vector<8x384xf32>
    %322 = arith.divf %320, %321 : vector<8x384xf32>
    %323 = vector.extract_strided_slice %322 {offsets = [0, 0], sizes = [8, 128], strides = [1, 1]} : vector<8x384xf32> to vector<8x128xf32>
    %324 = vector.extract_strided_slice %322 {offsets = [0, 128], sizes = [8, 128], strides = [1, 1]} : vector<8x384xf32> to vector<8x128xf32>
    %325 = vector.extract_strided_slice %322 {offsets = [0, 256], sizes = [8, 128], strides = [1, 1]} : vector<8x384xf32> to vector<8x128xf32>
    %326 = vector.extract_strided_slice %309 {offsets = [0, 384], sizes = [8, 128], strides = [1, 1]} : vector<8x512xf32> to vector<8x128xf32>
    %327 = math.tanh %326 : vector<8x128xf32>
    %328 = arith.mulf %324, %279 : vector<8x128xf32>
    %329 = arith.mulf %323, %327 : vector<8x128xf32>
    %330 = arith.addf %328, %329 : vector<8x128xf32>
    %331 = math.tanh %330 : vector<8x128xf32>
    %332 = arith.mulf %325, %331 : vector<8x128xf32>
    %c1_i32_116 = arith.constant 1 : i32
    %333 = arith.subi %c6_i32, %c1_i32_116 : i32
    %334 = arith.index_cast %333 : i32 to index
    %c0_117 = arith.constant 0 : index
    %c0_118 = arith.constant 0 : index
    %335 = vector.load %arg12[%334, %c0_117, %c0_118] : memref<16x8x128xf32, #tpu.memory_space<vmem>>, vector<1x8x128xf32>
    %336 = vector.shape_cast %335 : vector<1x8x128xf32> to vector<8x128xf32>
    %337 = vector.shape_cast %332 : vector<8x128xf32> to vector<1x8x128xf32>
    tpu.vector_store %arg12[%334, %c0_117, %c0_118], %337 {strides = array<i32>} : memref<16x8x128xf32, #tpu.memory_space<vmem>>, vector<1x8x128xf32>,
    %338 = vector.extract_strided_slice %316 {offsets = [0, 0], sizes = [8, 384], strides = [1, 1]} : vector<8x512xf32> to vector<8x384xf32>
    %339 = arith.negf %338 : vector<8x384xf32>
    %340 = math.exp %339 : vector<8x384xf32>
    %cst_119 = arith.constant 1.000000e+00 : f32
    %341 = vector.broadcast %cst_119 : f32 to vector<8x384xf32>
    %342 = arith.addf %341, %340 : vector<8x384xf32>
    %343 = arith.divf %341, %342 : vector<8x384xf32>
    %344 = vector.extract_strided_slice %343 {offsets = [0, 0], sizes = [8, 128], strides = [1, 1]} : vector<8x384xf32> to vector<8x128xf32>
    %345 = vector.extract_strided_slice %343 {offsets = [0, 128], sizes = [8, 128], strides = [1, 1]} : vector<8x384xf32> to vector<8x128xf32>
    %346 = vector.extract_strided_slice %343 {offsets = [0, 256], sizes = [8, 128], strides = [1, 1]} : vector<8x384xf32> to vector<8x128xf32>
    %347 = vector.extract_strided_slice %316 {offsets = [0, 384], sizes = [8, 128], strides = [1, 1]} : vector<8x512xf32> to vector<8x128xf32>
    %348 = math.tanh %347 : vector<8x128xf32>
    %349 = arith.mulf %345, %300 : vector<8x128xf32>
    %350 = arith.mulf %344, %348 : vector<8x128xf32>
    %351 = arith.addf %349, %350 : vector<8x128xf32>
    %352 = math.tanh %351 : vector<8x128xf32>
    %353 = arith.mulf %346, %352 : vector<8x128xf32>
    %c7_i32 = arith.constant 7 : i32
    %354 = tpu.concatenate %353, %332 in 1 : vector<8x128xf32>, vector<8x128xf32> -> vector<8x256xf32>
    %355 = arith.truncf %354 : vector<8x256xf32> to vector<8x256xbf16>
    %c0_120 = arith.constant 0 : index
    %c0_121 = arith.constant 0 : index
    %356 = vector.load %arg9[%c0_120, %c0_121] : memref<256x512xbf16, #tpu.memory_space<vmem>>, vector<256x512xbf16>
    %cst_122 = arith.constant dense<0.000000e+00> : vector<8x512xf32>
    %357 = tpu.matmul %355, %356, %cst_122 {dimension_numbers = #tpu.dot_dimension_numbers<[1], [0], [0], [1], [0, 0, 1, 1], [], []>} : vector<8x256xbf16>, vector<256x512xbf16>, vector<8x512xf32> -> vector<8x512xf32>
    %c0_123 = arith.constant 0 : index
    %c0_124 = arith.constant 0 : index
    %358 = vector.load %arg10[%c0_123, %c0_124] : memref<1x512xf32, #tpu.memory_space<vmem>>, vector<1x512xf32>
    %359 = vector.broadcast %358 : vector<1x512xf32> to vector<8x512xf32>
    %360 = arith.addf %357, %359 : vector<8x512xf32>
    %361 = arith.index_cast %c7_i32 : i32 to index
    %c0_125 = arith.constant 0 : index
    %c0_126 = arith.constant 0 : index
    %362 = vector.load %arg15[%361, %c0_125, %c0_126] : memref<16x8x512xf32, #tpu.memory_space<vmem>>, vector<1x8x512xf32>
    %363 = vector.shape_cast %362 : vector<1x8x512xf32> to vector<8x512xf32>
    %364 = arith.truncf %353 : vector<8x128xf32> to vector<8x128xbf16>
    %c0_127 = arith.constant 0 : index
    %c0_128 = arith.constant 0 : index
    %365 = vector.load %arg7[%c0_127, %c0_128] : memref<128x512xbf16, #tpu.memory_space<vmem>>, vector<128x512xbf16>
    %cst_129 = arith.constant dense<0.000000e+00> : vector<8x512xf32>
    %366 = tpu.matmul %364, %365, %cst_129 {dimension_numbers = #tpu.dot_dimension_numbers<[1], [0], [0], [1], [0, 0, 1, 1], [], []>} : vector<8x128xbf16>, vector<128x512xbf16>, vector<8x512xf32> -> vector<8x512xf32>
    %367 = arith.addf %363, %366 : vector<8x512xf32>
    %368 = vector.extract_strided_slice %360 {offsets = [0, 0], sizes = [8, 384], strides = [1, 1]} : vector<8x512xf32> to vector<8x384xf32>
    %369 = arith.negf %368 : vector<8x384xf32>
    %370 = math.exp %369 : vector<8x384xf32>
    %cst_130 = arith.constant 1.000000e+00 : f32
    %371 = vector.broadcast %cst_130 : f32 to vector<8x384xf32>
    %372 = arith.addf %371, %370 : vector<8x384xf32>
    %373 = arith.divf %371, %372 : vector<8x384xf32>
    %374 = vector.extract_strided_slice %373 {offsets = [0, 0], sizes = [8, 128], strides = [1, 1]} : vector<8x384xf32> to vector<8x128xf32>
    %375 = vector.extract_strided_slice %373 {offsets = [0, 128], sizes = [8, 128], strides = [1, 1]} : vector<8x384xf32> to vector<8x128xf32>
    %376 = vector.extract_strided_slice %373 {offsets = [0, 256], sizes = [8, 128], strides = [1, 1]} : vector<8x384xf32> to vector<8x128xf32>
    %377 = vector.extract_strided_slice %360 {offsets = [0, 384], sizes = [8, 128], strides = [1, 1]} : vector<8x512xf32> to vector<8x128xf32>
    %378 = math.tanh %377 : vector<8x128xf32>
    %379 = arith.mulf %375, %330 : vector<8x128xf32>
    %380 = arith.mulf %374, %378 : vector<8x128xf32>
    %381 = arith.addf %379, %380 : vector<8x128xf32>
    %382 = math.tanh %381 : vector<8x128xf32>
    %383 = arith.mulf %376, %382 : vector<8x128xf32>
    %c1_i32_131 = arith.constant 1 : i32
    %384 = arith.subi %c7_i32, %c1_i32_131 : i32
    %385 = arith.index_cast %384 : i32 to index
    %c0_132 = arith.constant 0 : index
    %c0_133 = arith.constant 0 : index
    %386 = vector.load %arg12[%385, %c0_132, %c0_133] : memref<16x8x128xf32, #tpu.memory_space<vmem>>, vector<1x8x128xf32>
    %387 = vector.shape_cast %386 : vector<1x8x128xf32> to vector<8x128xf32>
    %388 = vector.shape_cast %383 : vector<8x128xf32> to vector<1x8x128xf32>
    tpu.vector_store %arg12[%385, %c0_132, %c0_133], %388 {strides = array<i32>} : memref<16x8x128xf32, #tpu.memory_space<vmem>>, vector<1x8x128xf32>,
    %389 = vector.extract_strided_slice %367 {offsets = [0, 0], sizes = [8, 384], strides = [1, 1]} : vector<8x512xf32> to vector<8x384xf32>
    %390 = arith.negf %389 : vector<8x384xf32>
    %391 = math.exp %390 : vector<8x384xf32>
    %cst_134 = arith.constant 1.000000e+00 : f32
    %392 = vector.broadcast %cst_134 : f32 to vector<8x384xf32>
    %393 = arith.addf %392, %391 : vector<8x384xf32>
    %394 = arith.divf %392, %393 : vector<8x384xf32>
    %395 = vector.extract_strided_slice %394 {offsets = [0, 0], sizes = [8, 128], strides = [1, 1]} : vector<8x384xf32> to vector<8x128xf32>
    %396 = vector.extract_strided_slice %394 {offsets = [0, 128], sizes = [8, 128], strides = [1, 1]} : vector<8x384xf32> to vector<8x128xf32>
    %397 = vector.extract_strided_slice %394 {offsets = [0, 256], sizes = [8, 128], strides = [1, 1]} : vector<8x384xf32> to vector<8x128xf32>
    %398 = vector.extract_strided_slice %367 {offsets = [0, 384], sizes = [8, 128], strides = [1, 1]} : vector<8x512xf32> to vector<8x128xf32>
    %399 = math.tanh %398 : vector<8x128xf32>
    %400 = arith.mulf %396, %351 : vector<8x128xf32>
    %401 = arith.mulf %395, %399 : vector<8x128xf32>
    %402 = arith.addf %400, %401 : vector<8x128xf32>
    %403 = math.tanh %402 : vector<8x128xf32>
    %404 = arith.mulf %397, %403 : vector<8x128xf32>
    %c8_i32 = arith.constant 8 : i32
    %405 = tpu.concatenate %404, %383 in 1 : vector<8x128xf32>, vector<8x128xf32> -> vector<8x256xf32>
    %406 = arith.truncf %405 : vector<8x256xf32> to vector<8x256xbf16>
    %c0_135 = arith.constant 0 : index
    %c0_136 = arith.constant 0 : index
    %407 = vector.load %arg9[%c0_135, %c0_136] : memref<256x512xbf16, #tpu.memory_space<vmem>>, vector<256x512xbf16>
    %cst_137 = arith.constant dense<0.000000e+00> : vector<8x512xf32>
    %408 = tpu.matmul %406, %407, %cst_137 {dimension_numbers = #tpu.dot_dimension_numbers<[1], [0], [0], [1], [0, 0, 1, 1], [], []>} : vector<8x256xbf16>, vector<256x512xbf16>, vector<8x512xf32> -> vector<8x512xf32>
    %c0_138 = arith.constant 0 : index
    %c0_139 = arith.constant 0 : index
    %409 = vector.load %arg10[%c0_138, %c0_139] : memref<1x512xf32, #tpu.memory_space<vmem>>, vector<1x512xf32>
    %410 = vector.broadcast %409 : vector<1x512xf32> to vector<8x512xf32>
    %411 = arith.addf %408, %410 : vector<8x512xf32>
    %412 = arith.index_cast %c8_i32 : i32 to index
    %c0_140 = arith.constant 0 : index
    %c0_141 = arith.constant 0 : index
    %413 = vector.load %arg15[%412, %c0_140, %c0_141] : memref<16x8x512xf32, #tpu.memory_space<vmem>>, vector<1x8x512xf32>
    %414 = vector.shape_cast %413 : vector<1x8x512xf32> to vector<8x512xf32>
    %415 = arith.truncf %404 : vector<8x128xf32> to vector<8x128xbf16>
    %c0_142 = arith.constant 0 : index
    %c0_143 = arith.constant 0 : index
    %416 = vector.load %arg7[%c0_142, %c0_143] : memref<128x512xbf16, #tpu.memory_space<vmem>>, vector<128x512xbf16>
    %cst_144 = arith.constant dense<0.000000e+00> : vector<8x512xf32>
    %417 = tpu.matmul %415, %416, %cst_144 {dimension_numbers = #tpu.dot_dimension_numbers<[1], [0], [0], [1], [0, 0, 1, 1], [], []>} : vector<8x128xbf16>, vector<128x512xbf16>, vector<8x512xf32> -> vector<8x512xf32>
    %418 = arith.addf %414, %417 : vector<8x512xf32>
    %419 = vector.extract_strided_slice %411 {offsets = [0, 0], sizes = [8, 384], strides = [1, 1]} : vector<8x512xf32> to vector<8x384xf32>
    %420 = arith.negf %419 : vector<8x384xf32>
    %421 = math.exp %420 : vector<8x384xf32>
    %cst_145 = arith.constant 1.000000e+00 : f32
    %422 = vector.broadcast %cst_145 : f32 to vector<8x384xf32>
    %423 = arith.addf %422, %421 : vector<8x384xf32>
    %424 = arith.divf %422, %423 : vector<8x384xf32>
    %425 = vector.extract_strided_slice %424 {offsets = [0, 0], sizes = [8, 128], strides = [1, 1]} : vector<8x384xf32> to vector<8x128xf32>
    %426 = vector.extract_strided_slice %424 {offsets = [0, 128], sizes = [8, 128], strides = [1, 1]} : vector<8x384xf32> to vector<8x128xf32>
    %427 = vector.extract_strided_slice %424 {offsets = [0, 256], sizes = [8, 128], strides = [1, 1]} : vector<8x384xf32> to vector<8x128xf32>
    %428 = vector.extract_strided_slice %411 {offsets = [0, 384], sizes = [8, 128], strides = [1, 1]} : vector<8x512xf32> to vector<8x128xf32>
    %429 = math.tanh %428 : vector<8x128xf32>
    %430 = arith.mulf %426, %381 : vector<8x128xf32>
    %431 = arith.mulf %425, %429 : vector<8x128xf32>
    %432 = arith.addf %430, %431 : vector<8x128xf32>
    %433 = math.tanh %432 : vector<8x128xf32>
    %434 = arith.mulf %427, %433 : vector<8x128xf32>
    %c1_i32_146 = arith.constant 1 : i32
    %435 = arith.subi %c8_i32, %c1_i32_146 : i32
    %436 = arith.index_cast %435 : i32 to index
    %c0_147 = arith.constant 0 : index
    %c0_148 = arith.constant 0 : index
    %437 = vector.load %arg12[%436, %c0_147, %c0_148] : memref<16x8x128xf32, #tpu.memory_space<vmem>>, vector<1x8x128xf32>
    %438 = vector.shape_cast %437 : vector<1x8x128xf32> to vector<8x128xf32>
    %439 = vector.shape_cast %434 : vector<8x128xf32> to vector<1x8x128xf32>
    tpu.vector_store %arg12[%436, %c0_147, %c0_148], %439 {strides = array<i32>} : memref<16x8x128xf32, #tpu.memory_space<vmem>>, vector<1x8x128xf32>,
    %440 = vector.extract_strided_slice %418 {offsets = [0, 0], sizes = [8, 384], strides = [1, 1]} : vector<8x512xf32> to vector<8x384xf32>
    %441 = arith.negf %440 : vector<8x384xf32>
    %442 = math.exp %441 : vector<8x384xf32>
    %cst_149 = arith.constant 1.000000e+00 : f32
    %443 = vector.broadcast %cst_149 : f32 to vector<8x384xf32>
    %444 = arith.addf %443, %442 : vector<8x384xf32>
    %445 = arith.divf %443, %444 : vector<8x384xf32>
    %446 = vector.extract_strided_slice %445 {offsets = [0, 0], sizes = [8, 128], strides = [1, 1]} : vector<8x384xf32> to vector<8x128xf32>
    %447 = vector.extract_strided_slice %445 {offsets = [0, 128], sizes = [8, 128], strides = [1, 1]} : vector<8x384xf32> to vector<8x128xf32>
    %448 = vector.extract_strided_slice %445 {offsets = [0, 256], sizes = [8, 128], strides = [1, 1]} : vector<8x384xf32> to vector<8x128xf32>
    %449 = vector.extract_strided_slice %418 {offsets = [0, 384], sizes = [8, 128], strides = [1, 1]} : vector<8x512xf32> to vector<8x128xf32>
    %450 = math.tanh %449 : vector<8x128xf32>
    %451 = arith.mulf %447, %402 : vector<8x128xf32>
    %452 = arith.mulf %446, %450 : vector<8x128xf32>
    %453 = arith.addf %451, %452 : vector<8x128xf32>
    %454 = math.tanh %453 : vector<8x128xf32>
    %455 = arith.mulf %448, %454 : vector<8x128xf32>
    %c9_i32 = arith.constant 9 : i32
    %456 = tpu.concatenate %455, %434 in 1 : vector<8x128xf32>, vector<8x128xf32> -> vector<8x256xf32>
    %457 = arith.truncf %456 : vector<8x256xf32> to vector<8x256xbf16>
    %c0_150 = arith.constant 0 : index
    %c0_151 = arith.constant 0 : index
    %458 = vector.load %arg9[%c0_150, %c0_151] : memref<256x512xbf16, #tpu.memory_space<vmem>>, vector<256x512xbf16>
    %cst_152 = arith.constant dense<0.000000e+00> : vector<8x512xf32>
    %459 = tpu.matmul %457, %458, %cst_152 {dimension_numbers = #tpu.dot_dimension_numbers<[1], [0], [0], [1], [0, 0, 1, 1], [], []>} : vector<8x256xbf16>, vector<256x512xbf16>, vector<8x512xf32> -> vector<8x512xf32>
    %c0_153 = arith.constant 0 : index
    %c0_154 = arith.constant 0 : index
    %460 = vector.load %arg10[%c0_153, %c0_154] : memref<1x512xf32, #tpu.memory_space<vmem>>, vector<1x512xf32>
    %461 = vector.broadcast %460 : vector<1x512xf32> to vector<8x512xf32>
    %462 = arith.addf %459, %461 : vector<8x512xf32>
    %463 = arith.index_cast %c9_i32 : i32 to index
    %c0_155 = arith.constant 0 : index
    %c0_156 = arith.constant 0 : index
    %464 = vector.load %arg15[%463, %c0_155, %c0_156] : memref<16x8x512xf32, #tpu.memory_space<vmem>>, vector<1x8x512xf32>
    %465 = vector.shape_cast %464 : vector<1x8x512xf32> to vector<8x512xf32>
    %466 = arith.truncf %455 : vector<8x128xf32> to vector<8x128xbf16>
    %c0_157 = arith.constant 0 : index
    %c0_158 = arith.constant 0 : index
    %467 = vector.load %arg7[%c0_157, %c0_158] : memref<128x512xbf16, #tpu.memory_space<vmem>>, vector<128x512xbf16>
    %cst_159 = arith.constant dense<0.000000e+00> : vector<8x512xf32>
    %468 = tpu.matmul %466, %467, %cst_159 {dimension_numbers = #tpu.dot_dimension_numbers<[1], [0], [0], [1], [0, 0, 1, 1], [], []>} : vector<8x128xbf16>, vector<128x512xbf16>, vector<8x512xf32> -> vector<8x512xf32>
    %469 = arith.addf %465, %468 : vector<8x512xf32>
    %470 = vector.extract_strided_slice %462 {offsets = [0, 0], sizes = [8, 384], strides = [1, 1]} : vector<8x512xf32> to vector<8x384xf32>
    %471 = arith.negf %470 : vector<8x384xf32>
    %472 = math.exp %471 : vector<8x384xf32>
    %cst_160 = arith.constant 1.000000e+00 : f32
    %473 = vector.broadcast %cst_160 : f32 to vector<8x384xf32>
    %474 = arith.addf %473, %472 : vector<8x384xf32>
    %475 = arith.divf %473, %474 : vector<8x384xf32>
    %476 = vector.extract_strided_slice %475 {offsets = [0, 0], sizes = [8, 128], strides = [1, 1]} : vector<8x384xf32> to vector<8x128xf32>
    %477 = vector.extract_strided_slice %475 {offsets = [0, 128], sizes = [8, 128], strides = [1, 1]} : vector<8x384xf32> to vector<8x128xf32>
    %478 = vector.extract_strided_slice %475 {offsets = [0, 256], sizes = [8, 128], strides = [1, 1]} : vector<8x384xf32> to vector<8x128xf32>
    %479 = vector.extract_strided_slice %462 {offsets = [0, 384], sizes = [8, 128], strides = [1, 1]} : vector<8x512xf32> to vector<8x128xf32>
    %480 = math.tanh %479 : vector<8x128xf32>
    %481 = arith.mulf %477, %432 : vector<8x128xf32>
    %482 = arith.mulf %476, %480 : vector<8x128xf32>
    %483 = arith.addf %481, %482 : vector<8x128xf32>
    %484 = math.tanh %483 : vector<8x128xf32>
    %485 = arith.mulf %478, %484 : vector<8x128xf32>
    %c1_i32_161 = arith.constant 1 : i32
    %486 = arith.subi %c9_i32, %c1_i32_161 : i32
    %487 = arith.index_cast %486 : i32 to index
    %c0_162 = arith.constant 0 : index
    %c0_163 = arith.constant 0 : index
    %488 = vector.load %arg12[%487, %c0_162, %c0_163] : memref<16x8x128xf32, #tpu.memory_space<vmem>>, vector<1x8x128xf32>
    %489 = vector.shape_cast %488 : vector<1x8x128xf32> to vector<8x128xf32>
    %490 = vector.shape_cast %485 : vector<8x128xf32> to vector<1x8x128xf32>
    tpu.vector_store %arg12[%487, %c0_162, %c0_163], %490 {strides = array<i32>} : memref<16x8x128xf32, #tpu.memory_space<vmem>>, vector<1x8x128xf32>,
    %491 = vector.extract_strided_slice %469 {offsets = [0, 0], sizes = [8, 384], strides = [1, 1]} : vector<8x512xf32> to vector<8x384xf32>
    %492 = arith.negf %491 : vector<8x384xf32>
    %493 = math.exp %492 : vector<8x384xf32>
    %cst_164 = arith.constant 1.000000e+00 : f32
    %494 = vector.broadcast %cst_164 : f32 to vector<8x384xf32>
    %495 = arith.addf %494, %493 : vector<8x384xf32>
    %496 = arith.divf %494, %495 : vector<8x384xf32>
    %497 = vector.extract_strided_slice %496 {offsets = [0, 0], sizes = [8, 128], strides = [1, 1]} : vector<8x384xf32> to vector<8x128xf32>
    %498 = vector.extract_strided_slice %496 {offsets = [0, 128], sizes = [8, 128], strides = [1, 1]} : vector<8x384xf32> to vector<8x128xf32>
    %499 = vector.extract_strided_slice %496 {offsets = [0, 256], sizes = [8, 128], strides = [1, 1]} : vector<8x384xf32> to vector<8x128xf32>
    %500 = vector.extract_strided_slice %469 {offsets = [0, 384], sizes = [8, 128], strides = [1, 1]} : vector<8x512xf32> to vector<8x128xf32>
    %501 = math.tanh %500 : vector<8x128xf32>
    %502 = arith.mulf %498, %453 : vector<8x128xf32>
    %503 = arith.mulf %497, %501 : vector<8x128xf32>
    %504 = arith.addf %502, %503 : vector<8x128xf32>
    %505 = math.tanh %504 : vector<8x128xf32>
    %506 = arith.mulf %499, %505 : vector<8x128xf32>
    %c10_i32 = arith.constant 10 : i32
    %507 = tpu.concatenate %506, %485 in 1 : vector<8x128xf32>, vector<8x128xf32> -> vector<8x256xf32>
    %508 = arith.truncf %507 : vector<8x256xf32> to vector<8x256xbf16>
    %c0_165 = arith.constant 0 : index
    %c0_166 = arith.constant 0 : index
    %509 = vector.load %arg9[%c0_165, %c0_166] : memref<256x512xbf16, #tpu.memory_space<vmem>>, vector<256x512xbf16>
    %cst_167 = arith.constant dense<0.000000e+00> : vector<8x512xf32>
    %510 = tpu.matmul %508, %509, %cst_167 {dimension_numbers = #tpu.dot_dimension_numbers<[1], [0], [0], [1], [0, 0, 1, 1], [], []>} : vector<8x256xbf16>, vector<256x512xbf16>, vector<8x512xf32> -> vector<8x512xf32>
    %c0_168 = arith.constant 0 : index
    %c0_169 = arith.constant 0 : index
    %511 = vector.load %arg10[%c0_168, %c0_169] : memref<1x512xf32, #tpu.memory_space<vmem>>, vector<1x512xf32>
    %512 = vector.broadcast %511 : vector<1x512xf32> to vector<8x512xf32>
    %513 = arith.addf %510, %512 : vector<8x512xf32>
    %514 = arith.index_cast %c10_i32 : i32 to index
    %c0_170 = arith.constant 0 : index
    %c0_171 = arith.constant 0 : index
    %515 = vector.load %arg15[%514, %c0_170, %c0_171] : memref<16x8x512xf32, #tpu.memory_space<vmem>>, vector<1x8x512xf32>
    %516 = vector.shape_cast %515 : vector<1x8x512xf32> to vector<8x512xf32>
    %517 = arith.truncf %506 : vector<8x128xf32> to vector<8x128xbf16>
    %c0_172 = arith.constant 0 : index
    %c0_173 = arith.constant 0 : index
    %518 = vector.load %arg7[%c0_172, %c0_173] : memref<128x512xbf16, #tpu.memory_space<vmem>>, vector<128x512xbf16>
    %cst_174 = arith.constant dense<0.000000e+00> : vector<8x512xf32>
    %519 = tpu.matmul %517, %518, %cst_174 {dimension_numbers = #tpu.dot_dimension_numbers<[1], [0], [0], [1], [0, 0, 1, 1], [], []>} : vector<8x128xbf16>, vector<128x512xbf16>, vector<8x512xf32> -> vector<8x512xf32>
    %520 = arith.addf %516, %519 : vector<8x512xf32>
    %521 = vector.extract_strided_slice %513 {offsets = [0, 0], sizes = [8, 384], strides = [1, 1]} : vector<8x512xf32> to vector<8x384xf32>
    %522 = arith.negf %521 : vector<8x384xf32>
    %523 = math.exp %522 : vector<8x384xf32>
    %cst_175 = arith.constant 1.000000e+00 : f32
    %524 = vector.broadcast %cst_175 : f32 to vector<8x384xf32>
    %525 = arith.addf %524, %523 : vector<8x384xf32>
    %526 = arith.divf %524, %525 : vector<8x384xf32>
    %527 = vector.extract_strided_slice %526 {offsets = [0, 0], sizes = [8, 128], strides = [1, 1]} : vector<8x384xf32> to vector<8x128xf32>
    %528 = vector.extract_strided_slice %526 {offsets = [0, 128], sizes = [8, 128], strides = [1, 1]} : vector<8x384xf32> to vector<8x128xf32>
    %529 = vector.extract_strided_slice %526 {offsets = [0, 256], sizes = [8, 128], strides = [1, 1]} : vector<8x384xf32> to vector<8x128xf32>
    %530 = vector.extract_strided_slice %513 {offsets = [0, 384], sizes = [8, 128], strides = [1, 1]} : vector<8x512xf32> to vector<8x128xf32>
    %531 = math.tanh %530 : vector<8x128xf32>
    %532 = arith.mulf %528, %483 : vector<8x128xf32>
    %533 = arith.mulf %527, %531 : vector<8x128xf32>
    %534 = arith.addf %532, %533 : vector<8x128xf32>
    %535 = math.tanh %534 : vector<8x128xf32>
    %536 = arith.mulf %529, %535 : vector<8x128xf32>
    %c1_i32_176 = arith.constant 1 : i32
    %537 = arith.subi %c10_i32, %c1_i32_176 : i32
    %538 = arith.index_cast %537 : i32 to index
    %c0_177 = arith.constant 0 : index
    %c0_178 = arith.constant 0 : index
    %539 = vector.load %arg12[%538, %c0_177, %c0_178] : memref<16x8x128xf32, #tpu.memory_space<vmem>>, vector<1x8x128xf32>
    %540 = vector.shape_cast %539 : vector<1x8x128xf32> to vector<8x128xf32>
    %541 = vector.shape_cast %536 : vector<8x128xf32> to vector<1x8x128xf32>
    tpu.vector_store %arg12[%538, %c0_177, %c0_178], %541 {strides = array<i32>} : memref<16x8x128xf32, #tpu.memory_space<vmem>>, vector<1x8x128xf32>,
    %542 = vector.extract_strided_slice %520 {offsets = [0, 0], sizes = [8, 384], strides = [1, 1]} : vector<8x512xf32> to vector<8x384xf32>
    %543 = arith.negf %542 : vector<8x384xf32>
    %544 = math.exp %543 : vector<8x384xf32>
    %cst_179 = arith.constant 1.000000e+00 : f32
    %545 = vector.broadcast %cst_179 : f32 to vector<8x384xf32>
    %546 = arith.addf %545, %544 : vector<8x384xf32>
    %547 = arith.divf %545, %546 : vector<8x384xf32>
    %548 = vector.extract_strided_slice %547 {offsets = [0, 0], sizes = [8, 128], strides = [1, 1]} : vector<8x384xf32> to vector<8x128xf32>
    %549 = vector.extract_strided_slice %547 {offsets = [0, 128], sizes = [8, 128], strides = [1, 1]} : vector<8x384xf32> to vector<8x128xf32>
    %550 = vector.extract_strided_slice %547 {offsets = [0, 256], sizes = [8, 128], strides = [1, 1]} : vector<8x384xf32> to vector<8x128xf32>
    %551 = vector.extract_strided_slice %520 {offsets = [0, 384], sizes = [8, 128], strides = [1, 1]} : vector<8x512xf32> to vector<8x128xf32>
    %552 = math.tanh %551 : vector<8x128xf32>
    %553 = arith.mulf %549, %504 : vector<8x128xf32>
    %554 = arith.mulf %548, %552 : vector<8x128xf32>
    %555 = arith.addf %553, %554 : vector<8x128xf32>
    %556 = math.tanh %555 : vector<8x128xf32>
    %557 = arith.mulf %550, %556 : vector<8x128xf32>
    %c11_i32 = arith.constant 11 : i32
    %558 = tpu.concatenate %557, %536 in 1 : vector<8x128xf32>, vector<8x128xf32> -> vector<8x256xf32>
    %559 = arith.truncf %558 : vector<8x256xf32> to vector<8x256xbf16>
    %c0_180 = arith.constant 0 : index
    %c0_181 = arith.constant 0 : index
    %560 = vector.load %arg9[%c0_180, %c0_181] : memref<256x512xbf16, #tpu.memory_space<vmem>>, vector<256x512xbf16>
    %cst_182 = arith.constant dense<0.000000e+00> : vector<8x512xf32>
    %561 = tpu.matmul %559, %560, %cst_182 {dimension_numbers = #tpu.dot_dimension_numbers<[1], [0], [0], [1], [0, 0, 1, 1], [], []>} : vector<8x256xbf16>, vector<256x512xbf16>, vector<8x512xf32> -> vector<8x512xf32>
    %c0_183 = arith.constant 0 : index
    %c0_184 = arith.constant 0 : index
    %562 = vector.load %arg10[%c0_183, %c0_184] : memref<1x512xf32, #tpu.memory_space<vmem>>, vector<1x512xf32>
    %563 = vector.broadcast %562 : vector<1x512xf32> to vector<8x512xf32>
    %564 = arith.addf %561, %563 : vector<8x512xf32>
    %565 = arith.index_cast %c11_i32 : i32 to index
    %c0_185 = arith.constant 0 : index
    %c0_186 = arith.constant 0 : index
    %566 = vector.load %arg15[%565, %c0_185, %c0_186] : memref<16x8x512xf32, #tpu.memory_space<vmem>>, vector<1x8x512xf32>
    %567 = vector.shape_cast %566 : vector<1x8x512xf32> to vector<8x512xf32>
    %568 = arith.truncf %557 : vector<8x128xf32> to vector<8x128xbf16>
    %c0_187 = arith.constant 0 : index
    %c0_188 = arith.constant 0 : index
    %569 = vector.load %arg7[%c0_187, %c0_188] : memref<128x512xbf16, #tpu.memory_space<vmem>>, vector<128x512xbf16>
    %cst_189 = arith.constant dense<0.000000e+00> : vector<8x512xf32>
    %570 = tpu.matmul %568, %569, %cst_189 {dimension_numbers = #tpu.dot_dimension_numbers<[1], [0], [0], [1], [0, 0, 1, 1], [], []>} : vector<8x128xbf16>, vector<128x512xbf16>, vector<8x512xf32> -> vector<8x512xf32>
    %571 = arith.addf %567, %570 : vector<8x512xf32>
    %572 = vector.extract_strided_slice %564 {offsets = [0, 0], sizes = [8, 384], strides = [1, 1]} : vector<8x512xf32> to vector<8x384xf32>
    %573 = arith.negf %572 : vector<8x384xf32>
    %574 = math.exp %573 : vector<8x384xf32>
    %cst_190 = arith.constant 1.000000e+00 : f32
    %575 = vector.broadcast %cst_190 : f32 to vector<8x384xf32>
    %576 = arith.addf %575, %574 : vector<8x384xf32>
    %577 = arith.divf %575, %576 : vector<8x384xf32>
    %578 = vector.extract_strided_slice %577 {offsets = [0, 0], sizes = [8, 128], strides = [1, 1]} : vector<8x384xf32> to vector<8x128xf32>
    %579 = vector.extract_strided_slice %577 {offsets = [0, 128], sizes = [8, 128], strides = [1, 1]} : vector<8x384xf32> to vector<8x128xf32>
    %580 = vector.extract_strided_slice %577 {offsets = [0, 256], sizes = [8, 128], strides = [1, 1]} : vector<8x384xf32> to vector<8x128xf32>
    %581 = vector.extract_strided_slice %564 {offsets = [0, 384], sizes = [8, 128], strides = [1, 1]} : vector<8x512xf32> to vector<8x128xf32>
    %582 = math.tanh %581 : vector<8x128xf32>
    %583 = arith.mulf %579, %534 : vector<8x128xf32>
    %584 = arith.mulf %578, %582 : vector<8x128xf32>
    %585 = arith.addf %583, %584 : vector<8x128xf32>
    %586 = math.tanh %585 : vector<8x128xf32>
    %587 = arith.mulf %580, %586 : vector<8x128xf32>
    %c1_i32_191 = arith.constant 1 : i32
    %588 = arith.subi %c11_i32, %c1_i32_191 : i32
    %589 = arith.index_cast %588 : i32 to index
    %c0_192 = arith.constant 0 : index
    %c0_193 = arith.constant 0 : index
    %590 = vector.load %arg12[%589, %c0_192, %c0_193] : memref<16x8x128xf32, #tpu.memory_space<vmem>>, vector<1x8x128xf32>
    %591 = vector.shape_cast %590 : vector<1x8x128xf32> to vector<8x128xf32>
    %592 = vector.shape_cast %587 : vector<8x128xf32> to vector<1x8x128xf32>
    tpu.vector_store %arg12[%589, %c0_192, %c0_193], %592 {strides = array<i32>} : memref<16x8x128xf32, #tpu.memory_space<vmem>>, vector<1x8x128xf32>,
    %593 = vector.extract_strided_slice %571 {offsets = [0, 0], sizes = [8, 384], strides = [1, 1]} : vector<8x512xf32> to vector<8x384xf32>
    %594 = arith.negf %593 : vector<8x384xf32>
    %595 = math.exp %594 : vector<8x384xf32>
    %cst_194 = arith.constant 1.000000e+00 : f32
    %596 = vector.broadcast %cst_194 : f32 to vector<8x384xf32>
    %597 = arith.addf %596, %595 : vector<8x384xf32>
    %598 = arith.divf %596, %597 : vector<8x384xf32>
    %599 = vector.extract_strided_slice %598 {offsets = [0, 0], sizes = [8, 128], strides = [1, 1]} : vector<8x384xf32> to vector<8x128xf32>
    %600 = vector.extract_strided_slice %598 {offsets = [0, 128], sizes = [8, 128], strides = [1, 1]} : vector<8x384xf32> to vector<8x128xf32>
    %601 = vector.extract_strided_slice %598 {offsets = [0, 256], sizes = [8, 128], strides = [1, 1]} : vector<8x384xf32> to vector<8x128xf32>
    %602 = vector.extract_strided_slice %571 {offsets = [0, 384], sizes = [8, 128], strides = [1, 1]} : vector<8x512xf32> to vector<8x128xf32>
    %603 = math.tanh %602 : vector<8x128xf32>
    %604 = arith.mulf %600, %555 : vector<8x128xf32>
    %605 = arith.mulf %599, %603 : vector<8x128xf32>
    %606 = arith.addf %604, %605 : vector<8x128xf32>
    %607 = math.tanh %606 : vector<8x128xf32>
    %608 = arith.mulf %601, %607 : vector<8x128xf32>
    %c12_i32 = arith.constant 12 : i32
    %609 = tpu.concatenate %608, %587 in 1 : vector<8x128xf32>, vector<8x128xf32> -> vector<8x256xf32>
    %610 = arith.truncf %609 : vector<8x256xf32> to vector<8x256xbf16>
    %c0_195 = arith.constant 0 : index
    %c0_196 = arith.constant 0 : index
    %611 = vector.load %arg9[%c0_195, %c0_196] : memref<256x512xbf16, #tpu.memory_space<vmem>>, vector<256x512xbf16>
    %cst_197 = arith.constant dense<0.000000e+00> : vector<8x512xf32>
    %612 = tpu.matmul %610, %611, %cst_197 {dimension_numbers = #tpu.dot_dimension_numbers<[1], [0], [0], [1], [0, 0, 1, 1], [], []>} : vector<8x256xbf16>, vector<256x512xbf16>, vector<8x512xf32> -> vector<8x512xf32>
    %c0_198 = arith.constant 0 : index
    %c0_199 = arith.constant 0 : index
    %613 = vector.load %arg10[%c0_198, %c0_199] : memref<1x512xf32, #tpu.memory_space<vmem>>, vector<1x512xf32>
    %614 = vector.broadcast %613 : vector<1x512xf32> to vector<8x512xf32>
    %615 = arith.addf %612, %614 : vector<8x512xf32>
    %616 = arith.index_cast %c12_i32 : i32 to index
    %c0_200 = arith.constant 0 : index
    %c0_201 = arith.constant 0 : index
    %617 = vector.load %arg15[%616, %c0_200, %c0_201] : memref<16x8x512xf32, #tpu.memory_space<vmem>>, vector<1x8x512xf32>
    %618 = vector.shape_cast %617 : vector<1x8x512xf32> to vector<8x512xf32>
    %619 = arith.truncf %608 : vector<8x128xf32> to vector<8x128xbf16>
    %c0_202 = arith.constant 0 : index
    %c0_203 = arith.constant 0 : index
    %620 = vector.load %arg7[%c0_202, %c0_203] : memref<128x512xbf16, #tpu.memory_space<vmem>>, vector<128x512xbf16>
    %cst_204 = arith.constant dense<0.000000e+00> : vector<8x512xf32>
    %621 = tpu.matmul %619, %620, %cst_204 {dimension_numbers = #tpu.dot_dimension_numbers<[1], [0], [0], [1], [0, 0, 1, 1], [], []>} : vector<8x128xbf16>, vector<128x512xbf16>, vector<8x512xf32> -> vector<8x512xf32>
    %622 = arith.addf %618, %621 : vector<8x512xf32>
    %623 = vector.extract_strided_slice %615 {offsets = [0, 0], sizes = [8, 384], strides = [1, 1]} : vector<8x512xf32> to vector<8x384xf32>
    %624 = arith.negf %623 : vector<8x384xf32>
    %625 = math.exp %624 : vector<8x384xf32>
    %cst_205 = arith.constant 1.000000e+00 : f32
    %626 = vector.broadcast %cst_205 : f32 to vector<8x384xf32>
    %627 = arith.addf %626, %625 : vector<8x384xf32>
    %628 = arith.divf %626, %627 : vector<8x384xf32>
    %629 = vector.extract_strided_slice %628 {offsets = [0, 0], sizes = [8, 128], strides = [1, 1]} : vector<8x384xf32> to vector<8x128xf32>
    %630 = vector.extract_strided_slice %628 {offsets = [0, 128], sizes = [8, 128], strides = [1, 1]} : vector<8x384xf32> to vector<8x128xf32>
    %631 = vector.extract_strided_slice %628 {offsets = [0, 256], sizes = [8, 128], strides = [1, 1]} : vector<8x384xf32> to vector<8x128xf32>
    %632 = vector.extract_strided_slice %615 {offsets = [0, 384], sizes = [8, 128], strides = [1, 1]} : vector<8x512xf32> to vector<8x128xf32>
    %633 = math.tanh %632 : vector<8x128xf32>
    %634 = arith.mulf %630, %585 : vector<8x128xf32>
    %635 = arith.mulf %629, %633 : vector<8x128xf32>
    %636 = arith.addf %634, %635 : vector<8x128xf32>
    %637 = math.tanh %636 : vector<8x128xf32>
    %638 = arith.mulf %631, %637 : vector<8x128xf32>
    %c1_i32_206 = arith.constant 1 : i32
    %639 = arith.subi %c12_i32, %c1_i32_206 : i32
    %640 = arith.index_cast %639 : i32 to index
    %c0_207 = arith.constant 0 : index
    %c0_208 = arith.constant 0 : index
    %641 = vector.load %arg12[%640, %c0_207, %c0_208] : memref<16x8x128xf32, #tpu.memory_space<vmem>>, vector<1x8x128xf32>
    %642 = vector.shape_cast %641 : vector<1x8x128xf32> to vector<8x128xf32>
    %643 = vector.shape_cast %638 : vector<8x128xf32> to vector<1x8x128xf32>
    tpu.vector_store %arg12[%640, %c0_207, %c0_208], %643 {strides = array<i32>} : memref<16x8x128xf32, #tpu.memory_space<vmem>>, vector<1x8x128xf32>,
    %644 = vector.extract_strided_slice %622 {offsets = [0, 0], sizes = [8, 384], strides = [1, 1]} : vector<8x512xf32> to vector<8x384xf32>
    %645 = arith.negf %644 : vector<8x384xf32>
    %646 = math.exp %645 : vector<8x384xf32>
    %cst_209 = arith.constant 1.000000e+00 : f32
    %647 = vector.broadcast %cst_209 : f32 to vector<8x384xf32>
    %648 = arith.addf %647, %646 : vector<8x384xf32>
    %649 = arith.divf %647, %648 : vector<8x384xf32>
    %650 = vector.extract_strided_slice %649 {offsets = [0, 0], sizes = [8, 128], strides = [1, 1]} : vector<8x384xf32> to vector<8x128xf32>
    %651 = vector.extract_strided_slice %649 {offsets = [0, 128], sizes = [8, 128], strides = [1, 1]} : vector<8x384xf32> to vector<8x128xf32>
    %652 = vector.extract_strided_slice %649 {offsets = [0, 256], sizes = [8, 128], strides = [1, 1]} : vector<8x384xf32> to vector<8x128xf32>
    %653 = vector.extract_strided_slice %622 {offsets = [0, 384], sizes = [8, 128], strides = [1, 1]} : vector<8x512xf32> to vector<8x128xf32>
    %654 = math.tanh %653 : vector<8x128xf32>
    %655 = arith.mulf %651, %606 : vector<8x128xf32>
    %656 = arith.mulf %650, %654 : vector<8x128xf32>
    %657 = arith.addf %655, %656 : vector<8x128xf32>
    %658 = math.tanh %657 : vector<8x128xf32>
    %659 = arith.mulf %652, %658 : vector<8x128xf32>
    %c13_i32 = arith.constant 13 : i32
    %660 = tpu.concatenate %659, %638 in 1 : vector<8x128xf32>, vector<8x128xf32> -> vector<8x256xf32>
    %661 = arith.truncf %660 : vector<8x256xf32> to vector<8x256xbf16>
    %c0_210 = arith.constant 0 : index
    %c0_211 = arith.constant 0 : index
    %662 = vector.load %arg9[%c0_210, %c0_211] : memref<256x512xbf16, #tpu.memory_space<vmem>>, vector<256x512xbf16>
    %cst_212 = arith.constant dense<0.000000e+00> : vector<8x512xf32>
    %663 = tpu.matmul %661, %662, %cst_212 {dimension_numbers = #tpu.dot_dimension_numbers<[1], [0], [0], [1], [0, 0, 1, 1], [], []>} : vector<8x256xbf16>, vector<256x512xbf16>, vector<8x512xf32> -> vector<8x512xf32>
    %c0_213 = arith.constant 0 : index
    %c0_214 = arith.constant 0 : index
    %664 = vector.load %arg10[%c0_213, %c0_214] : memref<1x512xf32, #tpu.memory_space<vmem>>, vector<1x512xf32>
    %665 = vector.broadcast %664 : vector<1x512xf32> to vector<8x512xf32>
    %666 = arith.addf %663, %665 : vector<8x512xf32>
    %667 = arith.index_cast %c13_i32 : i32 to index
    %c0_215 = arith.constant 0 : index
    %c0_216 = arith.constant 0 : index
    %668 = vector.load %arg15[%667, %c0_215, %c0_216] : memref<16x8x512xf32, #tpu.memory_space<vmem>>, vector<1x8x512xf32>
    %669 = vector.shape_cast %668 : vector<1x8x512xf32> to vector<8x512xf32>
    %670 = arith.truncf %659 : vector<8x128xf32> to vector<8x128xbf16>
    %c0_217 = arith.constant 0 : index
    %c0_218 = arith.constant 0 : index
    %671 = vector.load %arg7[%c0_217, %c0_218] : memref<128x512xbf16, #tpu.memory_space<vmem>>, vector<128x512xbf16>
    %cst_219 = arith.constant dense<0.000000e+00> : vector<8x512xf32>
    %672 = tpu.matmul %670, %671, %cst_219 {dimension_numbers = #tpu.dot_dimension_numbers<[1], [0], [0], [1], [0, 0, 1, 1], [], []>} : vector<8x128xbf16>, vector<128x512xbf16>, vector<8x512xf32> -> vector<8x512xf32>
    %673 = arith.addf %669, %672 : vector<8x512xf32>
    %674 = vector.extract_strided_slice %666 {offsets = [0, 0], sizes = [8, 384], strides = [1, 1]} : vector<8x512xf32> to vector<8x384xf32>
    %675 = arith.negf %674 : vector<8x384xf32>
    %676 = math.exp %675 : vector<8x384xf32>
    %cst_220 = arith.constant 1.000000e+00 : f32
    %677 = vector.broadcast %cst_220 : f32 to vector<8x384xf32>
    %678 = arith.addf %677, %676 : vector<8x384xf32>
    %679 = arith.divf %677, %678 : vector<8x384xf32>
    %680 = vector.extract_strided_slice %679 {offsets = [0, 0], sizes = [8, 128], strides = [1, 1]} : vector<8x384xf32> to vector<8x128xf32>
    %681 = vector.extract_strided_slice %679 {offsets = [0, 128], sizes = [8, 128], strides = [1, 1]} : vector<8x384xf32> to vector<8x128xf32>
    %682 = vector.extract_strided_slice %679 {offsets = [0, 256], sizes = [8, 128], strides = [1, 1]} : vector<8x384xf32> to vector<8x128xf32>
    %683 = vector.extract_strided_slice %666 {offsets = [0, 384], sizes = [8, 128], strides = [1, 1]} : vector<8x512xf32> to vector<8x128xf32>
    %684 = math.tanh %683 : vector<8x128xf32>
    %685 = arith.mulf %681, %636 : vector<8x128xf32>
    %686 = arith.mulf %680, %684 : vector<8x128xf32>
    %687 = arith.addf %685, %686 : vector<8x128xf32>
    %688 = math.tanh %687 : vector<8x128xf32>
    %689 = arith.mulf %682, %688 : vector<8x128xf32>
    %c1_i32_221 = arith.constant 1 : i32
    %690 = arith.subi %c13_i32, %c1_i32_221 : i32
    %691 = arith.index_cast %690 : i32 to index
    %c0_222 = arith.constant 0 : index
    %c0_223 = arith.constant 0 : index
    %692 = vector.load %arg12[%691, %c0_222, %c0_223] : memref<16x8x128xf32, #tpu.memory_space<vmem>>, vector<1x8x128xf32>
    %693 = vector.shape_cast %692 : vector<1x8x128xf32> to vector<8x128xf32>
    %694 = vector.shape_cast %689 : vector<8x128xf32> to vector<1x8x128xf32>
    tpu.vector_store %arg12[%691, %c0_222, %c0_223], %694 {strides = array<i32>} : memref<16x8x128xf32, #tpu.memory_space<vmem>>, vector<1x8x128xf32>,
    %695 = vector.extract_strided_slice %673 {offsets = [0, 0], sizes = [8, 384], strides = [1, 1]} : vector<8x512xf32> to vector<8x384xf32>
    %696 = arith.negf %695 : vector<8x384xf32>
    %697 = math.exp %696 : vector<8x384xf32>
    %cst_224 = arith.constant 1.000000e+00 : f32
    %698 = vector.broadcast %cst_224 : f32 to vector<8x384xf32>
    %699 = arith.addf %698, %697 : vector<8x384xf32>
    %700 = arith.divf %698, %699 : vector<8x384xf32>
    %701 = vector.extract_strided_slice %700 {offsets = [0, 0], sizes = [8, 128], strides = [1, 1]} : vector<8x384xf32> to vector<8x128xf32>
    %702 = vector.extract_strided_slice %700 {offsets = [0, 128], sizes = [8, 128], strides = [1, 1]} : vector<8x384xf32> to vector<8x128xf32>
    %703 = vector.extract_strided_slice %700 {offsets = [0, 256], sizes = [8, 128], strides = [1, 1]} : vector<8x384xf32> to vector<8x128xf32>
    %704 = vector.extract_strided_slice %673 {offsets = [0, 384], sizes = [8, 128], strides = [1, 1]} : vector<8x512xf32> to vector<8x128xf32>
    %705 = math.tanh %704 : vector<8x128xf32>
    %706 = arith.mulf %702, %657 : vector<8x128xf32>
    %707 = arith.mulf %701, %705 : vector<8x128xf32>
    %708 = arith.addf %706, %707 : vector<8x128xf32>
    %709 = math.tanh %708 : vector<8x128xf32>
    %710 = arith.mulf %703, %709 : vector<8x128xf32>
    %c14_i32 = arith.constant 14 : i32
    %711 = tpu.concatenate %710, %689 in 1 : vector<8x128xf32>, vector<8x128xf32> -> vector<8x256xf32>
    %712 = arith.truncf %711 : vector<8x256xf32> to vector<8x256xbf16>
    %c0_225 = arith.constant 0 : index
    %c0_226 = arith.constant 0 : index
    %713 = vector.load %arg9[%c0_225, %c0_226] : memref<256x512xbf16, #tpu.memory_space<vmem>>, vector<256x512xbf16>
    %cst_227 = arith.constant dense<0.000000e+00> : vector<8x512xf32>
    %714 = tpu.matmul %712, %713, %cst_227 {dimension_numbers = #tpu.dot_dimension_numbers<[1], [0], [0], [1], [0, 0, 1, 1], [], []>} : vector<8x256xbf16>, vector<256x512xbf16>, vector<8x512xf32> -> vector<8x512xf32>
    %c0_228 = arith.constant 0 : index
    %c0_229 = arith.constant 0 : index
    %715 = vector.load %arg10[%c0_228, %c0_229] : memref<1x512xf32, #tpu.memory_space<vmem>>, vector<1x512xf32>
    %716 = vector.broadcast %715 : vector<1x512xf32> to vector<8x512xf32>
    %717 = arith.addf %714, %716 : vector<8x512xf32>
    %718 = arith.index_cast %c14_i32 : i32 to index
    %c0_230 = arith.constant 0 : index
    %c0_231 = arith.constant 0 : index
    %719 = vector.load %arg15[%718, %c0_230, %c0_231] : memref<16x8x512xf32, #tpu.memory_space<vmem>>, vector<1x8x512xf32>
    %720 = vector.shape_cast %719 : vector<1x8x512xf32> to vector<8x512xf32>
    %721 = arith.truncf %710 : vector<8x128xf32> to vector<8x128xbf16>
    %c0_232 = arith.constant 0 : index
    %c0_233 = arith.constant 0 : index
    %722 = vector.load %arg7[%c0_232, %c0_233] : memref<128x512xbf16, #tpu.memory_space<vmem>>, vector<128x512xbf16>
    %cst_234 = arith.constant dense<0.000000e+00> : vector<8x512xf32>
    %723 = tpu.matmul %721, %722, %cst_234 {dimension_numbers = #tpu.dot_dimension_numbers<[1], [0], [0], [1], [0, 0, 1, 1], [], []>} : vector<8x128xbf16>, vector<128x512xbf16>, vector<8x512xf32> -> vector<8x512xf32>
    %724 = arith.addf %720, %723 : vector<8x512xf32>
    %725 = vector.extract_strided_slice %717 {offsets = [0, 0], sizes = [8, 384], strides = [1, 1]} : vector<8x512xf32> to vector<8x384xf32>
    %726 = arith.negf %725 : vector<8x384xf32>
    %727 = math.exp %726 : vector<8x384xf32>
    %cst_235 = arith.constant 1.000000e+00 : f32
    %728 = vector.broadcast %cst_235 : f32 to vector<8x384xf32>
    %729 = arith.addf %728, %727 : vector<8x384xf32>
    %730 = arith.divf %728, %729 : vector<8x384xf32>
    %731 = vector.extract_strided_slice %730 {offsets = [0, 0], sizes = [8, 128], strides = [1, 1]} : vector<8x384xf32> to vector<8x128xf32>
    %732 = vector.extract_strided_slice %730 {offsets = [0, 128], sizes = [8, 128], strides = [1, 1]} : vector<8x384xf32> to vector<8x128xf32>
    %733 = vector.extract_strided_slice %730 {offsets = [0, 256], sizes = [8, 128], strides = [1, 1]} : vector<8x384xf32> to vector<8x128xf32>
    %734 = vector.extract_strided_slice %717 {offsets = [0, 384], sizes = [8, 128], strides = [1, 1]} : vector<8x512xf32> to vector<8x128xf32>
    %735 = math.tanh %734 : vector<8x128xf32>
    %736 = arith.mulf %732, %687 : vector<8x128xf32>
    %737 = arith.mulf %731, %735 : vector<8x128xf32>
    %738 = arith.addf %736, %737 : vector<8x128xf32>
    %739 = math.tanh %738 : vector<8x128xf32>
    %740 = arith.mulf %733, %739 : vector<8x128xf32>
    %c1_i32_236 = arith.constant 1 : i32
    %741 = arith.subi %c14_i32, %c1_i32_236 : i32
    %742 = arith.index_cast %741 : i32 to index
    %c0_237 = arith.constant 0 : index
    %c0_238 = arith.constant 0 : index
    %743 = vector.load %arg12[%742, %c0_237, %c0_238] : memref<16x8x128xf32, #tpu.memory_space<vmem>>, vector<1x8x128xf32>
    %744 = vector.shape_cast %743 : vector<1x8x128xf32> to vector<8x128xf32>
    %745 = vector.shape_cast %740 : vector<8x128xf32> to vector<1x8x128xf32>
    tpu.vector_store %arg12[%742, %c0_237, %c0_238], %745 {strides = array<i32>} : memref<16x8x128xf32, #tpu.memory_space<vmem>>, vector<1x8x128xf32>,
    %746 = vector.extract_strided_slice %724 {offsets = [0, 0], sizes = [8, 384], strides = [1, 1]} : vector<8x512xf32> to vector<8x384xf32>
    %747 = arith.negf %746 : vector<8x384xf32>
    %748 = math.exp %747 : vector<8x384xf32>
    %cst_239 = arith.constant 1.000000e+00 : f32
    %749 = vector.broadcast %cst_239 : f32 to vector<8x384xf32>
    %750 = arith.addf %749, %748 : vector<8x384xf32>
    %751 = arith.divf %749, %750 : vector<8x384xf32>
    %752 = vector.extract_strided_slice %751 {offsets = [0, 0], sizes = [8, 128], strides = [1, 1]} : vector<8x384xf32> to vector<8x128xf32>
    %753 = vector.extract_strided_slice %751 {offsets = [0, 128], sizes = [8, 128], strides = [1, 1]} : vector<8x384xf32> to vector<8x128xf32>
    %754 = vector.extract_strided_slice %751 {offsets = [0, 256], sizes = [8, 128], strides = [1, 1]} : vector<8x384xf32> to vector<8x128xf32>
    %755 = vector.extract_strided_slice %724 {offsets = [0, 384], sizes = [8, 128], strides = [1, 1]} : vector<8x512xf32> to vector<8x128xf32>
    %756 = math.tanh %755 : vector<8x128xf32>
    %757 = arith.mulf %753, %708 : vector<8x128xf32>
    %758 = arith.mulf %752, %756 : vector<8x128xf32>
    %759 = arith.addf %757, %758 : vector<8x128xf32>
    %760 = math.tanh %759 : vector<8x128xf32>
    %761 = arith.mulf %754, %760 : vector<8x128xf32>
    %c15_i32 = arith.constant 15 : i32
    %762 = tpu.concatenate %761, %740 in 1 : vector<8x128xf32>, vector<8x128xf32> -> vector<8x256xf32>
    %763 = arith.truncf %762 : vector<8x256xf32> to vector<8x256xbf16>
    %c0_240 = arith.constant 0 : index
    %c0_241 = arith.constant 0 : index
    %764 = vector.load %arg9[%c0_240, %c0_241] : memref<256x512xbf16, #tpu.memory_space<vmem>>, vector<256x512xbf16>
    %cst_242 = arith.constant dense<0.000000e+00> : vector<8x512xf32>
    %765 = tpu.matmul %763, %764, %cst_242 {dimension_numbers = #tpu.dot_dimension_numbers<[1], [0], [0], [1], [0, 0, 1, 1], [], []>} : vector<8x256xbf16>, vector<256x512xbf16>, vector<8x512xf32> -> vector<8x512xf32>
    %c0_243 = arith.constant 0 : index
    %c0_244 = arith.constant 0 : index
    %766 = vector.load %arg10[%c0_243, %c0_244] : memref<1x512xf32, #tpu.memory_space<vmem>>, vector<1x512xf32>
    %767 = vector.broadcast %766 : vector<1x512xf32> to vector<8x512xf32>
    %768 = arith.addf %765, %767 : vector<8x512xf32>
    %769 = arith.index_cast %c15_i32 : i32 to index
    %c0_245 = arith.constant 0 : index
    %c0_246 = arith.constant 0 : index
    %770 = vector.load %arg15[%769, %c0_245, %c0_246] : memref<16x8x512xf32, #tpu.memory_space<vmem>>, vector<1x8x512xf32>
    %771 = vector.shape_cast %770 : vector<1x8x512xf32> to vector<8x512xf32>
    %772 = arith.truncf %761 : vector<8x128xf32> to vector<8x128xbf16>
    %c0_247 = arith.constant 0 : index
    %c0_248 = arith.constant 0 : index
    %773 = vector.load %arg7[%c0_247, %c0_248] : memref<128x512xbf16, #tpu.memory_space<vmem>>, vector<128x512xbf16>
    %cst_249 = arith.constant dense<0.000000e+00> : vector<8x512xf32>
    %774 = tpu.matmul %772, %773, %cst_249 {dimension_numbers = #tpu.dot_dimension_numbers<[1], [0], [0], [1], [0, 0, 1, 1], [], []>} : vector<8x128xbf16>, vector<128x512xbf16>, vector<8x512xf32> -> vector<8x512xf32>
    %775 = arith.addf %771, %774 : vector<8x512xf32>
    %776 = vector.extract_strided_slice %768 {offsets = [0, 0], sizes = [8, 384], strides = [1, 1]} : vector<8x512xf32> to vector<8x384xf32>
    %777 = arith.negf %776 : vector<8x384xf32>
    %778 = math.exp %777 : vector<8x384xf32>
    %cst_250 = arith.constant 1.000000e+00 : f32
    %779 = vector.broadcast %cst_250 : f32 to vector<8x384xf32>
    %780 = arith.addf %779, %778 : vector<8x384xf32>
    %781 = arith.divf %779, %780 : vector<8x384xf32>
    %782 = vector.extract_strided_slice %781 {offsets = [0, 0], sizes = [8, 128], strides = [1, 1]} : vector<8x384xf32> to vector<8x128xf32>
    %783 = vector.extract_strided_slice %781 {offsets = [0, 128], sizes = [8, 128], strides = [1, 1]} : vector<8x384xf32> to vector<8x128xf32>
    %784 = vector.extract_strided_slice %781 {offsets = [0, 256], sizes = [8, 128], strides = [1, 1]} : vector<8x384xf32> to vector<8x128xf32>
    %785 = vector.extract_strided_slice %768 {offsets = [0, 384], sizes = [8, 128], strides = [1, 1]} : vector<8x512xf32> to vector<8x128xf32>
    %786 = math.tanh %785 : vector<8x128xf32>
    %787 = arith.mulf %783, %738 : vector<8x128xf32>
    %788 = arith.mulf %782, %786 : vector<8x128xf32>
    %789 = arith.addf %787, %788 : vector<8x128xf32>
    %790 = math.tanh %789 : vector<8x128xf32>
    %791 = arith.mulf %784, %790 : vector<8x128xf32>
    %c1_i32_251 = arith.constant 1 : i32
    %792 = arith.subi %c15_i32, %c1_i32_251 : i32
    %793 = arith.index_cast %792 : i32 to index
    %c0_252 = arith.constant 0 : index
    %c0_253 = arith.constant 0 : index
    %794 = vector.load %arg12[%793, %c0_252, %c0_253] : memref<16x8x128xf32, #tpu.memory_space<vmem>>, vector<1x8x128xf32>
    %795 = vector.shape_cast %794 : vector<1x8x128xf32> to vector<8x128xf32>
    %796 = vector.shape_cast %791 : vector<8x128xf32> to vector<1x8x128xf32>
    tpu.vector_store %arg12[%793, %c0_252, %c0_253], %796 {strides = array<i32>} : memref<16x8x128xf32, #tpu.memory_space<vmem>>, vector<1x8x128xf32>,
    %797 = vector.extract_strided_slice %775 {offsets = [0, 0], sizes = [8, 384], strides = [1, 1]} : vector<8x512xf32> to vector<8x384xf32>
    %798 = arith.negf %797 : vector<8x384xf32>
    %799 = math.exp %798 : vector<8x384xf32>
    %cst_254 = arith.constant 1.000000e+00 : f32
    %800 = vector.broadcast %cst_254 : f32 to vector<8x384xf32>
    %801 = arith.addf %800, %799 : vector<8x384xf32>
    %802 = arith.divf %800, %801 : vector<8x384xf32>
    %803 = vector.extract_strided_slice %802 {offsets = [0, 0], sizes = [8, 128], strides = [1, 1]} : vector<8x384xf32> to vector<8x128xf32>
    %804 = vector.extract_strided_slice %802 {offsets = [0, 128], sizes = [8, 128], strides = [1, 1]} : vector<8x384xf32> to vector<8x128xf32>
    %805 = vector.extract_strided_slice %802 {offsets = [0, 256], sizes = [8, 128], strides = [1, 1]} : vector<8x384xf32> to vector<8x128xf32>
    %806 = vector.extract_strided_slice %775 {offsets = [0, 384], sizes = [8, 128], strides = [1, 1]} : vector<8x512xf32> to vector<8x128xf32>
    %807 = math.tanh %806 : vector<8x128xf32>
    %808 = arith.mulf %804, %759 : vector<8x128xf32>
    %809 = arith.mulf %803, %807 : vector<8x128xf32>
    %810 = arith.addf %808, %809 : vector<8x128xf32>
    %811 = math.tanh %810 : vector<8x128xf32>
    %812 = arith.mulf %805, %811 : vector<8x128xf32>
    %c15_i32_255 = arith.constant 15 : i32
    %813 = tpu.concatenate %812, %791 in 1 : vector<8x128xf32>, vector<8x128xf32> -> vector<8x256xf32>
    %814 = arith.truncf %813 : vector<8x256xf32> to vector<8x256xbf16>
    %c0_256 = arith.constant 0 : index
    %c0_257 = arith.constant 0 : index
    %815 = vector.load %arg9[%c0_256, %c0_257] : memref<256x512xbf16, #tpu.memory_space<vmem>>, vector<256x512xbf16>
    %cst_258 = arith.constant dense<0.000000e+00> : vector<8x512xf32>
    %816 = tpu.matmul %814, %815, %cst_258 {dimension_numbers = #tpu.dot_dimension_numbers<[1], [0], [0], [1], [0, 0, 1, 1], [], []>} : vector<8x256xbf16>, vector<256x512xbf16>, vector<8x512xf32> -> vector<8x512xf32>
    %c0_259 = arith.constant 0 : index
    %c0_260 = arith.constant 0 : index
    %817 = vector.load %arg10[%c0_259, %c0_260] : memref<1x512xf32, #tpu.memory_space<vmem>>, vector<1x512xf32>
    %818 = vector.broadcast %817 : vector<1x512xf32> to vector<8x512xf32>
    %819 = arith.addf %816, %818 : vector<8x512xf32>
    %820 = vector.extract_strided_slice %819 {offsets = [0, 0], sizes = [8, 384], strides = [1, 1]} : vector<8x512xf32> to vector<8x384xf32>
    %821 = arith.negf %820 : vector<8x384xf32>
    %822 = math.exp %821 : vector<8x384xf32>
    %cst_261 = arith.constant 1.000000e+00 : f32
    %823 = vector.broadcast %cst_261 : f32 to vector<8x384xf32>
    %824 = arith.addf %823, %822 : vector<8x384xf32>
    %825 = arith.divf %823, %824 : vector<8x384xf32>
    %826 = vector.extract_strided_slice %825 {offsets = [0, 0], sizes = [8, 128], strides = [1, 1]} : vector<8x384xf32> to vector<8x128xf32>
    %827 = vector.extract_strided_slice %825 {offsets = [0, 128], sizes = [8, 128], strides = [1, 1]} : vector<8x384xf32> to vector<8x128xf32>
    %828 = vector.extract_strided_slice %825 {offsets = [0, 256], sizes = [8, 128], strides = [1, 1]} : vector<8x384xf32> to vector<8x128xf32>
    %829 = vector.extract_strided_slice %819 {offsets = [0, 384], sizes = [8, 128], strides = [1, 1]} : vector<8x512xf32> to vector<8x128xf32>
    %830 = math.tanh %829 : vector<8x128xf32>
    %831 = arith.mulf %827, %789 : vector<8x128xf32>
    %832 = arith.mulf %826, %830 : vector<8x128xf32>
    %833 = arith.addf %831, %832 : vector<8x128xf32>
    %834 = math.tanh %833 : vector<8x128xf32>
    %835 = arith.mulf %828, %834 : vector<8x128xf32>
    %c15 = arith.constant 15 : index
    %c0_262 = arith.constant 0 : index
    %c0_263 = arith.constant 0 : index
    %836 = vector.load %arg12[%c15, %c0_262, %c0_263] : memref<16x8x128xf32, #tpu.memory_space<vmem>>, vector<1x8x128xf32>
    %837 = vector.shape_cast %836 : vector<1x8x128xf32> to vector<8x128xf32>
    %838 = vector.shape_cast %835 : vector<8x128xf32> to vector<1x8x128xf32>
    tpu.vector_store %arg12[%c15, %c0_262, %c0_263], %838 {strides = array<i32>} : memref<16x8x128xf32, #tpu.memory_space<vmem>>, vector<1x8x128xf32>,
    %c0_264 = arith.constant 0 : index
    %c0_265 = arith.constant 0 : index
    %c0_266 = arith.constant 0 : index
    %839 = vector.load %arg13[%c0_264, %c0_265, %c0_266] : memref<2x8x128xf32, #tpu.memory_space<vmem>>, vector<1x8x128xf32>
    %840 = vector.shape_cast %839 : vector<1x8x128xf32> to vector<8x128xf32>
    %841 = vector.shape_cast %812 : vector<8x128xf32> to vector<1x8x128xf32>
    tpu.vector_store %arg13[%c0_264, %c0_265, %c0_266], %841 {strides = array<i32>} : memref<2x8x128xf32, #tpu.memory_space<vmem>>, vector<1x8x128xf32>,
    %c0_267 = arith.constant 0 : index
    %c0_268 = arith.constant 0 : index
    %c0_269 = arith.constant 0 : index
    %842 = vector.load %arg14[%c0_267, %c0_268, %c0_269] : memref<2x8x128xf32, #tpu.memory_space<vmem>>, vector<1x8x128xf32>
    %843 = vector.shape_cast %842 : vector<1x8x128xf32> to vector<8x128xf32>
    %844 = vector.shape_cast %810 : vector<8x128xf32> to vector<1x8x128xf32>
    tpu.vector_store %arg14[%c0_267, %c0_268, %c0_269], %844 {strides = array<i32>} : memref<2x8x128xf32, #tpu.memory_space<vmem>>, vector<1x8x128xf32>,
    %c1 = arith.constant 1 : index
    %c0_270 = arith.constant 0 : index
    %c0_271 = arith.constant 0 : index
    %845 = vector.load %arg13[%c1, %c0_270, %c0_271] : memref<2x8x128xf32, #tpu.memory_space<vmem>>, vector<1x8x128xf32>
    %846 = vector.shape_cast %845 : vector<1x8x128xf32> to vector<8x128xf32>
    %847 = vector.shape_cast %835 : vector<8x128xf32> to vector<1x8x128xf32>
    tpu.vector_store %arg13[%c1, %c0_270, %c0_271], %847 {strides = array<i32>} : memref<2x8x128xf32, #tpu.memory_space<vmem>>, vector<1x8x128xf32>,
    %c1_272 = arith.constant 1 : index
    %c0_273 = arith.constant 0 : index
    %c0_274 = arith.constant 0 : index
    %848 = vector.load %arg14[%c1_272, %c0_273, %c0_274] : memref<2x8x128xf32, #tpu.memory_space<vmem>>, vector<1x8x128xf32>
    %849 = vector.shape_cast %848 : vector<1x8x128xf32> to vector<8x128xf32>
    %850 = vector.shape_cast %833 : vector<8x128xf32> to vector<1x8x128xf32>
    tpu.vector_store %arg14[%c1_272, %c0_273, %c0_274], %850 {strides = array<i32>} : memref<2x8x128xf32, #tpu.memory_space<vmem>>, vector<1x8x128xf32>,
    return
  }
  func.func @transform_0(%arg0: i32) -> (i32, i32, i32) {
    %c0_i32 = arith.constant 0 : i32
    %c0_i32_0 = arith.constant 0 : i32
    %c0_i32_1 = arith.constant 0 : i32
    %c0_i32_2 = arith.constant 0 : i32
    return %c0_i32, %c0_i32_0, %c0_i32_1 : i32, i32, i32
  }
  func.func @transform_1(%arg0: i32) -> (i32, i32) {
    %c0_i32 = arith.constant 0 : i32
    %c0_i32_0 = arith.constant 0 : i32
    %c0_i32_1 = arith.constant 0 : i32
    return %c0_i32, %c0_i32_0 : i32, i32
  }
  func.func @transform_2(%arg0: i32) -> (i32, i32) {
    %c0_i32 = arith.constant 0 : i32
    %c0_i32_0 = arith.constant 0 : i32
    %c0_i32_1 = arith.constant 0 : i32
    return %c0_i32, %c0_i32_0 : i32, i32
  }
  func.func @transform_3(%arg0: i32) -> (i32, i32) {
    %c0_i32 = arith.constant 0 : i32
    %c0_i32_0 = arith.constant 0 : i32
    %c0_i32_1 = arith.constant 0 : i32
    return %c0_i32, %c0_i32_0 : i32, i32
  }
  func.func @transform_4(%arg0: i32) -> (i32, i32) {
    %c0_i32 = arith.constant 0 : i32
    %c0_i32_0 = arith.constant 0 : i32
    %c0_i32_1 = arith.constant 0 : i32
    return %c0_i32, %c0_i32_0 : i32, i32
  }
  func.func @transform_5(%arg0: i32) -> (i32, i32) {
    %c0_i32 = arith.constant 0 : i32
    %c0_i32_0 = arith.constant 0 : i32
    %c0_i32_1 = arith.constant 0 : i32
    return %c0_i32, %c0_i32_0 : i32, i32
  }
  func.func @transform_6(%arg0: i32) -> (i32, i32) {
    %c0_i32 = arith.constant 0 : i32
    %c0_i32_0 = arith.constant 0 : i32
    %c0_i32_1 = arith.constant 0 : i32
    return %c0_i32, %c0_i32_0 : i32, i32
  }
  func.func @transform_7(%arg0: i32) -> (i32, i32) {
    %c0_i32 = arith.constant 0 : i32
    %c0_i32_0 = arith.constant 0 : i32
    %c0_i32_1 = arith.constant 0 : i32
    return %c0_i32, %c0_i32_0 : i32, i32
  }
  func.func @transform_8(%arg0: i32) -> (i32, i32) {
    %c0_i32 = arith.constant 0 : i32
    %c0_i32_0 = arith.constant 0 : i32
    %c0_i32_1 = arith.constant 0 : i32
    return %c0_i32, %c0_i32_0 : i32, i32
  }
  func.func @transform_9(%arg0: i32) -> (i32, i32) {
    %c0_i32 = arith.constant 0 : i32
    %c0_i32_0 = arith.constant 0 : i32
    %c0_i32_1 = arith.constant 0 : i32
    return %c0_i32, %c0_i32_0 : i32, i32
  }
  func.func @transform_10(%arg0: i32) -> (i32, i32, i32) {
    %c0_i32 = arith.constant 0 : i32
    %c0_i32_0 = arith.constant 0 : i32
    %c0_i32_1 = arith.constant 0 : i32
    %c0_i32_2 = arith.constant 0 : i32
    return %c0_i32, %c0_i32_0, %c0_i32_1 : i32, i32, i32
  }
  func.func @transform_11(%arg0: i32) -> (i32, i32, i32) {
    %c0_i32 = arith.constant 0 : i32
    %c0_i32_0 = arith.constant 0 : i32
    %c0_i32_1 = arith.constant 0 : i32
    %c0_i32_2 = arith.constant 0 : i32
    return %c0_i32, %c0_i32_0, %c0_i32_1 : i32, i32, i32
  }
  func.func @transform_12(%arg0: i32) -> (i32, i32, i32) {
    %c0_i32 = arith.constant 0 : i32
    %c0_i32_0 = arith.constant 0 : i32
    %c0_i32_1 = arith.constant 0 : i32
    %c0_i32_2 = arith.constant 0 : i32
    return %c0_i32, %c0_i32_0, %c0_i32_1 : i32, i32, i32
  }
  func.func @transform_13(%arg0: i32) -> (i32, i32, i32) {
    %c0_i32 = arith.constant 0 : i32
    %c0_i32_0 = arith.constant 0 : i32
    %c0_i32_1 = arith.constant 0 : i32
    %c0_i32_2 = arith.constant 0 : i32
    return %c0_i32, %c0_i32_0, %c0_i32_1 : i32, i32, i32
  }
}

</mosaic_0001>

<bundles_post_ra>
// kernel: rnn_decoder_forward.1
= control target key start
LH: loop header
LB: loop body
LE: loop exit
PB: predicated region body
PF: predicated region fallthrough
CT: control target
= control target key end

     0   :  { %s23725_s1 = inlined_call_operand.vmem [shape: bf16[128,128], index: 1, kind: input, shape index: {}]   ;;  %s23726_s0 = inlined_call_operand.vmem [shape: f32[16,8,128], index: 0, kind: input, shape index: {}]   ;;  %s23727_s3 = inlined_call_operand.vmem [shape: bf16[128,128], index: 3, kind: input, shape index: {}]   ;;  %s23728_s5 = inlined_call_operand.vmem [shape: bf16[128,512], index: 5, kind: input, shape index: {}]   ;;  %s23729_s2 = inlined_call_operand.vmem [shape: f32[1,128], index: 2, kind: input, shape index: {}]   ;;  %s23730_s8 = inlined_call_operand.vmem [shape: bf16[256,512], index: 8, kind: input, shape index: {}]   ;;  %s23731_s4 = inlined_call_operand.vmem [shape: f32[1,128], index: 4, kind: input, shape index: {}]   ;;  %s23732_s10 = inlined_call_operand.vmem [shape: f32[16,8,128], index: 10, kind: output, shape index: {0}]   ;;  %s23733_s6 = inlined_call_operand.vmem [shape: bf16[128,512], index: 6, kind: input, shape index: {}]   ;;  %s23734_s7 = inlined_call_operand.vmem [shape: f32[1,512], index: 7, kind: input, shape index: {}]   ;;  %s23735_s9 = inlined_call_operand.vmem [shape: f32[1,512], index: 9, kind: input, shape index: {}]   ;;  %s23736_s11 = inlined_call_operand.vmem [shape: f32[16,8,128], index: 11, kind: output, shape index: {1}]   ;;  %s23737_s13 = inlined_call_operand.vmem [shape: f32[2,8,128], index: 13, kind: output, shape index: {3}]   ;;  %s23738_s12 = inlined_call_operand.vmem [shape: f32[2,8,128], index: 12, kind: output, shape index: {2}]  }
   0x1   :  { %v15681_v0 = vld [vmem:[%s23725_s1] sm:$0xff]   ;;  %v15682_v1 = vld [vmem:[%s23725_s1 + $0x8] sm:$0xff]   ;;  %v15683_v2 = vld [vmem:[%s23725_s1 + $0x10] sm:$0xff]  }
   0x2   :  { %15615 = vmatprep.subr.bf16.mxu0 %v15681_v0  ;;  %v15684_v3 = vld [vmem:[%s23725_s1 + $0x18] sm:$0xff]   ;;  %v40_v4 = vld [vmem:[%s23726_s0] sm:$0xff]  ;;  %v41_v5 = vld [vmem:[%s23726_s0 + $0x8] sm:$0xff] }
   0x3   :  { %15616 = vmatpush3.bf16.msra.mxu0 %v15681_v0  ;;  %v56_v6 = vpack.c.bf16 %v41_v5, %v40_v4  ;;  %v15689_v7 = vld [vmem:[%s23727_s3] sm:$0xff]   ;;  %v15690_v9 = vld [vmem:[%s23727_s3 + $0x8] sm:$0xff]   ;;  %v15691_v10 = vld [vmem:[%s23727_s3 + $0x10] sm:$0xff]  }
   0x4   :  { %15617 = vmatprep.subr.bf16.mxu0 %v15682_v1  ;;  %v15685_v8 = vld [vmem:[%s23725_s1 + $0x20] sm:$0xff]   ;;  %15647 = vmatprep.subr.bf16.mxu1 %v15689_v7  ;;  %v15686_v11 = vld [vmem:[%s23725_s1 + $0x28] sm:$0xff]   ;;  %v15692_v12 = vld [vmem:[%s23727_s3 + $0x18] sm:$0xff]  }
   0x5   :  { %15631 = vmatprep.mubr.bf16.mxu0 %v56_v6  ;;  %15648 = vmatpush3.bf16.msra.mxu1 %v15689_v7  ;;  %v15687_v13 = vld [vmem:[%s23725_s1 + $0x30] sm:$0xff]   ;;  %v15693_v14 = vld [vmem:[%s23727_s3 + $0x20] sm:$0xff]   ;;  %v15688_v15 = vld [vmem:[%s23725_s1 + $0x38] sm:$0xff]  }
   0x6   :  { %15649 = vmatprep.subr.bf16.mxu1 %v15690_v9  ;;  %v42_v16 = vld [vmem:[%s23726_s0 + $0x10] sm:$0xff]  ;;  %v43_v17 = vld [vmem:[%s23726_s0 + $0x18] sm:$0xff]  ;;  %v15694_v18 = vld [vmem:[%s23727_s3 + $0x28] sm:$0xff]  }
   0x7   :  { %15618 = vmatpush3.bf16.msra.mxu0 %v15682_v1  ;;  %v44_v19 = vld [vmem:[%s23726_s0 + $0x20] sm:$0xff]  ;;  %v45_v20 = vld [vmem:[%s23726_s0 + $0x28] sm:$0xff]  ;;  %v57_v21 = vpack.c.bf16 %v43_v17, %v42_v16  ;;  %v46_v23 = vld [vmem:[%s23726_s0 + $0x30] sm:$0xff] }
   0x8   :  { %15619 = vmatprep.subr.bf16.mxu0 %v15683_v2  ;;  %v58_v22 = vpack.c.bf16 %v45_v20, %v44_v19  ;;  %v47_v24 = vld [vmem:[%s23726_s0 + $0x38] sm:$0xff]  ;;  %v48_v25 = vld [vmem:[%s23726_s0 + $0x40] sm:$0xff]  ;;  %v49_v26 = vld [vmem:[%s23726_s0 + $0x48] sm:$0xff] }
   0x9   :  { %15650 = vmatpush3.bf16.msra.mxu1 %v15690_v9  ;;  %v59_v27 = vpack.c.bf16 %v47_v24, %v46_v23  ;;  %v60_v28 = vpack.c.bf16 %v49_v26, %v48_v25  ;;  %v50_v29 = vld [vmem:[%s23726_s0 + $0x50] sm:$0xff]  ;;  %v51_v30 = vld [vmem:[%s23726_s0 + $0x58] sm:$0xff]  ;;  %v52_v31 = vld [vmem:[%s23726_s0 + $0x60] sm:$0xff] }
   0xa   :  { %15651 = vmatprep.subr.bf16.mxu1 %v15691_v10  ;;  %v53_v32 = vld [vmem:[%s23726_s0 + $0x68] sm:$0xff]  ;;  %v61_v33 = vpack.c.bf16 %v51_v30, %v50_v29  ;;  %v54_v35 = vld [vmem:[%s23726_s0 + $0x70] sm:$0xff]  ;;  %v55_v36 = vld [vmem:[%s23726_s0 + $0x78] sm:$0xff] }
   0xb   :  { %15620 = vmatpush3.bf16.msra.mxu0 %v15683_v2  ;;  %v62_v34 = vpack.c.bf16 %v53_v32, %v52_v31  ;;  %v63_v37 = vpack.c.bf16 %v55_v36, %v54_v35  ;;  %v15695_v38 = vld [vmem:[%s23727_s3 + $0x30] sm:$0xff]   ;;  %v15696_v39 = vld [vmem:[%s23727_s3 + $0x38] sm:$0xff]   ;;  %v13917_v46 = vld [vmem:[%s23729_s2] ss:$0 sm:$0xff] }
   0xc   :  { %15621 = vmatprep.subr.bf16.mxu0 %v15684_v3  ;;  %v15697_v40 = vld [vmem:[%s23728_s5] ss:$16 sps:$4 sm:$0xff]   ;;  %v15699_v41 = vld [vmem:[%s23728_s5 + $0x4] ss:$16 sps:$4 sm:$0xff]   ;;  %v15702_v42 = vld [vmem:[%s23728_s5 + $0xc] ss:$16 sps:$4 sm:$0xff]  }
   0xd   :  { %15652 = vmatpush3.bf16.msra.mxu1 %v15691_v10  ;;  %v15705_v43 = vld [vmem:[%s23728_s5 + $0x24] ss:$16 sps:$4 sm:$0xff]   ;;  %v15703_v44 = vld [vmem:[%s23728_s5 + $0x20] ss:$16 sps:$4 sm:$0xff]   ;;  %v15700_v56 = vld [vmem:[%s23728_s5 + $0x8] ss:$16 sps:$4 sm:$0xff]  }
   0xe   :  { %15653 = vmatprep.subr.bf16.mxu1 %v15692_v12  ;;  %v15708_v57 = vld [vmem:[%s23728_s5 + $0x2c] ss:$16 sps:$4 sm:$0xff]   ;;  %v15706_v63 = vld [vmem:[%s23728_s5 + $0x28] ss:$16 sps:$4 sm:$0xff]   ;;  %v15711_v25 = vld [vmem:[%s23728_s5 + $0x44] ss:$16 sps:$4 sm:$0xff]  }
   0xf   :  { %15622 = vmatpush3.bf16.msra.mxu0 %v15684_v3  ;;  %v15714_v26 = vld [vmem:[%s23728_s5 + $0x4c] ss:$16 sps:$4 sm:$0xff]   ;;  %v15717_v29 = vld [vmem:[%s23728_s5 + $0x64] ss:$16 sps:$4 sm:$0xff]   ;;  %v15715_v31 = vld [vmem:[%s23728_s5 + $0x60] ss:$16 sps:$4 sm:$0xff]  }
  0x10   :  { %15623 = vmatprep.subr.bf16.mxu0 %v15685_v8  ;;  %v15720_v30 = vld [vmem:[%s23728_s5 + $0x6c] ss:$16 sps:$4 sm:$0xff]   ;;  %v15718_v32 = vld [vmem:[%s23728_s5 + $0x68] ss:$16 sps:$4 sm:$0xff]   ;;  %v15721_v35 = vld [vmem:[%s23728_s5 + $0x80] ss:$16 sps:$4 sm:$0xff]  }
  0x11   :  { %15654 = vmatpush3.bf16.msra.mxu1 %v15692_v12  ;;  %v15724_v36 = vld [vmem:[%s23728_s5 + $0x88] ss:$16 sps:$4 sm:$0xff]  }
  0x12   :  { %15655 = vmatprep.subr.bf16.mxu1 %v15693_v14 }
  0x13   :  { %15624 = vmatpush3.bf16.msra.mxu0 %v15685_v8 }
  0x14   :  { %15625 = vmatprep.subr.bf16.mxu0 %v15686_v11 }
  0x15   :  { %15656 = vmatpush3.bf16.msra.mxu1 %v15693_v14 }
  0x16   :  { %15657 = vmatprep.subr.bf16.mxu1 %v15694_v18 }
  0x17   :  { %15626 = vmatpush3.bf16.msra.mxu0 %v15686_v11 }
  0x18   :  { %15627 = vmatprep.subr.bf16.mxu0 %v15687_v13 }
  0x19   :  { %15658 = vmatpush3.bf16.msra.mxu1 %v15694_v18 }
  0x1a   :  { %15659 = vmatprep.subr.bf16.mxu1 %v15695_v38 }
  0x1b   :  { %15628 = vmatpush3.bf16.msra.mxu0 %v15687_v13 }
  0x1c   :  { %15629 = vmatprep.subr.bf16.mxu0 %v15688_v15 }
  0x1d   :  { %15660 = vmatpush3.bf16.msra.mxu1 %v15695_v38  ;;  %v15732_v38 = vld [vmem:[%s23728_s5 + $0xac] ss:$16 sps:$4 sm:$0xff]  }
  0x1e   :  { %15661 = vmatprep.subr.bf16.mxu1 %v15696_v39 }
  0x1f   :  { %15630 = vmatpush3.bf16.msra.mxu0 %v15688_v15 }
  0x20   :  { %726 = vmatprep.subr.bf16.mxu0 %v15699_v41  ;;  %v15735_v41 = vld [vmem:[%s23728_s5 + $0xc4] ss:$16 sps:$4 sm:$0xff]  }
  0x21   :  { %15662 = vmatpush3.bf16.msra.mxu1 %v15696_v39  ;;  %v15727_v39 = vld [vmem:[%s23728_s5 + $0xa0] ss:$16 sps:$4 sm:$0xff]  }
  0x22   :  { %15632 = vmatmul.mubr.bf16.vlgmr.msra.gmra.mrb[0].mxu0 %v57_v21  ;;  %839 = vmatprep.subr.bf16.mxu1 %v15702_v42  ;;  %v15738_v42 = vld [vmem:[%s23728_s5 + $0xcc] ss:$16 sps:$4 sm:$0xff]  }
  0x23   :  { %15635 = vmatprep.mubr.bf16.mxu0 %v58_v22  ;;  %727 = vmatpush1.bf16.msra.mxu0 %v15697_v40  ;;  %v15730_v40 = vld [vmem:[%s23728_s5 + $0xa8] ss:$16 sps:$4 sm:$0xff]  }
  0x24   :  { %728 = vmatprep.subr.bf16.mxu0 %v15705_v43  ;;  %v15733_v43 = vld [vmem:[%s23728_s5 + $0xc0] ss:$16 sps:$4 sm:$0xff]  }
  0x27   :  { %729 = vmatpush1.bf16.msra.mxu0 %v15703_v44  ;;  %v15736_v44 = vld [vmem:[%s23728_s5 + $0xc8] ss:$16 sps:$4 sm:$0xff]  }
  0x28   :  { %730 = vmatprep.subr.bf16.mxu0 %v15711_v25 }
  0x2a   :  { %15636 = vmatmul.mubr.bf16.gmra.mrb[4].mxu0 %v59_v27  ;;  %v15709_v27 = vld [vmem:[%s23728_s5 + $0x40] ss:$16 sps:$4 sm:$0xff]  }
  0x2b   :  { %15639 = vmatprep.mubr.bf16.mxu0 %v60_v28  ;;  %v15712_v28 = vld [vmem:[%s23728_s5 + $0x48] ss:$16 sps:$4 sm:$0xff]   ;;  %731 = vmatpush1.bf16.msra.mxu0 %v15709_v27 }
  0x2c   :  { %732 = vmatprep.subr.bf16.mxu0 %v15717_v29 }
  0x2f   :  { %733 = vmatpush1.bf16.msra.mxu0 %v15715_v31 }
  0x32   :  { %15640 = vmatmul.mubr.bf16.gmra.mrb[8].mxu0 %v61_v33  ;;  %v15723_v33 = vld [vmem:[%s23728_s5 + $0x84] ss:$16 sps:$4 sm:$0xff]  }
  0x33   :  { %15643 = vmatprep.mubr.bf16.mxu0 %v62_v34  ;;  %v15726_v34 = vld [vmem:[%s23728_s5 + $0x8c] ss:$16 sps:$4 sm:$0xff]   ;;  %734 = vmatprep.subr.bf16.mxu0 %v15723_v33 }
  0x34   :  { %735 = vmatpush1.bf16.msra.mxu0 %v15721_v35 }
  0x3a   :  { %15644 = vmatmul.mubr.bf16.gmra.mrb[12].mxu0 %v63_v37  ;;  %v15729_v37 = vld [vmem:[%s23728_s5 + $0xa4] ss:$16 sps:$4 sm:$0xff]  }
  0x3b   :  { %736 = vmatprep.subr.bf16.mxu0 %v15729_v37 }
  0x3c   :  { %737 = vmatpush1.bf16.msra.mxu0 %v15727_v39  ;;  %v15745_v39 = vld [vmem:[%s23730_s8] ss:$16 sps:$4 sm:$0xff]  }
  0x3d   :  { %738 = vmatprep.subr.bf16.mxu0 %v15735_v41 }
  0x40   :  { %739 = vmatpush1.bf16.msra.mxu0 %v15733_v43 }
  0xf5   :  { %v15633_v45 = vpop.f32.mrb[0].mxu0 }
  0xf6   :  { %v169_v47 = vpop.f32.mrb[1].mxu0  ;;  %v178_v49 = vadd.f32 %v15633_v45, %v13917_v46  ;;  %v15741_v45 = vld [vmem:[%s23728_s5 + $0xe4] ss:$16 sps:$4 sm:$0xff]  }
  0xf7   :  { %v15634_v48 = vpop.f32.mrb[2].mxu0  ;;  %v170_v52 = vadd.f32 %v13917_v46, %v169_v47  ;;  %v15739_v47 = vld [vmem:[%s23728_s5 + $0xe0] ss:$16 sps:$4 sm:$0xff]   ;;  %740 = vmatprep.subr.bf16.mxu0 %v15741_v45  ;;  %v15756_v45 = vld [vmem:[%s23730_s8 + $0x2c] ss:$16 sps:$4 sm:$0xff]  }
  0xf8   :  { %v181_v50 = vadd.f32 %v15634_v48, %v13917_v46  ;;  %v172_v51 = vpop.f32.mrb[3].mxu0  ;;  %v15742_v48 = vld [vmem:[%s23728_s5 + $0xe8] ss:$16 sps:$4 sm:$0xff]   ;;  %741 = vmatpush1.bf16.msra.mxu0 %v15739_v47 }
  0xf9   :  { %v173_v53 = vadd.f32 %v13917_v46, %v172_v51  ;;  %v15750_v51 = vld [vmem:[%s23730_s8 + $0xc] ss:$16 sps:$4 sm:$0xff]  }
  0xfa   :  { %v233_v54 = vpack.c.bf16 %v181_v50, %v178_v49  ;;  %v23739_v49 = vmov 0   ;;  %v15747_v50 = vld [vmem:[%s23730_s8 + $0x4] ss:$16 sps:$4 sm:$0xff]  }
  0xfb   :  { %v232_v55 = vpack.c.bf16 %v173_v53, %v170_v52  ;;  %758 = vmatprep.mubr.bf16.mxu0 %v23739_v49  ;;  %1443 = vmatprep.subr.bf16.mxu0 %v15747_v50  ;;  %v17759_v52 = vld [vmem:[%s23731_s4] ss:$0 sm:$0xff] }
  0xfd   :  { %15663 = vmatprep.mubr.bf16.mxu1 %v232_v55  ;;  %v15637_v58 = vpop.f32.mrb[4].mxu0 }
  0xfe   :  { %15664 = vmatmul.mubr.bf16.vlgmr.msra.gmra.mrb[0].mxu1 %v233_v54  ;;  %v194_v59 = vadd.f32 %v15637_v58, %v13917_v46  ;;  %v185_v60 = vpop.f32.mrb[5].mxu0 }
  0xff   :  { %v186_v61 = vadd.f32 %v13917_v46, %v185_v60  ;;  %v15638_v62 = vpop.f32.mrb[6].mxu0  ;;  %840 = vmatpush1.bf16.msra.mxu1 %v15700_v56 }
 0x100   :  { %v197_v0 = vadd.f32 %v15638_v62, %v13917_v46  ;;  %v188_v1 = vpop.f32.mrb[7].mxu0  ;;  %841 = vmatprep.subr.bf16.mxu1 %v15708_v57 }
 0x101   :  { %v189_v2 = vadd.f32 %v13917_v46, %v188_v1 }
 0x102   :  { %v235_v3 = vpack.c.bf16 %v197_v0, %v194_v59 }
 0x103   :  { %v234_v4 = vpack.c.bf16 %v189_v2, %v186_v61  ;;  %842 = vmatpush1.bf16.msra.mxu1 %v15706_v63 }
 0x104   :  { %843 = vmatprep.subr.bf16.mxu1 %v15714_v26 }
 0x105   :  { %15667 = vmatprep.mubr.bf16.mxu1 %v234_v4  ;;  %v15641_v5 = vpop.f32.mrb[8].mxu0 }
 0x106   :  { %15668 = vmatmul.mubr.bf16.gmra.mrb[4].mxu1 %v235_v3  ;;  %v210_v6 = vadd.f32 %v15641_v5, %v13917_v46  ;;  %v201_v7 = vpop.f32.mrb[9].mxu0 }
 0x107   :  { %v202_v8 = vadd.f32 %v13917_v46, %v201_v7  ;;  %v15642_v9 = vpop.f32.mrb[10].mxu0  ;;  %844 = vmatpush1.bf16.msra.mxu1 %v15712_v28 }
 0x108   :  { %v213_v10 = vadd.f32 %v15642_v9, %v13917_v46  ;;  %v204_v11 = vpop.f32.mrb[11].mxu0  ;;  %845 = vmatprep.subr.bf16.mxu1 %v15720_v30 }
 0x109   :  { %v205_v12 = vadd.f32 %v13917_v46, %v204_v11 }
 0x10a   :  { %v237_v13 = vpack.c.bf16 %v213_v10, %v210_v6 }
 0x10b   :  { %v236_v14 = vpack.c.bf16 %v205_v12, %v202_v8  ;;  %846 = vmatpush1.bf16.msra.mxu1 %v15718_v32 }
 0x10c   :  { %847 = vmatprep.subr.bf16.mxu1 %v15726_v34 }
 0x10d   :  { %15671 = vmatprep.mubr.bf16.mxu1 %v236_v14  ;;  %v15645_v15 = vpop.f32.mrb[12].mxu0 }
 0x10e   :  { %15672 = vmatmul.mubr.bf16.gmra.mrb[8].mxu1 %v237_v13  ;;  %v226_v16 = vadd.f32 %v15645_v15, %v13917_v46  ;;  %v217_v17 = vpop.f32.mrb[13].mxu0 }
 0x10f   :  { %v218_v18 = vadd.f32 %v13917_v46, %v217_v17  ;;  %v15646_v19 = vpop.f32.mrb[14].mxu0  ;;  %848 = vmatpush1.bf16.msra.mxu1 %v15724_v36 }
 0x110   :  { %v229_v20 = vadd.f32 %v15646_v19, %v13917_v46  ;;  %v220_v21 = vpop.f32.mrb[15].mxu0  ;;  %849 = vmatprep.subr.bf16.mxu1 %v15732_v38 }
 0x111   :  { %v221_v22 = vadd.f32 %v13917_v46, %v220_v21  ;;  %v15744_v46 = vld [vmem:[%s23728_s5 + $0xec] ss:$16 sps:$4 sm:$0xff]  }
 0x112   :  { %v239_v23 = vpack.c.bf16 %v229_v20, %v226_v16 }
 0x113   :  { %v238_v24 = vpack.c.bf16 %v221_v22, %v218_v18  ;;  %850 = vmatpush1.bf16.msra.mxu1 %v15730_v40  ;;  %v15748_v40 = vld [vmem:[%s23730_s8 + $0x8] ss:$16 sps:$4 sm:$0xff]  }
 0x114   :  { %851 = vmatprep.subr.bf16.mxu1 %v15738_v42 }
 0x115   :  { %15675 = vmatprep.mubr.bf16.mxu1 %v238_v24 }
 0x116   :  { %15676 = vmatmul.mubr.bf16.gmra.mrb[12].mxu1 %v239_v23 }
 0x117   :  { %852 = vmatpush1.bf16.msra.mxu1 %v15736_v44  ;;  %871 = vmatprep.mubr.bf16.mxu1 %v23739_v49  ;;  %v15753_v44 = vld [vmem:[%s23730_s8 + $0x24] ss:$16 sps:$4 sm:$0xff]  }
 0x118   :  { %853 = vmatprep.subr.bf16.mxu1 %v15744_v46 }
 0x11b   :  { %854 = vmatpush1.bf16.msra.mxu1 %v15742_v48 }
 0x11c   :  { %1484 = vmatprep.subr.bf16.mxu1 %v15750_v51 }
 0x1d1   :  { %v15665_v53 = vpop.f32.mrb[0].mxu1 }
 0x1d2   :  { %v354_v54 = vadd.f32 %v15665_v53, %v17759_v52  ;;  %v345_v55 = vpop.f32.mrb[1].mxu1 }
 0x1d3   :  { %v346_v56 = vadd.f32 %v17759_v52, %v345_v55  ;;  %v15666_v57 = vpop.f32.mrb[2].mxu1 }
 0x1d4   :  { %v426_v58 = vmul.f32 0.70710677, %v354_v54  ;;  %v357_v59 = vadd.f32 %v15666_v57, %v17759_v52  ;;  %v348_v60 = vpop.f32.mrb[3].mxu1  ;;  %v410_v15 = vmul.f32 0.5, %v354_v54 }
 0x1d5   :  { %v424_v61 = vmul.f32 0.70710677, %v346_v56  ;;  %v349_v62 = vadd.f32 %v17759_v52, %v348_v60  ;;  %v408_v19 = vmul.f32 0.5, %v346_v56 }
 0x1d6   :  { %16897 = verf.f32 %v426_v58  ;;  %v427_v63 = vmul.f32 0.70710677, %v357_v59  ;;  %v411_v25 = vmul.f32 0.5, %v357_v59 }
 0x1d7   :  { %16899 = verf.f32 %v424_v61  ;;  %v425_v0 = vmul.f32 0.70710677, %v349_v62  ;;  %v409_v30 = vmul.f32 0.5, %v349_v62  ;;  %v15751_v61 = vld [vmem:[%s23730_s8 + $0x20] ss:$16 sps:$4 sm:$0xff]  }
 0x1d8   :  { %16901 = verf.f32 %v427_v63  ;;  %v15754_v62 = vld [vmem:[%s23730_s8 + $0x28] ss:$16 sps:$4 sm:$0xff]  }
 0x1d9   :  { %16903 = verf.f32 %v425_v0  ;;  %v15669_v1 = vpop.f32.mrb[4].mxu1 }
 0x1da   :  { %v370_v2 = vadd.f32 %v15669_v1, %v17759_v52  ;;  %v361_v3 = vpop.f32.mrb[5].mxu1 }
 0x1db   :  { %v362_v4 = vadd.f32 %v17759_v52, %v361_v3  ;;  %v15670_v5 = vpop.f32.mrb[6].mxu1 }
 0x1dc   :  { %v430_v6 = vmul.f32 0.70710677, %v370_v2  ;;  %v373_v7 = vadd.f32 %v15670_v5, %v17759_v52  ;;  %v364_v8 = vpop.f32.mrb[7].mxu1  ;;  %v414_v42 = vmul.f32 0.5, %v370_v2  ;;  %v15762_v5 = vld [vmem:[%s23730_s8 + $0x4c] ss:$16 sps:$4 sm:$0xff]  }
 0x1dd   :  { %v428_v9 = vmul.f32 0.70710677, %v362_v4  ;;  %v365_v10 = vadd.f32 %v17759_v52, %v364_v8  ;;  %v412_v48 = vmul.f32 0.5, %v362_v4  ;;  %v15759_v4 = vld [vmem:[%s23730_s8 + $0x44] ss:$16 sps:$4 sm:$0xff]  }
 0x1de   :  { %16905 = verf.f32 %v430_v6  ;;  %v431_v11 = vmul.f32 0.70710677, %v373_v7  ;;  %v415_v54 = vmul.f32 0.5, %v373_v7 }
 0x1df   :  { %16907 = verf.f32 %v428_v9  ;;  %v429_v12 = vmul.f32 0.70710677, %v365_v10  ;;  %v413_v58 = vmul.f32 0.5, %v365_v10 }
 0x1e0   :  { %v16898_v13 = vpop.eup %16897  ;;  %16909 = verf.f32 %v431_v11 }
 0x1e1   :  { %v16900_v14 = vpop.eup %16899  ;;  %v458_v16 = vadd.f32 1.0, %v16898_v13  ;;  %16911 = verf.f32 %v429_v12  ;;  %v15673_v17 = vpop.f32.mrb[8].mxu1 }
 0x1e2   :  { %v16902_v18 = vpop.eup %16901  ;;  %v456_v20 = vadd.f32 1.0, %v16900_v14  ;;  %v17770_v21 = vadd.f32 %v15673_v17, %v17759_v52  ;;  %v377_v22 = vpop.f32.mrb[9].mxu1 }
 0x1e3   :  { %v16904_v23 = vpop.eup %16903  ;;  %v474_v24 = vmul.f32 %v458_v16, %v410_v15  ;;  %v459_v26 = vadd.f32 1.0, %v16902_v18  ;;  %v17773_v27 = vadd.f32 %v17759_v52, %v377_v22  ;;  %v15674_v28 = vpop.f32.mrb[10].mxu1  ;;  %v15757_v15 = vld [vmem:[%s23730_s8 + $0x40] ss:$16 sps:$4 sm:$0xff]   ;;  %v15760_v16 = vld [vmem:[%s23730_s8 + $0x48] ss:$16 sps:$4 sm:$0xff]  }
 0x1e4   :  { %v472_v29 = vmul.f32 %v456_v20, %v408_v19  ;;  %v457_v31 = vadd.f32 1.0, %v16904_v23  ;;  %v434_v32 = vmul.f32 0.70710677, %v17770_v21  ;;  %v380_v33 = vpop.f32.mrb[11].mxu1  ;;  %v17781_v36 = vadd.f32 %v15674_v28, %v17759_v52  ;;  %v15765_v19 = vld [vmem:[%s23730_s8 + $0x64] ss:$16 sps:$4 sm:$0xff]  }
 0x1e5   :  { %490 = vst [vmem:[%s23732_s10 + $0x10] sm:$0xff] %v474_v24  ;;  %v475_v34 = vmul.f32 %v459_v26, %v411_v25  ;;  %v432_v35 = vmul.f32 0.70710677, %v17773_v27  ;;  %v17787_v38 = vadd.f32 %v17759_v52, %v380_v33  ;;  %v418_v17 = vmul.f32 0.5, %v17770_v21  ;;  %v15768_v20 = vld [vmem:[%s23730_s8 + $0x6c] ss:$16 sps:$4 sm:$0xff]  }
 0x1e6   :  { %488 = vst [vmem:[%s23732_s10] sm:$0xff] %v472_v29  ;;  %v473_v37 = vmul.f32 %v457_v31, %v409_v30  ;;  %16913 = verf.f32 %v434_v32  ;;  %v435_v43 = vmul.f32 0.70710677, %v17781_v36  ;;  %v416_v21 = vmul.f32 0.5, %v17773_v27  ;;  %v15763_v27 = vld [vmem:[%s23730_s8 + $0x60] ss:$16 sps:$4 sm:$0xff]  }
 0x1e7   :  { %491 = vst [vmem:[%s23732_s10 + $0x18] sm:$0xff] %v475_v34  ;;  %v17798_v41 = vpack.c.bf16 %v475_v34, %v474_v24  ;;  %16915 = verf.f32 %v432_v35  ;;  %v433_v50 = vmul.f32 0.70710677, %v17787_v38  ;;  %v15766_v30 = vld [vmem:[%s23730_s8 + $0x68] ss:$16 sps:$4 sm:$0xff]   ;;  %v417_v33 = vmul.f32 0.5, %v17787_v38 }
 0x1e8   :  { %v16906_v46 = vpop.eup %16905  ;;  %489 = vst [vmem:[%s23732_s10 + $0x8] sm:$0xff] %v473_v37  ;;  %v504_v47 = vpack.c.bf16 %v473_v37, %v472_v29  ;;  %16917 = verf.f32 %v435_v43  ;;  %v419_v29 = vmul.f32 0.5, %v17781_v36  ;;  %v15771_v34 = vld [vmem:[%s23730_s8 + $0x84] ss:$16 sps:$4 sm:$0xff]   ;;  %v15774_v35 = vld [vmem:[%s23730_s8 + $0x8c] ss:$16 sps:$4 sm:$0xff]  }
 0x1e9   :  { %v16908_v51 = vpop.eup %16907  ;;  %v462_v53 = vadd.f32 1.0, %v16906_v46  ;;  %v15677_v55 = vpop.f32.mrb[12].mxu1  ;;  %16919 = verf.f32 %v433_v50 }
 0x1ea   :  { %v16910_v56 = vpop.eup %16909  ;;  %759 = vmatmul.mubr.bf16.vlgmr.msra.gmra.mrb[16].mxu0 %v504_v47  ;;  %872 = vmatmul.mubr.bf16.vlgmr.msra.gmra.mrb[16].mxu1 %v504_v47  ;;  %v460_v57 = vadd.f32 1.0, %v16908_v51  ;;  %v17812_v59 = vadd.f32 %v15677_v55, %v17759_v52  ;;  %v393_v60 = vpop.f32.mrb[13].mxu1 }
 0x1eb   :  { %v16912_v63 = vpop.eup %16911  ;;  %768 = vmatprep.mubr.bf16.mxu0 %v23739_v49  ;;  %881 = vmatprep.mubr.bf16.mxu1 %v23739_v49  ;;  %v478_v0 = vmul.f32 %v462_v53, %v414_v42  ;;  %v463_v1 = vadd.f32 1.0, %v16910_v56  ;;  %v17823_v2 = vadd.f32 %v17759_v52, %v393_v60  ;;  %v15678_v3 = vpop.f32.mrb[14].mxu1  ;;  %v15772_v42 = vld [vmem:[%s23730_s8 + $0x88] ss:$16 sps:$4 sm:$0xff]  }
 0x1ec   :  { %v476_v6 = vmul.f32 %v460_v57, %v412_v48  ;;  %v461_v7 = vadd.f32 1.0, %v16912_v63  ;;  %v438_v8 = vmul.f32 0.70710677, %v17812_v59  ;;  %v396_v9 = vpop.f32.mrb[15].mxu1  ;;  %1444 = vmatpush1.bf16.msra.mxu0 %v15745_v39  ;;  %1485 = vmatpush1.bf16.msra.mxu1 %v15748_v40  ;;  %v17837_v12 = vadd.f32 %v15678_v3, %v17759_v52  ;;  %v15775_v3 = vld [vmem:[%s23730_s8 + $0xa0] ss:$16 sps:$4 sm:$0xff]  }
 0x1ed   :  { %494 = vst [vmem:[%s23732_s10 + $0x30] sm:$0xff] %v478_v0  ;;  %v479_v10 = vmul.f32 %v463_v1, %v415_v54  ;;  %v436_v11 = vmul.f32 0.70710677, %v17823_v2  ;;  %1445 = vmatprep.subr.bf16.mxu0 %v15753_v44  ;;  %1486 = vmatprep.subr.bf16.mxu1 %v15756_v45  ;;  %v17843_v14 = vadd.f32 %v17759_v52, %v396_v9  ;;  %v422_v44 = vmul.f32 0.5, %v17812_v59  ;;  %v15777_v1 = vld [vmem:[%s23730_s8 + $0xa4] ss:$16 sps:$4 sm:$0xff]  }
 0x1ee   :  { %492 = vst [vmem:[%s23732_s10 + $0x20] sm:$0xff] %v476_v6  ;;  %v477_v13 = vmul.f32 %v461_v7, %v413_v58  ;;  %16921 = verf.f32 %v438_v8  ;;  %v439_v52 = vmul.f32 0.70710677, %v17837_v12  ;;  %v420_v46 = vmul.f32 0.5, %v17823_v2  ;;  %v15780_v2 = vld [vmem:[%s23730_s8 + $0xac] ss:$16 sps:$4 sm:$0xff]  }
 0x1ef   :  { %495 = vst [vmem:[%s23732_s10 + $0x38] sm:$0xff] %v479_v10  ;;  %16923 = verf.f32 %v436_v11  ;;  %v17855_v18 = vpack.c.bf16 %v479_v10, %v478_v0  ;;  %v437_v24 = vmul.f32 0.70710677, %v17843_v14  ;;  %v423_v54 = vmul.f32 0.5, %v17837_v12  ;;  %v15781_v7 = vld [vmem:[%s23730_s8 + $0xc0] ss:$16 sps:$4 sm:$0xff]  }
 0x1f0   :  { %v16914_v22 = vpop.eup %16913  ;;  %493 = vst [vmem:[%s23732_s10 + $0x28] sm:$0xff] %v477_v13  ;;  %v506_v23 = vpack.c.bf16 %v477_v13, %v476_v6  ;;  %1446 = vmatpush1.bf16.msra.mxu0 %v15751_v61  ;;  %1487 = vmatpush1.bf16.msra.mxu1 %v15754_v62  ;;  %16925 = verf.f32 %v439_v52  ;;  %v421_v57 = vmul.f32 0.5, %v17843_v14  ;;  %v15786_v6 = vld [vmem:[%s23730_s8 + $0xcc] ss:$16 sps:$4 sm:$0xff]   ;;  %v15784_v8 = vld [vmem:[%s23730_s8 + $0xc8] ss:$16 sps:$4 sm:$0xff]  }
 0x1f1   :  { %v16916_v25 = vpop.eup %16915  ;;  %v466_v26 = vadd.f32 1.0, %v16914_v22  ;;  %1447 = vmatprep.subr.bf16.mxu0 %v15759_v4  ;;  %1488 = vmatprep.subr.bf16.mxu1 %v15762_v5  ;;  %16927 = verf.f32 %v437_v24  ;;  %v15778_v4 = vld [vmem:[%s23730_s8 + $0xa8] ss:$16 sps:$4 sm:$0xff]   ;;  %v15783_v5 = vld [vmem:[%s23730_s8 + $0xc4] ss:$16 sps:$4 sm:$0xff]  }
 0x1f2   :  { %769 = vmatmul.mubr.bf16.gmra.mrb[20].mxu0 %v17798_v41  ;;  %882 = vmatmul.mubr.bf16.gmra.mrb[20].mxu1 %v17798_v41  ;;  %v464_v28 = vadd.f32 1.0, %v16916_v25  ;;  %v16918_v31 = vpop.eup %16917  ;;  %v15769_v41 = vld [vmem:[%s23730_s8 + $0x80] ss:$16 sps:$4 sm:$0xff]   ;;  %v15789_v10 = vld [vmem:[%s23730_s8 + $0xe4] ss:$16 sps:$4 sm:$0xff]  }
 0x1f3   :  { %v482_v32 = vmul.f32 %v466_v26, %v418_v17  ;;  %778 = vmatprep.mubr.bf16.mxu0 %v23739_v49  ;;  %891 = vmatprep.mubr.bf16.mxu1 %v23739_v49  ;;  %v16920_v36 = vpop.eup %16919  ;;  %v467_v39 = vadd.f32 1.0, %v16918_v31  ;;  %v15792_v11 = vld [vmem:[%s23730_s8 + $0xec] ss:$16 sps:$4 sm:$0xff]   ;;  %v15787_v12 = vld [vmem:[%s23730_s8 + $0xe0] ss:$16 sps:$4 sm:$0xff]  }
 0x1f4   :  { %v480_v37 = vmul.f32 %v464_v28, %v416_v21  ;;  %1448 = vmatpush1.bf16.msra.mxu0 %v15757_v15  ;;  %1489 = vmatpush1.bf16.msra.mxu1 %v15760_v16  ;;  %v465_v38 = vadd.f32 1.0, %v16920_v36  ;;  %v15790_v13 = vld [vmem:[%s23730_s8 + $0xe8] ss:$16 sps:$4 sm:$0xff]   ;;  %v15795_v14 = vld [vmem:[%s23730_s8 + $0x104] ss:$16 sps:$4 sm:$0xff]  }
 0x1f5   :  { %498 = vst [vmem:[%s23732_s10 + $0x50] sm:$0xff] %v482_v32  ;;  %1449 = vmatprep.subr.bf16.mxu0 %v15765_v19  ;;  %1490 = vmatprep.subr.bf16.mxu1 %v15768_v20  ;;  %v483_v40 = vmul.f32 %v467_v39, %v419_v29  ;;  %v15798_v15 = vld [vmem:[%s23730_s8 + $0x10c] ss:$16 sps:$4 sm:$0xff]   ;;  %v15793_v16 = vld [vmem:[%s23730_s8 + $0x100] ss:$16 sps:$4 sm:$0xff]  }
 0x1f6   :  { %496 = vst [vmem:[%s23732_s10 + $0x40] sm:$0xff] %v480_v37  ;;  %v481_v43 = vmul.f32 %v465_v38, %v417_v33  ;;  %v15796_v17 = vld [vmem:[%s23730_s8 + $0x108] ss:$16 sps:$4 sm:$0xff]   ;;  %v15804_v52 = vld [vmem:[%s23730_s8 + $0x12c] ss:$16 sps:$4 sm:$0xff]  }
 0x1f7   :  { %499 = vst [vmem:[%s23732_s10 + $0x58] sm:$0xff] %v483_v40  ;;  %v509_v47 = vpack.c.bf16 %v483_v40, %v482_v32  ;;  %v15799_v19 = vld [vmem:[%s23730_s8 + $0x120] ss:$16 sps:$4 sm:$0xff]   ;;  %v15802_v20 = vld [vmem:[%s23730_s8 + $0x128] ss:$16 sps:$4 sm:$0xff]  }
 0x1f8   :  { %v16922_v45 = vpop.eup %16921  ;;  %1450 = vmatpush1.bf16.msra.mxu0 %v15763_v27  ;;  %1491 = vmatpush1.bf16.msra.mxu1 %v15766_v30  ;;  %497 = vst [vmem:[%s23732_s10 + $0x48] sm:$0xff] %v481_v43  ;;  %v508_v51 = vpack.c.bf16 %v481_v43, %v480_v37  ;;  %v15807_v22 = vld [vmem:[%s23730_s8 + $0x144] ss:$16 sps:$4 sm:$0xff]   ;;  %v15810_v21 = vld [vmem:[%s23730_s8 + $0x14c] ss:$16 sps:$4 sm:$0xff]  }
 0x1f9   :  { %v16924_v48 = vpop.eup %16923  ;;  %v470_v50 = vadd.f32 1.0, %v16922_v45  ;;  %1451 = vmatprep.subr.bf16.mxu0 %v15771_v34  ;;  %1492 = vmatprep.subr.bf16.mxu1 %v15774_v35  ;;  %v15808_v24 = vld [vmem:[%s23730_s8 + $0x148] ss:$16 sps:$4 sm:$0xff]   ;;  %v18008_v25 = vld [vmem:[%s23730_s8 + $0x164] ss:$16 sps:$4 sm:$0xff]   ;;  %v17482_v45 = vmov 0.0|0.0  }
 0x1fa   :  { %779 = vmatmul.mubr.bf16.gmra.mrb[24].mxu0 %v506_v23  ;;  %892 = vmatmul.mubr.bf16.gmra.mrb[24].mxu1 %v506_v23  ;;  %v468_v53 = vadd.f32 1.0, %v16924_v48  ;;  %v16926_v55 = vpop.eup %16925  ;;  %v15805_v23 = vld [vmem:[%s23730_s8 + $0x140] ss:$16 sps:$4 sm:$0xff]   ;;  %v18013_v26 = vld [vmem:[%s23730_s8 + $0x16c] ss:$16 sps:$4 sm:$0xff]   ;;  %v546_v48 = vlaneseq }
 0x1fb   :  { %v486_v56 = vmul.f32 %v470_v50, %v422_v44  ;;  %788 = vmatprep.mubr.bf16.mxu0 %v23739_v49  ;;  %901 = vmatprep.mubr.bf16.mxu1 %v23739_v49  ;;  %v16928_v58 = vpop.eup %16927  ;;  %v471_v60 = vadd.f32 1.0, %v16926_v55  ;;  %v18018_v28 = vld [vmem:[%s23730_s8 + $0x160] ss:$16 sps:$4 sm:$0xff]   ;;  %v18023_v29 = vld [vmem:[%s23730_s8 + $0x168] ss:$16 sps:$4 sm:$0xff]  }
 0x1fc   :  { %v484_v59 = vmul.f32 %v468_v53, %v420_v46  ;;  %1452 = vmatpush1.bf16.msra.mxu0 %v15769_v41  ;;  %1493 = vmatpush1.bf16.msra.mxu1 %v15772_v42  ;;  %v469_v61 = vadd.f32 1.0, %v16928_v58  ;;  %v18032_v27 = vld [vmem:[%s23730_s8 + $0x184] ss:$16 sps:$4 sm:$0xff]   ;;  %v18037_v30 = vld [vmem:[%s23730_s8 + $0x18c] ss:$16 sps:$4 sm:$0xff]   ;;  %v18137_v50 = vshrl.u32 %v546_v48, 7 }
 0x1fd   :  { %502 = vst [vmem:[%s23732_s10 + $0x70] sm:$0xff] %v486_v56  ;;  %v487_v62 = vmul.f32 %v471_v60, %v423_v54  ;;  %1453 = vmatprep.subr.bf16.mxu0 %v15777_v1  ;;  %1494 = vmatprep.subr.bf16.mxu1 %v15780_v2  ;;  %v18042_v31 = vld [vmem:[%s23730_s8 + $0x180] ss:$16 sps:$4 sm:$0xff]   ;;  %v18047_v32 = vld [vmem:[%s23730_s8 + $0x188] ss:$16 sps:$4 sm:$0xff]  }
 0x1fe   :  { %500 = vst [vmem:[%s23732_s10 + $0x60] sm:$0xff] %v484_v59  ;;  %v485_v63 = vmul.f32 %v469_v61, %v421_v57  ;;  %v18056_v33 = vld [vmem:[%s23730_s8 + $0x1a0] ss:$16 sps:$4 sm:$0xff]   ;;  %v18061_v34 = vld [vmem:[%s23730_s8 + $0x1a4] ss:$16 sps:$4 sm:$0xff]   ;;  %v18145_v53 = vsub.s32 0, %v18137_v50 }
 0x1ff   :  { %503 = vst [vmem:[%s23732_s10 + $0x78] sm:$0xff] %v487_v62  ;;  %v511_v9 = vpack.c.bf16 %v487_v62, %v486_v56  ;;  %v18066_v35 = vld [vmem:[%s23730_s8 + $0x1a8] ss:$16 sps:$4 sm:$0xff]   ;;  %v18071_v36 = vld [vmem:[%s23730_s8 + $0x1ac] ss:$16 sps:$4 sm:$0xff]   ;;  %v18152_v55 = vsub.s32 2, %v18137_v50 }
 0x200   :  { %501 = vst [vmem:[%s23732_s10 + $0x68] sm:$0xff] %v485_v63  ;;  %v510_v0 = vpack.c.bf16 %v485_v63, %v484_v59  ;;  %1454 = vmatpush1.bf16.msra.mxu0 %v15775_v3  ;;  %1495 = vmatpush1.bf16.msra.mxu1 %v15778_v4  ;;  %v18076_v37 = vld [vmem:[%s23730_s8 + $0x1c4] ss:$16 sps:$4 sm:$0xff]   ;;  %v18082_v39 = vld [vmem:[%s23730_s8 + $0x1cc] ss:$16 sps:$4 sm:$0xff]   ;;  %24051 = vst [vmem:[#allocation3_spill] sm:$0xff] %v18145_v53 }
 0x201   :  { %1455 = vmatprep.subr.bf16.mxu0 %v15783_v5  ;;  %1496 = vmatprep.subr.bf16.mxu1 %v15786_v6  ;;  %v18088_v38 = vld [vmem:[%s23730_s8 + $0x1c0] ss:$16 sps:$4 sm:$0xff]   ;;  %v18093_v40 = vld [vmem:[%s23730_s8 + $0x1c8] ss:$16 sps:$4 sm:$0xff]   ;;  %v18100_v41 = vld [vmem:[%s23730_s8 + $0x1e4] ss:$16 sps:$4 sm:$0xff]  }
 0x202   :  { %789 = vmatmul.mubr.bf16.gmra.mrb[28].mxu0 %v17855_v18  ;;  %902 = vmatmul.mubr.bf16.gmra.mrb[28].mxu1 %v17855_v18  ;;  %v15801_v18 = vld [vmem:[%s23730_s8 + $0x124] ss:$16 sps:$4 sm:$0xff]   ;;  %v18107_v42 = vld [vmem:[%s23730_s8 + $0x1ec] ss:$16 sps:$4 sm:$0xff]   ;;  %v18112_v43 = vld [vmem:[%s23730_s8 + $0x1e0] ss:$16 sps:$4 sm:$0xff]  }
 0x203   :  { %798 = vmatprep.mubr.bf16.mxu0 %v23739_v49  ;;  %911 = vmatprep.mubr.bf16.mxu1 %v23739_v49  ;;  %v18117_v44 = vld [vmem:[%s23730_s8 + $0x1e8] ss:$16 sps:$4 sm:$0xff]   ;;  %v18122_v46 = vld [vmem:[%s23733_s6 + $0x4] ss:$16 sps:$4 sm:$0xff]   ;;  %v18169_v4 = vsub.s32 3, %v18137_v50 }
 0x204   :  { %1456 = vmatpush1.bf16.msra.mxu0 %v15781_v7  ;;  %1497 = vmatpush1.bf16.msra.mxu1 %v15784_v8 }
 0x205   :  { %1457 = vmatprep.subr.bf16.mxu0 %v15789_v10  ;;  %1498 = vmatprep.subr.bf16.mxu1 %v15792_v11 }
 0x208   :  { %1458 = vmatpush1.bf16.msra.mxu0 %v15787_v12  ;;  %1499 = vmatpush1.bf16.msra.mxu1 %v15790_v13 }
 0x209   :  { %1459 = vmatprep.subr.bf16.mxu0 %v15795_v14  ;;  %1500 = vmatprep.subr.bf16.mxu1 %v15798_v15 }
 0x20a   :  { %799 = vmatmul.mubr.bf16.gmra.mrb[32].mxu0 %v508_v51  ;;  %912 = vmatmul.mubr.bf16.gmra.mrb[32].mxu1 %v508_v51  ;;  %v18142_v51 = vld [vmem:[%s23734_s7] sm:$0xf] }
 0x20b   :  { %808 = vmatprep.mubr.bf16.mxu0 %v23739_v49  ;;  %921 = vmatprep.mubr.bf16.mxu1 %v23739_v49  ;;  %v18149_v54 = vrot.slane %v18142_v51, %v18145_v53  ;;  %v18157_v59 = vrot.slane %v18142_v51, %v18152_v55  ;;  %v18177_v8 = vrot.slane %v18142_v51, %v18169_v4 }
 0x20c   :  { %1460 = vmatpush1.bf16.msra.mxu0 %v15793_v16  ;;  %1501 = vmatpush1.bf16.msra.mxu1 %v15796_v17 }
 0x20d   :  { %1461 = vmatprep.subr.bf16.mxu0 %v15801_v18  ;;  %1502 = vmatprep.subr.bf16.mxu1 %v15804_v52 }
 0x210   :  { %1462 = vmatpush1.bf16.msra.mxu0 %v15799_v19  ;;  %1503 = vmatpush1.bf16.msra.mxu1 %v15802_v20 }
 0x211   :  { %1463 = vmatprep.subr.bf16.mxu0 %v15807_v22  ;;  %1504 = vmatprep.subr.bf16.mxu1 %v15810_v21 }
 0x212   :  { %809 = vmatmul.mubr.bf16.gmra.mrb[36].mxu0 %v509_v47  ;;  %922 = vmatmul.mubr.bf16.gmra.mrb[36].mxu1 %v509_v47  ;;  %v18127_v47 = vld [vmem:[%s23733_s6 + $0xc] ss:$16 sps:$4 sm:$0xff]  }
 0x213   :  { %818 = vmatprep.mubr.bf16.mxu0 %v23739_v49  ;;  %931 = vmatprep.mubr.bf16.mxu1 %v23739_v49 }
 0x214   :  { %1464 = vmatpush1.bf16.msra.mxu0 %v15805_v23  ;;  %1505 = vmatpush1.bf16.msra.mxu1 %v15808_v24 }
 0x215   :  { %1465 = vmatprep.subr.bf16.mxu0 %v18008_v25  ;;  %1506 = vmatprep.subr.bf16.mxu1 %v18013_v26 }
 0x218   :  { %1466 = vmatpush1.bf16.msra.mxu0 %v18018_v28  ;;  %1507 = vmatpush1.bf16.msra.mxu1 %v18023_v29 }
 0x219   :  { %1467 = vmatprep.subr.bf16.mxu0 %v18032_v27  ;;  %1508 = vmatprep.subr.bf16.mxu1 %v18037_v30 }
 0x21a   :  { %819 = vmatmul.mubr.bf16.gmra.mrb[40].mxu0 %v510_v0  ;;  %932 = vmatmul.mubr.bf16.gmra.mrb[40].mxu1 %v510_v0 }
 0x21b   :  { %828 = vmatprep.mubr.bf16.mxu0 %v23739_v49  ;;  %941 = vmatprep.mubr.bf16.mxu1 %v23739_v49 }
 0x21c   :  { %1468 = vmatpush1.bf16.msra.mxu0 %v18042_v31  ;;  %1509 = vmatpush1.bf16.msra.mxu1 %v18047_v32 }
 0x21d   :  { %1469 = vmatprep.subr.bf16.mxu0 %v18061_v34  ;;  %1510 = vmatprep.subr.bf16.mxu1 %v18071_v36 }
 0x220   :  { %1470 = vmatpush1.bf16.msra.mxu0 %v18056_v33  ;;  %1511 = vmatpush1.bf16.msra.mxu1 %v18066_v35 }
 0x221   :  { %1471 = vmatprep.subr.bf16.mxu0 %v18076_v37  ;;  %1512 = vmatprep.subr.bf16.mxu1 %v18082_v39 }
 0x222   :  { %829 = vmatmul.mubr.bf16.gmra.mrb[44].mxu0 %v511_v9  ;;  %942 = vmatmul.mubr.bf16.gmra.mrb[44].mxu1 %v511_v9 }
 0x223   :  { %1475 = vmatprep.mubr.bf16.mxu0 %v17482_v45  ;;  %1516 = vmatprep.mubr.bf16.mxu1 %v17482_v45 }
 0x224   :  { %1472 = vmatpush1.bf16.msra.mxu0 %v18088_v38  ;;  %1513 = vmatpush1.bf16.msra.mxu1 %v18093_v40 }
 0x225   :  { %1473 = vmatprep.subr.bf16.mxu0 %v18100_v41  ;;  %1514 = vmatprep.subr.bf16.mxu1 %v18107_v42 }
 0x228   :  { %1474 = vmatpush1.bf16.msra.mxu0 %v18112_v43  ;;  %1515 = vmatpush1.bf16.msra.mxu1 %v18117_v44 }
 0x229   :  { %1722 = vmatprep.subr.bf16.mxu0 %v18122_v46  ;;  %1763 = vmatprep.subr.bf16.mxu1 %v18127_v47 }
 0x2bd   :  { %v760_v56 = vpop.f32.mrb[16].mxu0  ;;  %v873_v57 = vpop.f32.mrb[16].mxu1 }
 0x2be   :  { %v761_v58 = vadd.f32 %v760_v56, %v18149_v54  ;;  %v762_v60 = vpop.f32.mrb[17].mxu0  ;;  %v875_v61 = vpop.f32.mrb[17].mxu1  ;;  %v874_v3 = vadd.f32 %v873_v57, %v18157_v59 }
 0x2bf   :  { %v18159_v62 = vpop.f32.mrb[18].mxu0  ;;  %v18161_v63 = vpop.f32.mrb[18].mxu1  ;;  %v876_v15 = vadd.f32 %v875_v61, %v18177_v8 }
 0x2c0   :  { %v13967_v0 = vmul.f32 -1.442695, %v761_v58  ;;  %v18163_v1 = vpop.f32.mrb[19].mxu0  ;;  %v18165_v2 = vpop.f32.mrb[19].mxu1  ;;  %v13968_v7 = vmul.f32 -1.442695, %v874_v3 }
 0x2c2   :  { %16929 = vpow2.f32 %v13967_v0 }
 0x2c3   :  { %16931 = vpow2.f32 %v13968_v7 }
 0x2c4   :  { %16933 = vtanh.f32 %v876_v15 }
 0x2c5   :  { %v18171_v5 = vpop.f32.mrb[20].mxu0  ;;  %v18173_v6 = vpop.f32.mrb[20].mxu1 }
 0x2c6   :  { %24052 = vst [vmem:[#allocation4_spill] sm:$0xff] %v18171_v5  ;;  %24053 = vst [vmem:[#allocation5_spill] sm:$0xff] %v18173_v6  ;;  %v18179_v9 = vpop.f32.mrb[21].mxu0  ;;  %v18181_v10 = vpop.f32.mrb[21].mxu1  ;;  %v18431_v6 = vld [vmem:[%s23733_s6 + $0xc8] ss:$16 sps:$4 sm:$0xff]  }
 0x2c7   :  { %24054 = vst [vmem:[#allocation6_spill] sm:$0xff] %v18179_v9  ;;  %24055 = vst [vmem:[#allocation7_spill] sm:$0xff] %v18181_v10  ;;  %v18183_v11 = vpop.f32.mrb[22].mxu0  ;;  %v18185_v12 = vpop.f32.mrb[22].mxu1  ;;  %v18419_v10 = vld [vmem:[%s23733_s6 + $0xcc] ss:$16 sps:$4 sm:$0xff]  }
 0x2c8   :  { %24056 = vst [vmem:[#allocation8_spill] sm:$0xff] %v18183_v11  ;;  %24057 = vst [vmem:[#allocation9_spill] sm:$0xff] %v18185_v12  ;;  %v18187_v13 = vpop.f32.mrb[23].mxu0  ;;  %v18189_v14 = vpop.f32.mrb[23].mxu1  ;;  %v18407_v12 = vld [vmem:[%s23733_s6 + $0xa8] ss:$16 sps:$4 sm:$0xff]  }
 0x2c9   :  { %24058 = vst [vmem:[#allocation10_spill] sm:$0xff] %v18187_v13  ;;  %24059 = vst [vmem:[#allocation11_spill] sm:$0xff] %v18189_v14  ;;  %v18395_v14 = vld [vmem:[%s23733_s6 + $0xac] ss:$16 sps:$4 sm:$0xff]   ;;  %v18402_v13 = vld [vmem:[%s23733_s6 + $0xa0] ss:$16 sps:$4 sm:$0xff]  }
 0x2ca   :  { %24101 = vst [vmem:[#allocation52_spill] sm:$0xff] %v18402_v13  ;;  %24102 = vst [vmem:[#allocation53_spill] sm:$0xff] %v18407_v12  ;;  %v18414_v11 = vld [vmem:[%s23733_s6 + $0xc4] ss:$16 sps:$4 sm:$0xff]   ;;  %v18426_v9 = vld [vmem:[%s23733_s6 + $0xc0] ss:$16 sps:$4 sm:$0xff]  }
 0x2cb   :  { %24103 = vst [vmem:[#allocation54_spill] sm:$0xff] %v18414_v11  ;;  %24104 = vst [vmem:[#allocation55_spill] sm:$0xff] %v18419_v10  ;;  %v18438_v5 = vld [vmem:[%s23733_s6 + $0xe4] ss:$16 sps:$4 sm:$0xff]  }
 0x2cc   :  { %v16930_v16 = vpop.eup %16929  ;;  %24105 = vst [vmem:[#allocation56_spill] sm:$0xff] %v18426_v9  ;;  %24106 = vst [vmem:[#allocation57_spill] sm:$0xff] %v18431_v6 }
 0x2cd   :  { %v1025_v17 = vadd.f32 1.0, %v16930_v16  ;;  %v18192_v18 = vpop.f32.mrb[24].mxu0  ;;  %v18194_v52 = vpop.f32.mrb[24].mxu1  ;;  %24107 = vst [vmem:[#allocation58_spill] sm:$0xff] %v18438_v5 }
 0x2ce   :  { %24060 = vst [vmem:[#allocation12_spill] sm:$0xff] %v18192_v18  ;;  %24061 = vst [vmem:[#allocation13_spill] sm:$0xff] %v18194_v52  ;;  %v18196_v19 = vpop.f32.mrb[25].mxu0  ;;  %v18198_v20 = vpop.f32.mrb[25].mxu1  ;;  %v18383_v52 = vld [vmem:[%s23733_s6 + $0x88] ss:$16 sps:$4 sm:$0xff]  }
 0x2cf   :  { %24062 = vst [vmem:[#allocation14_spill] sm:$0xff] %v18196_v19  ;;  %24063 = vst [vmem:[#allocation15_spill] sm:$0xff] %v18198_v20  ;;  %16935 = vrcp.f32 %v1025_v17  ;;  %v18200_v22 = vpop.f32.mrb[26].mxu0  ;;  %v18202_v21 = vpop.f32.mrb[26].mxu1  ;;  %v18371_v20 = vld [vmem:[%s23733_s6 + $0x8c] ss:$16 sps:$4 sm:$0xff]  }
 0x2d0   :  { %24064 = vst [vmem:[#allocation16_spill] sm:$0xff] %v18200_v22  ;;  %24065 = vst [vmem:[#allocation17_spill] sm:$0xff] %v18202_v21  ;;  %v18204_v23 = vpop.f32.mrb[27].mxu0  ;;  %v18206_v24 = vpop.f32.mrb[27].mxu1  ;;  %v18366_v22 = vld [vmem:[%s23733_s6 + $0x84] ss:$16 sps:$4 sm:$0xff]  }
 0x2d1   :  { %24066 = vst [vmem:[#allocation18_spill] sm:$0xff] %v18204_v23  ;;  %24067 = vst [vmem:[#allocation19_spill] sm:$0xff] %v18206_v24  ;;  %v16932_v45 = vpop.eup %16931  ;;  %v18378_v19 = vld [vmem:[%s23733_s6 + $0x80] ss:$16 sps:$4 sm:$0xff]   ;;  %v18390_v18 = vld [vmem:[%s23733_s6 + $0xa4] ss:$16 sps:$4 sm:$0xff]  }
 0x2d2   :  { %v1026_v60 = vadd.f32 1.0, %v16932_v45  ;;  %v16934_v3 = vpop.eup %16933 }
 0x2d4   :  { %16937 = vrcp.f32 %v1026_v60 }
 0x2d5   :  { %v18208_v48 = vpop.f32.mrb[28].mxu0  ;;  %v18210_v56 = vpop.f32.mrb[28].mxu1 }
 0x2d6   :  { %24068 = vst [vmem:[#allocation20_spill] sm:$0xff] %v18208_v48  ;;  %24069 = vst [vmem:[#allocation21_spill] sm:$0xff] %v18210_v56  ;;  %v18212_v57 = vpop.f32.mrb[29].mxu0  ;;  %v18214_v58 = vpop.f32.mrb[29].mxu1 }
 0x2d7   :  { %24070 = vst [vmem:[#allocation22_spill] sm:$0xff] %v18212_v57  ;;  %24071 = vst [vmem:[#allocation23_spill] sm:$0xff] %v18214_v58  ;;  %v18216_v61 = vpop.f32.mrb[30].mxu0  ;;  %v18218_v0 = vpop.f32.mrb[30].mxu1 }
 0x2d8   :  { %24072 = vst [vmem:[#allocation24_spill] sm:$0xff] %v18216_v61  ;;  %24073 = vst [vmem:[#allocation25_spill] sm:$0xff] %v18218_v0  ;;  %v18220_v7 = vpop.f32.mrb[31].mxu0  ;;  %v18222_v15 = vpop.f32.mrb[31].mxu1 }
 0x2d9   :  { %24074 = vst [vmem:[#allocation26_spill] sm:$0xff] %v18220_v7  ;;  %24075 = vst [vmem:[#allocation27_spill] sm:$0xff] %v18222_v15  ;;  %v16936_v16 = vpop.eup %16935 }
 0x2da   :  { %v18224_v17 = vmul.f32 %v16936_v16, %v16934_v3 }
 0x2dc   :  { %16939 = vtanh.f32 %v18224_v17 }
 0x2dd   :  { %v18227_v49 = vpop.f32.mrb[32].mxu0  ;;  %v18229_v57 = vpop.f32.mrb[32].mxu1 }
 0x2de   :  { %24076 = vst [vmem:[#allocation28_spill] sm:$0xff] %v18227_v49  ;;  %24077 = vst [vmem:[#allocation29_spill] sm:$0xff] %v18229_v57  ;;  %v18231_v45 = vpop.f32.mrb[33].mxu0  ;;  %v18233_v61 = vpop.f32.mrb[33].mxu1 }
 0x2df   :  { %24078 = vst [vmem:[#allocation30_spill] sm:$0xff] %v18231_v45  ;;  %24079 = vst [vmem:[#allocation31_spill] sm:$0xff] %v18233_v61  ;;  %v18235_v0 = vpop.f32.mrb[34].mxu0  ;;  %v18237_v58 = vpop.f32.mrb[34].mxu1 }
 0x2e0   :  { %24080 = vst [vmem:[#allocation32_spill] sm:$0xff] %v18235_v0  ;;  %24081 = vst [vmem:[#allocation33_spill] sm:$0xff] %v18237_v58  ;;  %v18239_v7 = vpop.f32.mrb[35].mxu0  ;;  %v18241_v15 = vpop.f32.mrb[35].mxu1  ;;  %v24094_v58 = vmov 0  }
 0x2e1   :  { %24082 = vst [vmem:[#allocation34_spill] sm:$0xff] %v18239_v7  ;;  %24083 = vst [vmem:[#allocation35_spill] sm:$0xff] %v18241_v15  ;;  %v16938_v3 = vpop.eup %16937  ;;  %v18258_v7 = vld [vmem:[%s23733_s6] ss:$16 sps:$4 sm:$0xff]  }
 0x2e5   :  { %v18243_v60 = vpop.f32.mrb[36].mxu0  ;;  %v18245_v16 = vpop.f32.mrb[36].mxu1 }
 0x2e6   :  { %24084 = vst [vmem:[#allocation36_spill] sm:$0xff] %v18243_v60  ;;  %24085 = vst [vmem:[#allocation37_spill] sm:$0xff] %v18245_v16  ;;  %v16940_v49 = vpop.eup %16939  ;;  %v18247_v56 = vpop.f32.mrb[37].mxu0  ;;  %v18263_v60 = vld [vmem:[%s23733_s6 + $0x8] ss:$16 sps:$4 sm:$0xff]  }
 0x2e7   :  { %24086 = vst [vmem:[#allocation38_spill] sm:$0xff] %v18247_v56  ;;  %v18249_v57 = vpop.f32.mrb[37].mxu1  ;;  %v1034_v45 = vmul.f32 %v16940_v49, %v16938_v3  ;;  %v18251_v61 = vpop.f32.mrb[38].mxu0  ;;  %v18274_v49 = vld [vmem:[%s23733_s6 + $0x24] ss:$16 sps:$4 sm:$0xff]  }
 0x2e8   :  { %24087 = vst [vmem:[#allocation39_spill] sm:$0xff] %v18249_v57  ;;  %24088 = vst [vmem:[#allocation40_spill] sm:$0xff] %v18251_v61  ;;  %v18253_v0 = vpop.f32.mrb[38].mxu1  ;;  %v18265_v16 = vpop.f32.mrb[39].mxu0  ;;  %v18279_v3 = vld [vmem:[%s23733_s6 + $0x2c] ss:$16 sps:$4 sm:$0xff]  }
 0x2e9   :  { %24089 = vst [vmem:[#allocation41_spill] sm:$0xff] %v18253_v0  ;;  %24090 = vst [vmem:[#allocation42_spill] sm:$0xff] %v18265_v16  ;;  %v18267_v56 = vpop.f32.mrb[39].mxu1  ;;  %v18269_v57 = vpack.c.bf16 %v1034_v45, %v1034_v45  ;;  %v18288_v45 = vld [vmem:[%s23733_s6 + $0x20] ss:$16 sps:$4 sm:$0xff]  }
 0x2ea   :  { %24091 = vst [vmem:[#allocation43_spill] sm:$0xff] %v18267_v56  ;;  %v18293_v56 = vld [vmem:[%s23733_s6 + $0x28] ss:$16 sps:$4 sm:$0xff]   ;;  %v18300_v16 = vld [vmem:[%s23733_s6 + $0x44] ss:$16 sps:$4 sm:$0xff]  }
 0x2eb   :  { %1476 = vmatmul.mubr.bf16.vlgmr.msra.gmra.mrb[48].mxu0 %v18269_v57  ;;  %1517 = vmatmul.mubr.bf16.vlgmr.msra.gmra.mrb[48].mxu1 %v18269_v57  ;;  %v18305_v0 = vld [vmem:[%s23733_s6 + $0x4c] ss:$16 sps:$4 sm:$0xff]  }
 0x2ec   :  { %1723 = vmatpush1.bf16.msra.mxu0 %v18258_v7  ;;  %1764 = vmatpush1.bf16.msra.mxu1 %v18263_v60 }
 0x2ed   :  { %1724 = vmatprep.subr.bf16.mxu0 %v18274_v49  ;;  %1765 = vmatprep.subr.bf16.mxu1 %v18279_v3  ;;  %v18307_v61 = vpop.f32.mrb[40].mxu0  ;;  %v18309_v15 = vpop.f32.mrb[40].mxu1 }
 0x2ee   :  { %24092 = vst [vmem:[#allocation44_spill] sm:$0xff] %v18307_v61  ;;  %24093 = vst [vmem:[#allocation45_spill] sm:$0xff] %v18309_v15  ;;  %1754 = vmatprep.mubr.bf16.mxu0 %v24094_v58  ;;  %1795 = vmatprep.mubr.bf16.mxu1 %v24094_v58  ;;  %v18313_v48 = vpop.f32.mrb[41].mxu0  ;;  %v18315_v24 = vpop.f32.mrb[41].mxu1  ;;  %v18326_v15 = vld [vmem:[%s23733_s6 + $0x40] ss:$16 sps:$4 sm:$0xff]  }
 0x2ef   :  { %24095 = vst [vmem:[#allocation46_spill] sm:$0xff] %v18313_v48  ;;  %24096 = vst [vmem:[#allocation47_spill] sm:$0xff] %v18315_v24  ;;  %v18317_v23 = vpop.f32.mrb[42].mxu0  ;;  %v18319_v21 = vpop.f32.mrb[42].mxu1  ;;  %v18331_v61 = vld [vmem:[%s23733_s6 + $0x48] ss:$16 sps:$4 sm:$0xff]  }
 0x2f0   :  { %24097 = vst [vmem:[#allocation48_spill] sm:$0xff] %v18317_v23  ;;  %24098 = vst [vmem:[#allocation49_spill] sm:$0xff] %v18319_v21  ;;  %1725 = vmatpush1.bf16.msra.mxu0 %v18288_v45  ;;  %1766 = vmatpush1.bf16.msra.mxu1 %v18293_v56  ;;  %v18333_v48 = vpop.f32.mrb[43].mxu0  ;;  %v18335_v24 = vpop.f32.mrb[43].mxu1  ;;  %v18342_v21 = vld [vmem:[%s23733_s6 + $0x64] ss:$16 sps:$4 sm:$0xff]  }
 0x2f1   :  { %24099 = vst [vmem:[#allocation50_spill] sm:$0xff] %v18333_v48  ;;  %24100 = vst [vmem:[#allocation51_spill] sm:$0xff] %v18335_v24  ;;  %1726 = vmatprep.subr.bf16.mxu0 %v18300_v16  ;;  %1767 = vmatprep.subr.bf16.mxu1 %v18305_v0  ;;  %v18347_v23 = vld [vmem:[%s23733_s6 + $0x6c] ss:$16 sps:$4 sm:$0xff]   ;;  %v18354_v24 = vld [vmem:[%s23733_s6 + $0x60] ss:$16 sps:$4 sm:$0xff]  }
 0x2f2   :  { %v18359_v48 = vld [vmem:[%s23733_s6 + $0x68] ss:$16 sps:$4 sm:$0xff]  }
 0x2f4   :  { %1727 = vmatpush1.bf16.msra.mxu0 %v18326_v15  ;;  %1768 = vmatpush1.bf16.msra.mxu1 %v18331_v61 }
 0x2f5   :  { %1728 = vmatprep.subr.bf16.mxu0 %v18342_v21  ;;  %1769 = vmatprep.subr.bf16.mxu1 %v18347_v23 }
 0x2f8   :  { %1729 = vmatpush1.bf16.msra.mxu0 %v18354_v24  ;;  %1770 = vmatpush1.bf16.msra.mxu1 %v18359_v48 }
 0x2f9   :  { %1730 = vmatprep.subr.bf16.mxu0 %v18366_v22  ;;  %1771 = vmatprep.subr.bf16.mxu1 %v18371_v20 }
 0x2fc   :  { %1731 = vmatpush1.bf16.msra.mxu0 %v18378_v19  ;;  %1772 = vmatpush1.bf16.msra.mxu1 %v18383_v52 }
 0x2fd   :  { %1732 = vmatprep.subr.bf16.mxu0 %v18390_v18  ;;  %1773 = vmatprep.subr.bf16.mxu1 %v18395_v14 }
 0x300   :  { %1733 = vmatpush1.bf16.msra.mxu0 %v18402_v13  ;;  %1774 = vmatpush1.bf16.msra.mxu1 %v18407_v12  ;;  %v18443_v12 = vld [vmem:[%s23733_s6 + $0xec] ss:$16 sps:$4 sm:$0xff]  }
 0x301   :  { %1734 = vmatprep.subr.bf16.mxu0 %v18414_v11  ;;  %1775 = vmatprep.subr.bf16.mxu1 %v18419_v10  ;;  %24108 = vst [vmem:[#allocation59_spill] sm:$0xff] %v18443_v12  ;;  %v18450_v11 = vld [vmem:[%s23733_s6 + $0xe0] ss:$16 sps:$4 sm:$0xff]   ;;  %v18455_v10 = vld [vmem:[%s23733_s6 + $0xe8] ss:$16 sps:$4 sm:$0xff]  }
 0x302   :  { %24109 = vst [vmem:[#allocation60_spill] sm:$0xff] %v18450_v11  ;;  %24110 = vst [vmem:[#allocation61_spill] sm:$0xff] %v18455_v10 }
 0x304   :  { %1735 = vmatpush1.bf16.msra.mxu0 %v18426_v9  ;;  %1776 = vmatpush1.bf16.msra.mxu1 %v18431_v6  ;;  %v17437_v6 = vld [vmem:[%s23730_s8 + $0x4] ss:$16 sps:$4 sm:$0xff]   ;;  %v17438_v9 = vld [vmem:[%s23730_s8 + $0xc] ss:$16 sps:$4 sm:$0xff]  }
 0x305   :  { %1736 = vmatprep.subr.bf16.mxu0 %v18438_v5  ;;  %1777 = vmatprep.subr.bf16.mxu1 %v18443_v12  ;;  %v18507_v12 = vpop.f32.mrb[44].mxu1 }
 0x306   :  { %24112 = vst [vmem:[#allocation63_spill] sm:$0xff] %v18507_v12  ;;  %v18517_v5 = vpop.f32.mrb[45].mxu1  ;;  %v17454_v12 = vld [vmem:[%s23730_s8 + $0x8c] ss:$16 sps:$4 sm:$0xff]  }
 0x307   :  { %24114 = vst [vmem:[#allocation65_spill] sm:$0xff] %v18517_v5  ;;  %v17455_v5 = vld [vmem:[%s23730_s8 + $0x80] ss:$16 sps:$4 sm:$0xff]  }
 0x308   :  { %1737 = vmatpush1.bf16.msra.mxu0 %v18450_v11  ;;  %1778 = vmatpush1.bf16.msra.mxu1 %v18455_v10  ;;  %v17439_v11 = vld [vmem:[%s23730_s8] ss:$16 sps:$4 sm:$0xff]   ;;  %v17440_v10 = vld [vmem:[%s23730_s8 + $0x8] ss:$16 sps:$4 sm:$0xff]  }
 0x309   :  { %2265 = vmatprep.subr.bf16.mxu0 %v17437_v6  ;;  %2306 = vmatprep.subr.bf16.mxu1 %v17438_v9  ;;  %v17441_v6 = vld [vmem:[%s23730_s8 + $0x24] ss:$16 sps:$4 sm:$0xff]   ;;  %v17442_v9 = vld [vmem:[%s23730_s8 + $0x2c] ss:$16 sps:$4 sm:$0xff]  }
 0x30b   :  { %1755 = vmatmul.mubr.bf16.vlgmr.msra.gmra.mrb[52].mxu0 %v18269_v57  ;;  %1796 = vmatmul.mubr.bf16.vlgmr.msra.gmra.mrb[52].mxu1 %v18269_v57  ;;  %v17443_v57 = vld [vmem:[%s23730_s8 + $0x20] ss:$16 sps:$4 sm:$0xff]  }
 0x30c   :  { %2266 = vmatpush1.bf16.msra.mxu0 %v17439_v11  ;;  %2307 = vmatpush1.bf16.msra.mxu1 %v17440_v10  ;;  %v17444_v11 = vld [vmem:[%s23730_s8 + $0x28] ss:$16 sps:$4 sm:$0xff]   ;;  %v17445_v10 = vld [vmem:[%s23730_s8 + $0x44] ss:$16 sps:$4 sm:$0xff]  }
 0x30d   :  { %2267 = vmatprep.subr.bf16.mxu0 %v17441_v6  ;;  %2308 = vmatprep.subr.bf16.mxu1 %v17442_v9  ;;  %v17446_v6 = vld [vmem:[%s23730_s8 + $0x4c] ss:$16 sps:$4 sm:$0xff]   ;;  %v17447_v9 = vld [vmem:[%s23730_s8 + $0x40] ss:$16 sps:$4 sm:$0xff]  }
 0x310   :  { %2268 = vmatpush1.bf16.msra.mxu0 %v17443_v57  ;;  %2309 = vmatpush1.bf16.msra.mxu1 %v17444_v11  ;;  %v17448_v57 = vld [vmem:[%s23730_s8 + $0x48] ss:$16 sps:$4 sm:$0xff]   ;;  %v17449_v11 = vld [vmem:[%s23730_s8 + $0x64] ss:$16 sps:$4 sm:$0xff]  }
 0x311   :  { %2269 = vmatprep.subr.bf16.mxu0 %v17445_v10  ;;  %2310 = vmatprep.subr.bf16.mxu1 %v17446_v6  ;;  %v17450_v10 = vld [vmem:[%s23730_s8 + $0x6c] ss:$16 sps:$4 sm:$0xff]   ;;  %v18505_v6 = vpop.f32.mrb[44].mxu0 }
 0x312   :  { %24111 = vst [vmem:[#allocation62_spill] sm:$0xff] %v18505_v6  ;;  %v18527_v6 = vpop.f32.mrb[46].mxu1 }
 0x313   :  { %24116 = vst [vmem:[#allocation67_spill] sm:$0xff] %v18527_v6  ;;  %v18998_v6 = vld [vmem:[%s23730_s8 + $0x180] ss:$16 sps:$4 sm:$0xff]  }
 0x314   :  { %2270 = vmatpush1.bf16.msra.mxu0 %v17447_v9  ;;  %2311 = vmatpush1.bf16.msra.mxu1 %v17448_v57  ;;  %v17451_v9 = vld [vmem:[%s23730_s8 + $0x60] ss:$16 sps:$4 sm:$0xff]   ;;  %v17452_v57 = vld [vmem:[%s23730_s8 + $0x68] ss:$16 sps:$4 sm:$0xff]   ;;  %24147 = vst [vmem:[#allocation78_spill] sm:$0xff] %v18998_v6 }
 0x315   :  { %2271 = vmatprep.subr.bf16.mxu0 %v17449_v11  ;;  %2312 = vmatprep.subr.bf16.mxu1 %v17450_v10  ;;  %v18515_v11 = vpop.f32.mrb[45].mxu0  ;;  %v17453_v10 = vld [vmem:[%s23730_s8 + $0x84] ss:$16 sps:$4 sm:$0xff]  }
 0x316   :  { %24113 = vst [vmem:[#allocation64_spill] sm:$0xff] %v18515_v11  ;;  %v19012_v11 = vld [vmem:[%s23730_s8 + $0x1a0] ss:$16 sps:$4 sm:$0xff]  }
 0x317   :  { %24149 = vst [vmem:[#allocation80_spill] sm:$0xff] %v19012_v11 }
 0x318   :  { %2272 = vmatpush1.bf16.msra.mxu0 %v17451_v9  ;;  %2313 = vmatpush1.bf16.msra.mxu1 %v17452_v57  ;;  %v18525_v9 = vpop.f32.mrb[46].mxu0  ;;  %v18531_v57 = vpop.f32.mrb[47].mxu1 }
 0x319   :  { %2273 = vmatprep.subr.bf16.mxu0 %v17453_v10  ;;  %2314 = vmatprep.subr.bf16.mxu1 %v17454_v12  ;;  %24115 = vst [vmem:[#allocation66_spill] sm:$0xff] %v18525_v9  ;;  %v18529_v13 = vpop.f32.mrb[47].mxu0  ;;  %24118 = vst [vmem:[#allocation69_spill] sm:$0xff] %v18531_v57  ;;  %v17456_v10 = vld [vmem:[%s23730_s8 + $0x88] ss:$16 sps:$4 sm:$0xff]  }
 0x31a   :  { %24117 = vst [vmem:[#allocation68_spill] sm:$0xff] %v18529_v13  ;;  %v17457_v12 = vld [vmem:[%s23730_s8 + $0xa4] ss:$16 sps:$4 sm:$0xff]   ;;  %v17458_v13 = vld [vmem:[%s23730_s8 + $0xac] ss:$16 sps:$4 sm:$0xff]  }
 0x31b   :  { %v17459_v57 = vld [vmem:[%s23730_s8 + $0xa0] ss:$16 sps:$4 sm:$0xff]   ;;  %v19003_v9 = vld [vmem:[%s23730_s8 + $0x188] ss:$16 sps:$4 sm:$0xff]  }
 0x31c   :  { %2274 = vmatpush1.bf16.msra.mxu0 %v17455_v5  ;;  %2315 = vmatpush1.bf16.msra.mxu1 %v17456_v10  ;;  %v17460_v5 = vld [vmem:[%s23730_s8 + $0xa8] ss:$16 sps:$4 sm:$0xff]   ;;  %v17461_v10 = vld [vmem:[%s23730_s8 + $0xc4] ss:$16 sps:$4 sm:$0xff]   ;;  %24148 = vst [vmem:[#allocation79_spill] sm:$0xff] %v19003_v9 }
 0x31d   :  { %2275 = vmatprep.subr.bf16.mxu0 %v17457_v12  ;;  %2316 = vmatprep.subr.bf16.mxu1 %v17458_v13  ;;  %v17462_v12 = vld [vmem:[%s23730_s8 + $0xcc] ss:$16 sps:$4 sm:$0xff]   ;;  %v17463_v13 = vld [vmem:[%s23730_s8 + $0xc0] ss:$16 sps:$4 sm:$0xff]  }
 0x320   :  { %2276 = vmatpush1.bf16.msra.mxu0 %v17459_v57  ;;  %2317 = vmatpush1.bf16.msra.mxu1 %v17460_v5  ;;  %v17464_v57 = vld [vmem:[%s23730_s8 + $0xc8] ss:$16 sps:$4 sm:$0xff]   ;;  %v17465_v5 = vld [vmem:[%s23730_s8 + $0xe4] ss:$16 sps:$4 sm:$0xff]  }
 0x321   :  { %2277 = vmatprep.subr.bf16.mxu0 %v17461_v10  ;;  %2318 = vmatprep.subr.bf16.mxu1 %v17462_v12  ;;  %v17466_v10 = vld [vmem:[%s23730_s8 + $0xec] ss:$16 sps:$4 sm:$0xff]   ;;  %v17467_v12 = vld [vmem:[%s23730_s8 + $0xe0] ss:$16 sps:$4 sm:$0xff]  }
 0x324   :  { %2278 = vmatpush1.bf16.msra.mxu0 %v17463_v13  ;;  %2319 = vmatpush1.bf16.msra.mxu1 %v17464_v57  ;;  %v17468_v13 = vld [vmem:[%s23730_s8 + $0xe8] ss:$16 sps:$4 sm:$0xff]   ;;  %v17469_v57 = vld [vmem:[%s23730_s8 + $0x104] ss:$16 sps:$4 sm:$0xff]  }
 0x325   :  { %2279 = vmatprep.subr.bf16.mxu0 %v17465_v5  ;;  %2320 = vmatprep.subr.bf16.mxu1 %v17466_v10  ;;  %v17470_v5 = vld [vmem:[%s23730_s8 + $0x10c] ss:$16 sps:$4 sm:$0xff]   ;;  %v17471_v10 = vld [vmem:[%s23730_s8 + $0x100] ss:$16 sps:$4 sm:$0xff]  }
 0x328   :  { %2280 = vmatpush1.bf16.msra.mxu0 %v17467_v12  ;;  %2321 = vmatpush1.bf16.msra.mxu1 %v17468_v13  ;;  %v17472_v12 = vld [vmem:[%s23730_s8 + $0x108] ss:$16 sps:$4 sm:$0xff]   ;;  %v17473_v13 = vld [vmem:[%s23730_s8 + $0x124] ss:$16 sps:$4 sm:$0xff]  }
 0x329   :  { %2281 = vmatprep.subr.bf16.mxu0 %v17469_v57  ;;  %2322 = vmatprep.subr.bf16.mxu1 %v17470_v5  ;;  %v17474_v57 = vld [vmem:[%s23730_s8 + $0x12c] ss:$16 sps:$4 sm:$0xff]   ;;  %v17475_v5 = vld [vmem:[%s23730_s8 + $0x120] ss:$16 sps:$4 sm:$0xff]  }
 0x32c   :  { %2282 = vmatpush1.bf16.msra.mxu0 %v17471_v10  ;;  %2323 = vmatpush1.bf16.msra.mxu1 %v17472_v12  ;;  %v17476_v10 = vld [vmem:[%s23730_s8 + $0x128] ss:$16 sps:$4 sm:$0xff]   ;;  %v17477_v12 = vld [vmem:[%s23730_s8 + $0x144] ss:$16 sps:$4 sm:$0xff]  }
 0x32d   :  { %2283 = vmatprep.subr.bf16.mxu0 %v17473_v13  ;;  %2324 = vmatprep.subr.bf16.mxu1 %v17474_v57  ;;  %v17478_v13 = vld [vmem:[%s23730_s8 + $0x14c] ss:$16 sps:$4 sm:$0xff]   ;;  %v17479_v57 = vld [vmem:[%s23730_s8 + $0x140] ss:$16 sps:$4 sm:$0xff]  }
 0x330   :  { %2284 = vmatpush1.bf16.msra.mxu0 %v17475_v5  ;;  %2325 = vmatpush1.bf16.msra.mxu1 %v17476_v10  ;;  %v17480_v5 = vld [vmem:[%s23730_s8 + $0x148] ss:$16 sps:$4 sm:$0xff]  }
 0x331   :  { %2285 = vmatprep.subr.bf16.mxu0 %v17477_v12  ;;  %2326 = vmatprep.subr.bf16.mxu1 %v17478_v13 }
 0x334   :  { %2286 = vmatpush1.bf16.msra.mxu0 %v17479_v57  ;;  %2327 = vmatpush1.bf16.msra.mxu1 %v17480_v5 }
 0x335   :  { %2287 = vmatprep.subr.bf16.mxu0 %v18008_v25  ;;  %2328 = vmatprep.subr.bf16.mxu1 %v18013_v26  ;;  %v1101_v25 = vld [vmem:[%s23735_s9] sm:$0xf]  ;;  %v18637_v26 = vsub.s32 1, %v18137_v50 }
 0x337   :  { %24119 = vst [vmem:[#allocation70_spill] sm:$0xff] %v18637_v26 }
 0x338   :  { %2288 = vmatpush1.bf16.msra.mxu0 %v18018_v28  ;;  %2329 = vmatpush1.bf16.msra.mxu1 %v18023_v29  ;;  %v1106_v28 = vrot.slane %v1101_v25, %v18145_v53  ;;  %v1110_v29 = vrot.slane %v1101_v25, %v18637_v26 }
 0x339   :  { %2289 = vmatprep.subr.bf16.mxu0 %v18032_v27  ;;  %2330 = vmatprep.subr.bf16.mxu1 %v18037_v30 }
 0x33c   :  { %2290 = vmatpush1.bf16.msra.mxu0 %v18042_v31  ;;  %2331 = vmatpush1.bf16.msra.mxu1 %v18047_v32 }
 0x33d   :  { %2291 = vmatprep.subr.bf16.mxu0 %v18061_v34  ;;  %2332 = vmatprep.subr.bf16.mxu1 %v18071_v36 }
 0x340   :  { %2292 = vmatpush1.bf16.msra.mxu0 %v18056_v33  ;;  %2333 = vmatpush1.bf16.msra.mxu1 %v18066_v35 }
 0x341   :  { %2293 = vmatprep.subr.bf16.mxu0 %v18076_v37  ;;  %2334 = vmatprep.subr.bf16.mxu1 %v18082_v39 }
 0x344   :  { %2294 = vmatpush1.bf16.msra.mxu0 %v18088_v38  ;;  %2335 = vmatpush1.bf16.msra.mxu1 %v18093_v40 }
 0x345   :  { %2295 = vmatprep.subr.bf16.mxu0 %v18100_v41  ;;  %2336 = vmatprep.subr.bf16.mxu1 %v18107_v42  ;;  %v1114_v41 = vrot.slane %v1101_v25, %v18152_v55  ;;  %v1118_v42 = vrot.slane %v1101_v25, %v18169_v4 }
 0x348   :  { %2296 = vmatpush1.bf16.msra.mxu0 %v18112_v43  ;;  %2337 = vmatpush1.bf16.msra.mxu1 %v18117_v44 }
 0x349   :  { %2544 = vmatprep.subr.bf16.mxu0 %v18122_v46  ;;  %2585 = vmatprep.subr.bf16.mxu1 %v18127_v47 }
 0x3be   :  { %v1477_v27 = vpop.f32.mrb[48].mxu0  ;;  %v1518_v30 = vpop.f32.mrb[48].mxu1 }
 0x3bf   :  { %v1478_v31 = vadd.f32 %v1477_v27, %v1106_v28  ;;  %v1479_v32 = vpop.f32.mrb[49].mxu0  ;;  %v1520_v33 = vpop.f32.mrb[49].mxu1  ;;  %v1519_v43 = vadd.f32 %v1518_v30, %v1114_v41  ;;  %v18645_v28 = vrot.slane %v18142_v51, %v18637_v26  ;;  %v765_v30 = vadd.f32 %v18159_v62, %v18149_v54 }
 0x3c0   :  { %v1480_v34 = vadd.f32 %v1479_v32, %v1110_v29  ;;  %v1481_v35 = vpop.f32.mrb[50].mxu0  ;;  %v1522_v36 = vpop.f32.mrb[50].mxu1  ;;  %v1521_v44 = vadd.f32 %v1520_v33, %v1118_v42 }
 0x3c1   :  { %v14065_v37 = vmul.f32 -1.442695, %v1478_v31  ;;  %v1482_v39 = vpop.f32.mrb[51].mxu0  ;;  %v1523_v38 = vpop.f32.mrb[51].mxu1  ;;  %v14067_v46 = vmul.f32 -1.442695, %v1519_v43  ;;  %v878_v31 = vadd.f32 %v18161_v63, %v18157_v59  ;;  %v767_v33 = vadd.f32 %v18163_v1, %v18645_v28 }
 0x3c2   :  { %v14066_v40 = vmul.f32 -1.442695, %v1480_v34  ;;  %24120 = vst [vmem:[#allocation71_spill] sm:$0xff] %v18645_v28  ;;  %v880_v34 = vadd.f32 %v18165_v2, %v18177_v8 }
 0x3c3   :  { %16941 = vpow2.f32 %v14065_v37 }
 0x3c4   :  { %16943 = vpow2.f32 %v14066_v40 }
 0x3c5   :  { %16945 = vtanh.f32 %v1521_v44 }
 0x3c6   :  { %16947 = vpow2.f32 %v14067_v46 }
 0x3cd   :  { %v16942_v47 = vpop.eup %16941 }
 0x3ce   :  { %v1817_v50 = vadd.f32 1.0, %v16942_v47  ;;  %v16944_v10 = vpop.eup %16943 }
 0x3cf   :  { %v1818_v12 = vadd.f32 1.0, %v16944_v10  ;;  %v16946_v13 = vpop.eup %16945 }
 0x3d0   :  { %16949 = vrcp.f32 %v1817_v50  ;;  %v16948_v57 = vpop.eup %16947 }
 0x3d1   :  { %16951 = vrcp.f32 %v1818_v12  ;;  %v1819_v27 = vadd.f32 1.0, %v16948_v57 }
 0x3d3   :  { %16953 = vrcp.f32 %v1819_v27 }
 0x3da   :  { %v16950_v5 = vpop.eup %16949 }
 0x3db   :  { %v1828_v29 = vmul.f32 %v16950_v5, %v16946_v13  ;;  %v16952_v25 = vpop.eup %16951 }
 0x3dc   :  { %v1827_v32 = vmul.f32 0.0, %v16952_v25 }
 0x3dd   :  { %v16954_v2 = vpop.eup %16953 }
 0x3de   :  { %v1756_v35 = vpop.f32.mrb[52].mxu0  ;;  %v1797_v36 = vpop.f32.mrb[52].mxu1  ;;  %v18655_v51 = vadd.f32 %v1828_v29, %v1827_v32 }
 0x3df   :  { %v1804_v37 = vadd.f32 %v1756_v35, %v765_v30  ;;  %v1806_v39 = vadd.f32 %v1797_v36, %v878_v31  ;;  %v1758_v38 = vpop.f32.mrb[53].mxu0  ;;  %v1799_v40 = vpop.f32.mrb[53].mxu1 }
 0x3e0   :  { %v1805_v62 = vadd.f32 %v1758_v38, %v767_v33  ;;  %v1807_v41 = vadd.f32 %v1799_v40, %v880_v34  ;;  %v1760_v42 = vpop.f32.mrb[54].mxu0  ;;  %v1801_v63 = vpop.f32.mrb[54].mxu1  ;;  %16955 = vtanh.f32 %v18655_v51  ;;  %v18763_v40 = vld [vmem:[%s23730_s8 + $0x48] ss:$16 sps:$4 sm:$0xff]  }
 0x3e1   :  { %v14068_v43 = vmul.f32 -1.442695, %v1804_v37  ;;  %v1761_v1 = vpop.f32.mrb[55].mxu0  ;;  %v1802_v44 = vpop.f32.mrb[55].mxu1  ;;  %v14070_v50 = vmul.f32 -1.442695, %v1806_v39 }
 0x3e2   :  { %v14069_v46 = vmul.f32 -1.442695, %v1805_v62  ;;  %v18772_v62 = vld [vmem:[%s23730_s8 + $0x64] ss:$16 sps:$4 sm:$0xff]   ;;  %v18782_v42 = vld [vmem:[%s23730_s8 + $0x60] ss:$16 sps:$4 sm:$0xff]  }
 0x3e3   :  { %16957 = vpow2.f32 %v14068_v43  ;;  %v18787_v63 = vld [vmem:[%s23730_s8 + $0x68] ss:$16 sps:$4 sm:$0xff]   ;;  %v18796_v43 = vld [vmem:[%s23730_s8 + $0x84] ss:$16 sps:$4 sm:$0xff]   ;;  %v18801_v1 = vld [vmem:[%s23730_s8 + $0x8c] ss:$16 sps:$4 sm:$0xff]  }
 0x3e4   :  { %16959 = vpow2.f32 %v14069_v46  ;;  %v18806_v44 = vld [vmem:[%s23730_s8 + $0x80] ss:$16 sps:$4 sm:$0xff]   ;;  %v18811_v46 = vld [vmem:[%s23730_s8 + $0x88] ss:$16 sps:$4 sm:$0xff]  }
 0x3e5   :  { %16961 = vtanh.f32 %v1807_v41  ;;  %v18777_v41 = vld [vmem:[%s23730_s8 + $0x6c] ss:$16 sps:$4 sm:$0xff]  }
 0x3e6   :  { %16963 = vpow2.f32 %v14070_v50  ;;  %v18830_v50 = vld [vmem:[%s23730_s8 + $0xa0] ss:$16 sps:$4 sm:$0xff]  }
 0x3ea   :  { %v16956_v47 = vpop.eup %16955 }
 0x3eb   :  { %v1831_v10 = vmul.f32 %v16956_v47, %v16954_v2  ;;  %v18820_v2 = vld [vmem:[%s23730_s8 + $0xa4] ss:$16 sps:$4 sm:$0xff]   ;;  %v18825_v47 = vld [vmem:[%s23730_s8 + $0xac] ss:$16 sps:$4 sm:$0xff]  }
 0x3ed   :  { %v16958_v12 = vpop.eup %16957  ;;  %1832 = vst [vmem:[%s23736_s11] sm:$0xff] %v1831_v10  ;;  %v1858_v57 = vpack.c.bf16 %v1831_v10, %v1831_v10  ;;  %v18835_v10 = vld [vmem:[%s23730_s8 + $0xa8] ss:$16 sps:$4 sm:$0xff]  }
 0x3ee   :  { %v1842_v13 = vadd.f32 1.0, %v16958_v12  ;;  %v16960_v5 = vpop.eup %16959  ;;  %v18844_v12 = vld [vmem:[%s23730_s8 + $0xc4] ss:$16 sps:$4 sm:$0xff]  }
 0x3ef   :  { %v1843_v29 = vadd.f32 1.0, %v16960_v5  ;;  %2297 = vmatprep.mubr.bf16.mxu0 %v1858_v57  ;;  %2338 = vmatprep.mubr.bf16.mxu1 %v1858_v57  ;;  %v16962_v25 = vpop.eup %16961  ;;  %v18854_v57 = vld [vmem:[%s23730_s8 + $0xc0] ss:$16 sps:$4 sm:$0xff]   ;;  %v18859_v5 = vld [vmem:[%s23730_s8 + $0xc8] ss:$16 sps:$4 sm:$0xff]  }
 0x3f0   :  { %16965 = vrcp.f32 %v1842_v13  ;;  %v16964_v27 = vpop.eup %16963  ;;  %v18849_v13 = vld [vmem:[%s23730_s8 + $0xcc] ss:$16 sps:$4 sm:$0xff]  }
 0x3f1   :  { %16967 = vrcp.f32 %v1843_v29  ;;  %v1844_v33 = vadd.f32 1.0, %v16964_v27  ;;  %v18868_v29 = vld [vmem:[%s23730_s8 + $0xe4] ss:$16 sps:$4 sm:$0xff]   ;;  %v18878_v27 = vld [vmem:[%s23730_s8 + $0xe0] ss:$16 sps:$4 sm:$0xff]  }
 0x3f3   :  { %16969 = vrcp.f32 %v1844_v33  ;;  %v18902_v33 = vld [vmem:[%s23730_s8 + $0x100] ss:$16 sps:$4 sm:$0xff]  }
 0x3fa   :  { %v16966_v30 = vpop.eup %16965 }
 0x3fb   :  { %v1853_v31 = vmul.f32 %v16966_v30, %v16962_v25  ;;  %v16968_v32 = vpop.eup %16967  ;;  %v18873_v25 = vld [vmem:[%s23730_s8 + $0xec] ss:$16 sps:$4 sm:$0xff]   ;;  %v18883_v30 = vld [vmem:[%s23730_s8 + $0xe8] ss:$16 sps:$4 sm:$0xff]  }
 0x3fc   :  { %v1852_v34 = vmul.f32 %v16968_v32, %v18224_v17  ;;  %v18729_v17 = vld [vmem:[%s23730_s8 + $0x2c] ss:$16 sps:$4 sm:$0xff]  }
 0x3fd   :  { %v16970_v36 = vpop.eup %16969  ;;  %v18897_v32 = vld [vmem:[%s23730_s8 + $0x10c] ss:$16 sps:$4 sm:$0xff]  }
 0x3fe   :  { %v18662_v35 = vadd.f32 %v1853_v31, %v1852_v34  ;;  %v18892_v31 = vld [vmem:[%s23730_s8 + $0x104] ss:$16 sps:$4 sm:$0xff]   ;;  %v18907_v34 = vld [vmem:[%s23730_s8 + $0x108] ss:$16 sps:$4 sm:$0xff]  }
 0x400   :  { %16971 = vtanh.f32 %v18662_v35 }
 0x40a   :  { %v16972_v37 = vpop.eup %16971 }
 0x40b   :  { %v1856_v39 = vmul.f32 %v16972_v37, %v16970_v36  ;;  %v18916_v36 = vld [vmem:[%s23730_s8 + $0x124] ss:$16 sps:$4 sm:$0xff]   ;;  %v18921_v37 = vld [vmem:[%s23730_s8 + $0x12c] ss:$16 sps:$4 sm:$0xff]  }
 0x40d   :  { %v1857_v38 = vpack.c.bf16 %v1856_v39, %v1856_v39  ;;  %v18926_v39 = vld [vmem:[%s23730_s8 + $0x120] ss:$16 sps:$4 sm:$0xff]  }
 0x40f   :  { %2298 = vmatmul.mubr.bf16.vlgmr.msra.gmra.mrb[56].mxu0 %v1857_v38  ;;  %2339 = vmatmul.mubr.bf16.vlgmr.msra.gmra.mrb[56].mxu1 %v1857_v38 }
 0x410   :  { %2545 = vmatpush1.bf16.msra.mxu0 %v18258_v7  ;;  %2586 = vmatpush1.bf16.msra.mxu1 %v18263_v60  ;;  %v18715_v7 = vld [vmem:[%s23730_s8 + $0x8] ss:$16 sps:$4 sm:$0xff]   ;;  %v18734_v60 = vld [vmem:[%s23730_s8 + $0x20] ss:$16 sps:$4 sm:$0xff]  }
 0x411   :  { %2546 = vmatprep.subr.bf16.mxu0 %v18274_v49  ;;  %2587 = vmatprep.subr.bf16.mxu1 %v18279_v3  ;;  %v18748_v49 = vld [vmem:[%s23730_s8 + $0x44] ss:$16 sps:$4 sm:$0xff]   ;;  %v18753_v3 = vld [vmem:[%s23730_s8 + $0x4c] ss:$16 sps:$4 sm:$0xff]  }
 0x412   :  { %2576 = vmatprep.mubr.bf16.mxu0 %v24094_v58  ;;  %2617 = vmatprep.mubr.bf16.mxu1 %v24094_v58 }
 0x414   :  { %2547 = vmatpush1.bf16.msra.mxu0 %v18288_v45  ;;  %2588 = vmatpush1.bf16.msra.mxu1 %v18293_v56  ;;  %v24121_v56 = vld [vmem:[#allocation52_spill] sm:$0xff]  ;;  %v18758_v45 = vld [vmem:[%s23730_s8 + $0x40] ss:$16 sps:$4 sm:$0xff]  }
 0x415   :  { %2548 = vmatprep.subr.bf16.mxu0 %v18300_v16  ;;  %2589 = vmatprep.subr.bf16.mxu1 %v18305_v0  ;;  %v18710_v0 = vld [vmem:[%s23730_s8] ss:$16 sps:$4 sm:$0xff]   ;;  %v18739_v16 = vld [vmem:[%s23730_s8 + $0x28] ss:$16 sps:$4 sm:$0xff]   ;;  %24131 = vst [vmem:[#allocation52_spill] sm:$0xff] %v18902_v33 }
 0x418   :  { %2549 = vmatpush1.bf16.msra.mxu0 %v18326_v15  ;;  %2590 = vmatpush1.bf16.msra.mxu1 %v18331_v61  ;;  %v18705_v61 = vld [vmem:[%s23730_s8 + $0xc] ss:$16 sps:$4 sm:$0xff]   ;;  %v18724_v15 = vld [vmem:[%s23730_s8 + $0x24] ss:$16 sps:$4 sm:$0xff]  }
 0x419   :  { %2550 = vmatprep.subr.bf16.mxu0 %v18342_v21  ;;  %2591 = vmatprep.subr.bf16.mxu1 %v18347_v23  ;;  %v24122_v21 = vld [vmem:[#allocation53_spill] sm:$0xff]  ;;  %v24123_v23 = vld [vmem:[#allocation54_spill] sm:$0xff] }
 0x41a   :  { %24132 = vst [vmem:[#allocation53_spill] sm:$0xff] %v18907_v34  ;;  %24133 = vst [vmem:[#allocation54_spill] sm:$0xff] %v18916_v36 }
 0x41c   :  { %2551 = vmatpush1.bf16.msra.mxu0 %v18354_v24  ;;  %2592 = vmatpush1.bf16.msra.mxu1 %v18359_v48  ;;  %v24124_v24 = vld [vmem:[#allocation55_spill] sm:$0xff]  ;;  %v24125_v48 = vld [vmem:[#allocation56_spill] sm:$0xff] }
 0x41d   :  { %2552 = vmatprep.subr.bf16.mxu0 %v18366_v22  ;;  %2593 = vmatprep.subr.bf16.mxu1 %v18371_v20  ;;  %v24126_v22 = vld [vmem:[#allocation57_spill] sm:$0xff]  ;;  %v24127_v20 = vld [vmem:[#allocation58_spill] sm:$0xff]  ;;  %24134 = vst [vmem:[#allocation55_spill] sm:$0xff] %v18921_v37  ;;  %24135 = vst [vmem:[#allocation56_spill] sm:$0xff] %v18926_v39 }
 0x420   :  { %2553 = vmatpush1.bf16.msra.mxu0 %v18378_v19  ;;  %2594 = vmatpush1.bf16.msra.mxu1 %v18383_v52  ;;  %v24128_v19 = vld [vmem:[#allocation59_spill] sm:$0xff]  ;;  %v24129_v52 = vld [vmem:[#allocation60_spill] sm:$0xff] }
 0x421   :  { %2554 = vmatprep.subr.bf16.mxu0 %v18390_v18  ;;  %2595 = vmatprep.subr.bf16.mxu1 %v18395_v14  ;;  %v24130_v18 = vld [vmem:[#allocation61_spill] sm:$0xff] }
 0x422   :  { %v18700_v14 = vld [vmem:[%s23730_s8 + $0x4] ss:$16 sps:$4 sm:$0xff]  }
 0x424   :  { %2555 = vmatpush1.bf16.msra.mxu0 %v24121_v56  ;;  %2596 = vmatpush1.bf16.msra.mxu1 %v24122_v21  ;;  %v18940_v56 = vld [vmem:[%s23730_s8 + $0x144] ss:$16 sps:$4 sm:$0xff]   ;;  %v18945_v21 = vld [vmem:[%s23730_s8 + $0x14c] ss:$16 sps:$4 sm:$0xff]  }
 0x425   :  { %2556 = vmatprep.subr.bf16.mxu0 %v24123_v23  ;;  %2597 = vmatprep.subr.bf16.mxu1 %v24124_v24  ;;  %24137 = vst [vmem:[#allocation58_spill] sm:$0xff] %v18940_v56  ;;  %24138 = vst [vmem:[#allocation59_spill] sm:$0xff] %v18945_v21  ;;  %v18950_v23 = vld [vmem:[%s23730_s8 + $0x140] ss:$16 sps:$4 sm:$0xff]   ;;  %v18955_v24 = vld [vmem:[%s23730_s8 + $0x148] ss:$16 sps:$4 sm:$0xff]  }
 0x426   :  { %24139 = vst [vmem:[#allocation60_spill] sm:$0xff] %v18950_v23  ;;  %24140 = vst [vmem:[#allocation61_spill] sm:$0xff] %v18955_v24 }
 0x428   :  { %2557 = vmatpush1.bf16.msra.mxu0 %v24125_v48  ;;  %2598 = vmatpush1.bf16.msra.mxu1 %v24126_v22  ;;  %v18964_v48 = vld [vmem:[%s23730_s8 + $0x164] ss:$16 sps:$4 sm:$0xff]   ;;  %v18969_v22 = vld [vmem:[%s23730_s8 + $0x16c] ss:$16 sps:$4 sm:$0xff]  }
 0x429   :  { %2558 = vmatprep.subr.bf16.mxu0 %v24127_v20  ;;  %2599 = vmatprep.subr.bf16.mxu1 %v24128_v19  ;;  %24141 = vst [vmem:[#allocation72_spill] sm:$0xff] %v18964_v48  ;;  %24142 = vst [vmem:[#allocation73_spill] sm:$0xff] %v18969_v22  ;;  %v18974_v20 = vld [vmem:[%s23730_s8 + $0x160] ss:$16 sps:$4 sm:$0xff]   ;;  %v18979_v19 = vld [vmem:[%s23730_s8 + $0x168] ss:$16 sps:$4 sm:$0xff]  }
 0x42a   :  { %24143 = vst [vmem:[#allocation74_spill] sm:$0xff] %v18974_v20  ;;  %24144 = vst [vmem:[#allocation75_spill] sm:$0xff] %v18979_v19 }
 0x42c   :  { %2559 = vmatpush1.bf16.msra.mxu0 %v24129_v52  ;;  %2600 = vmatpush1.bf16.msra.mxu1 %v24130_v18  ;;  %v18988_v52 = vld [vmem:[%s23730_s8 + $0x184] ss:$16 sps:$4 sm:$0xff]   ;;  %v18993_v18 = vld [vmem:[%s23730_s8 + $0x18c] ss:$16 sps:$4 sm:$0xff]  }
 0x42d   :  { %3088 = vmatprep.subr.bf16.mxu0 %v18700_v14  ;;  %3129 = vmatprep.subr.bf16.mxu1 %v18705_v61  ;;  %24145 = vst [vmem:[#allocation76_spill] sm:$0xff] %v18988_v52  ;;  %24146 = vst [vmem:[#allocation77_spill] sm:$0xff] %v18993_v18 }
 0x42f   :  { %2577 = vmatmul.mubr.bf16.vlgmr.msra.gmra.mrb[60].mxu0 %v1857_v38  ;;  %2618 = vmatmul.mubr.bf16.vlgmr.msra.gmra.mrb[60].mxu1 %v1857_v38  ;;  %v18931_v38 = vld [vmem:[%s23730_s8 + $0x128] ss:$16 sps:$4 sm:$0xff]  }
 0x430   :  { %3089 = vmatpush1.bf16.msra.mxu0 %v18710_v0  ;;  %3130 = vmatpush1.bf16.msra.mxu1 %v18715_v7  ;;  %24136 = vst [vmem:[#allocation57_spill] sm:$0xff] %v18931_v38 }
 0x431   :  { %3090 = vmatprep.subr.bf16.mxu0 %v18724_v15  ;;  %3131 = vmatprep.subr.bf16.mxu1 %v18729_v17 }
 0x434   :  { %3091 = vmatpush1.bf16.msra.mxu0 %v18734_v60  ;;  %3132 = vmatpush1.bf16.msra.mxu1 %v18739_v16 }
 0x435   :  { %3092 = vmatprep.subr.bf16.mxu0 %v18748_v49  ;;  %3133 = vmatprep.subr.bf16.mxu1 %v18753_v3 }
 0x438   :  { %3093 = vmatpush1.bf16.msra.mxu0 %v18758_v45  ;;  %3134 = vmatpush1.bf16.msra.mxu1 %v18763_v40 }
 0x439   :  { %3094 = vmatprep.subr.bf16.mxu0 %v18772_v62  ;;  %3135 = vmatprep.subr.bf16.mxu1 %v18777_v41 }
 0x43c   :  { %3095 = vmatpush1.bf16.msra.mxu0 %v18782_v42  ;;  %3136 = vmatpush1.bf16.msra.mxu1 %v18787_v63 }
 0x43d   :  { %3096 = vmatprep.subr.bf16.mxu0 %v18796_v43  ;;  %3137 = vmatprep.subr.bf16.mxu1 %v18801_v1 }
 0x440   :  { %3097 = vmatpush1.bf16.msra.mxu0 %v18806_v44  ;;  %3138 = vmatpush1.bf16.msra.mxu1 %v18811_v46 }
 0x441   :  { %3098 = vmatprep.subr.bf16.mxu0 %v18820_v2  ;;  %3139 = vmatprep.subr.bf16.mxu1 %v18825_v47 }
 0x444   :  { %3099 = vmatpush1.bf16.msra.mxu0 %v18830_v50  ;;  %3140 = vmatpush1.bf16.msra.mxu1 %v18835_v10 }
 0x445   :  { %3100 = vmatprep.subr.bf16.mxu0 %v18844_v12  ;;  %3141 = vmatprep.subr.bf16.mxu1 %v18849_v13 }
 0x448   :  { %3101 = vmatpush1.bf16.msra.mxu0 %v18854_v57  ;;  %3142 = vmatpush1.bf16.msra.mxu1 %v18859_v5 }
 0x449   :  { %3102 = vmatprep.subr.bf16.mxu0 %v18868_v29  ;;  %3143 = vmatprep.subr.bf16.mxu1 %v18873_v25 }
 0x44c   :  { %3103 = vmatpush1.bf16.msra.mxu0 %v18878_v27  ;;  %3144 = vmatpush1.bf16.msra.mxu1 %v18883_v30 }
 0x44d   :  { %3104 = vmatprep.subr.bf16.mxu0 %v18892_v31  ;;  %3145 = vmatprep.subr.bf16.mxu1 %v18897_v32 }
 0x450   :  { %3105 = vmatpush1.bf16.msra.mxu0 %v18902_v33  ;;  %3146 = vmatpush1.bf16.msra.mxu1 %v18907_v34 }
 0x451   :  { %3106 = vmatprep.subr.bf16.mxu0 %v18916_v36  ;;  %3147 = vmatprep.subr.bf16.mxu1 %v18921_v37 }
 0x454   :  { %3107 = vmatpush1.bf16.msra.mxu0 %v18926_v39  ;;  %3148 = vmatpush1.bf16.msra.mxu1 %v18931_v38 }
 0x455   :  { %3108 = vmatprep.subr.bf16.mxu0 %v18940_v56  ;;  %3149 = vmatprep.subr.bf16.mxu1 %v18945_v21 }
 0x458   :  { %3109 = vmatpush1.bf16.msra.mxu0 %v18950_v23  ;;  %3150 = vmatpush1.bf16.msra.mxu1 %v18955_v24 }
 0x459   :  { %3110 = vmatprep.subr.bf16.mxu0 %v18964_v48  ;;  %3151 = vmatprep.subr.bf16.mxu1 %v18969_v22 }
 0x45c   :  { %3111 = vmatpush1.bf16.msra.mxu0 %v18974_v20  ;;  %3152 = vmatpush1.bf16.msra.mxu1 %v18979_v19  ;;  %v19017_v19 = vld [vmem:[%s23730_s8 + $0x1a4] ss:$16 sps:$4 sm:$0xff]   ;;  %v19045_v20 = vld [vmem:[%s23730_s8 + $0x1c0] ss:$16 sps:$4 sm:$0xff]  }
 0x45d   :  { %3112 = vmatprep.subr.bf16.mxu0 %v18988_v52  ;;  %3153 = vmatprep.subr.bf16.mxu1 %v18993_v18  ;;  %24150 = vst [vmem:[#allocation81_spill] sm:$0xff] %v19017_v19  ;;  %v19022_v52 = vld [vmem:[%s23730_s8 + $0x1a8] ss:$16 sps:$4 sm:$0xff]   ;;  %v19038_v18 = vld [vmem:[%s23730_s8 + $0x1cc] ss:$16 sps:$4 sm:$0xff]   ;;  %24155 = vst [vmem:[#allocation86_spill] sm:$0xff] %v19045_v20 }
 0x45e   :  { %24151 = vst [vmem:[#allocation82_spill] sm:$0xff] %v19022_v52  ;;  %24154 = vst [vmem:[#allocation85_spill] sm:$0xff] %v19038_v18 }
 0x460   :  { %3113 = vmatpush1.bf16.msra.mxu0 %v18998_v6  ;;  %3154 = vmatpush1.bf16.msra.mxu1 %v19003_v9  ;;  %v19027_v6 = vld [vmem:[%s23730_s8 + $0x1ac] ss:$16 sps:$4 sm:$0xff]   ;;  %v19032_v9 = vld [vmem:[%s23730_s8 + $0x1c4] ss:$16 sps:$4 sm:$0xff]  }
 0x461   :  { %24152 = vst [vmem:[#allocation83_spill] sm:$0xff] %v19027_v6  ;;  %24153 = vst [vmem:[#allocation84_spill] sm:$0xff] %v19032_v9  ;;  %3114 = vmatprep.subr.bf16.mxu0 %v19017_v19  ;;  %3155 = vmatprep.subr.bf16.mxu1 %v19027_v6  ;;  %v19052_v19 = vld [vmem:[%s23730_s8 + $0x1c8] ss:$16 sps:$4 sm:$0xff]   ;;  %v19057_v6 = vld [vmem:[%s23730_s8 + $0x1e4] ss:$16 sps:$4 sm:$0xff]  }
 0x462   :  { %24156 = vst [vmem:[#allocation87_spill] sm:$0xff] %v19052_v19  ;;  %24157 = vst [vmem:[#allocation88_spill] sm:$0xff] %v19057_v6 }
 0x464   :  { %3115 = vmatpush1.bf16.msra.mxu0 %v19012_v11  ;;  %3156 = vmatpush1.bf16.msra.mxu1 %v19022_v52  ;;  %v19063_v11 = vld [vmem:[%s23730_s8 + $0x1ec] ss:$16 sps:$4 sm:$0xff]   ;;  %v19081_v52 = vld [vmem:[%s23733_s6 + $0x4] ss:$16 sps:$4 sm:$0xff]  }
 0x465   :  { %3116 = vmatprep.subr.bf16.mxu0 %v19032_v9  ;;  %3157 = vmatprep.subr.bf16.mxu1 %v19038_v18  ;;  %24158 = vst [vmem:[#allocation89_spill] sm:$0xff] %v19063_v11  ;;  %v19069_v9 = vld [vmem:[%s23730_s8 + $0x1e0] ss:$16 sps:$4 sm:$0xff]   ;;  %v19076_v18 = vld [vmem:[%s23730_s8 + $0x1e8] ss:$16 sps:$4 sm:$0xff]   ;;  %24161 = vst [vmem:[#allocation92_spill] sm:$0xff] %v19081_v52 }
 0x466   :  { %24159 = vst [vmem:[#allocation90_spill] sm:$0xff] %v19069_v9  ;;  %24160 = vst [vmem:[#allocation91_spill] sm:$0xff] %v19076_v18 }
 0x468   :  { %3117 = vmatpush1.bf16.msra.mxu0 %v19045_v20  ;;  %3158 = vmatpush1.bf16.msra.mxu1 %v19052_v19  ;;  %v19087_v20 = vld [vmem:[%s23733_s6 + $0xc] ss:$16 sps:$4 sm:$0xff]  }
 0x469   :  { %3118 = vmatprep.subr.bf16.mxu0 %v19057_v6  ;;  %3159 = vmatprep.subr.bf16.mxu1 %v19063_v11  ;;  %24162 = vst [vmem:[#allocation93_spill] sm:$0xff] %v19087_v20  ;;  %v1923_v6 = vld [vmem:[%s23735_s9] sm:$0xf] }
 0x46a   :  { %v1928_v19 = vrot.slane %v1923_v6, %v18145_v53  ;;  %v1932_v11 = vrot.slane %v1923_v6, %v18637_v26  ;;  %v1936_v37 = vrot.slane %v1923_v6, %v18152_v55  ;;  %v1940_v53 = vrot.slane %v1923_v6, %v18169_v4 }
 0x46c   :  { %3119 = vmatpush1.bf16.msra.mxu0 %v19069_v9  ;;  %3160 = vmatpush1.bf16.msra.mxu1 %v19076_v18 }
 0x46d   :  { %3367 = vmatprep.subr.bf16.mxu0 %v19081_v52  ;;  %3408 = vmatprep.subr.bf16.mxu1 %v19087_v20 }
 0x4e2   :  { %v2299_v22 = vpop.f32.mrb[56].mxu0  ;;  %v2340_v48 = vpop.f32.mrb[56].mxu1 }
 0x4e3   :  { %v2300_v24 = vadd.f32 %v2299_v22, %v1928_v19  ;;  %v2301_v23 = vpop.f32.mrb[57].mxu0  ;;  %v2342_v21 = vpop.f32.mrb[57].mxu1  ;;  %v2341_v36 = vadd.f32 %v2340_v48, %v1936_v37  ;;  %v24166_v37 = vld [vmem:[#allocation7_spill] sm:$0xff] }
 0x4e4   :  { %v2302_v9 = vadd.f32 %v2301_v23, %v1932_v11  ;;  %v2303_v56 = vpop.f32.mrb[58].mxu0  ;;  %v2344_v18 = vpop.f32.mrb[58].mxu1  ;;  %v2343_v26 = vadd.f32 %v2342_v21, %v1940_v53  ;;  %v24164_v53 = vld [vmem:[#allocation5_spill] sm:$0xff]  ;;  %v886_v21 = vadd.f32 %v24166_v37, %v18177_v8 }
 0x4e5   :  { %v14167_v38 = vmul.f32 -1.442695, %v2300_v24  ;;  %v2304_v52 = vpop.f32.mrb[59].mxu0  ;;  %v2345_v39 = vpop.f32.mrb[59].mxu1  ;;  %v14169_v34 = vmul.f32 -1.442695, %v2341_v36  ;;  %v884_v36 = vadd.f32 %v24164_v53, %v18157_v59 }
 0x4e6   :  { %v14168_v20 = vmul.f32 -1.442695, %v2302_v9 }
 0x4e7   :  { %16973 = vpow2.f32 %v14167_v38 }
 0x4e8   :  { %16975 = vpow2.f32 %v14168_v20  ;;  %v24163_v20 = vld [vmem:[#allocation4_spill] sm:$0xff] }
 0x4e9   :  { %16977 = vtanh.f32 %v2343_v26  ;;  %v771_v6 = vadd.f32 %v24163_v20, %v18149_v54  ;;  %v24165_v26 = vld [vmem:[#allocation6_spill] sm:$0xff] }
 0x4ea   :  { %16979 = vpow2.f32 %v14169_v34  ;;  %v773_v34 = vadd.f32 %v24165_v26, %v18645_v28 }
 0x4f1   :  { %v16974_v33 = vpop.eup %16973 }
 0x4f2   :  { %v2639_v22 = vadd.f32 1.0, %v16974_v33  ;;  %v16976_v19 = vpop.eup %16975 }
 0x4f3   :  { %v2640_v11 = vadd.f32 1.0, %v16976_v19  ;;  %v16978_v56 = vpop.eup %16977 }
 0x4f4   :  { %16981 = vrcp.f32 %v2639_v22  ;;  %v16980_v39 = vpop.eup %16979 }
 0x4f5   :  { %16983 = vrcp.f32 %v2640_v11  ;;  %v2641_v24 = vadd.f32 1.0, %v16980_v39 }
 0x4f7   :  { %16985 = vrcp.f32 %v2641_v24 }
 0x4fe   :  { %v16982_v9 = vpop.eup %16981 }
 0x4ff   :  { %v2650_v38 = vmul.f32 %v16982_v9, %v16978_v56  ;;  %v16984_v23 = vpop.eup %16983 }
 0x500   :  { %v2649_v33 = vmul.f32 %v16984_v23, %v18655_v51 }
 0x501   :  { %v16986_v37 = vpop.eup %16985 }
 0x502   :  { %v2578_v48 = vpop.f32.mrb[60].mxu0  ;;  %v2619_v52 = vpop.f32.mrb[60].mxu1  ;;  %v19109_v18 = vadd.f32 %v2650_v38, %v2649_v33 }
 0x503   :  { %v2626_v22 = vadd.f32 %v2578_v48, %v771_v6  ;;  %v2628_v19 = vadd.f32 %v2619_v52, %v884_v36  ;;  %v2580_v11 = vpop.f32.mrb[61].mxu0  ;;  %v2621_v56 = vpop.f32.mrb[61].mxu1 }
 0x504   :  { %v2627_v39 = vadd.f32 %v2580_v11, %v773_v34  ;;  %v2629_v9 = vadd.f32 %v2621_v56, %v886_v21  ;;  %v2582_v20 = vpop.f32.mrb[62].mxu0  ;;  %v2623_v53 = vpop.f32.mrb[62].mxu1  ;;  %16987 = vtanh.f32 %v19109_v18 }
 0x505   :  { %v14171_v51 = vmul.f32 -1.442695, %v2626_v22  ;;  %v2583_v23 = vpop.f32.mrb[63].mxu0  ;;  %v2624_v26 = vpop.f32.mrb[63].mxu1  ;;  %v14173_v33 = vmul.f32 -1.442695, %v2628_v19 }
 0x506   :  { %v14172_v28 = vmul.f32 -1.442695, %v2627_v39  ;;  %v19122_v23 = vld [vmem:[%s23733_s6] ss:$16 sps:$4 sm:$0xff]   ;;  %v19127_v26 = vld [vmem:[%s23733_s6 + $0x8] ss:$16 sps:$4 sm:$0xff]  }
 0x507   :  { %16989 = vpow2.f32 %v14171_v51 }
 0x508   :  { %16991 = vpow2.f32 %v14172_v28 }
 0x509   :  { %16993 = vtanh.f32 %v2629_v9 }
 0x50a   :  { %16995 = vpow2.f32 %v14173_v33  ;;  %v19148_v33 = vld [vmem:[%s23733_s6 + $0x20] ss:$16 sps:$4 sm:$0xff]  }
 0x50e   :  { %v16988_v38 = vpop.eup %16987 }
 0x50f   :  { %v2653_v6 = vmul.f32 %v16988_v38, %v16986_v37  ;;  %v19139_v38 = vld [vmem:[%s23733_s6 + $0x2c] ss:$16 sps:$4 sm:$0xff]  }
 0x511   :  { %v16990_v36 = vpop.eup %16989  ;;  %14170 = vst [vmem:[%s23736_s11 + $0x8] sm:$0xff] %v2653_v6  ;;  %v2681_v24 = vpack.c.bf16 %v2653_v6, %v2653_v6  ;;  %v19153_v6 = vld [vmem:[%s23733_s6 + $0x28] ss:$16 sps:$4 sm:$0xff]  }
 0x512   :  { %v2665_v48 = vadd.f32 1.0, %v16990_v36  ;;  %v16992_v34 = vpop.eup %16991  ;;  %v19160_v36 = vld [vmem:[%s23733_s6 + $0x44] ss:$16 sps:$4 sm:$0xff]  }
 0x513   :  { %v2666_v21 = vadd.f32 1.0, %v16992_v34  ;;  %3120 = vmatprep.mubr.bf16.mxu0 %v2681_v24  ;;  %3161 = vmatprep.mubr.bf16.mxu1 %v2681_v24  ;;  %v16994_v28 = vpop.eup %16993  ;;  %v19174_v24 = vld [vmem:[%s23733_s6 + $0x40] ss:$16 sps:$4 sm:$0xff]   ;;  %v19179_v34 = vld [vmem:[%s23733_s6 + $0x48] ss:$16 sps:$4 sm:$0xff]  }
 0x514   :  { %16997 = vrcp.f32 %v2665_v48  ;;  %v16996_v52 = vpop.eup %16995  ;;  %v19165_v48 = vld [vmem:[%s23733_s6 + $0x4c] ss:$16 sps:$4 sm:$0xff]  }
 0x515   :  { %16999 = vrcp.f32 %v2666_v21  ;;  %v2667_v56 = vadd.f32 1.0, %v16996_v52  ;;  %v19186_v21 = vld [vmem:[%s23733_s6 + $0x64] ss:$16 sps:$4 sm:$0xff]   ;;  %v19198_v52 = vld [vmem:[%s23733_s6 + $0x60] ss:$16 sps:$4 sm:$0xff]  }
 0x517   :  { %17001 = vrcp.f32 %v2667_v56  ;;  %v19222_v56 = vld [vmem:[%s23733_s6 + $0x80] ss:$16 sps:$4 sm:$0xff]  }
 0x518   :  { %24168 = vst [vmem:[#allocation5_spill] sm:$0xff] %v19222_v56 }
 0x51e   :  { %v16998_v22 = vpop.eup %16997 }
 0x51f   :  { %v2676_v19 = vmul.f32 %v16998_v22, %v16994_v28  ;;  %v17000_v11 = vpop.eup %16999  ;;  %v19191_v28 = vld [vmem:[%s23733_s6 + $0x6c] ss:$16 sps:$4 sm:$0xff]   ;;  %v19203_v22 = vld [vmem:[%s23733_s6 + $0x68] ss:$16 sps:$4 sm:$0xff]  }
 0x520   :  { %v2675_v39 = vmul.f32 %v17000_v11, %v18662_v35  ;;  %v19134_v35 = vld [vmem:[%s23733_s6 + $0x24] ss:$16 sps:$4 sm:$0xff]   ;;  %v19215_v11 = vld [vmem:[%s23733_s6 + $0x8c] ss:$16 sps:$4 sm:$0xff]  }
 0x521   :  { %v17002_v20 = vpop.eup %17001  ;;  %24167 = vst [vmem:[#allocation4_spill] sm:$0xff] %v19215_v11 }
 0x522   :  { %v19116_v9 = vadd.f32 %v2676_v19, %v2675_v39  ;;  %v19210_v19 = vld [vmem:[%s23733_s6 + $0x84] ss:$16 sps:$4 sm:$0xff]   ;;  %v19227_v39 = vld [vmem:[%s23733_s6 + $0x88] ss:$16 sps:$4 sm:$0xff]  }
 0x523   :  { %24169 = vst [vmem:[#allocation6_spill] sm:$0xff] %v19227_v39 }
 0x524   :  { %17003 = vtanh.f32 %v19116_v9 }
 0x52e   :  { %v17004_v53 = vpop.eup %17003 }
 0x52f   :  { %v2679_v51 = vmul.f32 %v17004_v53, %v17002_v20  ;;  %v19234_v20 = vld [vmem:[%s23733_s6 + $0xa4] ss:$16 sps:$4 sm:$0xff]   ;;  %v19239_v53 = vld [vmem:[%s23733_s6 + $0xac] ss:$16 sps:$4 sm:$0xff]  }
 0x530   :  { %24170 = vst [vmem:[#allocation7_spill] sm:$0xff] %v19234_v20  ;;  %24171 = vst [vmem:[#allocation94_spill] sm:$0xff] %v19239_v53 }
 0x531   :  { %v19129_v37 = vpack.c.bf16 %v2679_v51, %v2679_v51  ;;  %v19246_v51 = vld [vmem:[%s23733_s6 + $0xa0] ss:$16 sps:$4 sm:$0xff]  }
 0x532   :  { %24172 = vst [vmem:[#allocation95_spill] sm:$0xff] %v19246_v51 }
 0x533   :  { %3121 = vmatmul.mubr.bf16.vlgmr.msra.gmra.mrb[64].mxu0 %v19129_v37  ;;  %3162 = vmatmul.mubr.bf16.vlgmr.msra.gmra.mrb[64].mxu1 %v19129_v37 }
 0x534   :  { %3368 = vmatpush1.bf16.msra.mxu0 %v19122_v23  ;;  %3409 = vmatpush1.bf16.msra.mxu1 %v19127_v26 }
 0x535   :  { %3369 = vmatprep.subr.bf16.mxu0 %v19134_v35  ;;  %3410 = vmatprep.subr.bf16.mxu1 %v19139_v38 }
 0x536   :  { %3399 = vmatprep.mubr.bf16.mxu0 %v24094_v58  ;;  %3440 = vmatprep.mubr.bf16.mxu1 %v24094_v58 }
 0x538   :  { %3370 = vmatpush1.bf16.msra.mxu0 %v19148_v33  ;;  %3411 = vmatpush1.bf16.msra.mxu1 %v19153_v6 }
 0x539   :  { %3371 = vmatprep.subr.bf16.mxu0 %v19160_v36  ;;  %3412 = vmatprep.subr.bf16.mxu1 %v19165_v48 }
 0x53c   :  { %3372 = vmatpush1.bf16.msra.mxu0 %v19174_v24  ;;  %3413 = vmatpush1.bf16.msra.mxu1 %v19179_v34 }
 0x53d   :  { %3373 = vmatprep.subr.bf16.mxu0 %v19186_v21  ;;  %3414 = vmatprep.subr.bf16.mxu1 %v19191_v28 }
 0x540   :  { %3374 = vmatpush1.bf16.msra.mxu0 %v19198_v52  ;;  %3415 = vmatpush1.bf16.msra.mxu1 %v19203_v22 }
 0x541   :  { %3375 = vmatprep.subr.bf16.mxu0 %v19210_v19  ;;  %3416 = vmatprep.subr.bf16.mxu1 %v19215_v11  ;;  %v19251_v11 = vld [vmem:[%s23733_s6 + $0xa8] ss:$16 sps:$4 sm:$0xff]  }
 0x542   :  { %24173 = vst [vmem:[#allocation96_spill] sm:$0xff] %v19251_v11 }
 0x544   :  { %3376 = vmatpush1.bf16.msra.mxu0 %v19222_v56  ;;  %3417 = vmatpush1.bf16.msra.mxu1 %v19227_v39  ;;  %v19258_v56 = vld [vmem:[%s23733_s6 + $0xc4] ss:$16 sps:$4 sm:$0xff]   ;;  %v19263_v39 = vld [vmem:[%s23733_s6 + $0xcc] ss:$16 sps:$4 sm:$0xff]  }
 0x545   :  { %3377 = vmatprep.subr.bf16.mxu0 %v19234_v20  ;;  %3418 = vmatprep.subr.bf16.mxu1 %v19239_v53  ;;  %24174 = vst [vmem:[#allocation97_spill] sm:$0xff] %v19258_v56  ;;  %24175 = vst [vmem:[#allocation98_spill] sm:$0xff] %v19263_v39  ;;  %v19270_v20 = vld [vmem:[%s23733_s6 + $0xc0] ss:$16 sps:$4 sm:$0xff]   ;;  %v19275_v53 = vld [vmem:[%s23733_s6 + $0xc8] ss:$16 sps:$4 sm:$0xff]  }
 0x548   :  { %3378 = vmatpush1.bf16.msra.mxu0 %v19246_v51  ;;  %3419 = vmatpush1.bf16.msra.mxu1 %v19251_v11  ;;  %v19282_v51 = vld [vmem:[%s23733_s6 + $0xe4] ss:$16 sps:$4 sm:$0xff]   ;;  %v19287_v11 = vld [vmem:[%s23733_s6 + $0xec] ss:$16 sps:$4 sm:$0xff]  }
 0x549   :  { %3379 = vmatprep.subr.bf16.mxu0 %v19258_v56  ;;  %3420 = vmatprep.subr.bf16.mxu1 %v19263_v39  ;;  %v19294_v56 = vld [vmem:[%s23733_s6 + $0xe0] ss:$16 sps:$4 sm:$0xff]   ;;  %v19299_v39 = vld [vmem:[%s23733_s6 + $0xe8] ss:$16 sps:$4 sm:$0xff]  }
 0x54c   :  { %3380 = vmatpush1.bf16.msra.mxu0 %v19270_v20  ;;  %3421 = vmatpush1.bf16.msra.mxu1 %v19275_v53 }
 0x54d   :  { %3381 = vmatprep.subr.bf16.mxu0 %v19282_v51  ;;  %3422 = vmatprep.subr.bf16.mxu1 %v19287_v11 }
 0x550   :  { %3382 = vmatpush1.bf16.msra.mxu0 %v19294_v56  ;;  %3423 = vmatpush1.bf16.msra.mxu1 %v19299_v39 }
 0x551   :  { %3911 = vmatprep.subr.bf16.mxu0 %v18700_v14  ;;  %3952 = vmatprep.subr.bf16.mxu1 %v18705_v61  ;;  %v24176_v14 = vld [vmem:[#allocation52_spill] sm:$0xff]  ;;  %v24177_v61 = vld [vmem:[#allocation53_spill] sm:$0xff] }
 0x553   :  { %3400 = vmatmul.mubr.bf16.vlgmr.msra.gmra.mrb[68].mxu0 %v19129_v37  ;;  %3441 = vmatmul.mubr.bf16.vlgmr.msra.gmra.mrb[68].mxu1 %v19129_v37 }
 0x554   :  { %3912 = vmatpush1.bf16.msra.mxu0 %v18710_v0  ;;  %3953 = vmatpush1.bf16.msra.mxu1 %v18715_v7  ;;  %v24178_v0 = vld [vmem:[#allocation54_spill] sm:$0xff]  ;;  %v24179_v7 = vld [vmem:[#allocation55_spill] sm:$0xff] }
 0x555   :  { %3913 = vmatprep.subr.bf16.mxu0 %v18724_v15  ;;  %3954 = vmatprep.subr.bf16.mxu1 %v18729_v17  ;;  %v24180_v15 = vld [vmem:[#allocation56_spill] sm:$0xff]  ;;  %v24181_v17 = vld [vmem:[#allocation57_spill] sm:$0xff] }
 0x558   :  { %3914 = vmatpush1.bf16.msra.mxu0 %v18734_v60  ;;  %3955 = vmatpush1.bf16.msra.mxu1 %v18739_v16  ;;  %v24182_v60 = vld [vmem:[#allocation58_spill] sm:$0xff]  ;;  %v24183_v16 = vld [vmem:[#allocation59_spill] sm:$0xff] }
 0x559   :  { %3915 = vmatprep.subr.bf16.mxu0 %v18748_v49  ;;  %3956 = vmatprep.subr.bf16.mxu1 %v18753_v3  ;;  %v24184_v49 = vld [vmem:[#allocation60_spill] sm:$0xff]  ;;  %v24185_v3 = vld [vmem:[#allocation61_spill] sm:$0xff] }
 0x55c   :  { %3916 = vmatpush1.bf16.msra.mxu0 %v18758_v45  ;;  %3957 = vmatpush1.bf16.msra.mxu1 %v18763_v40  ;;  %v24186_v45 = vld [vmem:[#allocation72_spill] sm:$0xff]  ;;  %v24187_v40 = vld [vmem:[#allocation73_spill] sm:$0xff] }
 0x55d   :  { %3917 = vmatprep.subr.bf16.mxu0 %v18772_v62  ;;  %3958 = vmatprep.subr.bf16.mxu1 %v18777_v41  ;;  %v24188_v62 = vld [vmem:[#allocation74_spill] sm:$0xff]  ;;  %v24189_v41 = vld [vmem:[#allocation75_spill] sm:$0xff] }
 0x560   :  { %3918 = vmatpush1.bf16.msra.mxu0 %v18782_v42  ;;  %3959 = vmatpush1.bf16.msra.mxu1 %v18787_v63  ;;  %v24190_v42 = vld [vmem:[#allocation76_spill] sm:$0xff]  ;;  %v24191_v63 = vld [vmem:[#allocation77_spill] sm:$0xff] }
 0x561   :  { %3919 = vmatprep.subr.bf16.mxu0 %v18796_v43  ;;  %3960 = vmatprep.subr.bf16.mxu1 %v18801_v1  ;;  %v24192_v43 = vld [vmem:[#allocation78_spill] sm:$0xff]  ;;  %v24193_v1 = vld [vmem:[#allocation79_spill] sm:$0xff] }
 0x564   :  { %3920 = vmatpush1.bf16.msra.mxu0 %v18806_v44  ;;  %3961 = vmatpush1.bf16.msra.mxu1 %v18811_v46  ;;  %v24194_v44 = vld [vmem:[#allocation81_spill] sm:$0xff]  ;;  %v24195_v46 = vld [vmem:[#allocation83_spill] sm:$0xff] }
 0x565   :  { %3921 = vmatprep.subr.bf16.mxu0 %v18820_v2  ;;  %3962 = vmatprep.subr.bf16.mxu1 %v18825_v47  ;;  %v24196_v2 = vld [vmem:[#allocation80_spill] sm:$0xff]  ;;  %v24197_v47 = vld [vmem:[#allocation82_spill] sm:$0xff] }
 0x568   :  { %3922 = vmatpush1.bf16.msra.mxu0 %v18830_v50  ;;  %3963 = vmatpush1.bf16.msra.mxu1 %v18835_v10  ;;  %v24198_v50 = vld [vmem:[#allocation84_spill] sm:$0xff]  ;;  %v24199_v10 = vld [vmem:[#allocation85_spill] sm:$0xff] }
 0x569   :  { %3923 = vmatprep.subr.bf16.mxu0 %v18844_v12  ;;  %3964 = vmatprep.subr.bf16.mxu1 %v18849_v13  ;;  %v24200_v12 = vld [vmem:[#allocation86_spill] sm:$0xff]  ;;  %v24201_v13 = vld [vmem:[#allocation87_spill] sm:$0xff] }
 0x56c   :  { %3924 = vmatpush1.bf16.msra.mxu0 %v18854_v57  ;;  %3965 = vmatpush1.bf16.msra.mxu1 %v18859_v5  ;;  %v24202_v57 = vld [vmem:[#allocation88_spill] sm:$0xff]  ;;  %v24203_v5 = vld [vmem:[#allocation89_spill] sm:$0xff] }
 0x56d   :  { %3925 = vmatprep.subr.bf16.mxu0 %v18868_v29  ;;  %3966 = vmatprep.subr.bf16.mxu1 %v18873_v25  ;;  %v24204_v29 = vld [vmem:[#allocation90_spill] sm:$0xff]  ;;  %v24205_v25 = vld [vmem:[#allocation91_spill] sm:$0xff] }
 0x570   :  { %3926 = vmatpush1.bf16.msra.mxu0 %v18878_v27  ;;  %3967 = vmatpush1.bf16.msra.mxu1 %v18883_v30  ;;  %v24206_v27 = vld [vmem:[#allocation92_spill] sm:$0xff]  ;;  %v24207_v30 = vld [vmem:[#allocation93_spill] sm:$0xff] }
 0x571   :  { %3927 = vmatprep.subr.bf16.mxu0 %v18892_v31  ;;  %3968 = vmatprep.subr.bf16.mxu1 %v18897_v32  ;;  %v2746_v31 = vld [vmem:[%s23735_s9] sm:$0xf] }
 0x572   :  { %v24208_v32 = vld [vmem:[#allocation3_spill] sm:$0xff] }
 0x573   :  { %v2751_v37 = vrot.slane %v2746_v31, %v24208_v32 }
 0x574   :  { %3928 = vmatpush1.bf16.msra.mxu0 %v24176_v14  ;;  %3969 = vmatpush1.bf16.msra.mxu1 %v24177_v61  ;;  %v24209_v14 = vld [vmem:[#allocation70_spill] sm:$0xff] }
 0x575   :  { %3929 = vmatprep.subr.bf16.mxu0 %v24178_v0  ;;  %3970 = vmatprep.subr.bf16.mxu1 %v24179_v7  ;;  %v2755_v61 = vrot.slane %v2746_v31, %v24209_v14 }
 0x578   :  { %3930 = vmatpush1.bf16.msra.mxu0 %v24180_v15  ;;  %3971 = vmatpush1.bf16.msra.mxu1 %v24181_v17 }
 0x579   :  { %3931 = vmatprep.subr.bf16.mxu0 %v24182_v60  ;;  %3972 = vmatprep.subr.bf16.mxu1 %v24183_v16 }
 0x57c   :  { %3932 = vmatpush1.bf16.msra.mxu0 %v24184_v49  ;;  %3973 = vmatpush1.bf16.msra.mxu1 %v24185_v3 }
 0x57d   :  { %3933 = vmatprep.subr.bf16.mxu0 %v24186_v45  ;;  %3974 = vmatprep.subr.bf16.mxu1 %v24187_v40 }
 0x580   :  { %3934 = vmatpush1.bf16.msra.mxu0 %v24188_v62  ;;  %3975 = vmatpush1.bf16.msra.mxu1 %v24189_v41 }
 0x581   :  { %3935 = vmatprep.subr.bf16.mxu0 %v24190_v42  ;;  %3976 = vmatprep.subr.bf16.mxu1 %v24191_v63  ;;  %v2759_v42 = vrot.slane %v2746_v31, %v18152_v55  ;;  %v2763_v63 = vrot.slane %v2746_v31, %v18169_v4 }
 0x584   :  { %3936 = vmatpush1.bf16.msra.mxu0 %v24192_v43  ;;  %3977 = vmatpush1.bf16.msra.mxu1 %v24193_v1 }
 0x585   :  { %3937 = vmatprep.subr.bf16.mxu0 %v24194_v44  ;;  %3978 = vmatprep.subr.bf16.mxu1 %v24195_v46 }
 0x588   :  { %3938 = vmatpush1.bf16.msra.mxu0 %v24196_v2  ;;  %3979 = vmatpush1.bf16.msra.mxu1 %v24197_v47 }
 0x589   :  { %3939 = vmatprep.subr.bf16.mxu0 %v24198_v50  ;;  %3980 = vmatprep.subr.bf16.mxu1 %v24199_v10 }
 0x58c   :  { %3940 = vmatpush1.bf16.msra.mxu0 %v24200_v12  ;;  %3981 = vmatpush1.bf16.msra.mxu1 %v24201_v13 }
 0x58d   :  { %3941 = vmatprep.subr.bf16.mxu0 %v24202_v57  ;;  %3982 = vmatprep.subr.bf16.mxu1 %v24203_v5 }
 0x590   :  { %3942 = vmatpush1.bf16.msra.mxu0 %v24204_v29  ;;  %3983 = vmatpush1.bf16.msra.mxu1 %v24205_v25  ;;  %v24210_v25 = vld [vmem:[#allocation8_spill] sm:$0xff] }
 0x591   :  { %4190 = vmatprep.subr.bf16.mxu0 %v24206_v27  ;;  %4231 = vmatprep.subr.bf16.mxu1 %v24207_v30  ;;  %v775_v27 = vadd.f32 %v24210_v25, %v18149_v54  ;;  %v24211_v30 = vld [vmem:[#allocation9_spill] sm:$0xff] }
 0x592   :  { %v888_v31 = vadd.f32 %v24211_v30, %v18157_v59 }
 0x606   :  { %v3122_v0 = vpop.f32.mrb[64].mxu0  ;;  %v3163_v7 = vpop.f32.mrb[64].mxu1 }
 0x607   :  { %v3123_v15 = vadd.f32 %v3122_v0, %v2751_v37  ;;  %v3124_v17 = vpop.f32.mrb[65].mxu0  ;;  %v3165_v60 = vpop.f32.mrb[65].mxu1  ;;  %v3164_v43 = vadd.f32 %v3163_v7, %v2759_v42  ;;  %v24213_v0 = vld [vmem:[#allocation10_spill] sm:$0xff] }
 0x608   :  { %v3125_v16 = vadd.f32 %v3124_v17, %v2755_v61  ;;  %v3126_v49 = vpop.f32.mrb[66].mxu0  ;;  %v3167_v3 = vpop.f32.mrb[66].mxu1  ;;  %v3166_v1 = vadd.f32 %v3165_v60, %v2763_v63  ;;  %v24212_v61 = vld [vmem:[#allocation71_spill] sm:$0xff] }
 0x609   :  { %v14270_v45 = vmul.f32 -1.442695, %v3123_v15  ;;  %v3127_v40 = vpop.f32.mrb[67].mxu0  ;;  %v3168_v62 = vpop.f32.mrb[67].mxu1  ;;  %v14272_v44 = vmul.f32 -1.442695, %v3164_v43  ;;  %v777_v7 = vadd.f32 %v24213_v0, %v24212_v61 }
 0x60a   :  { %v14271_v41 = vmul.f32 -1.442695, %v3125_v16  ;;  %v24214_v15 = vld [vmem:[#allocation11_spill] sm:$0xff] }
 0x60b   :  { %17005 = vpow2.f32 %v14270_v45  ;;  %v890_v17 = vadd.f32 %v24214_v15, %v18177_v8 }
 0x60c   :  { %17007 = vpow2.f32 %v14271_v41 }
 0x60d   :  { %17009 = vtanh.f32 %v3166_v1 }
 0x60e   :  { %17011 = vpow2.f32 %v14272_v44 }
 0x615   :  { %v17006_v46 = vpop.eup %17005 }
 0x616   :  { %v3462_v2 = vadd.f32 1.0, %v17006_v46  ;;  %v17008_v47 = vpop.eup %17007 }
 0x617   :  { %v3463_v50 = vadd.f32 1.0, %v17008_v47  ;;  %v17010_v10 = vpop.eup %17009 }
 0x618   :  { %17013 = vrcp.f32 %v3462_v2  ;;  %v17012_v12 = vpop.eup %17011 }
 0x619   :  { %17015 = vrcp.f32 %v3463_v50  ;;  %v3464_v29 = vadd.f32 1.0, %v17012_v12 }
 0x61b   :  { %17017 = vrcp.f32 %v3464_v29 }
 0x622   :  { %v17014_v13 = vpop.eup %17013 }
 0x623   :  { %v3473_v57 = vmul.f32 %v17014_v13, %v17010_v10  ;;  %v17016_v5 = vpop.eup %17015 }
 0x624   :  { %v3472_v37 = vmul.f32 %v17016_v5, %v19109_v18 }
 0x625   :  { %v17018_v2 = vpop.eup %17017 }
 0x626   :  { %v3401_v60 = vpop.f32.mrb[68].mxu0  ;;  %v3442_v16 = vpop.f32.mrb[68].mxu1  ;;  %v19389_v49 = vadd.f32 %v3473_v57, %v3472_v37 }
 0x627   :  { %v3449_v3 = vadd.f32 %v3401_v60, %v775_v27  ;;  %v3451_v45 = vadd.f32 %v3442_v16, %v888_v31  ;;  %v3403_v40 = vpop.f32.mrb[69].mxu0  ;;  %v3444_v62 = vpop.f32.mrb[69].mxu1 }
 0x628   :  { %v3450_v41 = vadd.f32 %v3403_v40, %v777_v7  ;;  %v3452_v42 = vadd.f32 %v3444_v62, %v890_v17  ;;  %v3405_v63 = vpop.f32.mrb[70].mxu0  ;;  %v3446_v43 = vpop.f32.mrb[70].mxu1  ;;  %17019 = vtanh.f32 %v19389_v49  ;;  %v19516_v40 = vld [vmem:[%s23730_s8 + $0x60] ss:$16 sps:$4 sm:$0xff]   ;;  %v19521_v62 = vld [vmem:[%s23730_s8 + $0x68] ss:$16 sps:$4 sm:$0xff]  }
 0x629   :  { %v14274_v18 = vmul.f32 -1.442695, %v3449_v3  ;;  %v3406_v1 = vpop.f32.mrb[71].mxu0  ;;  %v3447_v44 = vpop.f32.mrb[71].mxu1  ;;  %v14276_v50 = vmul.f32 -1.442695, %v3451_v45 }
 0x62a   :  { %v14275_v46 = vmul.f32 -1.442695, %v3450_v41  ;;  %v19511_v45 = vld [vmem:[%s23730_s8 + $0x6c] ss:$16 sps:$4 sm:$0xff]   ;;  %v19530_v41 = vld [vmem:[%s23730_s8 + $0x84] ss:$16 sps:$4 sm:$0xff]  }
 0x62b   :  { %17021 = vpow2.f32 %v14274_v18  ;;  %v19540_v63 = vld [vmem:[%s23730_s8 + $0x80] ss:$16 sps:$4 sm:$0xff]   ;;  %v19545_v43 = vld [vmem:[%s23730_s8 + $0x88] ss:$16 sps:$4 sm:$0xff]   ;;  %v19554_v18 = vld [vmem:[%s23730_s8 + $0xa4] ss:$16 sps:$4 sm:$0xff]  }
 0x62c   :  { %17023 = vpow2.f32 %v14275_v46  ;;  %v19559_v1 = vld [vmem:[%s23730_s8 + $0xac] ss:$16 sps:$4 sm:$0xff]   ;;  %v19564_v44 = vld [vmem:[%s23730_s8 + $0xa0] ss:$16 sps:$4 sm:$0xff]   ;;  %v19569_v46 = vld [vmem:[%s23730_s8 + $0xa8] ss:$16 sps:$4 sm:$0xff]  }
 0x62d   :  { %17025 = vtanh.f32 %v3452_v42  ;;  %v19535_v42 = vld [vmem:[%s23730_s8 + $0x8c] ss:$16 sps:$4 sm:$0xff]  }
 0x62e   :  { %17027 = vpow2.f32 %v14276_v50  ;;  %v19588_v50 = vld [vmem:[%s23730_s8 + $0xc0] ss:$16 sps:$4 sm:$0xff]  }
 0x632   :  { %v17020_v47 = vpop.eup %17019 }
 0x633   :  { %v3476_v10 = vmul.f32 %v17020_v47, %v17018_v2  ;;  %v19578_v2 = vld [vmem:[%s23730_s8 + $0xc4] ss:$16 sps:$4 sm:$0xff]   ;;  %v19583_v47 = vld [vmem:[%s23730_s8 + $0xcc] ss:$16 sps:$4 sm:$0xff]  }
 0x635   :  { %v17022_v12 = vpop.eup %17021  ;;  %14273 = vst [vmem:[%s23736_s11 + $0x10] sm:$0xff] %v3476_v10  ;;  %v3504_v57 = vpack.c.bf16 %v3476_v10, %v3476_v10  ;;  %v19593_v10 = vld [vmem:[%s23730_s8 + $0xc8] ss:$16 sps:$4 sm:$0xff]  }
 0x636   :  { %v3488_v13 = vadd.f32 1.0, %v17022_v12  ;;  %v17024_v5 = vpop.eup %17023  ;;  %v19602_v12 = vld [vmem:[%s23730_s8 + $0xe4] ss:$16 sps:$4 sm:$0xff]  }
 0x637   :  { %v3489_v29 = vadd.f32 1.0, %v17024_v5  ;;  %3943 = vmatprep.mubr.bf16.mxu0 %v3504_v57  ;;  %3984 = vmatprep.mubr.bf16.mxu1 %v3504_v57  ;;  %v17026_v25 = vpop.eup %17025  ;;  %v19612_v57 = vld [vmem:[%s23730_s8 + $0xe0] ss:$16 sps:$4 sm:$0xff]   ;;  %v19617_v5 = vld [vmem:[%s23730_s8 + $0xe8] ss:$16 sps:$4 sm:$0xff]  }
 0x638   :  { %17029 = vrcp.f32 %v3488_v13  ;;  %v17028_v27 = vpop.eup %17027  ;;  %v19607_v13 = vld [vmem:[%s23730_s8 + $0xec] ss:$16 sps:$4 sm:$0xff]  }
 0x639   :  { %17031 = vrcp.f32 %v3489_v29  ;;  %v3490_v0 = vadd.f32 1.0, %v17028_v27  ;;  %v19626_v29 = vld [vmem:[%s23730_s8 + $0x104] ss:$16 sps:$4 sm:$0xff]   ;;  %v19636_v27 = vld [vmem:[%s23730_s8 + $0x100] ss:$16 sps:$4 sm:$0xff]  }
 0x63a   :  { %24224 = vst [vmem:[#allocation52_spill] sm:$0xff] %v19636_v27 }
 0x63b   :  { %17033 = vrcp.f32 %v3490_v0  ;;  %v19660_v0 = vld [vmem:[%s23730_s8 + $0x120] ss:$16 sps:$4 sm:$0xff]  }
 0x63c   :  { %24228 = vst [vmem:[#allocation56_spill] sm:$0xff] %v19660_v0 }
 0x642   :  { %v17030_v30 = vpop.eup %17029 }
 0x643   :  { %v3499_v31 = vmul.f32 %v17030_v30, %v17026_v25  ;;  %v17032_v37 = vpop.eup %17031  ;;  %v19631_v25 = vld [vmem:[%s23730_s8 + $0x10c] ss:$16 sps:$4 sm:$0xff]   ;;  %v19641_v30 = vld [vmem:[%s23730_s8 + $0x108] ss:$16 sps:$4 sm:$0xff]  }
 0x644   :  { %v3498_v7 = vmul.f32 %v17032_v37, %v19116_v9  ;;  %v24215_v9 = vld [vmem:[#allocation4_spill] sm:$0xff]  ;;  %24225 = vst [vmem:[#allocation53_spill] sm:$0xff] %v19641_v30 }
 0x645   :  { %v17034_v17 = vpop.eup %17033  ;;  %v19655_v37 = vld [vmem:[%s23730_s8 + $0x12c] ss:$16 sps:$4 sm:$0xff]  }
 0x646   :  { %v19396_v15 = vadd.f32 %v3499_v31, %v3498_v7  ;;  %v19650_v31 = vld [vmem:[%s23730_s8 + $0x124] ss:$16 sps:$4 sm:$0xff]   ;;  %24227 = vst [vmem:[#allocation55_spill] sm:$0xff] %v19655_v37  ;;  %v19665_v7 = vld [vmem:[%s23730_s8 + $0x128] ss:$16 sps:$4 sm:$0xff]  }
 0x647   :  { %24226 = vst [vmem:[#allocation54_spill] sm:$0xff] %v19650_v31  ;;  %24229 = vst [vmem:[#allocation57_spill] sm:$0xff] %v19665_v7 }
 0x648   :  { %17035 = vtanh.f32 %v19396_v15 }
 0x652   :  { %v17036_v60 = vpop.eup %17035 }
 0x653   :  { %v3502_v16 = vmul.f32 %v17036_v60, %v17034_v17  ;;  %v19674_v17 = vld [vmem:[%s23730_s8 + $0x144] ss:$16 sps:$4 sm:$0xff]   ;;  %v19679_v60 = vld [vmem:[%s23730_s8 + $0x14c] ss:$16 sps:$4 sm:$0xff]  }
 0x654   :  { %24230 = vst [vmem:[#allocation58_spill] sm:$0xff] %v19674_v17  ;;  %24231 = vst [vmem:[#allocation59_spill] sm:$0xff] %v19679_v60 }
 0x655   :  { %v3503_v3 = vpack.c.bf16 %v3502_v16, %v3502_v16  ;;  %v19684_v16 = vld [vmem:[%s23730_s8 + $0x140] ss:$16 sps:$4 sm:$0xff]  }
 0x656   :  { %24232 = vst [vmem:[#allocation60_spill] sm:$0xff] %v19684_v16 }
 0x657   :  { %3944 = vmatmul.mubr.bf16.vlgmr.msra.gmra.mrb[72].mxu0 %v3503_v3  ;;  %3985 = vmatmul.mubr.bf16.vlgmr.msra.gmra.mrb[72].mxu1 %v3503_v3 }
 0x658   :  { %4191 = vmatpush1.bf16.msra.mxu0 %v19122_v23  ;;  %4232 = vmatpush1.bf16.msra.mxu1 %v19127_v26  ;;  %v24216_v23 = vld [vmem:[#allocation5_spill] sm:$0xff]  ;;  %v24217_v26 = vld [vmem:[#allocation6_spill] sm:$0xff] }
 0x659   :  { %4192 = vmatprep.subr.bf16.mxu0 %v19134_v35  ;;  %4233 = vmatprep.subr.bf16.mxu1 %v19139_v38  ;;  %v24218_v35 = vld [vmem:[#allocation7_spill] sm:$0xff]  ;;  %v24219_v38 = vld [vmem:[#allocation94_spill] sm:$0xff] }
 0x65a   :  { %4222 = vmatprep.mubr.bf16.mxu0 %v24094_v58  ;;  %4263 = vmatprep.mubr.bf16.mxu1 %v24094_v58 }
 0x65c   :  { %4193 = vmatpush1.bf16.msra.mxu0 %v19148_v33  ;;  %4234 = vmatpush1.bf16.msra.mxu1 %v19153_v6  ;;  %v24220_v33 = vld [vmem:[#allocation95_spill] sm:$0xff]  ;;  %v24221_v6 = vld [vmem:[#allocation96_spill] sm:$0xff] }
 0x65d   :  { %4194 = vmatprep.subr.bf16.mxu0 %v19160_v36  ;;  %4235 = vmatprep.subr.bf16.mxu1 %v19165_v48  ;;  %v24222_v36 = vld [vmem:[#allocation97_spill] sm:$0xff]  ;;  %v24223_v48 = vld [vmem:[#allocation98_spill] sm:$0xff] }
 0x660   :  { %4195 = vmatpush1.bf16.msra.mxu0 %v19174_v24  ;;  %4236 = vmatpush1.bf16.msra.mxu1 %v19179_v34  ;;  %v19434_v24 = vld [vmem:[%s23730_s8 + $0x4] ss:$16 sps:$4 sm:$0xff]   ;;  %v19439_v34 = vld [vmem:[%s23730_s8 + $0xc] ss:$16 sps:$4 sm:$0xff]  }
 0x661   :  { %4196 = vmatprep.subr.bf16.mxu0 %v19186_v21  ;;  %4237 = vmatprep.subr.bf16.mxu1 %v19191_v28  ;;  %v19444_v21 = vld [vmem:[%s23730_s8] ss:$16 sps:$4 sm:$0xff]   ;;  %v19449_v28 = vld [vmem:[%s23730_s8 + $0x8] ss:$16 sps:$4 sm:$0xff]  }
 0x664   :  { %4197 = vmatpush1.bf16.msra.mxu0 %v19198_v52  ;;  %4238 = vmatpush1.bf16.msra.mxu1 %v19203_v22  ;;  %v19458_v52 = vld [vmem:[%s23730_s8 + $0x24] ss:$16 sps:$4 sm:$0xff]   ;;  %v19463_v22 = vld [vmem:[%s23730_s8 + $0x2c] ss:$16 sps:$4 sm:$0xff]  }
 0x665   :  { %4198 = vmatprep.subr.bf16.mxu0 %v19210_v19  ;;  %4239 = vmatprep.subr.bf16.mxu1 %v24215_v9  ;;  %v19468_v19 = vld [vmem:[%s23730_s8 + $0x20] ss:$16 sps:$4 sm:$0xff]   ;;  %v19698_v9 = vld [vmem:[%s23730_s8 + $0x164] ss:$16 sps:$4 sm:$0xff]  }
 0x666   :  { %24234 = vst [vmem:[#allocation72_spill] sm:$0xff] %v19698_v9 }
 0x668   :  { %4199 = vmatpush1.bf16.msra.mxu0 %v24216_v23  ;;  %4240 = vmatpush1.bf16.msra.mxu1 %v24217_v26  ;;  %v19703_v23 = vld [vmem:[%s23730_s8 + $0x16c] ss:$16 sps:$4 sm:$0xff]   ;;  %v19708_v26 = vld [vmem:[%s23730_s8 + $0x160] ss:$16 sps:$4 sm:$0xff]  }
 0x669   :  { %4200 = vmatprep.subr.bf16.mxu0 %v24218_v35  ;;  %4241 = vmatprep.subr.bf16.mxu1 %v24219_v38  ;;  %24235 = vst [vmem:[#allocation73_spill] sm:$0xff] %v19703_v23  ;;  %24236 = vst [vmem:[#allocation74_spill] sm:$0xff] %v19708_v26  ;;  %v19713_v35 = vld [vmem:[%s23730_s8 + $0x168] ss:$16 sps:$4 sm:$0xff]   ;;  %v19722_v38 = vld [vmem:[%s23730_s8 + $0x184] ss:$16 sps:$4 sm:$0xff]  }
 0x66a   :  { %24237 = vst [vmem:[#allocation75_spill] sm:$0xff] %v19713_v35  ;;  %24238 = vst [vmem:[#allocation76_spill] sm:$0xff] %v19722_v38 }
 0x66c   :  { %4201 = vmatpush1.bf16.msra.mxu0 %v24220_v33  ;;  %4242 = vmatpush1.bf16.msra.mxu1 %v24221_v6  ;;  %v19727_v33 = vld [vmem:[%s23730_s8 + $0x18c] ss:$16 sps:$4 sm:$0xff]   ;;  %v19732_v6 = vld [vmem:[%s23730_s8 + $0x180] ss:$16 sps:$4 sm:$0xff]  }
 0x66d   :  { %4202 = vmatprep.subr.bf16.mxu0 %v24222_v36  ;;  %4243 = vmatprep.subr.bf16.mxu1 %v24223_v48  ;;  %24239 = vst [vmem:[#allocation77_spill] sm:$0xff] %v19727_v33  ;;  %24240 = vst [vmem:[#allocation78_spill] sm:$0xff] %v19732_v6  ;;  %v19737_v36 = vld [vmem:[%s23730_s8 + $0x188] ss:$16 sps:$4 sm:$0xff]   ;;  %v19746_v48 = vld [vmem:[%s23730_s8 + $0x1a0] ss:$16 sps:$4 sm:$0xff]  }
 0x66e   :  { %24241 = vst [vmem:[#allocation79_spill] sm:$0xff] %v19737_v36  ;;  %24242 = vst [vmem:[#allocation81_spill] sm:$0xff] %v19746_v48 }
 0x670   :  { %4203 = vmatpush1.bf16.msra.mxu0 %v19270_v20  ;;  %4244 = vmatpush1.bf16.msra.mxu1 %v19275_v53  ;;  %v19492_v20 = vld [vmem:[%s23730_s8 + $0x40] ss:$16 sps:$4 sm:$0xff]   ;;  %v19497_v53 = vld [vmem:[%s23730_s8 + $0x48] ss:$16 sps:$4 sm:$0xff]  }
 0x671   :  { %4204 = vmatprep.subr.bf16.mxu0 %v19282_v51  ;;  %4245 = vmatprep.subr.bf16.mxu1 %v19287_v11  ;;  %v19473_v11 = vld [vmem:[%s23730_s8 + $0x28] ss:$16 sps:$4 sm:$0xff]   ;;  %v19506_v51 = vld [vmem:[%s23730_s8 + $0x64] ss:$16 sps:$4 sm:$0xff]  }
 0x674   :  { %4205 = vmatpush1.bf16.msra.mxu0 %v19294_v56  ;;  %4246 = vmatpush1.bf16.msra.mxu1 %v19299_v39  ;;  %v19482_v56 = vld [vmem:[%s23730_s8 + $0x44] ss:$16 sps:$4 sm:$0xff]   ;;  %v19487_v39 = vld [vmem:[%s23730_s8 + $0x4c] ss:$16 sps:$4 sm:$0xff]  }
 0x675   :  { %4734 = vmatprep.subr.bf16.mxu0 %v19434_v24  ;;  %4775 = vmatprep.subr.bf16.mxu1 %v19439_v34 }
 0x677   :  { %4223 = vmatmul.mubr.bf16.vlgmr.msra.gmra.mrb[76].mxu0 %v3503_v3  ;;  %4264 = vmatmul.mubr.bf16.vlgmr.msra.gmra.mrb[76].mxu1 %v3503_v3  ;;  %v19689_v3 = vld [vmem:[%s23730_s8 + $0x148] ss:$16 sps:$4 sm:$0xff]  }
 0x678   :  { %4735 = vmatpush1.bf16.msra.mxu0 %v19444_v21  ;;  %4776 = vmatpush1.bf16.msra.mxu1 %v19449_v28  ;;  %24233 = vst [vmem:[#allocation61_spill] sm:$0xff] %v19689_v3 }
 0x679   :  { %4736 = vmatprep.subr.bf16.mxu0 %v19458_v52  ;;  %4777 = vmatprep.subr.bf16.mxu1 %v19463_v22 }
 0x67c   :  { %4737 = vmatpush1.bf16.msra.mxu0 %v19468_v19  ;;  %4778 = vmatpush1.bf16.msra.mxu1 %v19473_v11 }
 0x67d   :  { %4738 = vmatprep.subr.bf16.mxu0 %v19482_v56  ;;  %4779 = vmatprep.subr.bf16.mxu1 %v19487_v39 }
 0x680   :  { %4739 = vmatpush1.bf16.msra.mxu0 %v19492_v20  ;;  %4780 = vmatpush1.bf16.msra.mxu1 %v19497_v53 }
 0x681   :  { %4740 = vmatprep.subr.bf16.mxu0 %v19506_v51  ;;  %4781 = vmatprep.subr.bf16.mxu1 %v19511_v45 }
 0x684   :  { %4741 = vmatpush1.bf16.msra.mxu0 %v19516_v40  ;;  %4782 = vmatpush1.bf16.msra.mxu1 %v19521_v62 }
 0x685   :  { %4742 = vmatprep.subr.bf16.mxu0 %v19530_v41  ;;  %4783 = vmatprep.subr.bf16.mxu1 %v19535_v42 }
 0x688   :  { %4743 = vmatpush1.bf16.msra.mxu0 %v19540_v63  ;;  %4784 = vmatpush1.bf16.msra.mxu1 %v19545_v43 }
 0x689   :  { %4744 = vmatprep.subr.bf16.mxu0 %v19554_v18  ;;  %4785 = vmatprep.subr.bf16.mxu1 %v19559_v1 }
 0x68c   :  { %4745 = vmatpush1.bf16.msra.mxu0 %v19564_v44  ;;  %4786 = vmatpush1.bf16.msra.mxu1 %v19569_v46 }
 0x68d   :  { %4746 = vmatprep.subr.bf16.mxu0 %v19578_v2  ;;  %4787 = vmatprep.subr.bf16.mxu1 %v19583_v47 }
 0x690   :  { %4747 = vmatpush1.bf16.msra.mxu0 %v19588_v50  ;;  %4788 = vmatpush1.bf16.msra.mxu1 %v19593_v10 }
 0x691   :  { %4748 = vmatprep.subr.bf16.mxu0 %v19602_v12  ;;  %4789 = vmatprep.subr.bf16.mxu1 %v19607_v13 }
 0x694   :  { %4749 = vmatpush1.bf16.msra.mxu0 %v19612_v57  ;;  %4790 = vmatpush1.bf16.msra.mxu1 %v19617_v5 }
 0x695   :  { %4750 = vmatprep.subr.bf16.mxu0 %v19626_v29  ;;  %4791 = vmatprep.subr.bf16.mxu1 %v19631_v25 }
 0x698   :  { %4751 = vmatpush1.bf16.msra.mxu0 %v19636_v27  ;;  %4792 = vmatpush1.bf16.msra.mxu1 %v19641_v30 }
 0x699   :  { %4752 = vmatprep.subr.bf16.mxu0 %v19650_v31  ;;  %4793 = vmatprep.subr.bf16.mxu1 %v19655_v37 }
 0x69c   :  { %4753 = vmatpush1.bf16.msra.mxu0 %v19660_v0  ;;  %4794 = vmatpush1.bf16.msra.mxu1 %v19665_v7 }
 0x69d   :  { %4754 = vmatprep.subr.bf16.mxu0 %v19674_v17  ;;  %4795 = vmatprep.subr.bf16.mxu1 %v19679_v60 }
 0x6a0   :  { %4755 = vmatpush1.bf16.msra.mxu0 %v19684_v16  ;;  %4796 = vmatpush1.bf16.msra.mxu1 %v19689_v3 }
 0x6a1   :  { %4756 = vmatprep.subr.bf16.mxu0 %v19698_v9  ;;  %4797 = vmatprep.subr.bf16.mxu1 %v19703_v23 }
 0x6a4   :  { %4757 = vmatpush1.bf16.msra.mxu0 %v19708_v26  ;;  %4798 = vmatpush1.bf16.msra.mxu1 %v19713_v35  ;;  %v19751_v35 = vld [vmem:[%s23730_s8 + $0x1a4] ss:$16 sps:$4 sm:$0xff]   ;;  %v19779_v26 = vld [vmem:[%s23730_s8 + $0x1c0] ss:$16 sps:$4 sm:$0xff]  }
 0x6a5   :  { %4758 = vmatprep.subr.bf16.mxu0 %v19722_v38  ;;  %4799 = vmatprep.subr.bf16.mxu1 %v19727_v33  ;;  %24243 = vst [vmem:[#allocation83_spill] sm:$0xff] %v19751_v35  ;;  %v19756_v38 = vld [vmem:[%s23730_s8 + $0x1a8] ss:$16 sps:$4 sm:$0xff]   ;;  %v19772_v33 = vld [vmem:[%s23730_s8 + $0x1cc] ss:$16 sps:$4 sm:$0xff]   ;;  %24248 = vst [vmem:[#allocation86_spill] sm:$0xff] %v19779_v26 }
 0x6a6   :  { %24244 = vst [vmem:[#allocation80_spill] sm:$0xff] %v19756_v38  ;;  %24247 = vst [vmem:[#allocation85_spill] sm:$0xff] %v19772_v33 }
 0x6a8   :  { %4759 = vmatpush1.bf16.msra.mxu0 %v19732_v6  ;;  %4800 = vmatpush1.bf16.msra.mxu1 %v19737_v36  ;;  %v19761_v6 = vld [vmem:[%s23730_s8 + $0x1ac] ss:$16 sps:$4 sm:$0xff]   ;;  %v19766_v36 = vld [vmem:[%s23730_s8 + $0x1c4] ss:$16 sps:$4 sm:$0xff]  }
 0x6a9   :  { %24245 = vst [vmem:[#allocation82_spill] sm:$0xff] %v19761_v6  ;;  %24246 = vst [vmem:[#allocation84_spill] sm:$0xff] %v19766_v36  ;;  %4760 = vmatprep.subr.bf16.mxu0 %v19751_v35  ;;  %4801 = vmatprep.subr.bf16.mxu1 %v19761_v6  ;;  %v19786_v35 = vld [vmem:[%s23730_s8 + $0x1c8] ss:$16 sps:$4 sm:$0xff]   ;;  %v19791_v6 = vld [vmem:[%s23730_s8 + $0x1e4] ss:$16 sps:$4 sm:$0xff]  }
 0x6aa   :  { %24249 = vst [vmem:[#allocation87_spill] sm:$0xff] %v19786_v35  ;;  %24250 = vst [vmem:[#allocation88_spill] sm:$0xff] %v19791_v6 }
 0x6ac   :  { %4761 = vmatpush1.bf16.msra.mxu0 %v19746_v48  ;;  %4802 = vmatpush1.bf16.msra.mxu1 %v19756_v38  ;;  %v19797_v48 = vld [vmem:[%s23730_s8 + $0x1ec] ss:$16 sps:$4 sm:$0xff]   ;;  %v19815_v38 = vld [vmem:[%s23733_s6 + $0x4] ss:$16 sps:$4 sm:$0xff]  }
 0x6ad   :  { %4762 = vmatprep.subr.bf16.mxu0 %v19766_v36  ;;  %4803 = vmatprep.subr.bf16.mxu1 %v19772_v33  ;;  %24251 = vst [vmem:[#allocation89_spill] sm:$0xff] %v19797_v48  ;;  %v19803_v36 = vld [vmem:[%s23730_s8 + $0x1e0] ss:$16 sps:$4 sm:$0xff]   ;;  %v19810_v33 = vld [vmem:[%s23730_s8 + $0x1e8] ss:$16 sps:$4 sm:$0xff]   ;;  %24254 = vst [vmem:[#allocation92_spill] sm:$0xff] %v19815_v38 }
 0x6ae   :  { %24252 = vst [vmem:[#allocation90_spill] sm:$0xff] %v19803_v36  ;;  %24253 = vst [vmem:[#allocation91_spill] sm:$0xff] %v19810_v33 }
 0x6b0   :  { %4763 = vmatpush1.bf16.msra.mxu0 %v19779_v26  ;;  %4804 = vmatpush1.bf16.msra.mxu1 %v19786_v35  ;;  %v19821_v26 = vld [vmem:[%s23733_s6 + $0xc] ss:$16 sps:$4 sm:$0xff]  }
 0x6b1   :  { %4764 = vmatprep.subr.bf16.mxu0 %v19791_v6  ;;  %4805 = vmatprep.subr.bf16.mxu1 %v19797_v48  ;;  %24255 = vst [vmem:[#allocation93_spill] sm:$0xff] %v19821_v26  ;;  %v3569_v6 = vld [vmem:[%s23735_s9] sm:$0xf] }
 0x6b2   :  { %v3574_v35 = vrot.slane %v3569_v6, %v24208_v32  ;;  %v3578_v48 = vrot.slane %v3569_v6, %v24209_v14  ;;  %v3582_v37 = vrot.slane %v3569_v6, %v18152_v55  ;;  %v3586_v32 = vrot.slane %v3569_v6, %v18169_v4 }
 0x6b4   :  { %4765 = vmatpush1.bf16.msra.mxu0 %v19803_v36  ;;  %4806 = vmatpush1.bf16.msra.mxu1 %v19810_v33 }
 0x6b5   :  { %5013 = vmatprep.subr.bf16.mxu0 %v19815_v38  ;;  %5054 = vmatprep.subr.bf16.mxu1 %v19821_v26 }
 0x72a   :  { %v3945_v23 = vpop.f32.mrb[72].mxu0  ;;  %v3986_v9 = vpop.f32.mrb[72].mxu1 }
 0x72b   :  { %v3946_v3 = vadd.f32 %v3945_v23, %v3574_v35  ;;  %v3947_v16 = vpop.f32.mrb[73].mxu0  ;;  %v3988_v60 = vpop.f32.mrb[73].mxu1  ;;  %v3987_v31 = vadd.f32 %v3986_v9, %v3582_v37  ;;  %v24259_v37 = vld [vmem:[#allocation15_spill] sm:$0xff] }
 0x72c   :  { %v3948_v36 = vadd.f32 %v3947_v16, %v3578_v48  ;;  %v3949_v17 = vpop.f32.mrb[74].mxu0  ;;  %v3990_v33 = vpop.f32.mrb[74].mxu1  ;;  %v3989_v14 = vadd.f32 %v3988_v60, %v3586_v32  ;;  %v24257_v32 = vld [vmem:[#allocation13_spill] sm:$0xff]  ;;  %v896_v60 = vadd.f32 %v24259_v37, %v18177_v8 }
 0x72d   :  { %v14373_v7 = vmul.f32 -1.442695, %v3946_v3  ;;  %v3950_v38 = vpop.f32.mrb[75].mxu0  ;;  %v3991_v0 = vpop.f32.mrb[75].mxu1  ;;  %v14375_v30 = vmul.f32 -1.442695, %v3987_v31  ;;  %v894_v31 = vadd.f32 %v24257_v32, %v18157_v59 }
 0x72e   :  { %v14374_v26 = vmul.f32 -1.442695, %v3948_v36 }
 0x72f   :  { %17037 = vpow2.f32 %v14373_v7 }
 0x730   :  { %17039 = vpow2.f32 %v14374_v26  ;;  %v24256_v26 = vld [vmem:[#allocation12_spill] sm:$0xff] }
 0x731   :  { %17041 = vtanh.f32 %v3989_v14  ;;  %v781_v6 = vadd.f32 %v24256_v26, %v18149_v54  ;;  %v24258_v14 = vld [vmem:[#allocation14_spill] sm:$0xff] }
 0x732   :  { %17043 = vpow2.f32 %v14375_v30  ;;  %v783_v30 = vadd.f32 %v24258_v14, %v24212_v61 }
 0x739   :  { %v17038_v27 = vpop.eup %17037 }
 0x73a   :  { %v4285_v23 = vadd.f32 1.0, %v17038_v27  ;;  %v17040_v35 = vpop.eup %17039 }
 0x73b   :  { %v4286_v17 = vadd.f32 1.0, %v17040_v35  ;;  %v17042_v16 = vpop.eup %17041 }
 0x73c   :  { %17045 = vrcp.f32 %v4285_v23  ;;  %v17044_v0 = vpop.eup %17043 }
 0x73d   :  { %17047 = vrcp.f32 %v4286_v17  ;;  %v4287_v33 = vadd.f32 1.0, %v17044_v0 }
 0x73f   :  { %17049 = vrcp.f32 %v4287_v33 }
 0x746   :  { %v17046_v3 = vpop.eup %17045 }
 0x747   :  { %v4296_v7 = vmul.f32 %v17046_v3, %v17042_v16  ;;  %v17048_v38 = vpop.eup %17047 }
 0x748   :  { %v4295_v27 = vmul.f32 %v17048_v38, %v19389_v49 }
 0x749   :  { %v17050_v37 = vpop.eup %17049 }
 0x74a   :  { %v4224_v9 = vpop.f32.mrb[76].mxu0  ;;  %v4265_v36 = vpop.f32.mrb[76].mxu1  ;;  %v19843_v48 = vadd.f32 %v4296_v7, %v4295_v27 }
 0x74b   :  { %v4272_v23 = vadd.f32 %v4224_v9, %v781_v6  ;;  %v4274_v35 = vadd.f32 %v4265_v36, %v894_v31  ;;  %v4226_v17 = vpop.f32.mrb[77].mxu0  ;;  %v4267_v16 = vpop.f32.mrb[77].mxu1 }
 0x74c   :  { %v4273_v0 = vadd.f32 %v4226_v17, %v783_v30  ;;  %v4275_v3 = vadd.f32 %v4267_v16, %v896_v60  ;;  %v4228_v26 = vpop.f32.mrb[78].mxu0  ;;  %v4269_v32 = vpop.f32.mrb[78].mxu1  ;;  %17051 = vtanh.f32 %v19843_v48 }
 0x74d   :  { %v14377_v49 = vmul.f32 -1.442695, %v4272_v23  ;;  %v4229_v38 = vpop.f32.mrb[79].mxu0  ;;  %v4270_v14 = vpop.f32.mrb[79].mxu1  ;;  %v14379_v27 = vmul.f32 -1.442695, %v4274_v35 }
 0x74e   :  { %v14378_v61 = vmul.f32 -1.442695, %v4273_v0  ;;  %v19856_v38 = vld [vmem:[%s23733_s6] ss:$16 sps:$4 sm:$0xff]   ;;  %v19861_v14 = vld [vmem:[%s23733_s6 + $0x8] ss:$16 sps:$4 sm:$0xff]  }
 0x74f   :  { %17053 = vpow2.f32 %v14377_v49 }
 0x750   :  { %17055 = vpow2.f32 %v14378_v61 }
 0x751   :  { %17057 = vtanh.f32 %v4275_v3 }
 0x752   :  { %17059 = vpow2.f32 %v14379_v27  ;;  %v19882_v27 = vld [vmem:[%s23733_s6 + $0x20] ss:$16 sps:$4 sm:$0xff]  }
 0x756   :  { %v17052_v7 = vpop.eup %17051 }
 0x757   :  { %v4299_v6 = vmul.f32 %v17052_v7, %v17050_v37  ;;  %v19873_v7 = vld [vmem:[%s23733_s6 + $0x2c] ss:$16 sps:$4 sm:$0xff]  }
 0x759   :  { %v17054_v31 = vpop.eup %17053  ;;  %14376 = vst [vmem:[%s23736_s11 + $0x18] sm:$0xff] %v4299_v6  ;;  %v4327_v33 = vpack.c.bf16 %v4299_v6, %v4299_v6  ;;  %v19887_v6 = vld [vmem:[%s23733_s6 + $0x28] ss:$16 sps:$4 sm:$0xff]  }
 0x75a   :  { %v4311_v9 = vadd.f32 1.0, %v17054_v31  ;;  %v17056_v30 = vpop.eup %17055  ;;  %v19894_v31 = vld [vmem:[%s23733_s6 + $0x44] ss:$16 sps:$4 sm:$0xff]  }
 0x75b   :  { %v4312_v60 = vadd.f32 1.0, %v17056_v30  ;;  %4766 = vmatprep.mubr.bf16.mxu0 %v4327_v33  ;;  %4807 = vmatprep.mubr.bf16.mxu1 %v4327_v33  ;;  %v17058_v61 = vpop.eup %17057  ;;  %v19908_v33 = vld [vmem:[%s23733_s6 + $0x40] ss:$16 sps:$4 sm:$0xff]   ;;  %v19913_v30 = vld [vmem:[%s23733_s6 + $0x48] ss:$16 sps:$4 sm:$0xff]  }
 0x75c   :  { %17061 = vrcp.f32 %v4311_v9  ;;  %v17060_v36 = vpop.eup %17059  ;;  %v19899_v9 = vld [vmem:[%s23733_s6 + $0x4c] ss:$16 sps:$4 sm:$0xff]  }
 0x75d   :  { %17063 = vrcp.f32 %v4312_v60  ;;  %v4313_v16 = vadd.f32 1.0, %v17060_v36  ;;  %v19920_v60 = vld [vmem:[%s23733_s6 + $0x64] ss:$16 sps:$4 sm:$0xff]   ;;  %v19932_v36 = vld [vmem:[%s23733_s6 + $0x60] ss:$16 sps:$4 sm:$0xff]  }
 0x75f   :  { %17065 = vrcp.f32 %v4313_v16  ;;  %v19956_v16 = vld [vmem:[%s23733_s6 + $0x80] ss:$16 sps:$4 sm:$0xff]  }
 0x760   :  { %24261 = vst [vmem:[#allocation9_spill] sm:$0xff] %v19956_v16 }
 0x766   :  { %v17062_v23 = vpop.eup %17061 }
 0x767   :  { %v4322_v35 = vmul.f32 %v17062_v23, %v17058_v61  ;;  %v17064_v17 = vpop.eup %17063  ;;  %v19925_v61 = vld [vmem:[%s23733_s6 + $0x6c] ss:$16 sps:$4 sm:$0xff]   ;;  %v19937_v23 = vld [vmem:[%s23733_s6 + $0x68] ss:$16 sps:$4 sm:$0xff]  }
 0x768   :  { %v4321_v0 = vmul.f32 %v17064_v17, %v19396_v15  ;;  %v19868_v15 = vld [vmem:[%s23733_s6 + $0x24] ss:$16 sps:$4 sm:$0xff]   ;;  %v19949_v17 = vld [vmem:[%s23733_s6 + $0x8c] ss:$16 sps:$4 sm:$0xff]  }
 0x769   :  { %v17066_v26 = vpop.eup %17065  ;;  %24260 = vst [vmem:[#allocation8_spill] sm:$0xff] %v19949_v17 }
 0x76a   :  { %v19850_v3 = vadd.f32 %v4322_v35, %v4321_v0  ;;  %v19944_v35 = vld [vmem:[%s23733_s6 + $0x84] ss:$16 sps:$4 sm:$0xff]   ;;  %v19961_v0 = vld [vmem:[%s23733_s6 + $0x88] ss:$16 sps:$4 sm:$0xff]  }
 0x76b   :  { %24262 = vst [vmem:[#allocation10_spill] sm:$0xff] %v19961_v0 }
 0x76c   :  { %17067 = vtanh.f32 %v19850_v3 }
 0x776   :  { %v17068_v32 = vpop.eup %17067 }
 0x777   :  { %v4325_v49 = vmul.f32 %v17068_v32, %v17066_v26  ;;  %v19968_v26 = vld [vmem:[%s23733_s6 + $0xa4] ss:$16 sps:$4 sm:$0xff]   ;;  %v19973_v32 = vld [vmem:[%s23733_s6 + $0xac] ss:$16 sps:$4 sm:$0xff]  }
 0x778   :  { %24263 = vst [vmem:[#allocation11_spill] sm:$0xff] %v19968_v26  ;;  %24264 = vst [vmem:[#allocation4_spill] sm:$0xff] %v19973_v32 }
 0x779   :  { %v19863_v37 = vpack.c.bf16 %v4325_v49, %v4325_v49  ;;  %v19980_v49 = vld [vmem:[%s23733_s6 + $0xa0] ss:$16 sps:$4 sm:$0xff]  }
 0x77a   :  { %24265 = vst [vmem:[#allocation5_spill] sm:$0xff] %v19980_v49 }
 0x77b   :  { %4767 = vmatmul.mubr.bf16.vlgmr.msra.gmra.mrb[80].mxu0 %v19863_v37  ;;  %4808 = vmatmul.mubr.bf16.vlgmr.msra.gmra.mrb[80].mxu1 %v19863_v37 }
 0x77c   :  { %5014 = vmatpush1.bf16.msra.mxu0 %v19856_v38  ;;  %5055 = vmatpush1.bf16.msra.mxu1 %v19861_v14 }
 0x77d   :  { %5015 = vmatprep.subr.bf16.mxu0 %v19868_v15  ;;  %5056 = vmatprep.subr.bf16.mxu1 %v19873_v7 }
 0x77e   :  { %5045 = vmatprep.mubr.bf16.mxu0 %v24094_v58  ;;  %5086 = vmatprep.mubr.bf16.mxu1 %v24094_v58 }
 0x780   :  { %5016 = vmatpush1.bf16.msra.mxu0 %v19882_v27  ;;  %5057 = vmatpush1.bf16.msra.mxu1 %v19887_v6 }
 0x781   :  { %5017 = vmatprep.subr.bf16.mxu0 %v19894_v31  ;;  %5058 = vmatprep.subr.bf16.mxu1 %v19899_v9 }
 0x784   :  { %5018 = vmatpush1.bf16.msra.mxu0 %v19908_v33  ;;  %5059 = vmatpush1.bf16.msra.mxu1 %v19913_v30 }
 0x785   :  { %5019 = vmatprep.subr.bf16.mxu0 %v19920_v60  ;;  %5060 = vmatprep.subr.bf16.mxu1 %v19925_v61 }
 0x788   :  { %5020 = vmatpush1.bf16.msra.mxu0 %v19932_v36  ;;  %5061 = vmatpush1.bf16.msra.mxu1 %v19937_v23 }
 0x789   :  { %5021 = vmatprep.subr.bf16.mxu0 %v19944_v35  ;;  %5062 = vmatprep.subr.bf16.mxu1 %v19949_v17  ;;  %v19985_v17 = vld [vmem:[%s23733_s6 + $0xa8] ss:$16 sps:$4 sm:$0xff]  }
 0x78a   :  { %24266 = vst [vmem:[#allocation6_spill] sm:$0xff] %v19985_v17 }
 0x78c   :  { %5022 = vmatpush1.bf16.msra.mxu0 %v19956_v16  ;;  %5063 = vmatpush1.bf16.msra.mxu1 %v19961_v0  ;;  %v19992_v16 = vld [vmem:[%s23733_s6 + $0xc4] ss:$16 sps:$4 sm:$0xff]   ;;  %v19997_v0 = vld [vmem:[%s23733_s6 + $0xcc] ss:$16 sps:$4 sm:$0xff]  }
 0x78d   :  { %5023 = vmatprep.subr.bf16.mxu0 %v19968_v26  ;;  %5064 = vmatprep.subr.bf16.mxu1 %v19973_v32  ;;  %24267 = vst [vmem:[#allocation7_spill] sm:$0xff] %v19992_v16  ;;  %24268 = vst [vmem:[#allocation94_spill] sm:$0xff] %v19997_v0  ;;  %v20004_v26 = vld [vmem:[%s23733_s6 + $0xc0] ss:$16 sps:$4 sm:$0xff]   ;;  %v20009_v32 = vld [vmem:[%s23733_s6 + $0xc8] ss:$16 sps:$4 sm:$0xff]  }
 0x790   :  { %5024 = vmatpush1.bf16.msra.mxu0 %v19980_v49  ;;  %5065 = vmatpush1.bf16.msra.mxu1 %v19985_v17  ;;  %v20016_v49 = vld [vmem:[%s23733_s6 + $0xe4] ss:$16 sps:$4 sm:$0xff]   ;;  %v20021_v17 = vld [vmem:[%s23733_s6 + $0xec] ss:$16 sps:$4 sm:$0xff]  }
 0x791   :  { %5025 = vmatprep.subr.bf16.mxu0 %v19992_v16  ;;  %5066 = vmatprep.subr.bf16.mxu1 %v19997_v0  ;;  %v20028_v16 = vld [vmem:[%s23733_s6 + $0xe0] ss:$16 sps:$4 sm:$0xff]   ;;  %v20033_v0 = vld [vmem:[%s23733_s6 + $0xe8] ss:$16 sps:$4 sm:$0xff]  }
 0x794   :  { %5026 = vmatpush1.bf16.msra.mxu0 %v20004_v26  ;;  %5067 = vmatpush1.bf16.msra.mxu1 %v20009_v32 }
 0x795   :  { %5027 = vmatprep.subr.bf16.mxu0 %v20016_v49  ;;  %5068 = vmatprep.subr.bf16.mxu1 %v20021_v17 }
 0x798   :  { %5028 = vmatpush1.bf16.msra.mxu0 %v20028_v16  ;;  %5069 = vmatpush1.bf16.msra.mxu1 %v20033_v0 }
 0x799   :  { %5557 = vmatprep.subr.bf16.mxu0 %v19434_v24  ;;  %5598 = vmatprep.subr.bf16.mxu1 %v19439_v34  ;;  %v24269_v24 = vld [vmem:[#allocation52_spill] sm:$0xff]  ;;  %v24270_v34 = vld [vmem:[#allocation53_spill] sm:$0xff] }
 0x79b   :  { %5046 = vmatmul.mubr.bf16.vlgmr.msra.gmra.mrb[84].mxu0 %v19863_v37  ;;  %5087 = vmatmul.mubr.bf16.vlgmr.msra.gmra.mrb[84].mxu1 %v19863_v37 }
 0x79c   :  { %5558 = vmatpush1.bf16.msra.mxu0 %v19444_v21  ;;  %5599 = vmatpush1.bf16.msra.mxu1 %v19449_v28  ;;  %v24271_v21 = vld [vmem:[#allocation54_spill] sm:$0xff]  ;;  %v24272_v28 = vld [vmem:[#allocation55_spill] sm:$0xff] }
 0x79d   :  { %5559 = vmatprep.subr.bf16.mxu0 %v19458_v52  ;;  %5600 = vmatprep.subr.bf16.mxu1 %v19463_v22  ;;  %v24273_v52 = vld [vmem:[#allocation56_spill] sm:$0xff]  ;;  %v24274_v22 = vld [vmem:[#allocation57_spill] sm:$0xff] }
 0x7a0   :  { %5560 = vmatpush1.bf16.msra.mxu0 %v19468_v19  ;;  %5601 = vmatpush1.bf16.msra.mxu1 %v19473_v11  ;;  %v24275_v19 = vld [vmem:[#allocation58_spill] sm:$0xff]  ;;  %v24276_v11 = vld [vmem:[#allocation59_spill] sm:$0xff] }
 0x7a1   :  { %5561 = vmatprep.subr.bf16.mxu0 %v19482_v56  ;;  %5602 = vmatprep.subr.bf16.mxu1 %v19487_v39  ;;  %v24277_v56 = vld [vmem:[#allocation60_spill] sm:$0xff]  ;;  %v24278_v39 = vld [vmem:[#allocation61_spill] sm:$0xff] }
 0x7a4   :  { %5562 = vmatpush1.bf16.msra.mxu0 %v19492_v20  ;;  %5603 = vmatpush1.bf16.msra.mxu1 %v19497_v53  ;;  %v24279_v20 = vld [vmem:[#allocation72_spill] sm:$0xff]  ;;  %v24280_v53 = vld [vmem:[#allocation73_spill] sm:$0xff] }
 0x7a5   :  { %5563 = vmatprep.subr.bf16.mxu0 %v19506_v51  ;;  %5604 = vmatprep.subr.bf16.mxu1 %v19511_v45  ;;  %v24281_v51 = vld [vmem:[#allocation74_spill] sm:$0xff]  ;;  %v24282_v45 = vld [vmem:[#allocation75_spill] sm:$0xff] }
 0x7a8   :  { %5564 = vmatpush1.bf16.msra.mxu0 %v19516_v40  ;;  %5605 = vmatpush1.bf16.msra.mxu1 %v19521_v62  ;;  %v24283_v40 = vld [vmem:[#allocation76_spill] sm:$0xff]  ;;  %v24284_v62 = vld [vmem:[#allocation77_spill] sm:$0xff] }
 0x7a9   :  { %5565 = vmatprep.subr.bf16.mxu0 %v19530_v41  ;;  %5606 = vmatprep.subr.bf16.mxu1 %v19535_v42  ;;  %v24285_v41 = vld [vmem:[#allocation78_spill] sm:$0xff]  ;;  %v24286_v42 = vld [vmem:[#allocation79_spill] sm:$0xff] }
 0x7ac   :  { %5566 = vmatpush1.bf16.msra.mxu0 %v19540_v63  ;;  %5607 = vmatpush1.bf16.msra.mxu1 %v19545_v43  ;;  %v24287_v63 = vld [vmem:[#allocation83_spill] sm:$0xff]  ;;  %v24288_v43 = vld [vmem:[#allocation82_spill] sm:$0xff] }
 0x7ad   :  { %5567 = vmatprep.subr.bf16.mxu0 %v19554_v18  ;;  %5608 = vmatprep.subr.bf16.mxu1 %v19559_v1  ;;  %v24289_v18 = vld [vmem:[#allocation81_spill] sm:$0xff]  ;;  %v24290_v1 = vld [vmem:[#allocation80_spill] sm:$0xff] }
 0x7b0   :  { %5568 = vmatpush1.bf16.msra.mxu0 %v19564_v44  ;;  %5609 = vmatpush1.bf16.msra.mxu1 %v19569_v46  ;;  %v24291_v44 = vld [vmem:[#allocation84_spill] sm:$0xff]  ;;  %v24292_v46 = vld [vmem:[#allocation85_spill] sm:$0xff] }
 0x7b1   :  { %5569 = vmatprep.subr.bf16.mxu0 %v19578_v2  ;;  %5610 = vmatprep.subr.bf16.mxu1 %v19583_v47  ;;  %v24293_v2 = vld [vmem:[#allocation86_spill] sm:$0xff]  ;;  %v24294_v47 = vld [vmem:[#allocation87_spill] sm:$0xff] }
 0x7b4   :  { %5570 = vmatpush1.bf16.msra.mxu0 %v19588_v50  ;;  %5611 = vmatpush1.bf16.msra.mxu1 %v19593_v10  ;;  %v24295_v50 = vld [vmem:[#allocation88_spill] sm:$0xff]  ;;  %v24296_v10 = vld [vmem:[#allocation89_spill] sm:$0xff] }
 0x7b5   :  { %5571 = vmatprep.subr.bf16.mxu0 %v19602_v12  ;;  %5612 = vmatprep.subr.bf16.mxu1 %v19607_v13  ;;  %v24297_v12 = vld [vmem:[#allocation90_spill] sm:$0xff]  ;;  %v24298_v13 = vld [vmem:[#allocation91_spill] sm:$0xff] }
 0x7b8   :  { %5572 = vmatpush1.bf16.msra.mxu0 %v19612_v57  ;;  %5613 = vmatpush1.bf16.msra.mxu1 %v19617_v5  ;;  %v24299_v57 = vld [vmem:[#allocation92_spill] sm:$0xff]  ;;  %v24300_v5 = vld [vmem:[#allocation93_spill] sm:$0xff] }
 0x7b9   :  { %5573 = vmatprep.subr.bf16.mxu0 %v19626_v29  ;;  %5614 = vmatprep.subr.bf16.mxu1 %v19631_v25  ;;  %v4392_v29 = vld [vmem:[%s23735_s9] sm:$0xf] }
 0x7ba   :  { %v24301_v25 = vld [vmem:[#allocation3_spill] sm:$0xff] }
 0x7bb   :  { %v4397_v37 = vrot.slane %v4392_v29, %v24301_v25 }
 0x7bc   :  { %5574 = vmatpush1.bf16.msra.mxu0 %v24269_v24  ;;  %5615 = vmatpush1.bf16.msra.mxu1 %v24270_v34  ;;  %v24302_v24 = vld [vmem:[#allocation70_spill] sm:$0xff] }
 0x7bd   :  { %5575 = vmatprep.subr.bf16.mxu0 %v24271_v21  ;;  %5616 = vmatprep.subr.bf16.mxu1 %v24272_v28  ;;  %v4401_v34 = vrot.slane %v4392_v29, %v24302_v24 }
 0x7c0   :  { %5576 = vmatpush1.bf16.msra.mxu0 %v24273_v52  ;;  %5617 = vmatpush1.bf16.msra.mxu1 %v24274_v22 }
 0x7c1   :  { %5577 = vmatprep.subr.bf16.mxu0 %v24275_v19  ;;  %5618 = vmatprep.subr.bf16.mxu1 %v24276_v11 }
 0x7c4   :  { %5578 = vmatpush1.bf16.msra.mxu0 %v24277_v56  ;;  %5619 = vmatpush1.bf16.msra.mxu1 %v24278_v39 }
 0x7c5   :  { %5579 = vmatprep.subr.bf16.mxu0 %v24279_v20  ;;  %5620 = vmatprep.subr.bf16.mxu1 %v24280_v53 }
 0x7c8   :  { %5580 = vmatpush1.bf16.msra.mxu0 %v24281_v51  ;;  %5621 = vmatpush1.bf16.msra.mxu1 %v24282_v45 }
 0x7c9   :  { %5581 = vmatprep.subr.bf16.mxu0 %v24283_v40  ;;  %5622 = vmatprep.subr.bf16.mxu1 %v24284_v62  ;;  %v4405_v40 = vrot.slane %v4392_v29, %v18152_v55  ;;  %v4409_v62 = vrot.slane %v4392_v29, %v18169_v4 }
 0x7cc   :  { %5582 = vmatpush1.bf16.msra.mxu0 %v24285_v41  ;;  %5623 = vmatpush1.bf16.msra.mxu1 %v24286_v42 }
 0x7cd   :  { %5583 = vmatprep.subr.bf16.mxu0 %v24287_v63  ;;  %5624 = vmatprep.subr.bf16.mxu1 %v24288_v43 }
 0x7d0   :  { %5584 = vmatpush1.bf16.msra.mxu0 %v24289_v18  ;;  %5625 = vmatpush1.bf16.msra.mxu1 %v24290_v1 }
 0x7d1   :  { %5585 = vmatprep.subr.bf16.mxu0 %v24291_v44  ;;  %5626 = vmatprep.subr.bf16.mxu1 %v24292_v46 }
 0x7d4   :  { %5586 = vmatpush1.bf16.msra.mxu0 %v24293_v2  ;;  %5627 = vmatpush1.bf16.msra.mxu1 %v24294_v47 }
 0x7d5   :  { %5587 = vmatprep.subr.bf16.mxu0 %v24295_v50  ;;  %5628 = vmatprep.subr.bf16.mxu1 %v24296_v10 }
 0x7d8   :  { %5588 = vmatpush1.bf16.msra.mxu0 %v24297_v12  ;;  %5629 = vmatpush1.bf16.msra.mxu1 %v24298_v13  ;;  %v24303_v13 = vld [vmem:[#allocation16_spill] sm:$0xff] }
 0x7d9   :  { %5836 = vmatprep.subr.bf16.mxu0 %v24299_v57  ;;  %5877 = vmatprep.subr.bf16.mxu1 %v24300_v5  ;;  %v785_v57 = vadd.f32 %v24303_v13, %v18149_v54  ;;  %v24304_v5 = vld [vmem:[#allocation17_spill] sm:$0xff] }
 0x7da   :  { %v898_v29 = vadd.f32 %v24304_v5, %v18157_v59 }
 0x84e   :  { %v4768_v21 = vpop.f32.mrb[80].mxu0  ;;  %v4809_v28 = vpop.f32.mrb[80].mxu1 }
 0x84f   :  { %v4769_v52 = vadd.f32 %v4768_v21, %v4397_v37  ;;  %v4770_v22 = vpop.f32.mrb[81].mxu0  ;;  %v4811_v19 = vpop.f32.mrb[81].mxu1  ;;  %v4810_v41 = vadd.f32 %v4809_v28, %v4405_v40  ;;  %v24306_v21 = vld [vmem:[#allocation18_spill] sm:$0xff] }
 0x850   :  { %v4771_v11 = vadd.f32 %v4770_v22, %v4401_v34  ;;  %v4772_v56 = vpop.f32.mrb[82].mxu0  ;;  %v4813_v39 = vpop.f32.mrb[82].mxu1  ;;  %v4812_v42 = vadd.f32 %v4811_v19, %v4409_v62  ;;  %v24305_v34 = vld [vmem:[#allocation71_spill] sm:$0xff] }
 0x851   :  { %v14476_v20 = vmul.f32 -1.442695, %v4769_v52  ;;  %v4773_v53 = vpop.f32.mrb[83].mxu0  ;;  %v4814_v51 = vpop.f32.mrb[83].mxu1  ;;  %v14478_v63 = vmul.f32 -1.442695, %v4810_v41  ;;  %v787_v28 = vadd.f32 %v24306_v21, %v24305_v34 }
 0x852   :  { %v14477_v45 = vmul.f32 -1.442695, %v4771_v11  ;;  %v24307_v52 = vld [vmem:[#allocation19_spill] sm:$0xff] }
 0x853   :  { %17069 = vpow2.f32 %v14476_v20  ;;  %v900_v22 = vadd.f32 %v24307_v52, %v18177_v8 }
 0x854   :  { %17071 = vpow2.f32 %v14477_v45 }
 0x855   :  { %17073 = vtanh.f32 %v4812_v42 }
 0x856   :  { %17075 = vpow2.f32 %v14478_v63 }
 0x85d   :  { %v17070_v43 = vpop.eup %17069 }
 0x85e   :  { %v5108_v18 = vadd.f32 1.0, %v17070_v43  ;;  %v17072_v1 = vpop.eup %17071 }
 0x85f   :  { %v5109_v44 = vadd.f32 1.0, %v17072_v1  ;;  %v17074_v46 = vpop.eup %17073 }
 0x860   :  { %17077 = vrcp.f32 %v5108_v18  ;;  %v17076_v2 = vpop.eup %17075 }
 0x861   :  { %17079 = vrcp.f32 %v5109_v44  ;;  %v5110_v12 = vadd.f32 1.0, %v17076_v2 }
 0x863   :  { %17081 = vrcp.f32 %v5110_v12 }
 0x86a   :  { %v17078_v47 = vpop.eup %17077 }
 0x86b   :  { %v5119_v50 = vmul.f32 %v17078_v47, %v17074_v46  ;;  %v17080_v10 = vpop.eup %17079 }
 0x86c   :  { %v5118_v37 = vmul.f32 %v17080_v10, %v19843_v48 }
 0x86d   :  { %v17082_v18 = vpop.eup %17081 }
 0x86e   :  { %v5047_v19 = vpop.f32.mrb[84].mxu0  ;;  %v5088_v11 = vpop.f32.mrb[84].mxu1  ;;  %v20123_v56 = vadd.f32 %v5119_v50, %v5118_v37 }
 0x86f   :  { %v5095_v39 = vadd.f32 %v5047_v19, %v785_v57  ;;  %v5097_v20 = vadd.f32 %v5088_v11, %v898_v29  ;;  %v5049_v53 = vpop.f32.mrb[85].mxu0  ;;  %v5090_v51 = vpop.f32.mrb[85].mxu1 }
 0x870   :  { %v5096_v45 = vadd.f32 %v5049_v53, %v787_v28  ;;  %v5098_v40 = vadd.f32 %v5090_v51, %v900_v22  ;;  %v5051_v62 = vpop.f32.mrb[86].mxu0  ;;  %v5092_v41 = vpop.f32.mrb[86].mxu1  ;;  %17083 = vtanh.f32 %v20123_v56  ;;  %v20250_v53 = vld [vmem:[%s23730_s8 + $0x60] ss:$16 sps:$4 sm:$0xff]   ;;  %v20255_v51 = vld [vmem:[%s23730_s8 + $0x68] ss:$16 sps:$4 sm:$0xff]  }
 0x871   :  { %v14480_v48 = vmul.f32 -1.442695, %v5095_v39  ;;  %v5052_v42 = vpop.f32.mrb[87].mxu0  ;;  %v5093_v63 = vpop.f32.mrb[87].mxu1  ;;  %v14482_v44 = vmul.f32 -1.442695, %v5097_v20 }
 0x872   :  { %v14481_v43 = vmul.f32 -1.442695, %v5096_v45  ;;  %v20245_v20 = vld [vmem:[%s23730_s8 + $0x6c] ss:$16 sps:$4 sm:$0xff]   ;;  %v20264_v45 = vld [vmem:[%s23730_s8 + $0x84] ss:$16 sps:$4 sm:$0xff]  }
 0x873   :  { %17085 = vpow2.f32 %v14480_v48  ;;  %v20274_v62 = vld [vmem:[%s23730_s8 + $0x80] ss:$16 sps:$4 sm:$0xff]   ;;  %v20279_v41 = vld [vmem:[%s23730_s8 + $0x88] ss:$16 sps:$4 sm:$0xff]   ;;  %v20288_v48 = vld [vmem:[%s23730_s8 + $0xa4] ss:$16 sps:$4 sm:$0xff]  }
 0x874   :  { %17087 = vpow2.f32 %v14481_v43  ;;  %v20293_v42 = vld [vmem:[%s23730_s8 + $0xac] ss:$16 sps:$4 sm:$0xff]   ;;  %v20298_v63 = vld [vmem:[%s23730_s8 + $0xa0] ss:$16 sps:$4 sm:$0xff]   ;;  %v20303_v43 = vld [vmem:[%s23730_s8 + $0xa8] ss:$16 sps:$4 sm:$0xff]  }
 0x875   :  { %17089 = vtanh.f32 %v5098_v40  ;;  %v20269_v40 = vld [vmem:[%s23730_s8 + $0x8c] ss:$16 sps:$4 sm:$0xff]  }
 0x876   :  { %17091 = vpow2.f32 %v14482_v44  ;;  %v20322_v44 = vld [vmem:[%s23730_s8 + $0xc0] ss:$16 sps:$4 sm:$0xff]  }
 0x87a   :  { %v17084_v1 = vpop.eup %17083 }
 0x87b   :  { %v5122_v46 = vmul.f32 %v17084_v1, %v17082_v18  ;;  %v20312_v18 = vld [vmem:[%s23730_s8 + $0xc4] ss:$16 sps:$4 sm:$0xff]   ;;  %v20317_v1 = vld [vmem:[%s23730_s8 + $0xcc] ss:$16 sps:$4 sm:$0xff]  }
 0x87d   :  { %v17086_v2 = vpop.eup %17085  ;;  %14479 = vst [vmem:[%s23736_s11 + $0x20] sm:$0xff] %v5122_v46  ;;  %v5150_v50 = vpack.c.bf16 %v5122_v46, %v5122_v46  ;;  %v20327_v46 = vld [vmem:[%s23730_s8 + $0xc8] ss:$16 sps:$4 sm:$0xff]  }
 0x87e   :  { %v5134_v47 = vadd.f32 1.0, %v17086_v2  ;;  %v17088_v10 = vpop.eup %17087  ;;  %v20336_v2 = vld [vmem:[%s23730_s8 + $0xe4] ss:$16 sps:$4 sm:$0xff]  }
 0x87f   :  { %v5135_v12 = vadd.f32 1.0, %v17088_v10  ;;  %5589 = vmatprep.mubr.bf16.mxu0 %v5150_v50  ;;  %5630 = vmatprep.mubr.bf16.mxu1 %v5150_v50  ;;  %v17090_v13 = vpop.eup %17089  ;;  %v20346_v50 = vld [vmem:[%s23730_s8 + $0xe0] ss:$16 sps:$4 sm:$0xff]   ;;  %v20351_v10 = vld [vmem:[%s23730_s8 + $0xe8] ss:$16 sps:$4 sm:$0xff]  }
 0x880   :  { %17093 = vrcp.f32 %v5134_v47  ;;  %v17092_v57 = vpop.eup %17091  ;;  %v20341_v47 = vld [vmem:[%s23730_s8 + $0xec] ss:$16 sps:$4 sm:$0xff]  }
 0x881   :  { %17095 = vrcp.f32 %v5135_v12  ;;  %v5136_v21 = vadd.f32 1.0, %v17092_v57  ;;  %v20360_v12 = vld [vmem:[%s23730_s8 + $0x104] ss:$16 sps:$4 sm:$0xff]   ;;  %v20370_v57 = vld [vmem:[%s23730_s8 + $0x100] ss:$16 sps:$4 sm:$0xff]  }
 0x882   :  { %24317 = vst [vmem:[#allocation95_spill] sm:$0xff] %v20370_v57 }
 0x883   :  { %17097 = vrcp.f32 %v5136_v21  ;;  %v20394_v21 = vld [vmem:[%s23730_s8 + $0x120] ss:$16 sps:$4 sm:$0xff]  }
 0x884   :  { %24321 = vst [vmem:[#allocation12_spill] sm:$0xff] %v20394_v21 }
 0x88a   :  { %v17094_v5 = vpop.eup %17093 }
 0x88b   :  { %v5145_v29 = vmul.f32 %v17094_v5, %v17090_v13  ;;  %v17096_v37 = vpop.eup %17095  ;;  %v20365_v13 = vld [vmem:[%s23730_s8 + $0x10c] ss:$16 sps:$4 sm:$0xff]   ;;  %v20375_v5 = vld [vmem:[%s23730_s8 + $0x108] ss:$16 sps:$4 sm:$0xff]  }
 0x88c   :  { %v5144_v28 = vmul.f32 %v17096_v37, %v19850_v3  ;;  %v24308_v3 = vld [vmem:[#allocation8_spill] sm:$0xff]  ;;  %24318 = vst [vmem:[#allocation96_spill] sm:$0xff] %v20375_v5 }
 0x88d   :  { %v17098_v22 = vpop.eup %17097  ;;  %v20389_v37 = vld [vmem:[%s23730_s8 + $0x12c] ss:$16 sps:$4 sm:$0xff]  }
 0x88e   :  { %v20130_v52 = vadd.f32 %v5145_v29, %v5144_v28  ;;  %v20384_v29 = vld [vmem:[%s23730_s8 + $0x124] ss:$16 sps:$4 sm:$0xff]   ;;  %24320 = vst [vmem:[#allocation98_spill] sm:$0xff] %v20389_v37  ;;  %v20399_v28 = vld [vmem:[%s23730_s8 + $0x128] ss:$16 sps:$4 sm:$0xff]  }
 0x88f   :  { %24319 = vst [vmem:[#allocation97_spill] sm:$0xff] %v20384_v29  ;;  %24322 = vst [vmem:[#allocation13_spill] sm:$0xff] %v20399_v28 }
 0x890   :  { %17099 = vtanh.f32 %v20130_v52 }
 0x89a   :  { %v17100_v19 = vpop.eup %17099 }
 0x89b   :  { %v5148_v11 = vmul.f32 %v17100_v19, %v17098_v22  ;;  %v20408_v22 = vld [vmem:[%s23730_s8 + $0x144] ss:$16 sps:$4 sm:$0xff]   ;;  %v20413_v19 = vld [vmem:[%s23730_s8 + $0x14c] ss:$16 sps:$4 sm:$0xff]  }
 0x89c   :  { %24323 = vst [vmem:[#allocation14_spill] sm:$0xff] %v20408_v22  ;;  %24324 = vst [vmem:[#allocation15_spill] sm:$0xff] %v20413_v19 }
 0x89d   :  { %v5149_v39 = vpack.c.bf16 %v5148_v11, %v5148_v11  ;;  %v20418_v11 = vld [vmem:[%s23730_s8 + $0x140] ss:$16 sps:$4 sm:$0xff]  }
 0x89e   :  { %24325 = vst [vmem:[#allocation52_spill] sm:$0xff] %v20418_v11 }
 0x89f   :  { %5590 = vmatmul.mubr.bf16.vlgmr.msra.gmra.mrb[88].mxu0 %v5149_v39  ;;  %5631 = vmatmul.mubr.bf16.vlgmr.msra.gmra.mrb[88].mxu1 %v5149_v39 }
 0x8a0   :  { %5837 = vmatpush1.bf16.msra.mxu0 %v19856_v38  ;;  %5878 = vmatpush1.bf16.msra.mxu1 %v19861_v14  ;;  %v24309_v38 = vld [vmem:[#allocation9_spill] sm:$0xff]  ;;  %v24310_v14 = vld [vmem:[#allocation10_spill] sm:$0xff] }
 0x8a1   :  { %5838 = vmatprep.subr.bf16.mxu0 %v19868_v15  ;;  %5879 = vmatprep.subr.bf16.mxu1 %v19873_v7  ;;  %v24311_v15 = vld [vmem:[#allocation11_spill] sm:$0xff]  ;;  %v24312_v7 = vld [vmem:[#allocation4_spill] sm:$0xff] }
 0x8a2   :  { %5868 = vmatprep.mubr.bf16.mxu0 %v24094_v58  ;;  %5909 = vmatprep.mubr.bf16.mxu1 %v24094_v58 }
 0x8a4   :  { %5839 = vmatpush1.bf16.msra.mxu0 %v19882_v27  ;;  %5880 = vmatpush1.bf16.msra.mxu1 %v19887_v6  ;;  %v24313_v27 = vld [vmem:[#allocation5_spill] sm:$0xff]  ;;  %v24314_v6 = vld [vmem:[#allocation6_spill] sm:$0xff] }
 0x8a5   :  { %5840 = vmatprep.subr.bf16.mxu0 %v19894_v31  ;;  %5881 = vmatprep.subr.bf16.mxu1 %v19899_v9  ;;  %v24315_v31 = vld [vmem:[#allocation7_spill] sm:$0xff]  ;;  %v24316_v9 = vld [vmem:[#allocation94_spill] sm:$0xff] }
 0x8a8   :  { %5841 = vmatpush1.bf16.msra.mxu0 %v19908_v33  ;;  %5882 = vmatpush1.bf16.msra.mxu1 %v19913_v30  ;;  %v20168_v33 = vld [vmem:[%s23730_s8 + $0x4] ss:$16 sps:$4 sm:$0xff]   ;;  %v20173_v30 = vld [vmem:[%s23730_s8 + $0xc] ss:$16 sps:$4 sm:$0xff]  }
 0x8a9   :  { %5842 = vmatprep.subr.bf16.mxu0 %v19920_v60  ;;  %5883 = vmatprep.subr.bf16.mxu1 %v19925_v61  ;;  %v20178_v60 = vld [vmem:[%s23730_s8] ss:$16 sps:$4 sm:$0xff]   ;;  %v20183_v61 = vld [vmem:[%s23730_s8 + $0x8] ss:$16 sps:$4 sm:$0xff]  }
 0x8ac   :  { %5843 = vmatpush1.bf16.msra.mxu0 %v19932_v36  ;;  %5884 = vmatpush1.bf16.msra.mxu1 %v19937_v23  ;;  %v20192_v36 = vld [vmem:[%s23730_s8 + $0x24] ss:$16 sps:$4 sm:$0xff]   ;;  %v20197_v23 = vld [vmem:[%s23730_s8 + $0x2c] ss:$16 sps:$4 sm:$0xff]  }
 0x8ad   :  { %5844 = vmatprep.subr.bf16.mxu0 %v19944_v35  ;;  %5885 = vmatprep.subr.bf16.mxu1 %v24308_v3  ;;  %v20202_v35 = vld [vmem:[%s23730_s8 + $0x20] ss:$16 sps:$4 sm:$0xff]   ;;  %v20432_v3 = vld [vmem:[%s23730_s8 + $0x164] ss:$16 sps:$4 sm:$0xff]  }
 0x8ae   :  { %24327 = vst [vmem:[#allocation54_spill] sm:$0xff] %v20432_v3 }
 0x8b0   :  { %5845 = vmatpush1.bf16.msra.mxu0 %v24309_v38  ;;  %5886 = vmatpush1.bf16.msra.mxu1 %v24310_v14  ;;  %v20437_v38 = vld [vmem:[%s23730_s8 + $0x16c] ss:$16 sps:$4 sm:$0xff]   ;;  %v20442_v14 = vld [vmem:[%s23730_s8 + $0x160] ss:$16 sps:$4 sm:$0xff]  }
 0x8b1   :  { %5846 = vmatprep.subr.bf16.mxu0 %v24311_v15  ;;  %5887 = vmatprep.subr.bf16.mxu1 %v24312_v7  ;;  %24328 = vst [vmem:[#allocation55_spill] sm:$0xff] %v20437_v38  ;;  %24329 = vst [vmem:[#allocation56_spill] sm:$0xff] %v20442_v14  ;;  %v20447_v15 = vld [vmem:[%s23730_s8 + $0x168] ss:$16 sps:$4 sm:$0xff]   ;;  %v20456_v7 = vld [vmem:[%s23730_s8 + $0x184] ss:$16 sps:$4 sm:$0xff]  }
 0x8b2   :  { %24330 = vst [vmem:[#allocation57_spill] sm:$0xff] %v20447_v15  ;;  %24331 = vst [vmem:[#allocation58_spill] sm:$0xff] %v20456_v7 }
 0x8b4   :  { %5847 = vmatpush1.bf16.msra.mxu0 %v24313_v27  ;;  %5888 = vmatpush1.bf16.msra.mxu1 %v24314_v6  ;;  %v20461_v27 = vld [vmem:[%s23730_s8 + $0x18c] ss:$16 sps:$4 sm:$0xff]   ;;  %v20466_v6 = vld [vmem:[%s23730_s8 + $0x180] ss:$16 sps:$4 sm:$0xff]  }
 0x8b5   :  { %5848 = vmatprep.subr.bf16.mxu0 %v24315_v31  ;;  %5889 = vmatprep.subr.bf16.mxu1 %v24316_v9  ;;  %24332 = vst [vmem:[#allocation59_spill] sm:$0xff] %v20461_v27  ;;  %24333 = vst [vmem:[#allocation60_spill] sm:$0xff] %v20466_v6  ;;  %v20471_v31 = vld [vmem:[%s23730_s8 + $0x188] ss:$16 sps:$4 sm:$0xff]   ;;  %v20480_v9 = vld [vmem:[%s23730_s8 + $0x1a0] ss:$16 sps:$4 sm:$0xff]  }
 0x8b6   :  { %24334 = vst [vmem:[#allocation61_spill] sm:$0xff] %v20471_v31  ;;  %24335 = vst [vmem:[#allocation72_spill] sm:$0xff] %v20480_v9 }
 0x8b8   :  { %5849 = vmatpush1.bf16.msra.mxu0 %v20004_v26  ;;  %5890 = vmatpush1.bf16.msra.mxu1 %v20009_v32  ;;  %v20226_v26 = vld [vmem:[%s23730_s8 + $0x40] ss:$16 sps:$4 sm:$0xff]   ;;  %v20231_v32 = vld [vmem:[%s23730_s8 + $0x48] ss:$16 sps:$4 sm:$0xff]  }
 0x8b9   :  { %5850 = vmatprep.subr.bf16.mxu0 %v20016_v49  ;;  %5891 = vmatprep.subr.bf16.mxu1 %v20021_v17  ;;  %v20207_v17 = vld [vmem:[%s23730_s8 + $0x28] ss:$16 sps:$4 sm:$0xff]   ;;  %v20240_v49 = vld [vmem:[%s23730_s8 + $0x64] ss:$16 sps:$4 sm:$0xff]  }
 0x8bc   :  { %5851 = vmatpush1.bf16.msra.mxu0 %v20028_v16  ;;  %5892 = vmatpush1.bf16.msra.mxu1 %v20033_v0  ;;  %v20216_v16 = vld [vmem:[%s23730_s8 + $0x44] ss:$16 sps:$4 sm:$0xff]   ;;  %v20221_v0 = vld [vmem:[%s23730_s8 + $0x4c] ss:$16 sps:$4 sm:$0xff]  }
 0x8bd   :  { %6380 = vmatprep.subr.bf16.mxu0 %v20168_v33  ;;  %6421 = vmatprep.subr.bf16.mxu1 %v20173_v30 }
 0x8bf   :  { %5869 = vmatmul.mubr.bf16.vlgmr.msra.gmra.mrb[92].mxu0 %v5149_v39  ;;  %5910 = vmatmul.mubr.bf16.vlgmr.msra.gmra.mrb[92].mxu1 %v5149_v39  ;;  %v20423_v39 = vld [vmem:[%s23730_s8 + $0x148] ss:$16 sps:$4 sm:$0xff]  }
 0x8c0   :  { %6381 = vmatpush1.bf16.msra.mxu0 %v20178_v60  ;;  %6422 = vmatpush1.bf16.msra.mxu1 %v20183_v61  ;;  %24326 = vst [vmem:[#allocation53_spill] sm:$0xff] %v20423_v39 }
 0x8c1   :  { %6382 = vmatprep.subr.bf16.mxu0 %v20192_v36  ;;  %6423 = vmatprep.subr.bf16.mxu1 %v20197_v23 }
 0x8c4   :  { %6383 = vmatpush1.bf16.msra.mxu0 %v20202_v35  ;;  %6424 = vmatpush1.bf16.msra.mxu1 %v20207_v17 }
 0x8c5   :  { %6384 = vmatprep.subr.bf16.mxu0 %v20216_v16  ;;  %6425 = vmatprep.subr.bf16.mxu1 %v20221_v0 }
 0x8c8   :  { %6385 = vmatpush1.bf16.msra.mxu0 %v20226_v26  ;;  %6426 = vmatpush1.bf16.msra.mxu1 %v20231_v32 }
 0x8c9   :  { %6386 = vmatprep.subr.bf16.mxu0 %v20240_v49  ;;  %6427 = vmatprep.subr.bf16.mxu1 %v20245_v20 }
 0x8cc   :  { %6387 = vmatpush1.bf16.msra.mxu0 %v20250_v53  ;;  %6428 = vmatpush1.bf16.msra.mxu1 %v20255_v51 }
 0x8cd   :  { %6388 = vmatprep.subr.bf16.mxu0 %v20264_v45  ;;  %6429 = vmatprep.subr.bf16.mxu1 %v20269_v40 }
 0x8d0   :  { %6389 = vmatpush1.bf16.msra.mxu0 %v20274_v62  ;;  %6430 = vmatpush1.bf16.msra.mxu1 %v20279_v41 }
 0x8d1   :  { %6390 = vmatprep.subr.bf16.mxu0 %v20288_v48  ;;  %6431 = vmatprep.subr.bf16.mxu1 %v20293_v42 }
 0x8d4   :  { %6391 = vmatpush1.bf16.msra.mxu0 %v20298_v63  ;;  %6432 = vmatpush1.bf16.msra.mxu1 %v20303_v43 }
 0x8d5   :  { %6392 = vmatprep.subr.bf16.mxu0 %v20312_v18  ;;  %6433 = vmatprep.subr.bf16.mxu1 %v20317_v1 }
 0x8d8   :  { %6393 = vmatpush1.bf16.msra.mxu0 %v20322_v44  ;;  %6434 = vmatpush1.bf16.msra.mxu1 %v20327_v46 }
 0x8d9   :  { %6394 = vmatprep.subr.bf16.mxu0 %v20336_v2  ;;  %6435 = vmatprep.subr.bf16.mxu1 %v20341_v47 }
 0x8dc   :  { %6395 = vmatpush1.bf16.msra.mxu0 %v20346_v50  ;;  %6436 = vmatpush1.bf16.msra.mxu1 %v20351_v10 }
 0x8dd   :  { %6396 = vmatprep.subr.bf16.mxu0 %v20360_v12  ;;  %6437 = vmatprep.subr.bf16.mxu1 %v20365_v13 }
 0x8e0   :  { %6397 = vmatpush1.bf16.msra.mxu0 %v20370_v57  ;;  %6438 = vmatpush1.bf16.msra.mxu1 %v20375_v5 }
 0x8e1   :  { %6398 = vmatprep.subr.bf16.mxu0 %v20384_v29  ;;  %6439 = vmatprep.subr.bf16.mxu1 %v20389_v37 }
 0x8e4   :  { %6399 = vmatpush1.bf16.msra.mxu0 %v20394_v21  ;;  %6440 = vmatpush1.bf16.msra.mxu1 %v20399_v28 }
 0x8e5   :  { %6400 = vmatprep.subr.bf16.mxu0 %v20408_v22  ;;  %6441 = vmatprep.subr.bf16.mxu1 %v20413_v19 }
 0x8e8   :  { %6401 = vmatpush1.bf16.msra.mxu0 %v20418_v11  ;;  %6442 = vmatpush1.bf16.msra.mxu1 %v20423_v39 }
 0x8e9   :  { %6402 = vmatprep.subr.bf16.mxu0 %v20432_v3  ;;  %6443 = vmatprep.subr.bf16.mxu1 %v20437_v38 }
 0x8ec   :  { %6403 = vmatpush1.bf16.msra.mxu0 %v20442_v14  ;;  %6444 = vmatpush1.bf16.msra.mxu1 %v20447_v15  ;;  %v20485_v15 = vld [vmem:[%s23730_s8 + $0x1a4] ss:$16 sps:$4 sm:$0xff]   ;;  %v20513_v14 = vld [vmem:[%s23730_s8 + $0x1c0] ss:$16 sps:$4 sm:$0xff]  }
 0x8ed   :  { %6404 = vmatprep.subr.bf16.mxu0 %v20456_v7  ;;  %6445 = vmatprep.subr.bf16.mxu1 %v20461_v27  ;;  %24336 = vst [vmem:[#allocation73_spill] sm:$0xff] %v20485_v15  ;;  %v20490_v7 = vld [vmem:[%s23730_s8 + $0x1a8] ss:$16 sps:$4 sm:$0xff]   ;;  %v20506_v27 = vld [vmem:[%s23730_s8 + $0x1cc] ss:$16 sps:$4 sm:$0xff]   ;;  %24341 = vst [vmem:[#allocation78_spill] sm:$0xff] %v20513_v14 }
 0x8ee   :  { %24337 = vst [vmem:[#allocation74_spill] sm:$0xff] %v20490_v7  ;;  %24340 = vst [vmem:[#allocation77_spill] sm:$0xff] %v20506_v27 }
 0x8f0   :  { %6405 = vmatpush1.bf16.msra.mxu0 %v20466_v6  ;;  %6446 = vmatpush1.bf16.msra.mxu1 %v20471_v31  ;;  %v20495_v6 = vld [vmem:[%s23730_s8 + $0x1ac] ss:$16 sps:$4 sm:$0xff]   ;;  %v20500_v31 = vld [vmem:[%s23730_s8 + $0x1c4] ss:$16 sps:$4 sm:$0xff]  }
 0x8f1   :  { %24338 = vst [vmem:[#allocation75_spill] sm:$0xff] %v20495_v6  ;;  %24339 = vst [vmem:[#allocation76_spill] sm:$0xff] %v20500_v31  ;;  %6406 = vmatprep.subr.bf16.mxu0 %v20485_v15  ;;  %6447 = vmatprep.subr.bf16.mxu1 %v20495_v6  ;;  %v20520_v15 = vld [vmem:[%s23730_s8 + $0x1c8] ss:$16 sps:$4 sm:$0xff]   ;;  %v20525_v6 = vld [vmem:[%s23730_s8 + $0x1e4] ss:$16 sps:$4 sm:$0xff]  }
 0x8f2   :  { %24342 = vst [vmem:[#allocation79_spill] sm:$0xff] %v20520_v15  ;;  %24343 = vst [vmem:[#allocation83_spill] sm:$0xff] %v20525_v6 }
 0x8f4   :  { %6407 = vmatpush1.bf16.msra.mxu0 %v20480_v9  ;;  %6448 = vmatpush1.bf16.msra.mxu1 %v20490_v7  ;;  %v20531_v9 = vld [vmem:[%s23730_s8 + $0x1ec] ss:$16 sps:$4 sm:$0xff]   ;;  %v20549_v7 = vld [vmem:[%s23733_s6 + $0x4] ss:$16 sps:$4 sm:$0xff]  }
 0x8f5   :  { %6408 = vmatprep.subr.bf16.mxu0 %v20500_v31  ;;  %6449 = vmatprep.subr.bf16.mxu1 %v20506_v27  ;;  %24344 = vst [vmem:[#allocation82_spill] sm:$0xff] %v20531_v9  ;;  %v20537_v31 = vld [vmem:[%s23730_s8 + $0x1e0] ss:$16 sps:$4 sm:$0xff]   ;;  %v20544_v27 = vld [vmem:[%s23730_s8 + $0x1e8] ss:$16 sps:$4 sm:$0xff]   ;;  %24347 = vst [vmem:[#allocation84_spill] sm:$0xff] %v20549_v7 }
 0x8f6   :  { %24345 = vst [vmem:[#allocation81_spill] sm:$0xff] %v20537_v31  ;;  %24346 = vst [vmem:[#allocation80_spill] sm:$0xff] %v20544_v27 }
 0x8f8   :  { %6409 = vmatpush1.bf16.msra.mxu0 %v20513_v14  ;;  %6450 = vmatpush1.bf16.msra.mxu1 %v20520_v15  ;;  %v20555_v14 = vld [vmem:[%s23733_s6 + $0xc] ss:$16 sps:$4 sm:$0xff]  }
 0x8f9   :  { %6410 = vmatprep.subr.bf16.mxu0 %v20525_v6  ;;  %6451 = vmatprep.subr.bf16.mxu1 %v20531_v9  ;;  %24348 = vst [vmem:[#allocation85_spill] sm:$0xff] %v20555_v14  ;;  %v5215_v6 = vld [vmem:[%s23735_s9] sm:$0xf] }
 0x8fa   :  { %v5220_v15 = vrot.slane %v5215_v6, %v24301_v25  ;;  %v5224_v9 = vrot.slane %v5215_v6, %v24302_v24  ;;  %v5228_v37 = vrot.slane %v5215_v6, %v18152_v55  ;;  %v5232_v25 = vrot.slane %v5215_v6, %v18169_v4 }
 0x8fc   :  { %6411 = vmatpush1.bf16.msra.mxu0 %v20537_v31  ;;  %6452 = vmatpush1.bf16.msra.mxu1 %v20544_v27 }
 0x8fd   :  { %6659 = vmatprep.subr.bf16.mxu0 %v20549_v7  ;;  %6700 = vmatprep.subr.bf16.mxu1 %v20555_v14 }
 0x972   :  { %v5591_v38 = vpop.f32.mrb[88].mxu0  ;;  %v5632_v3 = vpop.f32.mrb[88].mxu1 }
 0x973   :  { %v5592_v39 = vadd.f32 %v5591_v38, %v5220_v15  ;;  %v5593_v11 = vpop.f32.mrb[89].mxu0  ;;  %v5634_v19 = vpop.f32.mrb[89].mxu1  ;;  %v5633_v29 = vadd.f32 %v5632_v3, %v5228_v37  ;;  %v24352_v37 = vld [vmem:[#allocation23_spill] sm:$0xff] }
 0x974   :  { %v5594_v31 = vadd.f32 %v5593_v11, %v5224_v9  ;;  %v5595_v22 = vpop.f32.mrb[90].mxu0  ;;  %v5636_v27 = vpop.f32.mrb[90].mxu1  ;;  %v5635_v24 = vadd.f32 %v5634_v19, %v5232_v25  ;;  %v24350_v25 = vld [vmem:[#allocation21_spill] sm:$0xff]  ;;  %v906_v19 = vadd.f32 %v24352_v37, %v18177_v8 }
 0x975   :  { %v14579_v28 = vmul.f32 -1.442695, %v5592_v39  ;;  %v5596_v7 = vpop.f32.mrb[91].mxu0  ;;  %v5637_v21 = vpop.f32.mrb[91].mxu1  ;;  %v14581_v5 = vmul.f32 -1.442695, %v5633_v29  ;;  %v904_v29 = vadd.f32 %v24350_v25, %v18157_v59 }
 0x976   :  { %v14580_v14 = vmul.f32 -1.442695, %v5594_v31 }
 0x977   :  { %17101 = vpow2.f32 %v14579_v28 }
 0x978   :  { %17103 = vpow2.f32 %v14580_v14  ;;  %v24349_v14 = vld [vmem:[#allocation20_spill] sm:$0xff] }
 0x979   :  { %17105 = vtanh.f32 %v5635_v24  ;;  %v791_v6 = vadd.f32 %v24349_v14, %v18149_v54  ;;  %v24351_v24 = vld [vmem:[#allocation22_spill] sm:$0xff] }
 0x97a   :  { %17107 = vpow2.f32 %v14581_v5  ;;  %v793_v5 = vadd.f32 %v24351_v24, %v24305_v34 }
 0x981   :  { %v17102_v57 = vpop.eup %17101 }
 0x982   :  { %v5931_v38 = vadd.f32 1.0, %v17102_v57  ;;  %v17104_v15 = vpop.eup %17103 }
 0x983   :  { %v5932_v22 = vadd.f32 1.0, %v17104_v15  ;;  %v17106_v11 = vpop.eup %17105 }
 0x984   :  { %17109 = vrcp.f32 %v5931_v38  ;;  %v17108_v21 = vpop.eup %17107 }
 0x985   :  { %17111 = vrcp.f32 %v5932_v22  ;;  %v5933_v27 = vadd.f32 1.0, %v17108_v21 }
 0x987   :  { %17113 = vrcp.f32 %v5933_v27 }
 0x98e   :  { %v17110_v39 = vpop.eup %17109 }
 0x98f   :  { %v5942_v28 = vmul.f32 %v17110_v39, %v17106_v11  ;;  %v17112_v7 = vpop.eup %17111 }
 0x990   :  { %v5941_v57 = vmul.f32 %v17112_v7, %v20123_v56 }
 0x991   :  { %v17114_v37 = vpop.eup %17113 }
 0x992   :  { %v5870_v3 = vpop.f32.mrb[92].mxu0  ;;  %v5911_v31 = vpop.f32.mrb[92].mxu1  ;;  %v20577_v9 = vadd.f32 %v5942_v28, %v5941_v57 }
 0x993   :  { %v5918_v38 = vadd.f32 %v5870_v3, %v791_v6  ;;  %v5920_v15 = vadd.f32 %v5911_v31, %v904_v29  ;;  %v5872_v22 = vpop.f32.mrb[93].mxu0  ;;  %v5913_v11 = vpop.f32.mrb[93].mxu1 }
 0x994   :  { %v5919_v21 = vadd.f32 %v5872_v22, %v793_v5  ;;  %v5921_v39 = vadd.f32 %v5913_v11, %v906_v19  ;;  %v5874_v14 = vpop.f32.mrb[94].mxu0  ;;  %v5915_v25 = vpop.f32.mrb[94].mxu1  ;;  %17115 = vtanh.f32 %v20577_v9 }
 0x995   :  { %v14583_v56 = vmul.f32 -1.442695, %v5918_v38  ;;  %v5875_v7 = vpop.f32.mrb[95].mxu0  ;;  %v5916_v24 = vpop.f32.mrb[95].mxu1  ;;  %v14585_v57 = vmul.f32 -1.442695, %v5920_v15 }
 0x996   :  { %v14584_v34 = vmul.f32 -1.442695, %v5919_v21  ;;  %v20590_v7 = vld [vmem:[%s23733_s6] ss:$16 sps:$4 sm:$0xff]   ;;  %v20595_v24 = vld [vmem:[%s23733_s6 + $0x8] ss:$16 sps:$4 sm:$0xff]  }
 0x997   :  { %17117 = vpow2.f32 %v14583_v56 }
 0x998   :  { %17119 = vpow2.f32 %v14584_v34 }
 0x999   :  { %17121 = vtanh.f32 %v5921_v39 }
 0x99a   :  { %17123 = vpow2.f32 %v14585_v57  ;;  %v20616_v57 = vld [vmem:[%s23733_s6 + $0x20] ss:$16 sps:$4 sm:$0xff]  }
 0x99e   :  { %v17116_v28 = vpop.eup %17115 }
 0x99f   :  { %v5945_v6 = vmul.f32 %v17116_v28, %v17114_v37  ;;  %v20607_v28 = vld [vmem:[%s23733_s6 + $0x2c] ss:$16 sps:$4 sm:$0xff]  }
 0x9a1   :  { %v17118_v29 = vpop.eup %17117  ;;  %14582 = vst [vmem:[%s23736_s11 + $0x28] sm:$0xff] %v5945_v6  ;;  %v5973_v27 = vpack.c.bf16 %v5945_v6, %v5945_v6  ;;  %v20621_v6 = vld [vmem:[%s23733_s6 + $0x28] ss:$16 sps:$4 sm:$0xff]  }
 0x9a2   :  { %v5957_v3 = vadd.f32 1.0, %v17118_v29  ;;  %v17120_v5 = vpop.eup %17119  ;;  %v20628_v29 = vld [vmem:[%s23733_s6 + $0x44] ss:$16 sps:$4 sm:$0xff]  }
 0x9a3   :  { %v5958_v19 = vadd.f32 1.0, %v17120_v5  ;;  %6412 = vmatprep.mubr.bf16.mxu0 %v5973_v27  ;;  %6453 = vmatprep.mubr.bf16.mxu1 %v5973_v27  ;;  %v17122_v34 = vpop.eup %17121  ;;  %v20642_v27 = vld [vmem:[%s23733_s6 + $0x40] ss:$16 sps:$4 sm:$0xff]   ;;  %v20647_v5 = vld [vmem:[%s23733_s6 + $0x48] ss:$16 sps:$4 sm:$0xff]  }
 0x9a4   :  { %17125 = vrcp.f32 %v5957_v3  ;;  %v17124_v31 = vpop.eup %17123  ;;  %v20633_v3 = vld [vmem:[%s23733_s6 + $0x4c] ss:$16 sps:$4 sm:$0xff]  }
 0x9a5   :  { %17127 = vrcp.f32 %v5958_v19  ;;  %v5959_v11 = vadd.f32 1.0, %v17124_v31  ;;  %v20654_v19 = vld [vmem:[%s23733_s6 + $0x64] ss:$16 sps:$4 sm:$0xff]   ;;  %v20666_v31 = vld [vmem:[%s23733_s6 + $0x60] ss:$16 sps:$4 sm:$0xff]  }
 0x9a7   :  { %17129 = vrcp.f32 %v5959_v11  ;;  %v20690_v11 = vld [vmem:[%s23733_s6 + $0x80] ss:$16 sps:$4 sm:$0xff]  }
 0x9a8   :  { %24354 = vst [vmem:[#allocation87_spill] sm:$0xff] %v20690_v11 }
 0x9ae   :  { %v17126_v38 = vpop.eup %17125 }
 0x9af   :  { %v5968_v15 = vmul.f32 %v17126_v38, %v17122_v34  ;;  %v17128_v22 = vpop.eup %17127  ;;  %v20659_v34 = vld [vmem:[%s23733_s6 + $0x6c] ss:$16 sps:$4 sm:$0xff]   ;;  %v20671_v38 = vld [vmem:[%s23733_s6 + $0x68] ss:$16 sps:$4 sm:$0xff]  }
 0x9b0   :  { %v5967_v21 = vmul.f32 %v17128_v22, %v20130_v52  ;;  %v20602_v52 = vld [vmem:[%s23733_s6 + $0x24] ss:$16 sps:$4 sm:$0xff]   ;;  %v20683_v22 = vld [vmem:[%s23733_s6 + $0x8c] ss:$16 sps:$4 sm:$0xff]  }
 0x9b1   :  { %v17130_v14 = vpop.eup %17129  ;;  %24353 = vst [vmem:[#allocation86_spill] sm:$0xff] %v20683_v22 }
 0x9b2   :  { %v20584_v39 = vadd.f32 %v5968_v15, %v5967_v21  ;;  %v20678_v15 = vld [vmem:[%s23733_s6 + $0x84] ss:$16 sps:$4 sm:$0xff]   ;;  %v20695_v21 = vld [vmem:[%s23733_s6 + $0x88] ss:$16 sps:$4 sm:$0xff]  }
 0x9b3   :  { %24355 = vst [vmem:[#allocation88_spill] sm:$0xff] %v20695_v21 }
 0x9b4   :  { %17131 = vtanh.f32 %v20584_v39 }
 0x9be   :  { %v17132_v25 = vpop.eup %17131 }
 0x9bf   :  { %v5971_v56 = vmul.f32 %v17132_v25, %v17130_v14  ;;  %v20702_v14 = vld [vmem:[%s23733_s6 + $0xa4] ss:$16 sps:$4 sm:$0xff]   ;;  %v20707_v25 = vld [vmem:[%s23733_s6 + $0xac] ss:$16 sps:$4 sm:$0xff]  }
 0x9c0   :  { %24356 = vst [vmem:[#allocation89_spill] sm:$0xff] %v20702_v14  ;;  %24357 = vst [vmem:[#allocation90_spill] sm:$0xff] %v20707_v25 }
 0x9c1   :  { %v20597_v37 = vpack.c.bf16 %v5971_v56, %v5971_v56  ;;  %v20714_v56 = vld [vmem:[%s23733_s6 + $0xa0] ss:$16 sps:$4 sm:$0xff]  }
 0x9c2   :  { %24358 = vst [vmem:[#allocation91_spill] sm:$0xff] %v20714_v56 }
 0x9c3   :  { %6413 = vmatmul.mubr.bf16.vlgmr.msra.gmra.mrb[96].mxu0 %v20597_v37  ;;  %6454 = vmatmul.mubr.bf16.vlgmr.msra.gmra.mrb[96].mxu1 %v20597_v37 }
 0x9c4   :  { %6660 = vmatpush1.bf16.msra.mxu0 %v20590_v7  ;;  %6701 = vmatpush1.bf16.msra.mxu1 %v20595_v24 }
 0x9c5   :  { %6661 = vmatprep.subr.bf16.mxu0 %v20602_v52  ;;  %6702 = vmatprep.subr.bf16.mxu1 %v20607_v28 }
 0x9c6   :  { %6691 = vmatprep.mubr.bf16.mxu0 %v24094_v58  ;;  %6732 = vmatprep.mubr.bf16.mxu1 %v24094_v58 }
 0x9c8   :  { %6662 = vmatpush1.bf16.msra.mxu0 %v20616_v57  ;;  %6703 = vmatpush1.bf16.msra.mxu1 %v20621_v6 }
 0x9c9   :  { %6663 = vmatprep.subr.bf16.mxu0 %v20628_v29  ;;  %6704 = vmatprep.subr.bf16.mxu1 %v20633_v3 }
 0x9cc   :  { %6664 = vmatpush1.bf16.msra.mxu0 %v20642_v27  ;;  %6705 = vmatpush1.bf16.msra.mxu1 %v20647_v5 }
 0x9cd   :  { %6665 = vmatprep.subr.bf16.mxu0 %v20654_v19  ;;  %6706 = vmatprep.subr.bf16.mxu1 %v20659_v34 }
 0x9d0   :  { %6666 = vmatpush1.bf16.msra.mxu0 %v20666_v31  ;;  %6707 = vmatpush1.bf16.msra.mxu1 %v20671_v38 }
 0x9d1   :  { %6667 = vmatprep.subr.bf16.mxu0 %v20678_v15  ;;  %6708 = vmatprep.subr.bf16.mxu1 %v20683_v22  ;;  %v20719_v22 = vld [vmem:[%s23733_s6 + $0xa8] ss:$16 sps:$4 sm:$0xff]  }
 0x9d2   :  { %24359 = vst [vmem:[#allocation92_spill] sm:$0xff] %v20719_v22 }
 0x9d4   :  { %6668 = vmatpush1.bf16.msra.mxu0 %v20690_v11  ;;  %6709 = vmatpush1.bf16.msra.mxu1 %v20695_v21  ;;  %v20726_v11 = vld [vmem:[%s23733_s6 + $0xc4] ss:$16 sps:$4 sm:$0xff]   ;;  %v20731_v21 = vld [vmem:[%s23733_s6 + $0xcc] ss:$16 sps:$4 sm:$0xff]  }
 0x9d5   :  { %6669 = vmatprep.subr.bf16.mxu0 %v20702_v14  ;;  %6710 = vmatprep.subr.bf16.mxu1 %v20707_v25  ;;  %24360 = vst [vmem:[#allocation93_spill] sm:$0xff] %v20726_v11  ;;  %24361 = vst [vmem:[#allocation16_spill] sm:$0xff] %v20731_v21  ;;  %v20738_v14 = vld [vmem:[%s23733_s6 + $0xc0] ss:$16 sps:$4 sm:$0xff]   ;;  %v20743_v25 = vld [vmem:[%s23733_s6 + $0xc8] ss:$16 sps:$4 sm:$0xff]  }
 0x9d8   :  { %6670 = vmatpush1.bf16.msra.mxu0 %v20714_v56  ;;  %6711 = vmatpush1.bf16.msra.mxu1 %v20719_v22  ;;  %v20750_v56 = vld [vmem:[%s23733_s6 + $0xe4] ss:$16 sps:$4 sm:$0xff]   ;;  %v20755_v22 = vld [vmem:[%s23733_s6 + $0xec] ss:$16 sps:$4 sm:$0xff]  }
 0x9d9   :  { %6671 = vmatprep.subr.bf16.mxu0 %v20726_v11  ;;  %6712 = vmatprep.subr.bf16.mxu1 %v20731_v21  ;;  %v20762_v11 = vld [vmem:[%s23733_s6 + $0xe0] ss:$16 sps:$4 sm:$0xff]   ;;  %v20767_v21 = vld [vmem:[%s23733_s6 + $0xe8] ss:$16 sps:$4 sm:$0xff]  }
 0x9dc   :  { %6672 = vmatpush1.bf16.msra.mxu0 %v20738_v14  ;;  %6713 = vmatpush1.bf16.msra.mxu1 %v20743_v25 }
 0x9dd   :  { %6673 = vmatprep.subr.bf16.mxu0 %v20750_v56  ;;  %6714 = vmatprep.subr.bf16.mxu1 %v20755_v22 }
 0x9e0   :  { %6674 = vmatpush1.bf16.msra.mxu0 %v20762_v11  ;;  %6715 = vmatpush1.bf16.msra.mxu1 %v20767_v21 }
 0x9e1   :  { %7203 = vmatprep.subr.bf16.mxu0 %v20168_v33  ;;  %7244 = vmatprep.subr.bf16.mxu1 %v20173_v30  ;;  %v24362_v33 = vld [vmem:[#allocation95_spill] sm:$0xff]  ;;  %v24363_v30 = vld [vmem:[#allocation96_spill] sm:$0xff] }
 0x9e3   :  { %6692 = vmatmul.mubr.bf16.vlgmr.msra.gmra.mrb[100].mxu0 %v20597_v37  ;;  %6733 = vmatmul.mubr.bf16.vlgmr.msra.gmra.mrb[100].mxu1 %v20597_v37 }
 0x9e4   :  { %7204 = vmatpush1.bf16.msra.mxu0 %v20178_v60  ;;  %7245 = vmatpush1.bf16.msra.mxu1 %v20183_v61  ;;  %v24364_v60 = vld [vmem:[#allocation97_spill] sm:$0xff]  ;;  %v24365_v61 = vld [vmem:[#allocation98_spill] sm:$0xff] }
 0x9e5   :  { %7205 = vmatprep.subr.bf16.mxu0 %v20192_v36  ;;  %7246 = vmatprep.subr.bf16.mxu1 %v20197_v23  ;;  %v24366_v36 = vld [vmem:[#allocation12_spill] sm:$0xff]  ;;  %v24367_v23 = vld [vmem:[#allocation13_spill] sm:$0xff] }
 0x9e8   :  { %7206 = vmatpush1.bf16.msra.mxu0 %v20202_v35  ;;  %7247 = vmatpush1.bf16.msra.mxu1 %v20207_v17  ;;  %v24368_v35 = vld [vmem:[#allocation14_spill] sm:$0xff]  ;;  %v24369_v17 = vld [vmem:[#allocation15_spill] sm:$0xff] }
 0x9e9   :  { %7207 = vmatprep.subr.bf16.mxu0 %v20216_v16  ;;  %7248 = vmatprep.subr.bf16.mxu1 %v20221_v0  ;;  %v24370_v16 = vld [vmem:[#allocation52_spill] sm:$0xff]  ;;  %v24371_v0 = vld [vmem:[#allocation53_spill] sm:$0xff] }
 0x9ec   :  { %7208 = vmatpush1.bf16.msra.mxu0 %v20226_v26  ;;  %7249 = vmatpush1.bf16.msra.mxu1 %v20231_v32  ;;  %v24372_v26 = vld [vmem:[#allocation54_spill] sm:$0xff]  ;;  %v24373_v32 = vld [vmem:[#allocation55_spill] sm:$0xff] }
 0x9ed   :  { %7209 = vmatprep.subr.bf16.mxu0 %v20240_v49  ;;  %7250 = vmatprep.subr.bf16.mxu1 %v20245_v20  ;;  %v24374_v49 = vld [vmem:[#allocation56_spill] sm:$0xff]  ;;  %v24375_v20 = vld [vmem:[#allocation57_spill] sm:$0xff] }
 0x9f0   :  { %7210 = vmatpush1.bf16.msra.mxu0 %v20250_v53  ;;  %7251 = vmatpush1.bf16.msra.mxu1 %v20255_v51  ;;  %v24376_v53 = vld [vmem:[#allocation58_spill] sm:$0xff]  ;;  %v24377_v51 = vld [vmem:[#allocation59_spill] sm:$0xff] }
 0x9f1   :  { %7211 = vmatprep.subr.bf16.mxu0 %v20264_v45  ;;  %7252 = vmatprep.subr.bf16.mxu1 %v20269_v40  ;;  %v24378_v45 = vld [vmem:[#allocation60_spill] sm:$0xff]  ;;  %v24379_v40 = vld [vmem:[#allocation61_spill] sm:$0xff] }
 0x9f4   :  { %7212 = vmatpush1.bf16.msra.mxu0 %v20274_v62  ;;  %7253 = vmatpush1.bf16.msra.mxu1 %v20279_v41  ;;  %v24380_v62 = vld [vmem:[#allocation73_spill] sm:$0xff]  ;;  %v24381_v41 = vld [vmem:[#allocation75_spill] sm:$0xff] }
 0x9f5   :  { %7213 = vmatprep.subr.bf16.mxu0 %v20288_v48  ;;  %7254 = vmatprep.subr.bf16.mxu1 %v20293_v42  ;;  %v24382_v48 = vld [vmem:[#allocation72_spill] sm:$0xff]  ;;  %v24383_v42 = vld [vmem:[#allocation74_spill] sm:$0xff] }
 0x9f8   :  { %7214 = vmatpush1.bf16.msra.mxu0 %v20298_v63  ;;  %7255 = vmatpush1.bf16.msra.mxu1 %v20303_v43  ;;  %v24384_v63 = vld [vmem:[#allocation76_spill] sm:$0xff]  ;;  %v24385_v43 = vld [vmem:[#allocation77_spill] sm:$0xff] }
 0x9f9   :  { %7215 = vmatprep.subr.bf16.mxu0 %v20312_v18  ;;  %7256 = vmatprep.subr.bf16.mxu1 %v20317_v1  ;;  %v24386_v18 = vld [vmem:[#allocation78_spill] sm:$0xff]  ;;  %v24387_v1 = vld [vmem:[#allocation79_spill] sm:$0xff] }
 0x9fc   :  { %7216 = vmatpush1.bf16.msra.mxu0 %v20322_v44  ;;  %7257 = vmatpush1.bf16.msra.mxu1 %v20327_v46  ;;  %v24388_v44 = vld [vmem:[#allocation83_spill] sm:$0xff]  ;;  %v24389_v46 = vld [vmem:[#allocation82_spill] sm:$0xff] }
 0x9fd   :  { %7217 = vmatprep.subr.bf16.mxu0 %v20336_v2  ;;  %7258 = vmatprep.subr.bf16.mxu1 %v20341_v47  ;;  %v24390_v2 = vld [vmem:[#allocation81_spill] sm:$0xff]  ;;  %v24391_v47 = vld [vmem:[#allocation80_spill] sm:$0xff] }
 0xa00   :  { %7218 = vmatpush1.bf16.msra.mxu0 %v20346_v50  ;;  %7259 = vmatpush1.bf16.msra.mxu1 %v20351_v10  ;;  %v24392_v50 = vld [vmem:[#allocation84_spill] sm:$0xff]  ;;  %v24393_v10 = vld [vmem:[#allocation85_spill] sm:$0xff] }
 0xa01   :  { %7219 = vmatprep.subr.bf16.mxu0 %v20360_v12  ;;  %7260 = vmatprep.subr.bf16.mxu1 %v20365_v13  ;;  %v6038_v12 = vld [vmem:[%s23735_s9] sm:$0xf] }
 0xa02   :  { %v24394_v13 = vld [vmem:[#allocation3_spill] sm:$0xff] }
 0xa03   :  { %v6043_v37 = vrot.slane %v6038_v12, %v24394_v13 }
 0xa04   :  { %7220 = vmatpush1.bf16.msra.mxu0 %v24362_v33  ;;  %7261 = vmatpush1.bf16.msra.mxu1 %v24363_v30  ;;  %v24395_v33 = vld [vmem:[#allocation70_spill] sm:$0xff] }
 0xa05   :  { %7221 = vmatprep.subr.bf16.mxu0 %v24364_v60  ;;  %7262 = vmatprep.subr.bf16.mxu1 %v24365_v61  ;;  %v6047_v30 = vrot.slane %v6038_v12, %v24395_v33 }
 0xa08   :  { %7222 = vmatpush1.bf16.msra.mxu0 %v24366_v36  ;;  %7263 = vmatpush1.bf16.msra.mxu1 %v24367_v23 }
 0xa09   :  { %7223 = vmatprep.subr.bf16.mxu0 %v24368_v35  ;;  %7264 = vmatprep.subr.bf16.mxu1 %v24369_v17 }
 0xa0c   :  { %7224 = vmatpush1.bf16.msra.mxu0 %v24370_v16  ;;  %7265 = vmatpush1.bf16.msra.mxu1 %v24371_v0 }
 0xa0d   :  { %7225 = vmatprep.subr.bf16.mxu0 %v24372_v26  ;;  %7266 = vmatprep.subr.bf16.mxu1 %v24373_v32 }
 0xa10   :  { %7226 = vmatpush1.bf16.msra.mxu0 %v24374_v49  ;;  %7267 = vmatpush1.bf16.msra.mxu1 %v24375_v20 }
 0xa11   :  { %7227 = vmatprep.subr.bf16.mxu0 %v24376_v53  ;;  %7268 = vmatprep.subr.bf16.mxu1 %v24377_v51  ;;  %v6051_v53 = vrot.slane %v6038_v12, %v18152_v55  ;;  %v6055_v51 = vrot.slane %v6038_v12, %v18169_v4 }
 0xa14   :  { %7228 = vmatpush1.bf16.msra.mxu0 %v24378_v45  ;;  %7269 = vmatpush1.bf16.msra.mxu1 %v24379_v40 }
 0xa15   :  { %7229 = vmatprep.subr.bf16.mxu0 %v24380_v62  ;;  %7270 = vmatprep.subr.bf16.mxu1 %v24381_v41 }
 0xa18   :  { %7230 = vmatpush1.bf16.msra.mxu0 %v24382_v48  ;;  %7271 = vmatpush1.bf16.msra.mxu1 %v24383_v42 }
 0xa19   :  { %7231 = vmatprep.subr.bf16.mxu0 %v24384_v63  ;;  %7272 = vmatprep.subr.bf16.mxu1 %v24385_v43 }
 0xa1c   :  { %7232 = vmatpush1.bf16.msra.mxu0 %v24386_v18  ;;  %7273 = vmatpush1.bf16.msra.mxu1 %v24387_v1 }
 0xa1d   :  { %7233 = vmatprep.subr.bf16.mxu0 %v24388_v44  ;;  %7274 = vmatprep.subr.bf16.mxu1 %v24389_v46 }
 0xa20   :  { %7234 = vmatpush1.bf16.msra.mxu0 %v24390_v2  ;;  %7275 = vmatpush1.bf16.msra.mxu1 %v24391_v47  ;;  %v24396_v47 = vld [vmem:[#allocation24_spill] sm:$0xff] }
 0xa21   :  { %7482 = vmatprep.subr.bf16.mxu0 %v24392_v50  ;;  %7523 = vmatprep.subr.bf16.mxu1 %v24393_v10  ;;  %v795_v50 = vadd.f32 %v24396_v47, %v18149_v54  ;;  %v24397_v10 = vld [vmem:[#allocation25_spill] sm:$0xff] }
 0xa22   :  { %v908_v12 = vadd.f32 %v24397_v10, %v18157_v59 }
 0xa96   :  { %v6414_v60 = vpop.f32.mrb[96].mxu0  ;;  %v6455_v61 = vpop.f32.mrb[96].mxu1 }
 0xa97   :  { %v6415_v36 = vadd.f32 %v6414_v60, %v6043_v37  ;;  %v6416_v23 = vpop.f32.mrb[97].mxu0  ;;  %v6457_v35 = vpop.f32.mrb[97].mxu1  ;;  %v6456_v45 = vadd.f32 %v6455_v61, %v6051_v53  ;;  %v24399_v60 = vld [vmem:[#allocation26_spill] sm:$0xff] }
 0xa98   :  { %v6417_v17 = vadd.f32 %v6416_v23, %v6047_v30  ;;  %v6418_v16 = vpop.f32.mrb[98].mxu0  ;;  %v6459_v0 = vpop.f32.mrb[98].mxu1  ;;  %v6458_v40 = vadd.f32 %v6457_v35, %v6055_v51  ;;  %v24398_v30 = vld [vmem:[#allocation71_spill] sm:$0xff] }
 0xa99   :  { %v14682_v26 = vmul.f32 -1.442695, %v6415_v36  ;;  %v6419_v32 = vpop.f32.mrb[99].mxu0  ;;  %v6460_v49 = vpop.f32.mrb[99].mxu1  ;;  %v14684_v62 = vmul.f32 -1.442695, %v6456_v45  ;;  %v797_v61 = vadd.f32 %v24399_v60, %v24398_v30 }
 0xa9a   :  { %v14683_v20 = vmul.f32 -1.442695, %v6417_v17  ;;  %v24400_v36 = vld [vmem:[#allocation27_spill] sm:$0xff] }
 0xa9b   :  { %17133 = vpow2.f32 %v14682_v26  ;;  %v910_v23 = vadd.f32 %v24400_v36, %v18177_v8 }
 0xa9c   :  { %17135 = vpow2.f32 %v14683_v20 }
 0xa9d   :  { %17137 = vtanh.f32 %v6458_v40 }
 0xa9e   :  { %17139 = vpow2.f32 %v14684_v62 }
 0xaa5   :  { %v17134_v41 = vpop.eup %17133 }
 0xaa6   :  { %v6754_v48 = vadd.f32 1.0, %v17134_v41  ;;  %v17136_v42 = vpop.eup %17135 }
 0xaa7   :  { %v6755_v63 = vadd.f32 1.0, %v17136_v42  ;;  %v17138_v43 = vpop.eup %17137 }
 0xaa8   :  { %17141 = vrcp.f32 %v6754_v48  ;;  %v17140_v18 = vpop.eup %17139 }
 0xaa9   :  { %17143 = vrcp.f32 %v6755_v63  ;;  %v6756_v2 = vadd.f32 1.0, %v17140_v18 }
 0xaab   :  { %17145 = vrcp.f32 %v6756_v2 }
 0xab2   :  { %v17142_v1 = vpop.eup %17141 }
 0xab3   :  { %v6765_v44 = vmul.f32 %v17142_v1, %v17138_v43  ;;  %v17144_v46 = vpop.eup %17143 }
 0xab4   :  { %v6764_v37 = vmul.f32 %v17144_v46, %v20577_v9 }
 0xab5   :  { %v17146_v48 = vpop.eup %17145 }
 0xab6   :  { %v6693_v35 = vpop.f32.mrb[100].mxu0  ;;  %v6734_v17 = vpop.f32.mrb[100].mxu1  ;;  %v20857_v16 = vadd.f32 %v6765_v44, %v6764_v37 }
 0xab7   :  { %v6741_v0 = vadd.f32 %v6693_v35, %v795_v50  ;;  %v6743_v26 = vadd.f32 %v6734_v17, %v908_v12  ;;  %v6695_v32 = vpop.f32.mrb[101].mxu0  ;;  %v6736_v49 = vpop.f32.mrb[101].mxu1 }
 0xab8   :  { %v6742_v20 = vadd.f32 %v6695_v32, %v797_v61  ;;  %v6744_v53 = vadd.f32 %v6736_v49, %v910_v23  ;;  %v6697_v51 = vpop.f32.mrb[102].mxu0  ;;  %v6738_v45 = vpop.f32.mrb[102].mxu1  ;;  %17147 = vtanh.f32 %v20857_v16  ;;  %v20984_v32 = vld [vmem:[%s23730_s8 + $0x60] ss:$16 sps:$4 sm:$0xff]   ;;  %v20989_v49 = vld [vmem:[%s23730_s8 + $0x68] ss:$16 sps:$4 sm:$0xff]  }
 0xab9   :  { %v14686_v9 = vmul.f32 -1.442695, %v6741_v0  ;;  %v6698_v40 = vpop.f32.mrb[103].mxu0  ;;  %v6739_v62 = vpop.f32.mrb[103].mxu1  ;;  %v14688_v63 = vmul.f32 -1.442695, %v6743_v26 }
 0xaba   :  { %v14687_v41 = vmul.f32 -1.442695, %v6742_v20  ;;  %v20979_v26 = vld [vmem:[%s23730_s8 + $0x6c] ss:$16 sps:$4 sm:$0xff]   ;;  %v20998_v20 = vld [vmem:[%s23730_s8 + $0x84] ss:$16 sps:$4 sm:$0xff]  }
 0xabb   :  { %17149 = vpow2.f32 %v14686_v9  ;;  %v21008_v51 = vld [vmem:[%s23730_s8 + $0x80] ss:$16 sps:$4 sm:$0xff]   ;;  %v21013_v45 = vld [vmem:[%s23730_s8 + $0x88] ss:$16 sps:$4 sm:$0xff]   ;;  %v21022_v9 = vld [vmem:[%s23730_s8 + $0xa4] ss:$16 sps:$4 sm:$0xff]  }
 0xabc   :  { %17151 = vpow2.f32 %v14687_v41  ;;  %v21027_v40 = vld [vmem:[%s23730_s8 + $0xac] ss:$16 sps:$4 sm:$0xff]   ;;  %v21032_v62 = vld [vmem:[%s23730_s8 + $0xa0] ss:$16 sps:$4 sm:$0xff]   ;;  %v21037_v41 = vld [vmem:[%s23730_s8 + $0xa8] ss:$16 sps:$4 sm:$0xff]  }
 0xabd   :  { %17153 = vtanh.f32 %v6744_v53  ;;  %v21003_v53 = vld [vmem:[%s23730_s8 + $0x8c] ss:$16 sps:$4 sm:$0xff]  }
 0xabe   :  { %17155 = vpow2.f32 %v14688_v63  ;;  %v21056_v63 = vld [vmem:[%s23730_s8 + $0xc0] ss:$16 sps:$4 sm:$0xff]  }
 0xac2   :  { %v17148_v42 = vpop.eup %17147 }
 0xac3   :  { %v6768_v43 = vmul.f32 %v17148_v42, %v17146_v48  ;;  %v21046_v48 = vld [vmem:[%s23730_s8 + $0xc4] ss:$16 sps:$4 sm:$0xff]   ;;  %v21051_v42 = vld [vmem:[%s23730_s8 + $0xcc] ss:$16 sps:$4 sm:$0xff]  }
 0xac5   :  { %v17150_v18 = vpop.eup %17149  ;;  %14685 = vst [vmem:[%s23736_s11 + $0x30] sm:$0xff] %v6768_v43  ;;  %v6796_v44 = vpack.c.bf16 %v6768_v43, %v6768_v43  ;;  %v21061_v43 = vld [vmem:[%s23730_s8 + $0xc8] ss:$16 sps:$4 sm:$0xff]  }
 0xac6   :  { %v6780_v1 = vadd.f32 1.0, %v17150_v18  ;;  %v17152_v46 = vpop.eup %17151  ;;  %v21070_v18 = vld [vmem:[%s23730_s8 + $0xe4] ss:$16 sps:$4 sm:$0xff]  }
 0xac7   :  { %v6781_v2 = vadd.f32 1.0, %v17152_v46  ;;  %7235 = vmatprep.mubr.bf16.mxu0 %v6796_v44  ;;  %7276 = vmatprep.mubr.bf16.mxu1 %v6796_v44  ;;  %v17154_v47 = vpop.eup %17153  ;;  %v21080_v44 = vld [vmem:[%s23730_s8 + $0xe0] ss:$16 sps:$4 sm:$0xff]   ;;  %v21085_v46 = vld [vmem:[%s23730_s8 + $0xe8] ss:$16 sps:$4 sm:$0xff]  }
 0xac8   :  { %17157 = vrcp.f32 %v6780_v1  ;;  %v17156_v50 = vpop.eup %17155  ;;  %v21075_v1 = vld [vmem:[%s23730_s8 + $0xec] ss:$16 sps:$4 sm:$0xff]  }
 0xac9   :  { %17159 = vrcp.f32 %v6781_v2  ;;  %v6782_v60 = vadd.f32 1.0, %v17156_v50  ;;  %v21094_v2 = vld [vmem:[%s23730_s8 + $0x104] ss:$16 sps:$4 sm:$0xff]   ;;  %v21104_v50 = vld [vmem:[%s23730_s8 + $0x100] ss:$16 sps:$4 sm:$0xff]  }
 0xaca   :  { %24410 = vst [vmem:[#allocation17_spill] sm:$0xff] %v21104_v50 }
 0xacb   :  { %17161 = vrcp.f32 %v6782_v60  ;;  %v21128_v60 = vld [vmem:[%s23730_s8 + $0x120] ss:$16 sps:$4 sm:$0xff]  }
 0xacc   :  { %24414 = vst [vmem:[#allocation9_spill] sm:$0xff] %v21128_v60 }
 0xad2   :  { %v17158_v10 = vpop.eup %17157 }
 0xad3   :  { %v6791_v12 = vmul.f32 %v17158_v10, %v17154_v47  ;;  %v17160_v37 = vpop.eup %17159  ;;  %v21099_v47 = vld [vmem:[%s23730_s8 + $0x10c] ss:$16 sps:$4 sm:$0xff]   ;;  %v21109_v10 = vld [vmem:[%s23730_s8 + $0x108] ss:$16 sps:$4 sm:$0xff]  }
 0xad4   :  { %v6790_v61 = vmul.f32 %v17160_v37, %v20584_v39  ;;  %v24401_v39 = vld [vmem:[#allocation86_spill] sm:$0xff]  ;;  %24411 = vst [vmem:[#allocation18_spill] sm:$0xff] %v21109_v10 }
 0xad5   :  { %v17162_v23 = vpop.eup %17161  ;;  %v21123_v37 = vld [vmem:[%s23730_s8 + $0x12c] ss:$16 sps:$4 sm:$0xff]  }
 0xad6   :  { %v20864_v36 = vadd.f32 %v6791_v12, %v6790_v61  ;;  %v21118_v12 = vld [vmem:[%s23730_s8 + $0x124] ss:$16 sps:$4 sm:$0xff]   ;;  %24413 = vst [vmem:[#allocation8_spill] sm:$0xff] %v21123_v37  ;;  %v21133_v61 = vld [vmem:[%s23730_s8 + $0x128] ss:$16 sps:$4 sm:$0xff]  }
 0xad7   :  { %24412 = vst [vmem:[#allocation19_spill] sm:$0xff] %v21118_v12  ;;  %24415 = vst [vmem:[#allocation10_spill] sm:$0xff] %v21133_v61 }
 0xad8   :  { %17163 = vtanh.f32 %v20864_v36 }
 0xae2   :  { %v17164_v35 = vpop.eup %17163 }
 0xae3   :  { %v6794_v17 = vmul.f32 %v17164_v35, %v17162_v23  ;;  %v21142_v23 = vld [vmem:[%s23730_s8 + $0x144] ss:$16 sps:$4 sm:$0xff]   ;;  %v21147_v35 = vld [vmem:[%s23730_s8 + $0x14c] ss:$16 sps:$4 sm:$0xff]  }
 0xae4   :  { %24416 = vst [vmem:[#allocation11_spill] sm:$0xff] %v21142_v23  ;;  %24417 = vst [vmem:[#allocation4_spill] sm:$0xff] %v21147_v35 }
 0xae5   :  { %v6795_v0 = vpack.c.bf16 %v6794_v17, %v6794_v17  ;;  %v21152_v17 = vld [vmem:[%s23730_s8 + $0x140] ss:$16 sps:$4 sm:$0xff]  }
 0xae6   :  { %24418 = vst [vmem:[#allocation5_spill] sm:$0xff] %v21152_v17 }
 0xae7   :  { %7236 = vmatmul.mubr.bf16.vlgmr.msra.gmra.mrb[104].mxu0 %v6795_v0  ;;  %7277 = vmatmul.mubr.bf16.vlgmr.msra.gmra.mrb[104].mxu1 %v6795_v0 }
 0xae8   :  { %7483 = vmatpush1.bf16.msra.mxu0 %v20590_v7  ;;  %7524 = vmatpush1.bf16.msra.mxu1 %v20595_v24  ;;  %v24402_v7 = vld [vmem:[#allocation87_spill] sm:$0xff]  ;;  %v24403_v24 = vld [vmem:[#allocation88_spill] sm:$0xff] }
 0xae9   :  { %7484 = vmatprep.subr.bf16.mxu0 %v20602_v52  ;;  %7525 = vmatprep.subr.bf16.mxu1 %v20607_v28  ;;  %v24404_v52 = vld [vmem:[#allocation89_spill] sm:$0xff]  ;;  %v24405_v28 = vld [vmem:[#allocation90_spill] sm:$0xff] }
 0xaea   :  { %7514 = vmatprep.mubr.bf16.mxu0 %v24094_v58  ;;  %7555 = vmatprep.mubr.bf16.mxu1 %v24094_v58 }
 0xaec   :  { %7485 = vmatpush1.bf16.msra.mxu0 %v20616_v57  ;;  %7526 = vmatpush1.bf16.msra.mxu1 %v20621_v6  ;;  %v24406_v57 = vld [vmem:[#allocation91_spill] sm:$0xff]  ;;  %v24407_v6 = vld [vmem:[#allocation92_spill] sm:$0xff] }
 0xaed   :  { %7486 = vmatprep.subr.bf16.mxu0 %v20628_v29  ;;  %7527 = vmatprep.subr.bf16.mxu1 %v20633_v3  ;;  %v24408_v29 = vld [vmem:[#allocation93_spill] sm:$0xff]  ;;  %v24409_v3 = vld [vmem:[#allocation16_spill] sm:$0xff] }
 0xaf0   :  { %7487 = vmatpush1.bf16.msra.mxu0 %v20642_v27  ;;  %7528 = vmatpush1.bf16.msra.mxu1 %v20647_v5  ;;  %v20902_v27 = vld [vmem:[%s23730_s8 + $0x4] ss:$16 sps:$4 sm:$0xff]   ;;  %v20907_v5 = vld [vmem:[%s23730_s8 + $0xc] ss:$16 sps:$4 sm:$0xff]  }
 0xaf1   :  { %7488 = vmatprep.subr.bf16.mxu0 %v20654_v19  ;;  %7529 = vmatprep.subr.bf16.mxu1 %v20659_v34  ;;  %v20912_v19 = vld [vmem:[%s23730_s8] ss:$16 sps:$4 sm:$0xff]   ;;  %v20917_v34 = vld [vmem:[%s23730_s8 + $0x8] ss:$16 sps:$4 sm:$0xff]  }
 0xaf4   :  { %7489 = vmatpush1.bf16.msra.mxu0 %v20666_v31  ;;  %7530 = vmatpush1.bf16.msra.mxu1 %v20671_v38  ;;  %v20926_v31 = vld [vmem:[%s23730_s8 + $0x24] ss:$16 sps:$4 sm:$0xff]   ;;  %v20931_v38 = vld [vmem:[%s23730_s8 + $0x2c] ss:$16 sps:$4 sm:$0xff]  }
 0xaf5   :  { %7490 = vmatprep.subr.bf16.mxu0 %v20678_v15  ;;  %7531 = vmatprep.subr.bf16.mxu1 %v24401_v39  ;;  %v20936_v15 = vld [vmem:[%s23730_s8 + $0x20] ss:$16 sps:$4 sm:$0xff]   ;;  %v21166_v39 = vld [vmem:[%s23730_s8 + $0x164] ss:$16 sps:$4 sm:$0xff]  }
 0xaf6   :  { %24420 = vst [vmem:[#allocation7_spill] sm:$0xff] %v21166_v39 }
 0xaf8   :  { %7491 = vmatpush1.bf16.msra.mxu0 %v24402_v7  ;;  %7532 = vmatpush1.bf16.msra.mxu1 %v24403_v24  ;;  %v21171_v7 = vld [vmem:[%s23730_s8 + $0x16c] ss:$16 sps:$4 sm:$0xff]   ;;  %v21176_v24 = vld [vmem:[%s23730_s8 + $0x160] ss:$16 sps:$4 sm:$0xff]  }
 0xaf9   :  { %7492 = vmatprep.subr.bf16.mxu0 %v24404_v52  ;;  %7533 = vmatprep.subr.bf16.mxu1 %v24405_v28  ;;  %24421 = vst [vmem:[#allocation94_spill] sm:$0xff] %v21171_v7  ;;  %24422 = vst [vmem:[#allocation20_spill] sm:$0xff] %v21176_v24  ;;  %v21181_v52 = vld [vmem:[%s23730_s8 + $0x168] ss:$16 sps:$4 sm:$0xff]   ;;  %v21190_v28 = vld [vmem:[%s23730_s8 + $0x184] ss:$16 sps:$4 sm:$0xff]  }
 0xafa   :  { %24423 = vst [vmem:[#allocation21_spill] sm:$0xff] %v21181_v52  ;;  %24424 = vst [vmem:[#allocation22_spill] sm:$0xff] %v21190_v28 }
 0xafc   :  { %7493 = vmatpush1.bf16.msra.mxu0 %v24406_v57  ;;  %7534 = vmatpush1.bf16.msra.mxu1 %v24407_v6  ;;  %v21195_v57 = vld [vmem:[%s23730_s8 + $0x18c] ss:$16 sps:$4 sm:$0xff]   ;;  %v21200_v6 = vld [vmem:[%s23730_s8 + $0x180] ss:$16 sps:$4 sm:$0xff]  }
 0xafd   :  { %7494 = vmatprep.subr.bf16.mxu0 %v24408_v29  ;;  %7535 = vmatprep.subr.bf16.mxu1 %v24409_v3  ;;  %24425 = vst [vmem:[#allocation23_spill] sm:$0xff] %v21195_v57  ;;  %24426 = vst [vmem:[#allocation95_spill] sm:$0xff] %v21200_v6  ;;  %v21205_v29 = vld [vmem:[%s23730_s8 + $0x188] ss:$16 sps:$4 sm:$0xff]   ;;  %v21214_v3 = vld [vmem:[%s23730_s8 + $0x1a0] ss:$16 sps:$4 sm:$0xff]  }
 0xafe   :  { %24427 = vst [vmem:[#allocation96_spill] sm:$0xff] %v21205_v29  ;;  %24428 = vst [vmem:[#allocation97_spill] sm:$0xff] %v21214_v3 }
 0xb00   :  { %7495 = vmatpush1.bf16.msra.mxu0 %v20738_v14  ;;  %7536 = vmatpush1.bf16.msra.mxu1 %v20743_v25  ;;  %v20960_v14 = vld [vmem:[%s23730_s8 + $0x40] ss:$16 sps:$4 sm:$0xff]   ;;  %v20965_v25 = vld [vmem:[%s23730_s8 + $0x48] ss:$16 sps:$4 sm:$0xff]  }
 0xb01   :  { %7496 = vmatprep.subr.bf16.mxu0 %v20750_v56  ;;  %7537 = vmatprep.subr.bf16.mxu1 %v20755_v22  ;;  %v20941_v22 = vld [vmem:[%s23730_s8 + $0x28] ss:$16 sps:$4 sm:$0xff]   ;;  %v20974_v56 = vld [vmem:[%s23730_s8 + $0x64] ss:$16 sps:$4 sm:$0xff]  }
 0xb04   :  { %7497 = vmatpush1.bf16.msra.mxu0 %v20762_v11  ;;  %7538 = vmatpush1.bf16.msra.mxu1 %v20767_v21  ;;  %v20950_v11 = vld [vmem:[%s23730_s8 + $0x44] ss:$16 sps:$4 sm:$0xff]   ;;  %v20955_v21 = vld [vmem:[%s23730_s8 + $0x4c] ss:$16 sps:$4 sm:$0xff]  }
 0xb05   :  { %8026 = vmatprep.subr.bf16.mxu0 %v20902_v27  ;;  %8067 = vmatprep.subr.bf16.mxu1 %v20907_v5 }
 0xb07   :  { %7515 = vmatmul.mubr.bf16.vlgmr.msra.gmra.mrb[108].mxu0 %v6795_v0  ;;  %7556 = vmatmul.mubr.bf16.vlgmr.msra.gmra.mrb[108].mxu1 %v6795_v0  ;;  %v21157_v0 = vld [vmem:[%s23730_s8 + $0x148] ss:$16 sps:$4 sm:$0xff]  }
 0xb08   :  { %8027 = vmatpush1.bf16.msra.mxu0 %v20912_v19  ;;  %8068 = vmatpush1.bf16.msra.mxu1 %v20917_v34  ;;  %24419 = vst [vmem:[#allocation6_spill] sm:$0xff] %v21157_v0 }
 0xb09   :  { %8028 = vmatprep.subr.bf16.mxu0 %v20926_v31  ;;  %8069 = vmatprep.subr.bf16.mxu1 %v20931_v38 }
 0xb0c   :  { %8029 = vmatpush1.bf16.msra.mxu0 %v20936_v15  ;;  %8070 = vmatpush1.bf16.msra.mxu1 %v20941_v22 }
 0xb0d   :  { %8030 = vmatprep.subr.bf16.mxu0 %v20950_v11  ;;  %8071 = vmatprep.subr.bf16.mxu1 %v20955_v21 }
 0xb10   :  { %8031 = vmatpush1.bf16.msra.mxu0 %v20960_v14  ;;  %8072 = vmatpush1.bf16.msra.mxu1 %v20965_v25 }
 0xb11   :  { %8032 = vmatprep.subr.bf16.mxu0 %v20974_v56  ;;  %8073 = vmatprep.subr.bf16.mxu1 %v20979_v26 }
 0xb14   :  { %8033 = vmatpush1.bf16.msra.mxu0 %v20984_v32  ;;  %8074 = vmatpush1.bf16.msra.mxu1 %v20989_v49 }
 0xb15   :  { %8034 = vmatprep.subr.bf16.mxu0 %v20998_v20  ;;  %8075 = vmatprep.subr.bf16.mxu1 %v21003_v53 }
 0xb18   :  { %8035 = vmatpush1.bf16.msra.mxu0 %v21008_v51  ;;  %8076 = vmatpush1.bf16.msra.mxu1 %v21013_v45 }
 0xb19   :  { %8036 = vmatprep.subr.bf16.mxu0 %v21022_v9  ;;  %8077 = vmatprep.subr.bf16.mxu1 %v21027_v40 }
 0xb1c   :  { %8037 = vmatpush1.bf16.msra.mxu0 %v21032_v62  ;;  %8078 = vmatpush1.bf16.msra.mxu1 %v21037_v41 }
 0xb1d   :  { %8038 = vmatprep.subr.bf16.mxu0 %v21046_v48  ;;  %8079 = vmatprep.subr.bf16.mxu1 %v21051_v42 }
 0xb20   :  { %8039 = vmatpush1.bf16.msra.mxu0 %v21056_v63  ;;  %8080 = vmatpush1.bf16.msra.mxu1 %v21061_v43 }
 0xb21   :  { %8040 = vmatprep.subr.bf16.mxu0 %v21070_v18  ;;  %8081 = vmatprep.subr.bf16.mxu1 %v21075_v1 }
 0xb24   :  { %8041 = vmatpush1.bf16.msra.mxu0 %v21080_v44  ;;  %8082 = vmatpush1.bf16.msra.mxu1 %v21085_v46 }
 0xb25   :  { %8042 = vmatprep.subr.bf16.mxu0 %v21094_v2  ;;  %8083 = vmatprep.subr.bf16.mxu1 %v21099_v47 }
 0xb28   :  { %8043 = vmatpush1.bf16.msra.mxu0 %v21104_v50  ;;  %8084 = vmatpush1.bf16.msra.mxu1 %v21109_v10 }
 0xb29   :  { %8044 = vmatprep.subr.bf16.mxu0 %v21118_v12  ;;  %8085 = vmatprep.subr.bf16.mxu1 %v21123_v37 }
 0xb2c   :  { %8045 = vmatpush1.bf16.msra.mxu0 %v21128_v60  ;;  %8086 = vmatpush1.bf16.msra.mxu1 %v21133_v61 }
 0xb2d   :  { %8046 = vmatprep.subr.bf16.mxu0 %v21142_v23  ;;  %8087 = vmatprep.subr.bf16.mxu1 %v21147_v35 }
 0xb30   :  { %8047 = vmatpush1.bf16.msra.mxu0 %v21152_v17  ;;  %8088 = vmatpush1.bf16.msra.mxu1 %v21157_v0 }
 0xb31   :  { %8048 = vmatprep.subr.bf16.mxu0 %v21166_v39  ;;  %8089 = vmatprep.subr.bf16.mxu1 %v21171_v7 }
 0xb34   :  { %8049 = vmatpush1.bf16.msra.mxu0 %v21176_v24  ;;  %8090 = vmatpush1.bf16.msra.mxu1 %v21181_v52  ;;  %v21219_v52 = vld [vmem:[%s23730_s8 + $0x1a4] ss:$16 sps:$4 sm:$0xff]   ;;  %v21247_v24 = vld [vmem:[%s23730_s8 + $0x1c0] ss:$16 sps:$4 sm:$0xff]  }
 0xb35   :  { %8050 = vmatprep.subr.bf16.mxu0 %v21190_v28  ;;  %8091 = vmatprep.subr.bf16.mxu1 %v21195_v57  ;;  %24429 = vst [vmem:[#allocation98_spill] sm:$0xff] %v21219_v52  ;;  %v21224_v28 = vld [vmem:[%s23730_s8 + $0x1a8] ss:$16 sps:$4 sm:$0xff]   ;;  %v21240_v57 = vld [vmem:[%s23730_s8 + $0x1cc] ss:$16 sps:$4 sm:$0xff]   ;;  %24434 = vst [vmem:[#allocation52_spill] sm:$0xff] %v21247_v24 }
 0xb36   :  { %24430 = vst [vmem:[#allocation12_spill] sm:$0xff] %v21224_v28  ;;  %24433 = vst [vmem:[#allocation15_spill] sm:$0xff] %v21240_v57 }
 0xb38   :  { %8051 = vmatpush1.bf16.msra.mxu0 %v21200_v6  ;;  %8092 = vmatpush1.bf16.msra.mxu1 %v21205_v29  ;;  %v21229_v6 = vld [vmem:[%s23730_s8 + $0x1ac] ss:$16 sps:$4 sm:$0xff]   ;;  %v21234_v29 = vld [vmem:[%s23730_s8 + $0x1c4] ss:$16 sps:$4 sm:$0xff]  }
 0xb39   :  { %24431 = vst [vmem:[#allocation13_spill] sm:$0xff] %v21229_v6  ;;  %24432 = vst [vmem:[#allocation14_spill] sm:$0xff] %v21234_v29  ;;  %8052 = vmatprep.subr.bf16.mxu0 %v21219_v52  ;;  %8093 = vmatprep.subr.bf16.mxu1 %v21229_v6  ;;  %v21254_v52 = vld [vmem:[%s23730_s8 + $0x1c8] ss:$16 sps:$4 sm:$0xff]   ;;  %v21259_v6 = vld [vmem:[%s23730_s8 + $0x1e4] ss:$16 sps:$4 sm:$0xff]  }
 0xb3a   :  { %24435 = vst [vmem:[#allocation53_spill] sm:$0xff] %v21254_v52  ;;  %24436 = vst [vmem:[#allocation54_spill] sm:$0xff] %v21259_v6 }
 0xb3c   :  { %8053 = vmatpush1.bf16.msra.mxu0 %v21214_v3  ;;  %8094 = vmatpush1.bf16.msra.mxu1 %v21224_v28  ;;  %v21265_v3 = vld [vmem:[%s23730_s8 + $0x1ec] ss:$16 sps:$4 sm:$0xff]   ;;  %v21283_v28 = vld [vmem:[%s23733_s6 + $0x4] ss:$16 sps:$4 sm:$0xff]  }
 0xb3d   :  { %8054 = vmatprep.subr.bf16.mxu0 %v21234_v29  ;;  %8095 = vmatprep.subr.bf16.mxu1 %v21240_v57  ;;  %24437 = vst [vmem:[#allocation55_spill] sm:$0xff] %v21265_v3  ;;  %v21271_v29 = vld [vmem:[%s23730_s8 + $0x1e0] ss:$16 sps:$4 sm:$0xff]   ;;  %v21278_v57 = vld [vmem:[%s23730_s8 + $0x1e8] ss:$16 sps:$4 sm:$0xff]   ;;  %24440 = vst [vmem:[#allocation58_spill] sm:$0xff] %v21283_v28 }
 0xb3e   :  { %24438 = vst [vmem:[#allocation56_spill] sm:$0xff] %v21271_v29  ;;  %24439 = vst [vmem:[#allocation57_spill] sm:$0xff] %v21278_v57 }
 0xb40   :  { %8055 = vmatpush1.bf16.msra.mxu0 %v21247_v24  ;;  %8096 = vmatpush1.bf16.msra.mxu1 %v21254_v52  ;;  %v21289_v24 = vld [vmem:[%s23733_s6 + $0xc] ss:$16 sps:$4 sm:$0xff]  }
 0xb41   :  { %8056 = vmatprep.subr.bf16.mxu0 %v21259_v6  ;;  %8097 = vmatprep.subr.bf16.mxu1 %v21265_v3  ;;  %24441 = vst [vmem:[#allocation59_spill] sm:$0xff] %v21289_v24  ;;  %v6861_v6 = vld [vmem:[%s23735_s9] sm:$0xf] }
 0xb42   :  { %v6866_v52 = vrot.slane %v6861_v6, %v24394_v13  ;;  %v6870_v3 = vrot.slane %v6861_v6, %v24395_v33  ;;  %v6874_v37 = vrot.slane %v6861_v6, %v18152_v55  ;;  %v6878_v13 = vrot.slane %v6861_v6, %v18169_v4 }
 0xb44   :  { %8057 = vmatpush1.bf16.msra.mxu0 %v21271_v29  ;;  %8098 = vmatpush1.bf16.msra.mxu1 %v21278_v57 }
 0xb45   :  { %8305 = vmatprep.subr.bf16.mxu0 %v21283_v28  ;;  %8346 = vmatprep.subr.bf16.mxu1 %v21289_v24 }
 0xbba   :  { %v7237_v7 = vpop.f32.mrb[104].mxu0  ;;  %v7278_v39 = vpop.f32.mrb[104].mxu1 }
 0xbbb   :  { %v7238_v0 = vadd.f32 %v7237_v7, %v6866_v52  ;;  %v7239_v17 = vpop.f32.mrb[105].mxu0  ;;  %v7280_v35 = vpop.f32.mrb[105].mxu1  ;;  %v7279_v12 = vadd.f32 %v7278_v39, %v6874_v37  ;;  %v24445_v37 = vld [vmem:[#allocation31_spill] sm:$0xff] }
 0xbbc   :  { %v7240_v29 = vadd.f32 %v7239_v17, %v6870_v3  ;;  %v7241_v23 = vpop.f32.mrb[106].mxu0  ;;  %v7282_v57 = vpop.f32.mrb[106].mxu1  ;;  %v7281_v33 = vadd.f32 %v7280_v35, %v6878_v13  ;;  %v24443_v13 = vld [vmem:[#allocation29_spill] sm:$0xff]  ;;  %v916_v35 = vadd.f32 %v24445_v37, %v18177_v8 }
 0xbbd   :  { %v14785_v61 = vmul.f32 -1.442695, %v7238_v0  ;;  %v7242_v28 = vpop.f32.mrb[107].mxu0  ;;  %v7283_v60 = vpop.f32.mrb[107].mxu1  ;;  %v14787_v10 = vmul.f32 -1.442695, %v7279_v12  ;;  %v914_v12 = vadd.f32 %v24443_v13, %v18157_v59 }
 0xbbe   :  { %v14786_v24 = vmul.f32 -1.442695, %v7240_v29 }
 0xbbf   :  { %17165 = vpow2.f32 %v14785_v61 }
 0xbc0   :  { %17167 = vpow2.f32 %v14786_v24  ;;  %v24442_v24 = vld [vmem:[#allocation28_spill] sm:$0xff] }
 0xbc1   :  { %17169 = vtanh.f32 %v7281_v33  ;;  %v801_v6 = vadd.f32 %v24442_v24, %v18149_v54  ;;  %v24444_v33 = vld [vmem:[#allocation30_spill] sm:$0xff] }
 0xbc2   :  { %17171 = vpow2.f32 %v14787_v10  ;;  %v803_v10 = vadd.f32 %v24444_v33, %v24398_v30 }
 0xbc9   :  { %v17166_v50 = vpop.eup %17165 }
 0xbca   :  { %v7577_v7 = vadd.f32 1.0, %v17166_v50  ;;  %v17168_v52 = vpop.eup %17167 }
 0xbcb   :  { %v7578_v23 = vadd.f32 1.0, %v17168_v52  ;;  %v17170_v17 = vpop.eup %17169 }
 0xbcc   :  { %17173 = vrcp.f32 %v7577_v7  ;;  %v17172_v60 = vpop.eup %17171 }
 0xbcd   :  { %17175 = vrcp.f32 %v7578_v23  ;;  %v7579_v57 = vadd.f32 1.0, %v17172_v60 }
 0xbcf   :  { %17177 = vrcp.f32 %v7579_v57 }
 0xbd6   :  { %v17174_v0 = vpop.eup %17173 }
 0xbd7   :  { %v7588_v61 = vmul.f32 %v17174_v0, %v17170_v17  ;;  %v17176_v28 = vpop.eup %17175 }
 0xbd8   :  { %v7587_v50 = vmul.f32 %v17176_v28, %v20857_v16 }
 0xbd9   :  { %v17178_v37 = vpop.eup %17177 }
 0xbda   :  { %v7516_v39 = vpop.f32.mrb[108].mxu0  ;;  %v7557_v29 = vpop.f32.mrb[108].mxu1  ;;  %v21311_v3 = vadd.f32 %v7588_v61, %v7587_v50 }
 0xbdb   :  { %v7564_v7 = vadd.f32 %v7516_v39, %v801_v6  ;;  %v7566_v52 = vadd.f32 %v7557_v29, %v914_v12  ;;  %v7518_v23 = vpop.f32.mrb[109].mxu0  ;;  %v7559_v17 = vpop.f32.mrb[109].mxu1 }
 0xbdc   :  { %v7565_v60 = vadd.f32 %v7518_v23, %v803_v10  ;;  %v7567_v0 = vadd.f32 %v7559_v17, %v916_v35  ;;  %v7520_v24 = vpop.f32.mrb[110].mxu0  ;;  %v7561_v13 = vpop.f32.mrb[110].mxu1  ;;  %17179 = vtanh.f32 %v21311_v3 }
 0xbdd   :  { %v14789_v16 = vmul.f32 -1.442695, %v7564_v7  ;;  %v7521_v28 = vpop.f32.mrb[111].mxu0  ;;  %v7562_v33 = vpop.f32.mrb[111].mxu1  ;;  %v14791_v50 = vmul.f32 -1.442695, %v7566_v52 }
 0xbde   :  { %v14790_v30 = vmul.f32 -1.442695, %v7565_v60  ;;  %v21324_v28 = vld [vmem:[%s23733_s6] ss:$16 sps:$4 sm:$0xff]   ;;  %v21329_v33 = vld [vmem:[%s23733_s6 + $0x8] ss:$16 sps:$4 sm:$0xff]  }
 0xbdf   :  { %17181 = vpow2.f32 %v14789_v16 }
 0xbe0   :  { %17183 = vpow2.f32 %v14790_v30 }
 0xbe1   :  { %17185 = vtanh.f32 %v7567_v0 }
 0xbe2   :  { %17187 = vpow2.f32 %v14791_v50  ;;  %v21350_v50 = vld [vmem:[%s23733_s6 + $0x20] ss:$16 sps:$4 sm:$0xff]  }
 0xbe6   :  { %v17180_v61 = vpop.eup %17179 }
 0xbe7   :  { %v7591_v6 = vmul.f32 %v17180_v61, %v17178_v37  ;;  %v21341_v61 = vld [vmem:[%s23733_s6 + $0x2c] ss:$16 sps:$4 sm:$0xff]  }
 0xbe9   :  { %v17182_v12 = vpop.eup %17181  ;;  %14788 = vst [vmem:[%s23736_s11 + $0x38] sm:$0xff] %v7591_v6  ;;  %v7619_v57 = vpack.c.bf16 %v7591_v6, %v7591_v6  ;;  %v21355_v6 = vld [vmem:[%s23733_s6 + $0x28] ss:$16 sps:$4 sm:$0xff]  }
 0xbea   :  { %v7603_v39 = vadd.f32 1.0, %v17182_v12  ;;  %v17184_v10 = vpop.eup %17183  ;;  %v21362_v12 = vld [vmem:[%s23733_s6 + $0x44] ss:$16 sps:$4 sm:$0xff]  }
 0xbeb   :  { %v7604_v35 = vadd.f32 1.0, %v17184_v10  ;;  %8058 = vmatprep.mubr.bf16.mxu0 %v7619_v57  ;;  %8099 = vmatprep.mubr.bf16.mxu1 %v7619_v57  ;;  %v17186_v30 = vpop.eup %17185  ;;  %v21376_v57 = vld [vmem:[%s23733_s6 + $0x40] ss:$16 sps:$4 sm:$0xff]   ;;  %v21381_v10 = vld [vmem:[%s23733_s6 + $0x48] ss:$16 sps:$4 sm:$0xff]  }
 0xbec   :  { %17189 = vrcp.f32 %v7603_v39  ;;  %v17188_v29 = vpop.eup %17187  ;;  %v21367_v39 = vld [vmem:[%s23733_s6 + $0x4c] ss:$16 sps:$4 sm:$0xff]  }
 0xbed   :  { %17191 = vrcp.f32 %v7604_v35  ;;  %v7605_v17 = vadd.f32 1.0, %v17188_v29  ;;  %v21388_v35 = vld [vmem:[%s23733_s6 + $0x64] ss:$16 sps:$4 sm:$0xff]   ;;  %v21400_v29 = vld [vmem:[%s23733_s6 + $0x60] ss:$16 sps:$4 sm:$0xff]  }
 0xbef   :  { %17193 = vrcp.f32 %v7605_v17  ;;  %v21424_v17 = vld [vmem:[%s23733_s6 + $0x80] ss:$16 sps:$4 sm:$0xff]  }
 0xbf0   :  { %24447 = vst [vmem:[#allocation61_spill] sm:$0xff] %v21424_v17 }
 0xbf6   :  { %v17190_v7 = vpop.eup %17189 }
 0xbf7   :  { %v7614_v52 = vmul.f32 %v17190_v7, %v17186_v30  ;;  %v17192_v23 = vpop.eup %17191  ;;  %v21393_v30 = vld [vmem:[%s23733_s6 + $0x6c] ss:$16 sps:$4 sm:$0xff]   ;;  %v21405_v7 = vld [vmem:[%s23733_s6 + $0x68] ss:$16 sps:$4 sm:$0xff]  }
 0xbf8   :  { %v7613_v60 = vmul.f32 %v17192_v23, %v20864_v36  ;;  %v21336_v36 = vld [vmem:[%s23733_s6 + $0x24] ss:$16 sps:$4 sm:$0xff]   ;;  %v21417_v23 = vld [vmem:[%s23733_s6 + $0x8c] ss:$16 sps:$4 sm:$0xff]  }
 0xbf9   :  { %v17194_v24 = vpop.eup %17193  ;;  %24446 = vst [vmem:[#allocation60_spill] sm:$0xff] %v21417_v23 }
 0xbfa   :  { %v21318_v0 = vadd.f32 %v7614_v52, %v7613_v60  ;;  %v21412_v52 = vld [vmem:[%s23733_s6 + $0x84] ss:$16 sps:$4 sm:$0xff]   ;;  %v21429_v60 = vld [vmem:[%s23733_s6 + $0x88] ss:$16 sps:$4 sm:$0xff]  }
 0xbfb   :  { %24448 = vst [vmem:[#allocation73_spill] sm:$0xff] %v21429_v60 }
 0xbfc   :  { %17195 = vtanh.f32 %v21318_v0 }
 0xc06   :  { %v17196_v13 = vpop.eup %17195 }
 0xc07   :  { %v7617_v16 = vmul.f32 %v17196_v13, %v17194_v24  ;;  %v21436_v24 = vld [vmem:[%s23733_s6 + $0xa4] ss:$16 sps:$4 sm:$0xff]   ;;  %v21441_v13 = vld [vmem:[%s23733_s6 + $0xac] ss:$16 sps:$4 sm:$0xff]  }
 0xc08   :  { %24449 = vst [vmem:[#allocation75_spill] sm:$0xff] %v21436_v24  ;;  %24450 = vst [vmem:[#allocation72_spill] sm:$0xff] %v21441_v13 }
 0xc09   :  { %v21331_v37 = vpack.c.bf16 %v7617_v16, %v7617_v16  ;;  %v21448_v16 = vld [vmem:[%s23733_s6 + $0xa0] ss:$16 sps:$4 sm:$0xff]  }
 0xc0a   :  { %24451 = vst [vmem:[#allocation74_spill] sm:$0xff] %v21448_v16 }
 0xc0b   :  { %8059 = vmatmul.mubr.bf16.vlgmr.msra.gmra.mrb[112].mxu0 %v21331_v37  ;;  %8100 = vmatmul.mubr.bf16.vlgmr.msra.gmra.mrb[112].mxu1 %v21331_v37 }
 0xc0c   :  { %8306 = vmatpush1.bf16.msra.mxu0 %v21324_v28  ;;  %8347 = vmatpush1.bf16.msra.mxu1 %v21329_v33 }
 0xc0d   :  { %8307 = vmatprep.subr.bf16.mxu0 %v21336_v36  ;;  %8348 = vmatprep.subr.bf16.mxu1 %v21341_v61 }
 0xc0e   :  { %8337 = vmatprep.mubr.bf16.mxu0 %v24094_v58  ;;  %8378 = vmatprep.mubr.bf16.mxu1 %v24094_v58 }
 0xc10   :  { %8308 = vmatpush1.bf16.msra.mxu0 %v21350_v50  ;;  %8349 = vmatpush1.bf16.msra.mxu1 %v21355_v6 }
 0xc11   :  { %8309 = vmatprep.subr.bf16.mxu0 %v21362_v12  ;;  %8350 = vmatprep.subr.bf16.mxu1 %v21367_v39 }
 0xc14   :  { %8310 = vmatpush1.bf16.msra.mxu0 %v21376_v57  ;;  %8351 = vmatpush1.bf16.msra.mxu1 %v21381_v10 }
 0xc15   :  { %8311 = vmatprep.subr.bf16.mxu0 %v21388_v35  ;;  %8352 = vmatprep.subr.bf16.mxu1 %v21393_v30 }
 0xc18   :  { %8312 = vmatpush1.bf16.msra.mxu0 %v21400_v29  ;;  %8353 = vmatpush1.bf16.msra.mxu1 %v21405_v7 }
 0xc19   :  { %8313 = vmatprep.subr.bf16.mxu0 %v21412_v52  ;;  %8354 = vmatprep.subr.bf16.mxu1 %v21417_v23  ;;  %v21453_v23 = vld [vmem:[%s23733_s6 + $0xa8] ss:$16 sps:$4 sm:$0xff]  }
 0xc1a   :  { %24452 = vst [vmem:[#allocation76_spill] sm:$0xff] %v21453_v23 }
 0xc1c   :  { %8314 = vmatpush1.bf16.msra.mxu0 %v21424_v17  ;;  %8355 = vmatpush1.bf16.msra.mxu1 %v21429_v60  ;;  %v21460_v17 = vld [vmem:[%s23733_s6 + $0xc4] ss:$16 sps:$4 sm:$0xff]   ;;  %v21465_v60 = vld [vmem:[%s23733_s6 + $0xcc] ss:$16 sps:$4 sm:$0xff]  }
 0xc1d   :  { %8315 = vmatprep.subr.bf16.mxu0 %v21436_v24  ;;  %8356 = vmatprep.subr.bf16.mxu1 %v21441_v13  ;;  %24453 = vst [vmem:[#allocation77_spill] sm:$0xff] %v21460_v17  ;;  %24454 = vst [vmem:[#allocation78_spill] sm:$0xff] %v21465_v60  ;;  %v21472_v24 = vld [vmem:[%s23733_s6 + $0xc0] ss:$16 sps:$4 sm:$0xff]   ;;  %v21477_v13 = vld [vmem:[%s23733_s6 + $0xc8] ss:$16 sps:$4 sm:$0xff]  }
 0xc20   :  { %8316 = vmatpush1.bf16.msra.mxu0 %v21448_v16  ;;  %8357 = vmatpush1.bf16.msra.mxu1 %v21453_v23  ;;  %v21484_v16 = vld [vmem:[%s23733_s6 + $0xe4] ss:$16 sps:$4 sm:$0xff]   ;;  %v21489_v23 = vld [vmem:[%s23733_s6 + $0xec] ss:$16 sps:$4 sm:$0xff]  }
 0xc21   :  { %8317 = vmatprep.subr.bf16.mxu0 %v21460_v17  ;;  %8358 = vmatprep.subr.bf16.mxu1 %v21465_v60  ;;  %v21496_v17 = vld [vmem:[%s23733_s6 + $0xe0] ss:$16 sps:$4 sm:$0xff]   ;;  %v21501_v60 = vld [vmem:[%s23733_s6 + $0xe8] ss:$16 sps:$4 sm:$0xff]  }
 0xc24   :  { %8318 = vmatpush1.bf16.msra.mxu0 %v21472_v24  ;;  %8359 = vmatpush1.bf16.msra.mxu1 %v21477_v13 }
 0xc25   :  { %8319 = vmatprep.subr.bf16.mxu0 %v21484_v16  ;;  %8360 = vmatprep.subr.bf16.mxu1 %v21489_v23 }
 0xc28   :  { %8320 = vmatpush1.bf16.msra.mxu0 %v21496_v17  ;;  %8361 = vmatpush1.bf16.msra.mxu1 %v21501_v60 }
 0xc29   :  { %8849 = vmatprep.subr.bf16.mxu0 %v20902_v27  ;;  %8890 = vmatprep.subr.bf16.mxu1 %v20907_v5  ;;  %v24455_v27 = vld [vmem:[#allocation17_spill] sm:$0xff]  ;;  %v24456_v5 = vld [vmem:[#allocation18_spill] sm:$0xff] }
 0xc2b   :  { %8338 = vmatmul.mubr.bf16.vlgmr.msra.gmra.mrb[116].mxu0 %v21331_v37  ;;  %8379 = vmatmul.mubr.bf16.vlgmr.msra.gmra.mrb[116].mxu1 %v21331_v37 }
 0xc2c   :  { %8850 = vmatpush1.bf16.msra.mxu0 %v20912_v19  ;;  %8891 = vmatpush1.bf16.msra.mxu1 %v20917_v34  ;;  %v24457_v19 = vld [vmem:[#allocation19_spill] sm:$0xff]  ;;  %v24458_v34 = vld [vmem:[#allocation8_spill] sm:$0xff] }
 0xc2d   :  { %8851 = vmatprep.subr.bf16.mxu0 %v20926_v31  ;;  %8892 = vmatprep.subr.bf16.mxu1 %v20931_v38  ;;  %v24459_v31 = vld [vmem:[#allocation9_spill] sm:$0xff]  ;;  %v24460_v38 = vld [vmem:[#allocation10_spill] sm:$0xff] }
 0xc30   :  { %8852 = vmatpush1.bf16.msra.mxu0 %v20936_v15  ;;  %8893 = vmatpush1.bf16.msra.mxu1 %v20941_v22  ;;  %v24461_v15 = vld [vmem:[#allocation11_spill] sm:$0xff]  ;;  %v24462_v22 = vld [vmem:[#allocation4_spill] sm:$0xff] }
 0xc31   :  { %8853 = vmatprep.subr.bf16.mxu0 %v20950_v11  ;;  %8894 = vmatprep.subr.bf16.mxu1 %v20955_v21  ;;  %v24463_v11 = vld [vmem:[#allocation5_spill] sm:$0xff]  ;;  %v24464_v21 = vld [vmem:[#allocation6_spill] sm:$0xff] }
 0xc34   :  { %8854 = vmatpush1.bf16.msra.mxu0 %v20960_v14  ;;  %8895 = vmatpush1.bf16.msra.mxu1 %v20965_v25  ;;  %v24465_v14 = vld [vmem:[#allocation7_spill] sm:$0xff]  ;;  %v24466_v25 = vld [vmem:[#allocation94_spill] sm:$0xff] }
 0xc35   :  { %8855 = vmatprep.subr.bf16.mxu0 %v20974_v56  ;;  %8896 = vmatprep.subr.bf16.mxu1 %v20979_v26  ;;  %v24467_v56 = vld [vmem:[#allocation20_spill] sm:$0xff]  ;;  %v24468_v26 = vld [vmem:[#allocation21_spill] sm:$0xff] }
 0xc38   :  { %8856 = vmatpush1.bf16.msra.mxu0 %v20984_v32  ;;  %8897 = vmatpush1.bf16.msra.mxu1 %v20989_v49  ;;  %v24469_v32 = vld [vmem:[#allocation22_spill] sm:$0xff]  ;;  %v24470_v49 = vld [vmem:[#allocation23_spill] sm:$0xff] }
 0xc39   :  { %8857 = vmatprep.subr.bf16.mxu0 %v20998_v20  ;;  %8898 = vmatprep.subr.bf16.mxu1 %v21003_v53  ;;  %v24471_v20 = vld [vmem:[#allocation95_spill] sm:$0xff]  ;;  %v24472_v53 = vld [vmem:[#allocation96_spill] sm:$0xff] }
 0xc3c   :  { %8858 = vmatpush1.bf16.msra.mxu0 %v21008_v51  ;;  %8899 = vmatpush1.bf16.msra.mxu1 %v21013_v45  ;;  %v24473_v51 = vld [vmem:[#allocation98_spill] sm:$0xff]  ;;  %v24474_v45 = vld [vmem:[#allocation13_spill] sm:$0xff] }
 0xc3d   :  { %8859 = vmatprep.subr.bf16.mxu0 %v21022_v9  ;;  %8900 = vmatprep.subr.bf16.mxu1 %v21027_v40  ;;  %v24475_v9 = vld [vmem:[#allocation97_spill] sm:$0xff]  ;;  %v24476_v40 = vld [vmem:[#allocation12_spill] sm:$0xff] }
 0xc40   :  { %8860 = vmatpush1.bf16.msra.mxu0 %v21032_v62  ;;  %8901 = vmatpush1.bf16.msra.mxu1 %v21037_v41  ;;  %v24477_v62 = vld [vmem:[#allocation14_spill] sm:$0xff]  ;;  %v24478_v41 = vld [vmem:[#allocation15_spill] sm:$0xff] }
 0xc41   :  { %8861 = vmatprep.subr.bf16.mxu0 %v21046_v48  ;;  %8902 = vmatprep.subr.bf16.mxu1 %v21051_v42  ;;  %v24479_v48 = vld [vmem:[#allocation52_spill] sm:$0xff]  ;;  %v24480_v42 = vld [vmem:[#allocation53_spill] sm:$0xff] }
 0xc44   :  { %8862 = vmatpush1.bf16.msra.mxu0 %v21056_v63  ;;  %8903 = vmatpush1.bf16.msra.mxu1 %v21061_v43  ;;  %v24481_v63 = vld [vmem:[#allocation54_spill] sm:$0xff]  ;;  %v24482_v43 = vld [vmem:[#allocation55_spill] sm:$0xff] }
 0xc45   :  { %8863 = vmatprep.subr.bf16.mxu0 %v21070_v18  ;;  %8904 = vmatprep.subr.bf16.mxu1 %v21075_v1  ;;  %v24483_v18 = vld [vmem:[#allocation56_spill] sm:$0xff]  ;;  %v24484_v1 = vld [vmem:[#allocation57_spill] sm:$0xff] }
 0xc48   :  { %8864 = vmatpush1.bf16.msra.mxu0 %v21080_v44  ;;  %8905 = vmatpush1.bf16.msra.mxu1 %v21085_v46  ;;  %v24485_v44 = vld [vmem:[#allocation58_spill] sm:$0xff]  ;;  %v24486_v46 = vld [vmem:[#allocation59_spill] sm:$0xff] }
 0xc49   :  { %8865 = vmatprep.subr.bf16.mxu0 %v21094_v2  ;;  %8906 = vmatprep.subr.bf16.mxu1 %v21099_v47  ;;  %v7684_v2 = vld [vmem:[%s23735_s9] sm:$0xf] }
 0xc4a   :  { %v24487_v47 = vld [vmem:[#allocation3_spill] sm:$0xff] }
 0xc4b   :  { %v7689_v37 = vrot.slane %v7684_v2, %v24487_v47 }
 0xc4c   :  { %8866 = vmatpush1.bf16.msra.mxu0 %v24455_v27  ;;  %8907 = vmatpush1.bf16.msra.mxu1 %v24456_v5  ;;  %v24488_v27 = vld [vmem:[#allocation70_spill] sm:$0xff] }
 0xc4d   :  { %8867 = vmatprep.subr.bf16.mxu0 %v24457_v19  ;;  %8908 = vmatprep.subr.bf16.mxu1 %v24458_v34  ;;  %v7693_v5 = vrot.slane %v7684_v2, %v24488_v27 }
 0xc50   :  { %8868 = vmatpush1.bf16.msra.mxu0 %v24459_v31  ;;  %8909 = vmatpush1.bf16.msra.mxu1 %v24460_v38 }
 0xc51   :  { %8869 = vmatprep.subr.bf16.mxu0 %v24461_v15  ;;  %8910 = vmatprep.subr.bf16.mxu1 %v24462_v22 }
 0xc54   :  { %8870 = vmatpush1.bf16.msra.mxu0 %v24463_v11  ;;  %8911 = vmatpush1.bf16.msra.mxu1 %v24464_v21 }
 0xc55   :  { %8871 = vmatprep.subr.bf16.mxu0 %v24465_v14  ;;  %8912 = vmatprep.subr.bf16.mxu1 %v24466_v25 }
 0xc58   :  { %8872 = vmatpush1.bf16.msra.mxu0 %v24467_v56  ;;  %8913 = vmatpush1.bf16.msra.mxu1 %v24468_v26 }
 0xc59   :  { %8873 = vmatprep.subr.bf16.mxu0 %v24469_v32  ;;  %8914 = vmatprep.subr.bf16.mxu1 %v24470_v49  ;;  %v7697_v32 = vrot.slane %v7684_v2, %v18152_v55  ;;  %v7701_v49 = vrot.slane %v7684_v2, %v18169_v4 }
 0xc5c   :  { %8874 = vmatpush1.bf16.msra.mxu0 %v24471_v20  ;;  %8915 = vmatpush1.bf16.msra.mxu1 %v24472_v53 }
 0xc5d   :  { %8875 = vmatprep.subr.bf16.mxu0 %v24473_v51  ;;  %8916 = vmatprep.subr.bf16.mxu1 %v24474_v45 }
 0xc60   :  { %8876 = vmatpush1.bf16.msra.mxu0 %v24475_v9  ;;  %8917 = vmatpush1.bf16.msra.mxu1 %v24476_v40 }
 0xc61   :  { %8877 = vmatprep.subr.bf16.mxu0 %v24477_v62  ;;  %8918 = vmatprep.subr.bf16.mxu1 %v24478_v41 }
 0xc64   :  { %8878 = vmatpush1.bf16.msra.mxu0 %v24479_v48  ;;  %8919 = vmatpush1.bf16.msra.mxu1 %v24480_v42 }
 0xc65   :  { %8879 = vmatprep.subr.bf16.mxu0 %v24481_v63  ;;  %8920 = vmatprep.subr.bf16.mxu1 %v24482_v43 }
 0xc68   :  { %8880 = vmatpush1.bf16.msra.mxu0 %v24483_v18  ;;  %8921 = vmatpush1.bf16.msra.mxu1 %v24484_v1  ;;  %v24489_v1 = vld [vmem:[#allocation32_spill] sm:$0xff] }
 0xc69   :  { %9128 = vmatprep.subr.bf16.mxu0 %v24485_v44  ;;  %9169 = vmatprep.subr.bf16.mxu1 %v24486_v46  ;;  %v805_v44 = vadd.f32 %v24489_v1, %v18149_v54  ;;  %v24490_v46 = vld [vmem:[#allocation33_spill] sm:$0xff] }
 0xc6a   :  { %v918_v2 = vadd.f32 %v24490_v46, %v18157_v59 }
 0xcde   :  { %v8060_v19 = vpop.f32.mrb[112].mxu0  ;;  %v8101_v34 = vpop.f32.mrb[112].mxu1 }
 0xcdf   :  { %v8061_v31 = vadd.f32 %v8060_v19, %v7689_v37  ;;  %v8062_v38 = vpop.f32.mrb[113].mxu0  ;;  %v8103_v15 = vpop.f32.mrb[113].mxu1  ;;  %v8102_v20 = vadd.f32 %v8101_v34, %v7697_v32  ;;  %v24492_v19 = vld [vmem:[#allocation34_spill] sm:$0xff] }
 0xce0   :  { %v8063_v22 = vadd.f32 %v8062_v38, %v7693_v5  ;;  %v8064_v11 = vpop.f32.mrb[114].mxu0  ;;  %v8105_v21 = vpop.f32.mrb[114].mxu1  ;;  %v8104_v53 = vadd.f32 %v8103_v15, %v7701_v49  ;;  %v24491_v5 = vld [vmem:[#allocation71_spill] sm:$0xff] }
 0xce1   :  { %v14888_v14 = vmul.f32 -1.442695, %v8061_v31  ;;  %v8065_v25 = vpop.f32.mrb[115].mxu0  ;;  %v8106_v56 = vpop.f32.mrb[115].mxu1  ;;  %v14890_v51 = vmul.f32 -1.442695, %v8102_v20  ;;  %v807_v34 = vadd.f32 %v24492_v19, %v24491_v5 }
 0xce2   :  { %v14889_v26 = vmul.f32 -1.442695, %v8063_v22  ;;  %v24493_v31 = vld [vmem:[#allocation35_spill] sm:$0xff] }
 0xce3   :  { %17197 = vpow2.f32 %v14888_v14  ;;  %v920_v38 = vadd.f32 %v24493_v31, %v18177_v8 }
 0xce4   :  { %17199 = vpow2.f32 %v14889_v26 }
 0xce5   :  { %17201 = vtanh.f32 %v8104_v53 }
 0xce6   :  { %17203 = vpow2.f32 %v14890_v51 }
 0xced   :  { %v17198_v45 = vpop.eup %17197 }
 0xcee   :  { %v8400_v9 = vadd.f32 1.0, %v17198_v45  ;;  %v17200_v40 = vpop.eup %17199 }
 0xcef   :  { %v8401_v62 = vadd.f32 1.0, %v17200_v40  ;;  %v17202_v41 = vpop.eup %17201 }
 0xcf0   :  { %17205 = vrcp.f32 %v8400_v9  ;;  %v17204_v48 = vpop.eup %17203 }
 0xcf1   :  { %17207 = vrcp.f32 %v8401_v62  ;;  %v8402_v18 = vadd.f32 1.0, %v17204_v48 }
 0xcf3   :  { %17209 = vrcp.f32 %v8402_v18 }
 0xcfa   :  { %v17206_v42 = vpop.eup %17205 }
 0xcfb   :  { %v8411_v63 = vmul.f32 %v17206_v42, %v17202_v41  ;;  %v17208_v43 = vpop.eup %17207 }
 0xcfc   :  { %v8410_v37 = vmul.f32 %v17208_v43, %v21311_v3 }
 0xcfd   :  { %v17210_v9 = vpop.eup %17209 }
 0xcfe   :  { %v8339_v15 = vpop.f32.mrb[116].mxu0  ;;  %v8380_v22 = vpop.f32.mrb[116].mxu1  ;;  %v21591_v11 = vadd.f32 %v8411_v63, %v8410_v37 }
 0xcff   :  { %v8387_v21 = vadd.f32 %v8339_v15, %v805_v44  ;;  %v8389_v14 = vadd.f32 %v8380_v22, %v918_v2  ;;  %v8341_v25 = vpop.f32.mrb[117].mxu0  ;;  %v8382_v56 = vpop.f32.mrb[117].mxu1 }
 0xd00   :  { %v8388_v26 = vadd.f32 %v8341_v25, %v807_v34  ;;  %v8390_v32 = vadd.f32 %v8382_v56, %v920_v38  ;;  %v8343_v49 = vpop.f32.mrb[118].mxu0  ;;  %v8384_v20 = vpop.f32.mrb[118].mxu1  ;;  %17211 = vtanh.f32 %v21591_v11  ;;  %v21718_v25 = vld [vmem:[%s23730_s8 + $0x60] ss:$16 sps:$4 sm:$0xff]   ;;  %v21723_v56 = vld [vmem:[%s23730_s8 + $0x68] ss:$16 sps:$4 sm:$0xff]  }
 0xd01   :  { %v14892_v3 = vmul.f32 -1.442695, %v8387_v21  ;;  %v8344_v53 = vpop.f32.mrb[119].mxu0  ;;  %v8385_v51 = vpop.f32.mrb[119].mxu1  ;;  %v14894_v62 = vmul.f32 -1.442695, %v8389_v14 }
 0xd02   :  { %v14893_v45 = vmul.f32 -1.442695, %v8388_v26  ;;  %v21713_v14 = vld [vmem:[%s23730_s8 + $0x6c] ss:$16 sps:$4 sm:$0xff]   ;;  %v21732_v26 = vld [vmem:[%s23730_s8 + $0x84] ss:$16 sps:$4 sm:$0xff]  }
 0xd03   :  { %17213 = vpow2.f32 %v14892_v3  ;;  %v21742_v49 = vld [vmem:[%s23730_s8 + $0x80] ss:$16 sps:$4 sm:$0xff]   ;;  %v21747_v20 = vld [vmem:[%s23730_s8 + $0x88] ss:$16 sps:$4 sm:$0xff]   ;;  %v21756_v3 = vld [vmem:[%s23730_s8 + $0xa4] ss:$16 sps:$4 sm:$0xff]  }
 0xd04   :  { %17215 = vpow2.f32 %v14893_v45  ;;  %v21761_v53 = vld [vmem:[%s23730_s8 + $0xac] ss:$16 sps:$4 sm:$0xff]   ;;  %v21766_v51 = vld [vmem:[%s23730_s8 + $0xa0] ss:$16 sps:$4 sm:$0xff]   ;;  %v21771_v45 = vld [vmem:[%s23730_s8 + $0xa8] ss:$16 sps:$4 sm:$0xff]  }
 0xd05   :  { %17217 = vtanh.f32 %v8390_v32  ;;  %v21737_v32 = vld [vmem:[%s23730_s8 + $0x8c] ss:$16 sps:$4 sm:$0xff]  }
 0xd06   :  { %17219 = vpow2.f32 %v14894_v62  ;;  %v21790_v62 = vld [vmem:[%s23730_s8 + $0xc0] ss:$16 sps:$4 sm:$0xff]  }
 0xd0a   :  { %v17212_v40 = vpop.eup %17211 }
 0xd0b   :  { %v8414_v41 = vmul.f32 %v17212_v40, %v17210_v9  ;;  %v21780_v9 = vld [vmem:[%s23730_s8 + $0xc4] ss:$16 sps:$4 sm:$0xff]   ;;  %v21785_v40 = vld [vmem:[%s23730_s8 + $0xcc] ss:$16 sps:$4 sm:$0xff]  }
 0xd0d   :  { %v17214_v48 = vpop.eup %17213  ;;  %14891 = vst [vmem:[%s23736_s11 + $0x40] sm:$0xff] %v8414_v41  ;;  %v8442_v63 = vpack.c.bf16 %v8414_v41, %v8414_v41  ;;  %v21795_v41 = vld [vmem:[%s23730_s8 + $0xc8] ss:$16 sps:$4 sm:$0xff]  }
 0xd0e   :  { %v8426_v42 = vadd.f32 1.0, %v17214_v48  ;;  %v17216_v43 = vpop.eup %17215  ;;  %v21804_v48 = vld [vmem:[%s23730_s8 + $0xe4] ss:$16 sps:$4 sm:$0xff]  }
 0xd0f   :  { %v8427_v18 = vadd.f32 1.0, %v17216_v43  ;;  %8881 = vmatprep.mubr.bf16.mxu0 %v8442_v63  ;;  %8922 = vmatprep.mubr.bf16.mxu1 %v8442_v63  ;;  %v17218_v1 = vpop.eup %17217  ;;  %v21814_v63 = vld [vmem:[%s23730_s8 + $0xe0] ss:$16 sps:$4 sm:$0xff]   ;;  %v21819_v43 = vld [vmem:[%s23730_s8 + $0xe8] ss:$16 sps:$4 sm:$0xff]  }
 0xd10   :  { %17221 = vrcp.f32 %v8426_v42  ;;  %v17220_v44 = vpop.eup %17219  ;;  %v21809_v42 = vld [vmem:[%s23730_s8 + $0xec] ss:$16 sps:$4 sm:$0xff]  }
 0xd11   :  { %17223 = vrcp.f32 %v8427_v18  ;;  %v8428_v19 = vadd.f32 1.0, %v17220_v44  ;;  %v21828_v18 = vld [vmem:[%s23730_s8 + $0x104] ss:$16 sps:$4 sm:$0xff]   ;;  %v21838_v44 = vld [vmem:[%s23730_s8 + $0x100] ss:$16 sps:$4 sm:$0xff]  }
 0xd12   :  { %24503 = vst [vmem:[#allocation79_spill] sm:$0xff] %v21838_v44 }
 0xd13   :  { %17225 = vrcp.f32 %v8428_v19  ;;  %v21862_v19 = vld [vmem:[%s23730_s8 + $0x120] ss:$16 sps:$4 sm:$0xff]  }
 0xd14   :  { %24507 = vst [vmem:[#allocation80_spill] sm:$0xff] %v21862_v19 }
 0xd1a   :  { %v17222_v46 = vpop.eup %17221 }
 0xd1b   :  { %v8437_v2 = vmul.f32 %v17222_v46, %v17218_v1  ;;  %v17224_v37 = vpop.eup %17223  ;;  %v21833_v1 = vld [vmem:[%s23730_s8 + $0x10c] ss:$16 sps:$4 sm:$0xff]   ;;  %v21843_v46 = vld [vmem:[%s23730_s8 + $0x108] ss:$16 sps:$4 sm:$0xff]  }
 0xd1c   :  { %v8436_v34 = vmul.f32 %v17224_v37, %v21318_v0  ;;  %v24494_v0 = vld [vmem:[#allocation60_spill] sm:$0xff]  ;;  %24504 = vst [vmem:[#allocation83_spill] sm:$0xff] %v21843_v46 }
 0xd1d   :  { %v17226_v38 = vpop.eup %17225  ;;  %v21857_v37 = vld [vmem:[%s23730_s8 + $0x12c] ss:$16 sps:$4 sm:$0xff]  }
 0xd1e   :  { %v21598_v31 = vadd.f32 %v8437_v2, %v8436_v34  ;;  %v21852_v2 = vld [vmem:[%s23730_s8 + $0x124] ss:$16 sps:$4 sm:$0xff]   ;;  %24506 = vst [vmem:[#allocation81_spill] sm:$0xff] %v21857_v37  ;;  %v21867_v34 = vld [vmem:[%s23730_s8 + $0x128] ss:$16 sps:$4 sm:$0xff]  }
 0xd1f   :  { %24505 = vst [vmem:[#allocation82_spill] sm:$0xff] %v21852_v2  ;;  %24508 = vst [vmem:[#allocation84_spill] sm:$0xff] %v21867_v34 }
 0xd20   :  { %17227 = vtanh.f32 %v21598_v31 }
 0xd2a   :  { %v17228_v15 = vpop.eup %17227 }
 0xd2b   :  { %v8440_v22 = vmul.f32 %v17228_v15, %v17226_v38  ;;  %v21876_v38 = vld [vmem:[%s23730_s8 + $0x144] ss:$16 sps:$4 sm:$0xff]   ;;  %v21881_v15 = vld [vmem:[%s23730_s8 + $0x14c] ss:$16 sps:$4 sm:$0xff]  }
 0xd2c   :  { %24509 = vst [vmem:[#allocation85_spill] sm:$0xff] %v21876_v38  ;;  %24510 = vst [vmem:[#allocation24_spill] sm:$0xff] %v21881_v15 }
 0xd2d   :  { %v8441_v21 = vpack.c.bf16 %v8440_v22, %v8440_v22  ;;  %v21886_v22 = vld [vmem:[%s23730_s8 + $0x140] ss:$16 sps:$4 sm:$0xff]  }
 0xd2e   :  { %24511 = vst [vmem:[#allocation25_spill] sm:$0xff] %v21886_v22 }
 0xd2f   :  { %8882 = vmatmul.mubr.bf16.vlgmr.msra.gmra.mrb[120].mxu0 %v8441_v21  ;;  %8923 = vmatmul.mubr.bf16.vlgmr.msra.gmra.mrb[120].mxu1 %v8441_v21 }
 0xd30   :  { %9129 = vmatpush1.bf16.msra.mxu0 %v21324_v28  ;;  %9170 = vmatpush1.bf16.msra.mxu1 %v21329_v33  ;;  %v24495_v28 = vld [vmem:[#allocation61_spill] sm:$0xff] }
 0xd31   :  { %9130 = vmatprep.subr.bf16.mxu0 %v21336_v36  ;;  %9171 = vmatprep.subr.bf16.mxu1 %v21341_v61  ;;  %v24496_v33 = vld [vmem:[#allocation73_spill] sm:$0xff]  ;;  %v24497_v36 = vld [vmem:[#allocation75_spill] sm:$0xff]  ;;  %v24498_v61 = vld [vmem:[#allocation72_spill] sm:$0xff] }
 0xd32   :  { %9160 = vmatprep.mubr.bf16.mxu0 %v24094_v58  ;;  %9201 = vmatprep.mubr.bf16.mxu1 %v24094_v58 }
 0xd34   :  { %9131 = vmatpush1.bf16.msra.mxu0 %v21350_v50  ;;  %9172 = vmatpush1.bf16.msra.mxu1 %v21355_v6  ;;  %v24499_v50 = vld [vmem:[#allocation74_spill] sm:$0xff]  ;;  %v24500_v6 = vld [vmem:[#allocation76_spill] sm:$0xff] }
 0xd35   :  { %9132 = vmatprep.subr.bf16.mxu0 %v21362_v12  ;;  %9173 = vmatprep.subr.bf16.mxu1 %v21367_v39  ;;  %v24501_v12 = vld [vmem:[#allocation77_spill] sm:$0xff]  ;;  %v24502_v39 = vld [vmem:[#allocation78_spill] sm:$0xff] }
 0xd38   :  { %9133 = vmatpush1.bf16.msra.mxu0 %v21376_v57  ;;  %9174 = vmatpush1.bf16.msra.mxu1 %v21381_v10  ;;  %v21636_v57 = vld [vmem:[%s23730_s8 + $0x4] ss:$16 sps:$4 sm:$0xff]   ;;  %v21641_v10 = vld [vmem:[%s23730_s8 + $0xc] ss:$16 sps:$4 sm:$0xff]  }
 0xd39   :  { %9134 = vmatprep.subr.bf16.mxu0 %v21388_v35  ;;  %9175 = vmatprep.subr.bf16.mxu1 %v21393_v30  ;;  %v21646_v35 = vld [vmem:[%s23730_s8] ss:$16 sps:$4 sm:$0xff]   ;;  %v21651_v30 = vld [vmem:[%s23730_s8 + $0x8] ss:$16 sps:$4 sm:$0xff]  }
 0xd3c   :  { %9135 = vmatpush1.bf16.msra.mxu0 %v21400_v29  ;;  %9176 = vmatpush1.bf16.msra.mxu1 %v21405_v7  ;;  %v21660_v29 = vld [vmem:[%s23730_s8 + $0x24] ss:$16 sps:$4 sm:$0xff]   ;;  %v21665_v7 = vld [vmem:[%s23730_s8 + $0x2c] ss:$16 sps:$4 sm:$0xff]  }
 0xd3d   :  { %9136 = vmatprep.subr.bf16.mxu0 %v21412_v52  ;;  %9177 = vmatprep.subr.bf16.mxu1 %v24494_v0  ;;  %v21670_v52 = vld [vmem:[%s23730_s8 + $0x20] ss:$16 sps:$4 sm:$0xff]   ;;  %v21900_v0 = vld [vmem:[%s23730_s8 + $0x164] ss:$16 sps:$4 sm:$0xff]  }
 0xd3e   :  { %24513 = vst [vmem:[#allocation27_spill] sm:$0xff] %v21900_v0 }
 0xd40   :  { %9137 = vmatpush1.bf16.msra.mxu0 %v24495_v28  ;;  %9178 = vmatpush1.bf16.msra.mxu1 %v24496_v33  ;;  %v21905_v28 = vld [vmem:[%s23730_s8 + $0x16c] ss:$16 sps:$4 sm:$0xff]   ;;  %v21910_v33 = vld [vmem:[%s23730_s8 + $0x160] ss:$16 sps:$4 sm:$0xff]  }
 0xd41   :  { %9138 = vmatprep.subr.bf16.mxu0 %v24497_v36  ;;  %9179 = vmatprep.subr.bf16.mxu1 %v24498_v61  ;;  %24514 = vst [vmem:[#allocation86_spill] sm:$0xff] %v21905_v28  ;;  %24515 = vst [vmem:[#allocation87_spill] sm:$0xff] %v21910_v33  ;;  %v21915_v36 = vld [vmem:[%s23730_s8 + $0x168] ss:$16 sps:$4 sm:$0xff]   ;;  %v21924_v61 = vld [vmem:[%s23730_s8 + $0x184] ss:$16 sps:$4 sm:$0xff]  }
 0xd42   :  { %24516 = vst [vmem:[#allocation88_spill] sm:$0xff] %v21915_v36  ;;  %24517 = vst [vmem:[#allocation89_spill] sm:$0xff] %v21924_v61 }
 0xd44   :  { %9139 = vmatpush1.bf16.msra.mxu0 %v24499_v50  ;;  %9180 = vmatpush1.bf16.msra.mxu1 %v24500_v6  ;;  %v21929_v50 = vld [vmem:[%s23730_s8 + $0x18c] ss:$16 sps:$4 sm:$0xff]   ;;  %v21934_v6 = vld [vmem:[%s23730_s8 + $0x180] ss:$16 sps:$4 sm:$0xff]  }
 0xd45   :  { %9140 = vmatprep.subr.bf16.mxu0 %v24501_v12  ;;  %9181 = vmatprep.subr.bf16.mxu1 %v24502_v39  ;;  %24518 = vst [vmem:[#allocation90_spill] sm:$0xff] %v21929_v50  ;;  %24519 = vst [vmem:[#allocation91_spill] sm:$0xff] %v21934_v6  ;;  %v21939_v12 = vld [vmem:[%s23730_s8 + $0x188] ss:$16 sps:$4 sm:$0xff]   ;;  %v21948_v39 = vld [vmem:[%s23730_s8 + $0x1a0] ss:$16 sps:$4 sm:$0xff]  }
 0xd46   :  { %24520 = vst [vmem:[#allocation92_spill] sm:$0xff] %v21939_v12  ;;  %24521 = vst [vmem:[#allocation93_spill] sm:$0xff] %v21948_v39 }
 0xd48   :  { %9141 = vmatpush1.bf16.msra.mxu0 %v21472_v24  ;;  %9182 = vmatpush1.bf16.msra.mxu1 %v21477_v13  ;;  %v21694_v24 = vld [vmem:[%s23730_s8 + $0x40] ss:$16 sps:$4 sm:$0xff]   ;;  %v21699_v13 = vld [vmem:[%s23730_s8 + $0x48] ss:$16 sps:$4 sm:$0xff]  }
 0xd49   :  { %9142 = vmatprep.subr.bf16.mxu0 %v21484_v16  ;;  %9183 = vmatprep.subr.bf16.mxu1 %v21489_v23  ;;  %v21675_v23 = vld [vmem:[%s23730_s8 + $0x28] ss:$16 sps:$4 sm:$0xff]   ;;  %v21708_v16 = vld [vmem:[%s23730_s8 + $0x64] ss:$16 sps:$4 sm:$0xff]  }
 0xd4c   :  { %9143 = vmatpush1.bf16.msra.mxu0 %v21496_v17  ;;  %9184 = vmatpush1.bf16.msra.mxu1 %v21501_v60  ;;  %v21684_v17 = vld [vmem:[%s23730_s8 + $0x44] ss:$16 sps:$4 sm:$0xff]   ;;  %v21689_v60 = vld [vmem:[%s23730_s8 + $0x4c] ss:$16 sps:$4 sm:$0xff]  }
 0xd4d   :  { %9672 = vmatprep.subr.bf16.mxu0 %v21636_v57  ;;  %9713 = vmatprep.subr.bf16.mxu1 %v21641_v10 }
 0xd4f   :  { %9161 = vmatmul.mubr.bf16.vlgmr.msra.gmra.mrb[124].mxu0 %v8441_v21  ;;  %9202 = vmatmul.mubr.bf16.vlgmr.msra.gmra.mrb[124].mxu1 %v8441_v21  ;;  %v21891_v21 = vld [vmem:[%s23730_s8 + $0x148] ss:$16 sps:$4 sm:$0xff]  }
 0xd50   :  { %9673 = vmatpush1.bf16.msra.mxu0 %v21646_v35  ;;  %9714 = vmatpush1.bf16.msra.mxu1 %v21651_v30  ;;  %24512 = vst [vmem:[#allocation26_spill] sm:$0xff] %v21891_v21 }
 0xd51   :  { %9674 = vmatprep.subr.bf16.mxu0 %v21660_v29  ;;  %9715 = vmatprep.subr.bf16.mxu1 %v21665_v7 }
 0xd54   :  { %9675 = vmatpush1.bf16.msra.mxu0 %v21670_v52  ;;  %9716 = vmatpush1.bf16.msra.mxu1 %v21675_v23 }
 0xd55   :  { %9676 = vmatprep.subr.bf16.mxu0 %v21684_v17  ;;  %9717 = vmatprep.subr.bf16.mxu1 %v21689_v60 }
 0xd58   :  { %9677 = vmatpush1.bf16.msra.mxu0 %v21694_v24  ;;  %9718 = vmatpush1.bf16.msra.mxu1 %v21699_v13 }
 0xd59   :  { %9678 = vmatprep.subr.bf16.mxu0 %v21708_v16  ;;  %9719 = vmatprep.subr.bf16.mxu1 %v21713_v14 }
 0xd5c   :  { %9679 = vmatpush1.bf16.msra.mxu0 %v21718_v25  ;;  %9720 = vmatpush1.bf16.msra.mxu1 %v21723_v56 }
 0xd5d   :  { %9680 = vmatprep.subr.bf16.mxu0 %v21732_v26  ;;  %9721 = vmatprep.subr.bf16.mxu1 %v21737_v32 }
 0xd60   :  { %9681 = vmatpush1.bf16.msra.mxu0 %v21742_v49  ;;  %9722 = vmatpush1.bf16.msra.mxu1 %v21747_v20 }
 0xd61   :  { %9682 = vmatprep.subr.bf16.mxu0 %v21756_v3  ;;  %9723 = vmatprep.subr.bf16.mxu1 %v21761_v53 }
 0xd64   :  { %9683 = vmatpush1.bf16.msra.mxu0 %v21766_v51  ;;  %9724 = vmatpush1.bf16.msra.mxu1 %v21771_v45 }
 0xd65   :  { %9684 = vmatprep.subr.bf16.mxu0 %v21780_v9  ;;  %9725 = vmatprep.subr.bf16.mxu1 %v21785_v40 }
 0xd68   :  { %9685 = vmatpush1.bf16.msra.mxu0 %v21790_v62  ;;  %9726 = vmatpush1.bf16.msra.mxu1 %v21795_v41 }
 0xd69   :  { %9686 = vmatprep.subr.bf16.mxu0 %v21804_v48  ;;  %9727 = vmatprep.subr.bf16.mxu1 %v21809_v42 }
 0xd6c   :  { %9687 = vmatpush1.bf16.msra.mxu0 %v21814_v63  ;;  %9728 = vmatpush1.bf16.msra.mxu1 %v21819_v43 }
 0xd6d   :  { %9688 = vmatprep.subr.bf16.mxu0 %v21828_v18  ;;  %9729 = vmatprep.subr.bf16.mxu1 %v21833_v1 }
 0xd70   :  { %9689 = vmatpush1.bf16.msra.mxu0 %v21838_v44  ;;  %9730 = vmatpush1.bf16.msra.mxu1 %v21843_v46 }
 0xd71   :  { %9690 = vmatprep.subr.bf16.mxu0 %v21852_v2  ;;  %9731 = vmatprep.subr.bf16.mxu1 %v21857_v37 }
 0xd74   :  { %9691 = vmatpush1.bf16.msra.mxu0 %v21862_v19  ;;  %9732 = vmatpush1.bf16.msra.mxu1 %v21867_v34 }
 0xd75   :  { %9692 = vmatprep.subr.bf16.mxu0 %v21876_v38  ;;  %9733 = vmatprep.subr.bf16.mxu1 %v21881_v15 }
 0xd78   :  { %9693 = vmatpush1.bf16.msra.mxu0 %v21886_v22  ;;  %9734 = vmatpush1.bf16.msra.mxu1 %v21891_v21 }
 0xd79   :  { %9694 = vmatprep.subr.bf16.mxu0 %v21900_v0  ;;  %9735 = vmatprep.subr.bf16.mxu1 %v21905_v28 }
 0xd7c   :  { %9695 = vmatpush1.bf16.msra.mxu0 %v21910_v33  ;;  %9736 = vmatpush1.bf16.msra.mxu1 %v21915_v36  ;;  %v21953_v36 = vld [vmem:[%s23730_s8 + $0x1a4] ss:$16 sps:$4 sm:$0xff]   ;;  %v21981_v33 = vld [vmem:[%s23730_s8 + $0x1c0] ss:$16 sps:$4 sm:$0xff]  }
 0xd7d   :  { %9696 = vmatprep.subr.bf16.mxu0 %v21924_v61  ;;  %9737 = vmatprep.subr.bf16.mxu1 %v21929_v50  ;;  %24522 = vst [vmem:[#allocation16_spill] sm:$0xff] %v21953_v36  ;;  %v21958_v61 = vld [vmem:[%s23730_s8 + $0x1a8] ss:$16 sps:$4 sm:$0xff]   ;;  %v21974_v50 = vld [vmem:[%s23730_s8 + $0x1cc] ss:$16 sps:$4 sm:$0xff]   ;;  %24527 = vst [vmem:[#allocation17_spill] sm:$0xff] %v21981_v33 }
 0xd7e   :  { %24523 = vst [vmem:[#allocation28_spill] sm:$0xff] %v21958_v61  ;;  %24526 = vst [vmem:[#allocation31_spill] sm:$0xff] %v21974_v50 }
 0xd80   :  { %9697 = vmatpush1.bf16.msra.mxu0 %v21934_v6  ;;  %9738 = vmatpush1.bf16.msra.mxu1 %v21939_v12  ;;  %v21963_v6 = vld [vmem:[%s23730_s8 + $0x1ac] ss:$16 sps:$4 sm:$0xff]   ;;  %v21968_v12 = vld [vmem:[%s23730_s8 + $0x1c4] ss:$16 sps:$4 sm:$0xff]  }
 0xd81   :  { %24524 = vst [vmem:[#allocation29_spill] sm:$0xff] %v21963_v6  ;;  %24525 = vst [vmem:[#allocation30_spill] sm:$0xff] %v21968_v12  ;;  %9698 = vmatprep.subr.bf16.mxu0 %v21953_v36  ;;  %9739 = vmatprep.subr.bf16.mxu1 %v21963_v6  ;;  %v21988_v36 = vld [vmem:[%s23730_s8 + $0x1c8] ss:$16 sps:$4 sm:$0xff]   ;;  %v21993_v6 = vld [vmem:[%s23730_s8 + $0x1e4] ss:$16 sps:$4 sm:$0xff]  }
 0xd82   :  { %24528 = vst [vmem:[#allocation18_spill] sm:$0xff] %v21988_v36  ;;  %24529 = vst [vmem:[#allocation19_spill] sm:$0xff] %v21993_v6 }
 0xd84   :  { %9699 = vmatpush1.bf16.msra.mxu0 %v21948_v39  ;;  %9740 = vmatpush1.bf16.msra.mxu1 %v21958_v61  ;;  %v21999_v39 = vld [vmem:[%s23730_s8 + $0x1ec] ss:$16 sps:$4 sm:$0xff]   ;;  %v22017_v61 = vld [vmem:[%s23733_s6 + $0x4] ss:$16 sps:$4 sm:$0xff]  }
 0xd85   :  { %9700 = vmatprep.subr.bf16.mxu0 %v21968_v12  ;;  %9741 = vmatprep.subr.bf16.mxu1 %v21974_v50  ;;  %24530 = vst [vmem:[#allocation8_spill] sm:$0xff] %v21999_v39  ;;  %v22005_v12 = vld [vmem:[%s23730_s8 + $0x1e0] ss:$16 sps:$4 sm:$0xff]   ;;  %v22012_v50 = vld [vmem:[%s23730_s8 + $0x1e8] ss:$16 sps:$4 sm:$0xff]   ;;  %24533 = vst [vmem:[#allocation11_spill] sm:$0xff] %v22017_v61 }
 0xd86   :  { %24531 = vst [vmem:[#allocation9_spill] sm:$0xff] %v22005_v12  ;;  %24532 = vst [vmem:[#allocation10_spill] sm:$0xff] %v22012_v50 }
 0xd88   :  { %9701 = vmatpush1.bf16.msra.mxu0 %v21981_v33  ;;  %9742 = vmatpush1.bf16.msra.mxu1 %v21988_v36  ;;  %v22023_v33 = vld [vmem:[%s23733_s6 + $0xc] ss:$16 sps:$4 sm:$0xff]  }
 0xd89   :  { %9702 = vmatprep.subr.bf16.mxu0 %v21993_v6  ;;  %9743 = vmatprep.subr.bf16.mxu1 %v21999_v39  ;;  %24534 = vst [vmem:[#allocation4_spill] sm:$0xff] %v22023_v33  ;;  %v8507_v6 = vld [vmem:[%s23735_s9] sm:$0xf] }
 0xd8a   :  { %v8512_v36 = vrot.slane %v8507_v6, %v24487_v47  ;;  %v8516_v39 = vrot.slane %v8507_v6, %v24488_v27  ;;  %v8520_v37 = vrot.slane %v8507_v6, %v18152_v55  ;;  %v8524_v47 = vrot.slane %v8507_v6, %v18169_v4 }
 0xd8c   :  { %9703 = vmatpush1.bf16.msra.mxu0 %v22005_v12  ;;  %9744 = vmatpush1.bf16.msra.mxu1 %v22012_v50 }
 0xd8d   :  { %9951 = vmatprep.subr.bf16.mxu0 %v22017_v61  ;;  %9992 = vmatprep.subr.bf16.mxu1 %v22023_v33 }
 0xe02   :  { %v8883_v28 = vpop.f32.mrb[120].mxu0  ;;  %v8924_v0 = vpop.f32.mrb[120].mxu1 }
 0xe03   :  { %v8884_v21 = vadd.f32 %v8883_v28, %v8512_v36  ;;  %v8885_v22 = vpop.f32.mrb[121].mxu0  ;;  %v8926_v15 = vpop.f32.mrb[121].mxu1  ;;  %v8925_v2 = vadd.f32 %v8924_v0, %v8520_v37  ;;  %v24538_v37 = vld [vmem:[#allocation39_spill] sm:$0xff] }
 0xe04   :  { %v8886_v12 = vadd.f32 %v8885_v22, %v8516_v39  ;;  %v8887_v38 = vpop.f32.mrb[122].mxu0  ;;  %v8928_v50 = vpop.f32.mrb[122].mxu1  ;;  %v8927_v27 = vadd.f32 %v8926_v15, %v8524_v47  ;;  %v24536_v47 = vld [vmem:[#allocation37_spill] sm:$0xff]  ;;  %v926_v15 = vadd.f32 %v24538_v37, %v18177_v8 }
 0xe05   :  { %v14991_v34 = vmul.f32 -1.442695, %v8884_v21  ;;  %v8888_v61 = vpop.f32.mrb[123].mxu0  ;;  %v8929_v19 = vpop.f32.mrb[123].mxu1  ;;  %v14993_v46 = vmul.f32 -1.442695, %v8925_v2  ;;  %v924_v2 = vadd.f32 %v24536_v47, %v18157_v59 }
 0xe06   :  { %v14992_v33 = vmul.f32 -1.442695, %v8886_v12 }
 0xe07   :  { %17229 = vpow2.f32 %v14991_v34 }
 0xe08   :  { %17231 = vpow2.f32 %v14992_v33  ;;  %v24535_v33 = vld [vmem:[#allocation36_spill] sm:$0xff] }
 0xe09   :  { %17233 = vtanh.f32 %v8927_v27  ;;  %v811_v6 = vadd.f32 %v24535_v33, %v18149_v54  ;;  %v24537_v27 = vld [vmem:[#allocation38_spill] sm:$0xff] }
 0xe0a   :  { %17235 = vpow2.f32 %v14993_v46  ;;  %v813_v46 = vadd.f32 %v24537_v27, %v24491_v5 }
 0xe11   :  { %v17230_v44 = vpop.eup %17229 }
 0xe12   :  { %v9223_v28 = vadd.f32 1.0, %v17230_v44  ;;  %v17232_v36 = vpop.eup %17231 }
 0xe13   :  { %v9224_v38 = vadd.f32 1.0, %v17232_v36  ;;  %v17234_v22 = vpop.eup %17233 }
 0xe14   :  { %17237 = vrcp.f32 %v9223_v28  ;;  %v17236_v19 = vpop.eup %17235 }
 0xe15   :  { %17239 = vrcp.f32 %v9224_v38  ;;  %v9225_v50 = vadd.f32 1.0, %v17236_v19 }
 0xe17   :  { %17241 = vrcp.f32 %v9225_v50 }
 0xe1e   :  { %v17238_v21 = vpop.eup %17237 }
 0xe1f   :  { %v9234_v34 = vmul.f32 %v17238_v21, %v17234_v22  ;;  %v17240_v61 = vpop.eup %17239 }
 0xe20   :  { %v9233_v44 = vmul.f32 %v17240_v61, %v21591_v11 }
 0xe21   :  { %v17242_v37 = vpop.eup %17241 }
 0xe22   :  { %v9162_v0 = vpop.f32.mrb[124].mxu0  ;;  %v9203_v12 = vpop.f32.mrb[124].mxu1  ;;  %v22045_v39 = vadd.f32 %v9234_v34, %v9233_v44 }
 0xe23   :  { %v9210_v28 = vadd.f32 %v9162_v0, %v811_v6  ;;  %v9212_v36 = vadd.f32 %v9203_v12, %v924_v2  ;;  %v9164_v38 = vpop.f32.mrb[125].mxu0  ;;  %v9205_v22 = vpop.f32.mrb[125].mxu1 }
 0xe24   :  { %v9211_v19 = vadd.f32 %v9164_v38, %v813_v46  ;;  %v9213_v21 = vadd.f32 %v9205_v22, %v926_v15  ;;  %v9166_v33 = vpop.f32.mrb[126].mxu0  ;;  %v9207_v47 = vpop.f32.mrb[126].mxu1  ;;  %17243 = vtanh.f32 %v22045_v39 }
 0xe25   :  { %v14995_v11 = vmul.f32 -1.442695, %v9210_v28  ;;  %v9167_v61 = vpop.f32.mrb[127].mxu0  ;;  %v9208_v27 = vpop.f32.mrb[127].mxu1  ;;  %v14997_v44 = vmul.f32 -1.442695, %v9212_v36 }
 0xe26   :  { %v14996_v5 = vmul.f32 -1.442695, %v9211_v19  ;;  %v22058_v61 = vld [vmem:[%s23733_s6] ss:$16 sps:$4 sm:$0xff]   ;;  %v22063_v27 = vld [vmem:[%s23733_s6 + $0x8] ss:$16 sps:$4 sm:$0xff]  }
 0xe27   :  { %17245 = vpow2.f32 %v14995_v11 }
 0xe28   :  { %17247 = vpow2.f32 %v14996_v5 }
 0xe29   :  { %17249 = vtanh.f32 %v9213_v21 }
 0xe2a   :  { %17251 = vpow2.f32 %v14997_v44  ;;  %v22084_v44 = vld [vmem:[%s23733_s6 + $0x20] ss:$16 sps:$4 sm:$0xff]  }
 0xe2e   :  { %v17244_v34 = vpop.eup %17243 }
 0xe2f   :  { %v9237_v6 = vmul.f32 %v17244_v34, %v17242_v37  ;;  %v22075_v34 = vld [vmem:[%s23733_s6 + $0x2c] ss:$16 sps:$4 sm:$0xff]  }
 0xe31   :  { %v17246_v2 = vpop.eup %17245  ;;  %14994 = vst [vmem:[%s23736_s11 + $0x48] sm:$0xff] %v9237_v6  ;;  %v9265_v50 = vpack.c.bf16 %v9237_v6, %v9237_v6  ;;  %v22089_v6 = vld [vmem:[%s23733_s6 + $0x28] ss:$16 sps:$4 sm:$0xff]  }
 0xe32   :  { %v9249_v0 = vadd.f32 1.0, %v17246_v2  ;;  %v17248_v46 = vpop.eup %17247  ;;  %v22096_v2 = vld [vmem:[%s23733_s6 + $0x44] ss:$16 sps:$4 sm:$0xff]  }
 0xe33   :  { %v9250_v15 = vadd.f32 1.0, %v17248_v46  ;;  %9704 = vmatprep.mubr.bf16.mxu0 %v9265_v50  ;;  %9745 = vmatprep.mubr.bf16.mxu1 %v9265_v50  ;;  %v17250_v5 = vpop.eup %17249  ;;  %v22110_v50 = vld [vmem:[%s23733_s6 + $0x40] ss:$16 sps:$4 sm:$0xff]   ;;  %v22115_v46 = vld [vmem:[%s23733_s6 + $0x48] ss:$16 sps:$4 sm:$0xff]  }
 0xe34   :  { %17253 = vrcp.f32 %v9249_v0  ;;  %v17252_v12 = vpop.eup %17251  ;;  %v22101_v0 = vld [vmem:[%s23733_s6 + $0x4c] ss:$16 sps:$4 sm:$0xff]  }
 0xe35   :  { %17255 = vrcp.f32 %v9250_v15  ;;  %v9251_v22 = vadd.f32 1.0, %v17252_v12  ;;  %v22122_v15 = vld [vmem:[%s23733_s6 + $0x64] ss:$16 sps:$4 sm:$0xff]   ;;  %v22134_v12 = vld [vmem:[%s23733_s6 + $0x60] ss:$16 sps:$4 sm:$0xff]  }
 0xe37   :  { %17257 = vrcp.f32 %v9251_v22  ;;  %v22158_v22 = vld [vmem:[%s23733_s6 + $0x80] ss:$16 sps:$4 sm:$0xff]  }
 0xe38   :  { %24540 = vst [vmem:[#allocation6_spill] sm:$0xff] %v22158_v22 }
 0xe3e   :  { %v17254_v28 = vpop.eup %17253 }
 0xe3f   :  { %v9260_v36 = vmul.f32 %v17254_v28, %v17250_v5  ;;  %v17256_v38 = vpop.eup %17255  ;;  %v22127_v5 = vld [vmem:[%s23733_s6 + $0x6c] ss:$16 sps:$4 sm:$0xff]   ;;  %v22139_v28 = vld [vmem:[%s23733_s6 + $0x68] ss:$16 sps:$4 sm:$0xff]  }
 0xe40   :  { %v9259_v19 = vmul.f32 %v17256_v38, %v21598_v31  ;;  %v22070_v31 = vld [vmem:[%s23733_s6 + $0x24] ss:$16 sps:$4 sm:$0xff]   ;;  %v22151_v38 = vld [vmem:[%s23733_s6 + $0x8c] ss:$16 sps:$4 sm:$0xff]  }
 0xe41   :  { %v17258_v33 = vpop.eup %17257  ;;  %24539 = vst [vmem:[#allocation5_spill] sm:$0xff] %v22151_v38 }
 0xe42   :  { %v22052_v21 = vadd.f32 %v9260_v36, %v9259_v19  ;;  %v22146_v36 = vld [vmem:[%s23733_s6 + $0x84] ss:$16 sps:$4 sm:$0xff]   ;;  %v22163_v19 = vld [vmem:[%s23733_s6 + $0x88] ss:$16 sps:$4 sm:$0xff]  }
 0xe43   :  { %24541 = vst [vmem:[#allocation7_spill] sm:$0xff] %v22163_v19 }
 0xe44   :  { %17259 = vtanh.f32 %v22052_v21 }
 0xe4e   :  { %v17260_v47 = vpop.eup %17259 }
 0xe4f   :  { %v9263_v11 = vmul.f32 %v17260_v47, %v17258_v33  ;;  %v22170_v33 = vld [vmem:[%s23733_s6 + $0xa4] ss:$16 sps:$4 sm:$0xff]   ;;  %v22175_v47 = vld [vmem:[%s23733_s6 + $0xac] ss:$16 sps:$4 sm:$0xff]  }
 0xe50   :  { %24542 = vst [vmem:[#allocation94_spill] sm:$0xff] %v22170_v33  ;;  %24543 = vst [vmem:[#allocation20_spill] sm:$0xff] %v22175_v47 }
 0xe51   :  { %v22065_v37 = vpack.c.bf16 %v9263_v11, %v9263_v11  ;;  %v22182_v11 = vld [vmem:[%s23733_s6 + $0xa0] ss:$16 sps:$4 sm:$0xff]  }
 0xe52   :  { %24544 = vst [vmem:[#allocation21_spill] sm:$0xff] %v22182_v11 }
 0xe53   :  { %9705 = vmatmul.mubr.bf16.vlgmr.msra.gmra.mrb[128].mxu0 %v22065_v37  ;;  %9746 = vmatmul.mubr.bf16.vlgmr.msra.gmra.mrb[128].mxu1 %v22065_v37 }
 0xe54   :  { %9952 = vmatpush1.bf16.msra.mxu0 %v22058_v61  ;;  %9993 = vmatpush1.bf16.msra.mxu1 %v22063_v27 }
 0xe55   :  { %9953 = vmatprep.subr.bf16.mxu0 %v22070_v31  ;;  %9994 = vmatprep.subr.bf16.mxu1 %v22075_v34 }
 0xe56   :  { %9983 = vmatprep.mubr.bf16.mxu0 %v24094_v58  ;;  %10024 = vmatprep.mubr.bf16.mxu1 %v24094_v58 }
 0xe58   :  { %9954 = vmatpush1.bf16.msra.mxu0 %v22084_v44  ;;  %9995 = vmatpush1.bf16.msra.mxu1 %v22089_v6 }
 0xe59   :  { %9955 = vmatprep.subr.bf16.mxu0 %v22096_v2  ;;  %9996 = vmatprep.subr.bf16.mxu1 %v22101_v0 }
 0xe5c   :  { %9956 = vmatpush1.bf16.msra.mxu0 %v22110_v50  ;;  %9997 = vmatpush1.bf16.msra.mxu1 %v22115_v46 }
 0xe5d   :  { %9957 = vmatprep.subr.bf16.mxu0 %v22122_v15  ;;  %9998 = vmatprep.subr.bf16.mxu1 %v22127_v5 }
 0xe60   :  { %9958 = vmatpush1.bf16.msra.mxu0 %v22134_v12  ;;  %9999 = vmatpush1.bf16.msra.mxu1 %v22139_v28 }
 0xe61   :  { %9959 = vmatprep.subr.bf16.mxu0 %v22146_v36  ;;  %10000 = vmatprep.subr.bf16.mxu1 %v22151_v38  ;;  %v22187_v38 = vld [vmem:[%s23733_s6 + $0xa8] ss:$16 sps:$4 sm:$0xff]  }
 0xe62   :  { %24545 = vst [vmem:[#allocation22_spill] sm:$0xff] %v22187_v38 }
 0xe64   :  { %9960 = vmatpush1.bf16.msra.mxu0 %v22158_v22  ;;  %10001 = vmatpush1.bf16.msra.mxu1 %v22163_v19  ;;  %v22194_v22 = vld [vmem:[%s23733_s6 + $0xc4] ss:$16 sps:$4 sm:$0xff]   ;;  %v22199_v19 = vld [vmem:[%s23733_s6 + $0xcc] ss:$16 sps:$4 sm:$0xff]  }
 0xe65   :  { %9961 = vmatprep.subr.bf16.mxu0 %v22170_v33  ;;  %10002 = vmatprep.subr.bf16.mxu1 %v22175_v47  ;;  %24546 = vst [vmem:[#allocation23_spill] sm:$0xff] %v22194_v22  ;;  %24547 = vst [vmem:[#allocation95_spill] sm:$0xff] %v22199_v19  ;;  %v22206_v33 = vld [vmem:[%s23733_s6 + $0xc0] ss:$16 sps:$4 sm:$0xff]   ;;  %v22211_v47 = vld [vmem:[%s23733_s6 + $0xc8] ss:$16 sps:$4 sm:$0xff]  }
 0xe68   :  { %9962 = vmatpush1.bf16.msra.mxu0 %v22182_v11  ;;  %10003 = vmatpush1.bf16.msra.mxu1 %v22187_v38  ;;  %v22218_v11 = vld [vmem:[%s23733_s6 + $0xe4] ss:$16 sps:$4 sm:$0xff]   ;;  %v22223_v38 = vld [vmem:[%s23733_s6 + $0xec] ss:$16 sps:$4 sm:$0xff]  }
 0xe69   :  { %9963 = vmatprep.subr.bf16.mxu0 %v22194_v22  ;;  %10004 = vmatprep.subr.bf16.mxu1 %v22199_v19  ;;  %v22230_v22 = vld [vmem:[%s23733_s6 + $0xe0] ss:$16 sps:$4 sm:$0xff]   ;;  %v22235_v19 = vld [vmem:[%s23733_s6 + $0xe8] ss:$16 sps:$4 sm:$0xff]  }
 0xe6c   :  { %9964 = vmatpush1.bf16.msra.mxu0 %v22206_v33  ;;  %10005 = vmatpush1.bf16.msra.mxu1 %v22211_v47 }
 0xe6d   :  { %9965 = vmatprep.subr.bf16.mxu0 %v22218_v11  ;;  %10006 = vmatprep.subr.bf16.mxu1 %v22223_v38 }
 0xe70   :  { %9966 = vmatpush1.bf16.msra.mxu0 %v22230_v22  ;;  %10007 = vmatpush1.bf16.msra.mxu1 %v22235_v19 }
 0xe71   :  { %10495 = vmatprep.subr.bf16.mxu0 %v21636_v57  ;;  %10536 = vmatprep.subr.bf16.mxu1 %v21641_v10  ;;  %v24548_v57 = vld [vmem:[#allocation79_spill] sm:$0xff] }
 0xe72   :  { %v24549_v10 = vld [vmem:[#allocation83_spill] sm:$0xff] }
 0xe73   :  { %9984 = vmatmul.mubr.bf16.vlgmr.msra.gmra.mrb[132].mxu0 %v22065_v37  ;;  %10025 = vmatmul.mubr.bf16.vlgmr.msra.gmra.mrb[132].mxu1 %v22065_v37 }
 0xe74   :  { %10496 = vmatpush1.bf16.msra.mxu0 %v21646_v35  ;;  %10537 = vmatpush1.bf16.msra.mxu1 %v21651_v30  ;;  %v24550_v35 = vld [vmem:[#allocation82_spill] sm:$0xff]  ;;  %v24551_v30 = vld [vmem:[#allocation81_spill] sm:$0xff] }
 0xe75   :  { %10497 = vmatprep.subr.bf16.mxu0 %v21660_v29  ;;  %10538 = vmatprep.subr.bf16.mxu1 %v21665_v7  ;;  %v24552_v29 = vld [vmem:[#allocation80_spill] sm:$0xff] }
 0xe76   :  { %v24553_v7 = vld [vmem:[#allocation84_spill] sm:$0xff] }
 0xe78   :  { %10498 = vmatpush1.bf16.msra.mxu0 %v21670_v52  ;;  %10539 = vmatpush1.bf16.msra.mxu1 %v21675_v23  ;;  %v24554_v52 = vld [vmem:[#allocation85_spill] sm:$0xff]  ;;  %v24555_v23 = vld [vmem:[#allocation24_spill] sm:$0xff] }
 0xe79   :  { %10499 = vmatprep.subr.bf16.mxu0 %v21684_v17  ;;  %10540 = vmatprep.subr.bf16.mxu1 %v21689_v60  ;;  %v24556_v17 = vld [vmem:[#allocation25_spill] sm:$0xff]  ;;  %v24557_v60 = vld [vmem:[#allocation26_spill] sm:$0xff] }
 0xe7c   :  { %10500 = vmatpush1.bf16.msra.mxu0 %v21694_v24  ;;  %10541 = vmatpush1.bf16.msra.mxu1 %v21699_v13  ;;  %v24558_v24 = vld [vmem:[#allocation27_spill] sm:$0xff]  ;;  %v24559_v13 = vld [vmem:[#allocation86_spill] sm:$0xff] }
 0xe7d   :  { %10501 = vmatprep.subr.bf16.mxu0 %v21708_v16  ;;  %10542 = vmatprep.subr.bf16.mxu1 %v21713_v14  ;;  %v24560_v16 = vld [vmem:[#allocation87_spill] sm:$0xff]  ;;  %v24561_v14 = vld [vmem:[#allocation88_spill] sm:$0xff] }
 0xe80   :  { %10502 = vmatpush1.bf16.msra.mxu0 %v21718_v25  ;;  %10543 = vmatpush1.bf16.msra.mxu1 %v21723_v56  ;;  %v24562_v25 = vld [vmem:[#allocation89_spill] sm:$0xff]  ;;  %v24563_v56 = vld [vmem:[#allocation90_spill] sm:$0xff] }
 0xe81   :  { %10503 = vmatprep.subr.bf16.mxu0 %v21732_v26  ;;  %10544 = vmatprep.subr.bf16.mxu1 %v21737_v32  ;;  %v24564_v26 = vld [vmem:[#allocation91_spill] sm:$0xff]  ;;  %v24565_v32 = vld [vmem:[#allocation92_spill] sm:$0xff] }
 0xe84   :  { %10504 = vmatpush1.bf16.msra.mxu0 %v21742_v49  ;;  %10545 = vmatpush1.bf16.msra.mxu1 %v21747_v20  ;;  %v24566_v49 = vld [vmem:[#allocation16_spill] sm:$0xff]  ;;  %v24567_v20 = vld [vmem:[#allocation29_spill] sm:$0xff] }
 0xe85   :  { %10505 = vmatprep.subr.bf16.mxu0 %v21756_v3  ;;  %10546 = vmatprep.subr.bf16.mxu1 %v21761_v53  ;;  %v24568_v3 = vld [vmem:[#allocation93_spill] sm:$0xff]  ;;  %v24569_v53 = vld [vmem:[#allocation28_spill] sm:$0xff] }
 0xe88   :  { %10506 = vmatpush1.bf16.msra.mxu0 %v21766_v51  ;;  %10547 = vmatpush1.bf16.msra.mxu1 %v21771_v45  ;;  %v24570_v51 = vld [vmem:[#allocation30_spill] sm:$0xff]  ;;  %v24571_v45 = vld [vmem:[#allocation31_spill] sm:$0xff] }
 0xe89   :  { %10507 = vmatprep.subr.bf16.mxu0 %v21780_v9  ;;  %10548 = vmatprep.subr.bf16.mxu1 %v21785_v40  ;;  %v24572_v9 = vld [vmem:[#allocation17_spill] sm:$0xff]  ;;  %v24573_v40 = vld [vmem:[#allocation18_spill] sm:$0xff] }
 0xe8c   :  { %10508 = vmatpush1.bf16.msra.mxu0 %v21790_v62  ;;  %10549 = vmatpush1.bf16.msra.mxu1 %v21795_v41  ;;  %v24574_v62 = vld [vmem:[#allocation19_spill] sm:$0xff]  ;;  %v24575_v41 = vld [vmem:[#allocation8_spill] sm:$0xff] }
 0xe8d   :  { %10509 = vmatprep.subr.bf16.mxu0 %v21804_v48  ;;  %10550 = vmatprep.subr.bf16.mxu1 %v21809_v42  ;;  %v24576_v48 = vld [vmem:[#allocation9_spill] sm:$0xff]  ;;  %v24577_v42 = vld [vmem:[#allocation10_spill] sm:$0xff] }
 0xe90   :  { %10510 = vmatpush1.bf16.msra.mxu0 %v21814_v63  ;;  %10551 = vmatpush1.bf16.msra.mxu1 %v21819_v43  ;;  %v24578_v63 = vld [vmem:[#allocation11_spill] sm:$0xff]  ;;  %v24579_v43 = vld [vmem:[#allocation4_spill] sm:$0xff] }
 0xe91   :  { %10511 = vmatprep.subr.bf16.mxu0 %v21828_v18  ;;  %10552 = vmatprep.subr.bf16.mxu1 %v21833_v1  ;;  %v9330_v18 = vld [vmem:[%s23735_s9] sm:$0xf] }
 0xe92   :  { %v24580_v1 = vld [vmem:[#allocation3_spill] sm:$0xff] }
 0xe93   :  { %v9335_v37 = vrot.slane %v9330_v18, %v24580_v1 }
 0xe94   :  { %10512 = vmatpush1.bf16.msra.mxu0 %v24548_v57  ;;  %10553 = vmatpush1.bf16.msra.mxu1 %v24549_v10  ;;  %v24581_v57 = vld [vmem:[#allocation70_spill] sm:$0xff] }
 0xe95   :  { %10513 = vmatprep.subr.bf16.mxu0 %v24550_v35  ;;  %10554 = vmatprep.subr.bf16.mxu1 %v24551_v30  ;;  %v9339_v10 = vrot.slane %v9330_v18, %v24581_v57 }
 0xe98   :  { %10514 = vmatpush1.bf16.msra.mxu0 %v24552_v29  ;;  %10555 = vmatpush1.bf16.msra.mxu1 %v24553_v7 }
 0xe99   :  { %10515 = vmatprep.subr.bf16.mxu0 %v24554_v52  ;;  %10556 = vmatprep.subr.bf16.mxu1 %v24555_v23 }
 0xe9c   :  { %10516 = vmatpush1.bf16.msra.mxu0 %v24556_v17  ;;  %10557 = vmatpush1.bf16.msra.mxu1 %v24557_v60 }
 0xe9d   :  { %10517 = vmatprep.subr.bf16.mxu0 %v24558_v24  ;;  %10558 = vmatprep.subr.bf16.mxu1 %v24559_v13 }
 0xea0   :  { %10518 = vmatpush1.bf16.msra.mxu0 %v24560_v16  ;;  %10559 = vmatpush1.bf16.msra.mxu1 %v24561_v14 }
 0xea1   :  { %10519 = vmatprep.subr.bf16.mxu0 %v24562_v25  ;;  %10560 = vmatprep.subr.bf16.mxu1 %v24563_v56  ;;  %v9343_v25 = vrot.slane %v9330_v18, %v18152_v55  ;;  %v9347_v56 = vrot.slane %v9330_v18, %v18169_v4 }
 0xea4   :  { %10520 = vmatpush1.bf16.msra.mxu0 %v24564_v26  ;;  %10561 = vmatpush1.bf16.msra.mxu1 %v24565_v32 }
 0xea5   :  { %10521 = vmatprep.subr.bf16.mxu0 %v24566_v49  ;;  %10562 = vmatprep.subr.bf16.mxu1 %v24567_v20 }
 0xea8   :  { %10522 = vmatpush1.bf16.msra.mxu0 %v24568_v3  ;;  %10563 = vmatpush1.bf16.msra.mxu1 %v24569_v53 }
 0xea9   :  { %10523 = vmatprep.subr.bf16.mxu0 %v24570_v51  ;;  %10564 = vmatprep.subr.bf16.mxu1 %v24571_v45 }
 0xeac   :  { %10524 = vmatpush1.bf16.msra.mxu0 %v24572_v9  ;;  %10565 = vmatpush1.bf16.msra.mxu1 %v24573_v40 }
 0xead   :  { %10525 = vmatprep.subr.bf16.mxu0 %v24574_v62  ;;  %10566 = vmatprep.subr.bf16.mxu1 %v24575_v41 }
 0xeb0   :  { %10526 = vmatpush1.bf16.msra.mxu0 %v24576_v48  ;;  %10567 = vmatpush1.bf16.msra.mxu1 %v24577_v42  ;;  %v24582_v42 = vld [vmem:[#allocation40_spill] sm:$0xff] }
 0xeb1   :  { %10774 = vmatprep.subr.bf16.mxu0 %v24578_v63  ;;  %10815 = vmatprep.subr.bf16.mxu1 %v24579_v43  ;;  %v815_v63 = vadd.f32 %v24582_v42, %v18149_v54  ;;  %v24583_v43 = vld [vmem:[#allocation41_spill] sm:$0xff] }
 0xeb2   :  { %v928_v18 = vadd.f32 %v24583_v43, %v18157_v59 }
 0xf26   :  { %v9706_v35 = vpop.f32.mrb[128].mxu0  ;;  %v9747_v30 = vpop.f32.mrb[128].mxu1 }
 0xf27   :  { %v9707_v29 = vadd.f32 %v9706_v35, %v9335_v37  ;;  %v9708_v7 = vpop.f32.mrb[129].mxu0  ;;  %v9749_v52 = vpop.f32.mrb[129].mxu1  ;;  %v9748_v26 = vadd.f32 %v9747_v30, %v9343_v25  ;;  %v24585_v35 = vld [vmem:[#allocation42_spill] sm:$0xff] }
 0xf28   :  { %v9709_v23 = vadd.f32 %v9708_v7, %v9339_v10  ;;  %v9710_v17 = vpop.f32.mrb[130].mxu0  ;;  %v9751_v60 = vpop.f32.mrb[130].mxu1  ;;  %v9750_v32 = vadd.f32 %v9749_v52, %v9347_v56  ;;  %v24584_v10 = vld [vmem:[#allocation71_spill] sm:$0xff] }
 0xf29   :  { %v15094_v24 = vmul.f32 -1.442695, %v9707_v29  ;;  %v9711_v13 = vpop.f32.mrb[131].mxu0  ;;  %v9752_v16 = vpop.f32.mrb[131].mxu1  ;;  %v15096_v49 = vmul.f32 -1.442695, %v9748_v26  ;;  %v817_v30 = vadd.f32 %v24585_v35, %v24584_v10 }
 0xf2a   :  { %v15095_v14 = vmul.f32 -1.442695, %v9709_v23  ;;  %v24586_v29 = vld [vmem:[#allocation43_spill] sm:$0xff] }
 0xf2b   :  { %17261 = vpow2.f32 %v15094_v24  ;;  %v930_v7 = vadd.f32 %v24586_v29, %v18177_v8 }
 0xf2c   :  { %17263 = vpow2.f32 %v15095_v14 }
 0xf2d   :  { %17265 = vtanh.f32 %v9750_v32 }
 0xf2e   :  { %17267 = vpow2.f32 %v15096_v49 }
 0xf35   :  { %v17262_v20 = vpop.eup %17261 }
 0xf36   :  { %v10046_v3 = vadd.f32 1.0, %v17262_v20  ;;  %v17264_v53 = vpop.eup %17263 }
 0xf37   :  { %v10047_v51 = vadd.f32 1.0, %v17264_v53  ;;  %v17266_v45 = vpop.eup %17265 }
 0xf38   :  { %17269 = vrcp.f32 %v10046_v3  ;;  %v17268_v9 = vpop.eup %17267 }
 0xf39   :  { %17271 = vrcp.f32 %v10047_v51  ;;  %v10048_v48 = vadd.f32 1.0, %v17268_v9 }
 0xf3b   :  { %17273 = vrcp.f32 %v10048_v48 }
 0xf42   :  { %v17270_v40 = vpop.eup %17269 }
 0xf43   :  { %v10057_v62 = vmul.f32 %v17270_v40, %v17266_v45  ;;  %v17272_v41 = vpop.eup %17271 }
 0xf44   :  { %v10056_v37 = vmul.f32 %v17272_v41, %v22045_v39 }
 0xf45   :  { %v17274_v3 = vpop.eup %17273 }
 0xf46   :  { %v9985_v52 = vpop.f32.mrb[132].mxu0  ;;  %v10026_v23 = vpop.f32.mrb[132].mxu1  ;;  %v22325_v17 = vadd.f32 %v10057_v62, %v10056_v37 }
 0xf47   :  { %v10033_v60 = vadd.f32 %v9985_v52, %v815_v63  ;;  %v10035_v24 = vadd.f32 %v10026_v23, %v928_v18  ;;  %v9987_v13 = vpop.f32.mrb[133].mxu0  ;;  %v10028_v16 = vpop.f32.mrb[133].mxu1 }
 0xf48   :  { %v10034_v14 = vadd.f32 %v9987_v13, %v817_v30  ;;  %v10036_v25 = vadd.f32 %v10028_v16, %v930_v7  ;;  %v9989_v56 = vpop.f32.mrb[134].mxu0  ;;  %v10030_v26 = vpop.f32.mrb[134].mxu1  ;;  %17275 = vtanh.f32 %v22325_v17  ;;  %v22452_v13 = vld [vmem:[%s23730_s8 + $0x60] ss:$16 sps:$4 sm:$0xff]   ;;  %v22457_v16 = vld [vmem:[%s23730_s8 + $0x68] ss:$16 sps:$4 sm:$0xff]  }
 0xf49   :  { %v15098_v39 = vmul.f32 -1.442695, %v10033_v60  ;;  %v9990_v32 = vpop.f32.mrb[135].mxu0  ;;  %v10031_v49 = vpop.f32.mrb[135].mxu1  ;;  %v15100_v51 = vmul.f32 -1.442695, %v10035_v24 }
 0xf4a   :  { %v15099_v20 = vmul.f32 -1.442695, %v10034_v14  ;;  %v22447_v24 = vld [vmem:[%s23730_s8 + $0x6c] ss:$16 sps:$4 sm:$0xff]   ;;  %v22466_v14 = vld [vmem:[%s23730_s8 + $0x84] ss:$16 sps:$4 sm:$0xff]  }
 0xf4b   :  { %17277 = vpow2.f32 %v15098_v39  ;;  %v22476_v56 = vld [vmem:[%s23730_s8 + $0x80] ss:$16 sps:$4 sm:$0xff]   ;;  %v22481_v26 = vld [vmem:[%s23730_s8 + $0x88] ss:$16 sps:$4 sm:$0xff]   ;;  %v22490_v39 = vld [vmem:[%s23730_s8 + $0xa4] ss:$16 sps:$4 sm:$0xff]  }
 0xf4c   :  { %17279 = vpow2.f32 %v15099_v20  ;;  %v22495_v32 = vld [vmem:[%s23730_s8 + $0xac] ss:$16 sps:$4 sm:$0xff]   ;;  %v22500_v49 = vld [vmem:[%s23730_s8 + $0xa0] ss:$16 sps:$4 sm:$0xff]   ;;  %v22505_v20 = vld [vmem:[%s23730_s8 + $0xa8] ss:$16 sps:$4 sm:$0xff]  }
 0xf4d   :  { %17281 = vtanh.f32 %v10036_v25  ;;  %v22471_v25 = vld [vmem:[%s23730_s8 + $0x8c] ss:$16 sps:$4 sm:$0xff]  }
 0xf4e   :  { %17283 = vpow2.f32 %v15100_v51  ;;  %v22524_v51 = vld [vmem:[%s23730_s8 + $0xc0] ss:$16 sps:$4 sm:$0xff]  }
 0xf52   :  { %v17276_v53 = vpop.eup %17275 }
 0xf53   :  { %v10060_v45 = vmul.f32 %v17276_v53, %v17274_v3  ;;  %v22514_v3 = vld [vmem:[%s23730_s8 + $0xc4] ss:$16 sps:$4 sm:$0xff]   ;;  %v22519_v53 = vld [vmem:[%s23730_s8 + $0xcc] ss:$16 sps:$4 sm:$0xff]  }
 0xf55   :  { %v17278_v9 = vpop.eup %17277  ;;  %15097 = vst [vmem:[%s23736_s11 + $0x50] sm:$0xff] %v10060_v45  ;;  %v10088_v62 = vpack.c.bf16 %v10060_v45, %v10060_v45  ;;  %v22529_v45 = vld [vmem:[%s23730_s8 + $0xc8] ss:$16 sps:$4 sm:$0xff]  }
 0xf56   :  { %v10072_v40 = vadd.f32 1.0, %v17278_v9  ;;  %v17280_v41 = vpop.eup %17279  ;;  %v22538_v9 = vld [vmem:[%s23730_s8 + $0xe4] ss:$16 sps:$4 sm:$0xff]  }
 0xf57   :  { %v10073_v48 = vadd.f32 1.0, %v17280_v41  ;;  %10527 = vmatprep.mubr.bf16.mxu0 %v10088_v62  ;;  %10568 = vmatprep.mubr.bf16.mxu1 %v10088_v62  ;;  %v17282_v42 = vpop.eup %17281  ;;  %v22548_v62 = vld [vmem:[%s23730_s8 + $0xe0] ss:$16 sps:$4 sm:$0xff]   ;;  %v22553_v41 = vld [vmem:[%s23730_s8 + $0xe8] ss:$16 sps:$4 sm:$0xff]  }
 0xf58   :  { %17285 = vrcp.f32 %v10072_v40  ;;  %v17284_v63 = vpop.eup %17283  ;;  %v22543_v40 = vld [vmem:[%s23730_s8 + $0xec] ss:$16 sps:$4 sm:$0xff]  }
 0xf59   :  { %17287 = vrcp.f32 %v10073_v48  ;;  %v10074_v35 = vadd.f32 1.0, %v17284_v63  ;;  %v22562_v48 = vld [vmem:[%s23730_s8 + $0x104] ss:$16 sps:$4 sm:$0xff]   ;;  %v22572_v63 = vld [vmem:[%s23730_s8 + $0x100] ss:$16 sps:$4 sm:$0xff]  }
 0xf5a   :  { %24596 = vst [vmem:[#allocation96_spill] sm:$0xff] %v22572_v63 }
 0xf5b   :  { %17289 = vrcp.f32 %v10074_v35  ;;  %v22596_v35 = vld [vmem:[%s23730_s8 + $0x120] ss:$16 sps:$4 sm:$0xff]  }
 0xf5c   :  { %24600 = vst [vmem:[#allocation12_spill] sm:$0xff] %v22596_v35 }
 0xf62   :  { %v17286_v43 = vpop.eup %17285 }
 0xf63   :  { %v10083_v18 = vmul.f32 %v17286_v43, %v17282_v42  ;;  %v17288_v37 = vpop.eup %17287  ;;  %v22567_v42 = vld [vmem:[%s23730_s8 + $0x10c] ss:$16 sps:$4 sm:$0xff]   ;;  %v22577_v43 = vld [vmem:[%s23730_s8 + $0x108] ss:$16 sps:$4 sm:$0xff]  }
 0xf64   :  { %v10082_v30 = vmul.f32 %v17288_v37, %v22052_v21  ;;  %v24587_v21 = vld [vmem:[#allocation5_spill] sm:$0xff]  ;;  %24597 = vst [vmem:[#allocation98_spill] sm:$0xff] %v22577_v43  ;;  %v22591_v37 = vld [vmem:[%s23730_s8 + $0x12c] ss:$16 sps:$4 sm:$0xff]  }
 0xf65   :  { %v17290_v7 = vpop.eup %17289  ;;  %24599 = vst [vmem:[#allocation97_spill] sm:$0xff] %v22591_v37 }
 0xf66   :  { %v22332_v29 = vadd.f32 %v10083_v18, %v10082_v30  ;;  %v22586_v18 = vld [vmem:[%s23730_s8 + $0x124] ss:$16 sps:$4 sm:$0xff]   ;;  %v22601_v30 = vld [vmem:[%s23730_s8 + $0x128] ss:$16 sps:$4 sm:$0xff]  }
 0xf67   :  { %24598 = vst [vmem:[#allocation13_spill] sm:$0xff] %v22586_v18  ;;  %24601 = vst [vmem:[#allocation14_spill] sm:$0xff] %v22601_v30 }
 0xf68   :  { %17291 = vtanh.f32 %v22332_v29 }
 0xf72   :  { %v17292_v52 = vpop.eup %17291 }
 0xf73   :  { %v10086_v23 = vmul.f32 %v17292_v52, %v17290_v7  ;;  %v22610_v7 = vld [vmem:[%s23730_s8 + $0x144] ss:$16 sps:$4 sm:$0xff]   ;;  %v22615_v52 = vld [vmem:[%s23730_s8 + $0x14c] ss:$16 sps:$4 sm:$0xff]  }
 0xf74   :  { %24602 = vst [vmem:[#allocation15_spill] sm:$0xff] %v22610_v7  ;;  %24603 = vst [vmem:[#allocation52_spill] sm:$0xff] %v22615_v52 }
 0xf75   :  { %v10087_v60 = vpack.c.bf16 %v10086_v23, %v10086_v23  ;;  %v22620_v23 = vld [vmem:[%s23730_s8 + $0x140] ss:$16 sps:$4 sm:$0xff]  }
 0xf76   :  { %24604 = vst [vmem:[#allocation53_spill] sm:$0xff] %v22620_v23 }
 0xf77   :  { %10528 = vmatmul.mubr.bf16.vlgmr.msra.gmra.mrb[136].mxu0 %v10087_v60  ;;  %10569 = vmatmul.mubr.bf16.vlgmr.msra.gmra.mrb[136].mxu1 %v10087_v60 }
 0xf78   :  { %10775 = vmatpush1.bf16.msra.mxu0 %v22058_v61  ;;  %10816 = vmatpush1.bf16.msra.mxu1 %v22063_v27  ;;  %v24588_v61 = vld [vmem:[#allocation6_spill] sm:$0xff]  ;;  %v24589_v27 = vld [vmem:[#allocation7_spill] sm:$0xff] }
 0xf79   :  { %10776 = vmatprep.subr.bf16.mxu0 %v22070_v31  ;;  %10817 = vmatprep.subr.bf16.mxu1 %v22075_v34  ;;  %v24590_v31 = vld [vmem:[#allocation94_spill] sm:$0xff]  ;;  %v24591_v34 = vld [vmem:[#allocation20_spill] sm:$0xff] }
 0xf7a   :  { %10806 = vmatprep.mubr.bf16.mxu0 %v24094_v58  ;;  %10847 = vmatprep.mubr.bf16.mxu1 %v24094_v58 }
 0xf7c   :  { %10777 = vmatpush1.bf16.msra.mxu0 %v22084_v44  ;;  %10818 = vmatpush1.bf16.msra.mxu1 %v22089_v6  ;;  %v24592_v44 = vld [vmem:[#allocation21_spill] sm:$0xff]  ;;  %v24593_v6 = vld [vmem:[#allocation22_spill] sm:$0xff] }
 0xf7d   :  { %10778 = vmatprep.subr.bf16.mxu0 %v22096_v2  ;;  %10819 = vmatprep.subr.bf16.mxu1 %v22101_v0  ;;  %v24594_v2 = vld [vmem:[#allocation23_spill] sm:$0xff] }
 0xf7e   :  { %v24595_v0 = vld [vmem:[#allocation95_spill] sm:$0xff] }
 0xf80   :  { %10779 = vmatpush1.bf16.msra.mxu0 %v22110_v50  ;;  %10820 = vmatpush1.bf16.msra.mxu1 %v22115_v46  ;;  %v22370_v50 = vld [vmem:[%s23730_s8 + $0x4] ss:$16 sps:$4 sm:$0xff]   ;;  %v22375_v46 = vld [vmem:[%s23730_s8 + $0xc] ss:$16 sps:$4 sm:$0xff]  }
 0xf81   :  { %10780 = vmatprep.subr.bf16.mxu0 %v22122_v15  ;;  %10821 = vmatprep.subr.bf16.mxu1 %v22127_v5  ;;  %v22380_v15 = vld [vmem:[%s23730_s8] ss:$16 sps:$4 sm:$0xff]   ;;  %v22385_v5 = vld [vmem:[%s23730_s8 + $0x8] ss:$16 sps:$4 sm:$0xff]  }
 0xf84   :  { %10781 = vmatpush1.bf16.msra.mxu0 %v22134_v12  ;;  %10822 = vmatpush1.bf16.msra.mxu1 %v22139_v28  ;;  %v22394_v12 = vld [vmem:[%s23730_s8 + $0x24] ss:$16 sps:$4 sm:$0xff]   ;;  %v22399_v28 = vld [vmem:[%s23730_s8 + $0x2c] ss:$16 sps:$4 sm:$0xff]  }
 0xf85   :  { %10782 = vmatprep.subr.bf16.mxu0 %v22146_v36  ;;  %10823 = vmatprep.subr.bf16.mxu1 %v24587_v21  ;;  %v22404_v36 = vld [vmem:[%s23730_s8 + $0x20] ss:$16 sps:$4 sm:$0xff]   ;;  %v22634_v21 = vld [vmem:[%s23730_s8 + $0x164] ss:$16 sps:$4 sm:$0xff]  }
 0xf86   :  { %24606 = vst [vmem:[#allocation55_spill] sm:$0xff] %v22634_v21 }
 0xf88   :  { %10783 = vmatpush1.bf16.msra.mxu0 %v24588_v61  ;;  %10824 = vmatpush1.bf16.msra.mxu1 %v24589_v27  ;;  %v22639_v61 = vld [vmem:[%s23730_s8 + $0x16c] ss:$16 sps:$4 sm:$0xff]   ;;  %v22644_v27 = vld [vmem:[%s23730_s8 + $0x160] ss:$16 sps:$4 sm:$0xff]  }
 0xf89   :  { %10784 = vmatprep.subr.bf16.mxu0 %v24590_v31  ;;  %10825 = vmatprep.subr.bf16.mxu1 %v24591_v34  ;;  %24607 = vst [vmem:[#allocation56_spill] sm:$0xff] %v22639_v61  ;;  %24608 = vst [vmem:[#allocation57_spill] sm:$0xff] %v22644_v27  ;;  %v22649_v31 = vld [vmem:[%s23730_s8 + $0x168] ss:$16 sps:$4 sm:$0xff]   ;;  %v22658_v34 = vld [vmem:[%s23730_s8 + $0x184] ss:$16 sps:$4 sm:$0xff]  }
 0xf8a   :  { %24609 = vst [vmem:[#allocation58_spill] sm:$0xff] %v22649_v31  ;;  %24610 = vst [vmem:[#allocation59_spill] sm:$0xff] %v22658_v34 }
 0xf8c   :  { %10785 = vmatpush1.bf16.msra.mxu0 %v24592_v44  ;;  %10826 = vmatpush1.bf16.msra.mxu1 %v24593_v6  ;;  %v22663_v44 = vld [vmem:[%s23730_s8 + $0x18c] ss:$16 sps:$4 sm:$0xff]   ;;  %v22668_v6 = vld [vmem:[%s23730_s8 + $0x180] ss:$16 sps:$4 sm:$0xff]  }
 0xf8d   :  { %10786 = vmatprep.subr.bf16.mxu0 %v24594_v2  ;;  %10827 = vmatprep.subr.bf16.mxu1 %v24595_v0  ;;  %24611 = vst [vmem:[#allocation32_spill] sm:$0xff] %v22663_v44  ;;  %24612 = vst [vmem:[#allocation33_spill] sm:$0xff] %v22668_v6  ;;  %v22673_v2 = vld [vmem:[%s23730_s8 + $0x188] ss:$16 sps:$4 sm:$0xff]   ;;  %v22682_v0 = vld [vmem:[%s23730_s8 + $0x1a0] ss:$16 sps:$4 sm:$0xff]  }
 0xf8e   :  { %24613 = vst [vmem:[#allocation34_spill] sm:$0xff] %v22673_v2  ;;  %24614 = vst [vmem:[#allocation35_spill] sm:$0xff] %v22682_v0 }
 0xf90   :  { %10787 = vmatpush1.bf16.msra.mxu0 %v22206_v33  ;;  %10828 = vmatpush1.bf16.msra.mxu1 %v22211_v47  ;;  %v22428_v33 = vld [vmem:[%s23730_s8 + $0x40] ss:$16 sps:$4 sm:$0xff]   ;;  %v22433_v47 = vld [vmem:[%s23730_s8 + $0x48] ss:$16 sps:$4 sm:$0xff]  }
 0xf91   :  { %10788 = vmatprep.subr.bf16.mxu0 %v22218_v11  ;;  %10829 = vmatprep.subr.bf16.mxu1 %v22223_v38  ;;  %v22409_v38 = vld [vmem:[%s23730_s8 + $0x28] ss:$16 sps:$4 sm:$0xff]   ;;  %v22442_v11 = vld [vmem:[%s23730_s8 + $0x64] ss:$16 sps:$4 sm:$0xff]  }
 0xf94   :  { %10789 = vmatpush1.bf16.msra.mxu0 %v22230_v22  ;;  %10830 = vmatpush1.bf16.msra.mxu1 %v22235_v19  ;;  %v22418_v22 = vld [vmem:[%s23730_s8 + $0x44] ss:$16 sps:$4 sm:$0xff]   ;;  %v22423_v19 = vld [vmem:[%s23730_s8 + $0x4c] ss:$16 sps:$4 sm:$0xff]  }
 0xf95   :  { %11318 = vmatprep.subr.bf16.mxu0 %v22370_v50  ;;  %11359 = vmatprep.subr.bf16.mxu1 %v22375_v46 }
 0xf97   :  { %10807 = vmatmul.mubr.bf16.vlgmr.msra.gmra.mrb[140].mxu0 %v10087_v60  ;;  %10848 = vmatmul.mubr.bf16.vlgmr.msra.gmra.mrb[140].mxu1 %v10087_v60  ;;  %v22625_v60 = vld [vmem:[%s23730_s8 + $0x148] ss:$16 sps:$4 sm:$0xff]  }
 0xf98   :  { %11319 = vmatpush1.bf16.msra.mxu0 %v22380_v15  ;;  %11360 = vmatpush1.bf16.msra.mxu1 %v22385_v5  ;;  %24605 = vst [vmem:[#allocation54_spill] sm:$0xff] %v22625_v60 }
 0xf99   :  { %11320 = vmatprep.subr.bf16.mxu0 %v22394_v12  ;;  %11361 = vmatprep.subr.bf16.mxu1 %v22399_v28 }
 0xf9c   :  { %11321 = vmatpush1.bf16.msra.mxu0 %v22404_v36  ;;  %11362 = vmatpush1.bf16.msra.mxu1 %v22409_v38 }
 0xf9d   :  { %11322 = vmatprep.subr.bf16.mxu0 %v22418_v22  ;;  %11363 = vmatprep.subr.bf16.mxu1 %v22423_v19 }
 0xfa0   :  { %11323 = vmatpush1.bf16.msra.mxu0 %v22428_v33  ;;  %11364 = vmatpush1.bf16.msra.mxu1 %v22433_v47 }
 0xfa1   :  { %11324 = vmatprep.subr.bf16.mxu0 %v22442_v11  ;;  %11365 = vmatprep.subr.bf16.mxu1 %v22447_v24 }
 0xfa4   :  { %11325 = vmatpush1.bf16.msra.mxu0 %v22452_v13  ;;  %11366 = vmatpush1.bf16.msra.mxu1 %v22457_v16 }
 0xfa5   :  { %11326 = vmatprep.subr.bf16.mxu0 %v22466_v14  ;;  %11367 = vmatprep.subr.bf16.mxu1 %v22471_v25 }
 0xfa8   :  { %11327 = vmatpush1.bf16.msra.mxu0 %v22476_v56  ;;  %11368 = vmatpush1.bf16.msra.mxu1 %v22481_v26 }
 0xfa9   :  { %11328 = vmatprep.subr.bf16.mxu0 %v22490_v39  ;;  %11369 = vmatprep.subr.bf16.mxu1 %v22495_v32 }
 0xfac   :  { %11329 = vmatpush1.bf16.msra.mxu0 %v22500_v49  ;;  %11370 = vmatpush1.bf16.msra.mxu1 %v22505_v20 }
 0xfad   :  { %11330 = vmatprep.subr.bf16.mxu0 %v22514_v3  ;;  %11371 = vmatprep.subr.bf16.mxu1 %v22519_v53 }
 0xfb0   :  { %11331 = vmatpush1.bf16.msra.mxu0 %v22524_v51  ;;  %11372 = vmatpush1.bf16.msra.mxu1 %v22529_v45 }
 0xfb1   :  { %11332 = vmatprep.subr.bf16.mxu0 %v22538_v9  ;;  %11373 = vmatprep.subr.bf16.mxu1 %v22543_v40 }
 0xfb4   :  { %11333 = vmatpush1.bf16.msra.mxu0 %v22548_v62  ;;  %11374 = vmatpush1.bf16.msra.mxu1 %v22553_v41 }
 0xfb5   :  { %11334 = vmatprep.subr.bf16.mxu0 %v22562_v48  ;;  %11375 = vmatprep.subr.bf16.mxu1 %v22567_v42 }
 0xfb8   :  { %11335 = vmatpush1.bf16.msra.mxu0 %v22572_v63  ;;  %11376 = vmatpush1.bf16.msra.mxu1 %v22577_v43 }
 0xfb9   :  { %11336 = vmatprep.subr.bf16.mxu0 %v22586_v18  ;;  %11377 = vmatprep.subr.bf16.mxu1 %v22591_v37 }
 0xfbc   :  { %11337 = vmatpush1.bf16.msra.mxu0 %v22596_v35  ;;  %11378 = vmatpush1.bf16.msra.mxu1 %v22601_v30 }
 0xfbd   :  { %11338 = vmatprep.subr.bf16.mxu0 %v22610_v7  ;;  %11379 = vmatprep.subr.bf16.mxu1 %v22615_v52 }
 0xfc0   :  { %11339 = vmatpush1.bf16.msra.mxu0 %v22620_v23  ;;  %11380 = vmatpush1.bf16.msra.mxu1 %v22625_v60 }
 0xfc1   :  { %11340 = vmatprep.subr.bf16.mxu0 %v22634_v21  ;;  %11381 = vmatprep.subr.bf16.mxu1 %v22639_v61 }
 0xfc4   :  { %11341 = vmatpush1.bf16.msra.mxu0 %v22644_v27  ;;  %11382 = vmatpush1.bf16.msra.mxu1 %v22649_v31  ;;  %v22687_v31 = vld [vmem:[%s23730_s8 + $0x1a4] ss:$16 sps:$4 sm:$0xff]   ;;  %v22715_v27 = vld [vmem:[%s23730_s8 + $0x1c0] ss:$16 sps:$4 sm:$0xff]  }
 0xfc5   :  { %11342 = vmatprep.subr.bf16.mxu0 %v22658_v34  ;;  %11383 = vmatprep.subr.bf16.mxu1 %v22663_v44  ;;  %24615 = vst [vmem:[#allocation60_spill] sm:$0xff] %v22687_v31  ;;  %v22692_v34 = vld [vmem:[%s23730_s8 + $0x1a8] ss:$16 sps:$4 sm:$0xff]   ;;  %v22708_v44 = vld [vmem:[%s23730_s8 + $0x1cc] ss:$16 sps:$4 sm:$0xff]   ;;  %24620 = vst [vmem:[#allocation74_spill] sm:$0xff] %v22715_v27 }
 0xfc6   :  { %24616 = vst [vmem:[#allocation61_spill] sm:$0xff] %v22692_v34  ;;  %24619 = vst [vmem:[#allocation72_spill] sm:$0xff] %v22708_v44 }
 0xfc8   :  { %11343 = vmatpush1.bf16.msra.mxu0 %v22668_v6  ;;  %11384 = vmatpush1.bf16.msra.mxu1 %v22673_v2  ;;  %v22697_v6 = vld [vmem:[%s23730_s8 + $0x1ac] ss:$16 sps:$4 sm:$0xff]   ;;  %v22702_v2 = vld [vmem:[%s23730_s8 + $0x1c4] ss:$16 sps:$4 sm:$0xff]  }
 0xfc9   :  { %24617 = vst [vmem:[#allocation73_spill] sm:$0xff] %v22697_v6  ;;  %24618 = vst [vmem:[#allocation75_spill] sm:$0xff] %v22702_v2  ;;  %11344 = vmatprep.subr.bf16.mxu0 %v22687_v31  ;;  %11385 = vmatprep.subr.bf16.mxu1 %v22697_v6  ;;  %v22722_v31 = vld [vmem:[%s23730_s8 + $0x1c8] ss:$16 sps:$4 sm:$0xff]   ;;  %v22727_v6 = vld [vmem:[%s23730_s8 + $0x1e4] ss:$16 sps:$4 sm:$0xff]  }
 0xfca   :  { %24621 = vst [vmem:[#allocation76_spill] sm:$0xff] %v22722_v31  ;;  %24622 = vst [vmem:[#allocation77_spill] sm:$0xff] %v22727_v6 }
 0xfcc   :  { %11345 = vmatpush1.bf16.msra.mxu0 %v22682_v0  ;;  %11386 = vmatpush1.bf16.msra.mxu1 %v22692_v34  ;;  %v22733_v0 = vld [vmem:[%s23730_s8 + $0x1ec] ss:$16 sps:$4 sm:$0xff]   ;;  %v22751_v34 = vld [vmem:[%s23733_s6 + $0x4] ss:$16 sps:$4 sm:$0xff]  }
 0xfcd   :  { %11346 = vmatprep.subr.bf16.mxu0 %v22702_v2  ;;  %11387 = vmatprep.subr.bf16.mxu1 %v22708_v44  ;;  %24623 = vst [vmem:[#allocation78_spill] sm:$0xff] %v22733_v0  ;;  %v22739_v2 = vld [vmem:[%s23730_s8 + $0x1e0] ss:$16 sps:$4 sm:$0xff]   ;;  %v22746_v44 = vld [vmem:[%s23730_s8 + $0x1e8] ss:$16 sps:$4 sm:$0xff]   ;;  %24626 = vst [vmem:[#allocation38_spill] sm:$0xff] %v22751_v34 }
 0xfce   :  { %24624 = vst [vmem:[#allocation36_spill] sm:$0xff] %v22739_v2  ;;  %24625 = vst [vmem:[#allocation37_spill] sm:$0xff] %v22746_v44 }
 0xfd0   :  { %11347 = vmatpush1.bf16.msra.mxu0 %v22715_v27  ;;  %11388 = vmatpush1.bf16.msra.mxu1 %v22722_v31  ;;  %v22757_v27 = vld [vmem:[%s23733_s6 + $0xc] ss:$16 sps:$4 sm:$0xff]  }
 0xfd1   :  { %11348 = vmatprep.subr.bf16.mxu0 %v22727_v6  ;;  %11389 = vmatprep.subr.bf16.mxu1 %v22733_v0  ;;  %24627 = vst [vmem:[#allocation39_spill] sm:$0xff] %v22757_v27  ;;  %v10153_v6 = vld [vmem:[%s23735_s9] sm:$0xf] }
 0xfd2   :  { %v10158_v31 = vrot.slane %v10153_v6, %v24580_v1  ;;  %v10162_v0 = vrot.slane %v10153_v6, %v24581_v57  ;;  %v10166_v37 = vrot.slane %v10153_v6, %v18152_v55  ;;  %v10170_v1 = vrot.slane %v10153_v6, %v18169_v4 }
 0xfd4   :  { %11349 = vmatpush1.bf16.msra.mxu0 %v22739_v2  ;;  %11390 = vmatpush1.bf16.msra.mxu1 %v22746_v44 }
 0xfd5   :  { %11597 = vmatprep.subr.bf16.mxu0 %v22751_v34  ;;  %11638 = vmatprep.subr.bf16.mxu1 %v22757_v27 }
0x104a   :  { %v10529_v61 = vpop.f32.mrb[136].mxu0  ;;  %v10570_v21 = vpop.f32.mrb[136].mxu1 }
0x104b   :  { %v10530_v60 = vadd.f32 %v10529_v61, %v10158_v31  ;;  %v10531_v23 = vpop.f32.mrb[137].mxu0  ;;  %v10572_v52 = vpop.f32.mrb[137].mxu1  ;;  %v10571_v18 = vadd.f32 %v10570_v21, %v10166_v37  ;;  %v24631_v37 = vld [vmem:[#allocation47_spill] sm:$0xff] }
0x104c   :  { %v10532_v2 = vadd.f32 %v10531_v23, %v10162_v0  ;;  %v10533_v7 = vpop.f32.mrb[138].mxu0  ;;  %v10574_v44 = vpop.f32.mrb[138].mxu1  ;;  %v10573_v57 = vadd.f32 %v10572_v52, %v10170_v1  ;;  %v24629_v1 = vld [vmem:[#allocation45_spill] sm:$0xff]  ;;  %v936_v52 = vadd.f32 %v24631_v37, %v18177_v8 }
0x104d   :  { %v15197_v30 = vmul.f32 -1.442695, %v10530_v60  ;;  %v10534_v34 = vpop.f32.mrb[139].mxu0  ;;  %v10575_v35 = vpop.f32.mrb[139].mxu1  ;;  %v15199_v43 = vmul.f32 -1.442695, %v10571_v18  ;;  %v934_v18 = vadd.f32 %v24629_v1, %v18157_v59 }
0x104e   :  { %v15198_v27 = vmul.f32 -1.442695, %v10532_v2 }
0x104f   :  { %17293 = vpow2.f32 %v15197_v30 }
0x1050   :  { %17295 = vpow2.f32 %v15198_v27  ;;  %v24628_v27 = vld [vmem:[#allocation44_spill] sm:$0xff] }
0x1051   :  { %17297 = vtanh.f32 %v10573_v57  ;;  %v821_v6 = vadd.f32 %v24628_v27, %v18149_v54  ;;  %v24630_v57 = vld [vmem:[#allocation46_spill] sm:$0xff] }
0x1052   :  { %17299 = vpow2.f32 %v15199_v43  ;;  %v823_v43 = vadd.f32 %v24630_v57, %v24584_v10 }
0x1059   :  { %v17294_v63 = vpop.eup %17293 }
0x105a   :  { %v10869_v61 = vadd.f32 1.0, %v17294_v63  ;;  %v17296_v31 = vpop.eup %17295 }
0x105b   :  { %v10870_v7 = vadd.f32 1.0, %v17296_v31  ;;  %v17298_v23 = vpop.eup %17297 }
0x105c   :  { %17301 = vrcp.f32 %v10869_v61  ;;  %v17300_v35 = vpop.eup %17299 }
0x105d   :  { %17303 = vrcp.f32 %v10870_v7  ;;  %v10871_v44 = vadd.f32 1.0, %v17300_v35 }
0x105f   :  { %17305 = vrcp.f32 %v10871_v44 }
0x1066   :  { %v17302_v60 = vpop.eup %17301 }
0x1067   :  { %v10880_v30 = vmul.f32 %v17302_v60, %v17298_v23  ;;  %v17304_v34 = vpop.eup %17303 }
0x1068   :  { %v10879_v63 = vmul.f32 %v17304_v34, %v22325_v17 }
0x1069   :  { %v17306_v37 = vpop.eup %17305 }
0x106a   :  { %v10808_v21 = vpop.f32.mrb[140].mxu0  ;;  %v10849_v2 = vpop.f32.mrb[140].mxu1  ;;  %v22779_v0 = vadd.f32 %v10880_v30, %v10879_v63 }
0x106b   :  { %v10856_v61 = vadd.f32 %v10808_v21, %v821_v6  ;;  %v10858_v31 = vadd.f32 %v10849_v2, %v934_v18  ;;  %v10810_v7 = vpop.f32.mrb[141].mxu0  ;;  %v10851_v23 = vpop.f32.mrb[141].mxu1 }
0x106c   :  { %v10857_v35 = vadd.f32 %v10810_v7, %v823_v43  ;;  %v10859_v60 = vadd.f32 %v10851_v23, %v936_v52  ;;  %v10812_v27 = vpop.f32.mrb[142].mxu0  ;;  %v10853_v1 = vpop.f32.mrb[142].mxu1  ;;  %17307 = vtanh.f32 %v22779_v0 }
0x106d   :  { %v15201_v17 = vmul.f32 -1.442695, %v10856_v61  ;;  %v10813_v34 = vpop.f32.mrb[143].mxu0  ;;  %v10854_v57 = vpop.f32.mrb[143].mxu1  ;;  %v15203_v63 = vmul.f32 -1.442695, %v10858_v31 }
0x106e   :  { %v15202_v10 = vmul.f32 -1.442695, %v10857_v35  ;;  %v22792_v34 = vld [vmem:[%s23733_s6] ss:$16 sps:$4 sm:$0xff]   ;;  %v22797_v57 = vld [vmem:[%s23733_s6 + $0x8] ss:$16 sps:$4 sm:$0xff]  }
0x106f   :  { %17309 = vpow2.f32 %v15201_v17 }
0x1070   :  { %17311 = vpow2.f32 %v15202_v10 }
0x1071   :  { %17313 = vtanh.f32 %v10859_v60 }
0x1072   :  { %17315 = vpow2.f32 %v15203_v63  ;;  %v22818_v63 = vld [vmem:[%s23733_s6 + $0x20] ss:$16 sps:$4 sm:$0xff]  }
0x1076   :  { %v17308_v30 = vpop.eup %17307 }
0x1077   :  { %v10883_v6 = vmul.f32 %v17308_v30, %v17306_v37  ;;  %v22809_v30 = vld [vmem:[%s23733_s6 + $0x2c] ss:$16 sps:$4 sm:$0xff]  }
0x1079   :  { %v17310_v18 = vpop.eup %17309  ;;  %15200 = vst [vmem:[%s23736_s11 + $0x58] sm:$0xff] %v10883_v6  ;;  %v10911_v44 = vpack.c.bf16 %v10883_v6, %v10883_v6  ;;  %v22823_v6 = vld [vmem:[%s23733_s6 + $0x28] ss:$16 sps:$4 sm:$0xff]  }
0x107a   :  { %v10895_v21 = vadd.f32 1.0, %v17310_v18  ;;  %v17312_v43 = vpop.eup %17311  ;;  %v22830_v18 = vld [vmem:[%s23733_s6 + $0x44] ss:$16 sps:$4 sm:$0xff]  }
0x107b   :  { %v10896_v52 = vadd.f32 1.0, %v17312_v43  ;;  %11350 = vmatprep.mubr.bf16.mxu0 %v10911_v44  ;;  %11391 = vmatprep.mubr.bf16.mxu1 %v10911_v44  ;;  %v17314_v10 = vpop.eup %17313  ;;  %v22844_v44 = vld [vmem:[%s23733_s6 + $0x40] ss:$16 sps:$4 sm:$0xff]   ;;  %v22849_v43 = vld [vmem:[%s23733_s6 + $0x48] ss:$16 sps:$4 sm:$0xff]  }
0x107c   :  { %17317 = vrcp.f32 %v10895_v21  ;;  %v17316_v2 = vpop.eup %17315  ;;  %v22835_v21 = vld [vmem:[%s23733_s6 + $0x4c] ss:$16 sps:$4 sm:$0xff]  }
0x107d   :  { %17319 = vrcp.f32 %v10896_v52  ;;  %v10897_v23 = vadd.f32 1.0, %v17316_v2  ;;  %v22856_v52 = vld [vmem:[%s23733_s6 + $0x64] ss:$16 sps:$4 sm:$0xff]   ;;  %v22868_v2 = vld [vmem:[%s23733_s6 + $0x60] ss:$16 sps:$4 sm:$0xff]  }
0x107f   :  { %17321 = vrcp.f32 %v10897_v23  ;;  %v22892_v23 = vld [vmem:[%s23733_s6 + $0x80] ss:$16 sps:$4 sm:$0xff]  }
0x1080   :  { %24633 = vst [vmem:[#allocation83_spill] sm:$0xff] %v22892_v23 }
0x1086   :  { %v17318_v61 = vpop.eup %17317 }
0x1087   :  { %v10906_v31 = vmul.f32 %v17318_v61, %v17314_v10  ;;  %v17320_v7 = vpop.eup %17319  ;;  %v22861_v10 = vld [vmem:[%s23733_s6 + $0x6c] ss:$16 sps:$4 sm:$0xff]   ;;  %v22873_v61 = vld [vmem:[%s23733_s6 + $0x68] ss:$16 sps:$4 sm:$0xff]  }
0x1088   :  { %v10905_v35 = vmul.f32 %v17320_v7, %v22332_v29  ;;  %v22804_v29 = vld [vmem:[%s23733_s6 + $0x24] ss:$16 sps:$4 sm:$0xff]   ;;  %v22885_v7 = vld [vmem:[%s23733_s6 + $0x8c] ss:$16 sps:$4 sm:$0xff]  }
0x1089   :  { %v17322_v27 = vpop.eup %17321  ;;  %24632 = vst [vmem:[#allocation79_spill] sm:$0xff] %v22885_v7 }
0x108a   :  { %v22786_v60 = vadd.f32 %v10906_v31, %v10905_v35  ;;  %v22880_v31 = vld [vmem:[%s23733_s6 + $0x84] ss:$16 sps:$4 sm:$0xff]   ;;  %v22897_v35 = vld [vmem:[%s23733_s6 + $0x88] ss:$16 sps:$4 sm:$0xff]  }
0x108b   :  { %24634 = vst [vmem:[#allocation82_spill] sm:$0xff] %v22897_v35 }
0x108c   :  { %17323 = vtanh.f32 %v22786_v60 }
0x1096   :  { %v17324_v1 = vpop.eup %17323 }
0x1097   :  { %v10909_v17 = vmul.f32 %v17324_v1, %v17322_v27  ;;  %v22904_v27 = vld [vmem:[%s23733_s6 + $0xa4] ss:$16 sps:$4 sm:$0xff]   ;;  %v22909_v1 = vld [vmem:[%s23733_s6 + $0xac] ss:$16 sps:$4 sm:$0xff]  }
0x1098   :  { %24635 = vst [vmem:[#allocation81_spill] sm:$0xff] %v22904_v27  ;;  %24636 = vst [vmem:[#allocation80_spill] sm:$0xff] %v22909_v1 }
0x1099   :  { %v22799_v37 = vpack.c.bf16 %v10909_v17, %v10909_v17  ;;  %v22916_v17 = vld [vmem:[%s23733_s6 + $0xa0] ss:$16 sps:$4 sm:$0xff]  }
0x109a   :  { %24637 = vst [vmem:[#allocation84_spill] sm:$0xff] %v22916_v17 }
0x109b   :  { %11351 = vmatmul.mubr.bf16.vlgmr.msra.gmra.mrb[144].mxu0 %v22799_v37  ;;  %11392 = vmatmul.mubr.bf16.vlgmr.msra.gmra.mrb[144].mxu1 %v22799_v37 }
0x109c   :  { %11598 = vmatpush1.bf16.msra.mxu0 %v22792_v34  ;;  %11639 = vmatpush1.bf16.msra.mxu1 %v22797_v57 }
0x109d   :  { %11599 = vmatprep.subr.bf16.mxu0 %v22804_v29  ;;  %11640 = vmatprep.subr.bf16.mxu1 %v22809_v30 }
0x109e   :  { %11629 = vmatprep.mubr.bf16.mxu0 %v24094_v58  ;;  %11670 = vmatprep.mubr.bf16.mxu1 %v24094_v58 }
0x10a0   :  { %11600 = vmatpush1.bf16.msra.mxu0 %v22818_v63  ;;  %11641 = vmatpush1.bf16.msra.mxu1 %v22823_v6 }
0x10a1   :  { %11601 = vmatprep.subr.bf16.mxu0 %v22830_v18  ;;  %11642 = vmatprep.subr.bf16.mxu1 %v22835_v21 }
0x10a4   :  { %11602 = vmatpush1.bf16.msra.mxu0 %v22844_v44  ;;  %11643 = vmatpush1.bf16.msra.mxu1 %v22849_v43 }
0x10a5   :  { %11603 = vmatprep.subr.bf16.mxu0 %v22856_v52  ;;  %11644 = vmatprep.subr.bf16.mxu1 %v22861_v10 }
0x10a8   :  { %11604 = vmatpush1.bf16.msra.mxu0 %v22868_v2  ;;  %11645 = vmatpush1.bf16.msra.mxu1 %v22873_v61 }
0x10a9   :  { %11605 = vmatprep.subr.bf16.mxu0 %v22880_v31  ;;  %11646 = vmatprep.subr.bf16.mxu1 %v22885_v7  ;;  %v22921_v7 = vld [vmem:[%s23733_s6 + $0xa8] ss:$16 sps:$4 sm:$0xff]  }
0x10aa   :  { %24638 = vst [vmem:[#allocation85_spill] sm:$0xff] %v22921_v7 }
0x10ac   :  { %11606 = vmatpush1.bf16.msra.mxu0 %v22892_v23  ;;  %11647 = vmatpush1.bf16.msra.mxu1 %v22897_v35  ;;  %v22928_v23 = vld [vmem:[%s23733_s6 + $0xc4] ss:$16 sps:$4 sm:$0xff]   ;;  %v22933_v35 = vld [vmem:[%s23733_s6 + $0xcc] ss:$16 sps:$4 sm:$0xff]  }
0x10ad   :  { %11607 = vmatprep.subr.bf16.mxu0 %v22904_v27  ;;  %11648 = vmatprep.subr.bf16.mxu1 %v22909_v1  ;;  %24639 = vst [vmem:[#allocation24_spill] sm:$0xff] %v22928_v23  ;;  %24640 = vst [vmem:[#allocation25_spill] sm:$0xff] %v22933_v35  ;;  %v22940_v27 = vld [vmem:[%s23733_s6 + $0xc0] ss:$16 sps:$4 sm:$0xff]   ;;  %v22945_v1 = vld [vmem:[%s23733_s6 + $0xc8] ss:$16 sps:$4 sm:$0xff]  }
0x10b0   :  { %11608 = vmatpush1.bf16.msra.mxu0 %v22916_v17  ;;  %11649 = vmatpush1.bf16.msra.mxu1 %v22921_v7  ;;  %v22952_v17 = vld [vmem:[%s23733_s6 + $0xe4] ss:$16 sps:$4 sm:$0xff]   ;;  %v22957_v7 = vld [vmem:[%s23733_s6 + $0xec] ss:$16 sps:$4 sm:$0xff]  }
0x10b1   :  { %11609 = vmatprep.subr.bf16.mxu0 %v22928_v23  ;;  %11650 = vmatprep.subr.bf16.mxu1 %v22933_v35  ;;  %v22964_v23 = vld [vmem:[%s23733_s6 + $0xe0] ss:$16 sps:$4 sm:$0xff]   ;;  %v22969_v35 = vld [vmem:[%s23733_s6 + $0xe8] ss:$16 sps:$4 sm:$0xff]  }
0x10b4   :  { %11610 = vmatpush1.bf16.msra.mxu0 %v22940_v27  ;;  %11651 = vmatpush1.bf16.msra.mxu1 %v22945_v1 }
0x10b5   :  { %11611 = vmatprep.subr.bf16.mxu0 %v22952_v17  ;;  %11652 = vmatprep.subr.bf16.mxu1 %v22957_v7 }
0x10b8   :  { %11612 = vmatpush1.bf16.msra.mxu0 %v22964_v23  ;;  %11653 = vmatpush1.bf16.msra.mxu1 %v22969_v35 }
0x10b9   :  { %12141 = vmatprep.subr.bf16.mxu0 %v22370_v50  ;;  %12182 = vmatprep.subr.bf16.mxu1 %v22375_v46  ;;  %v24641_v50 = vld [vmem:[#allocation96_spill] sm:$0xff]  ;;  %v24642_v46 = vld [vmem:[#allocation98_spill] sm:$0xff] }
0x10bb   :  { %11630 = vmatmul.mubr.bf16.vlgmr.msra.gmra.mrb[148].mxu0 %v22799_v37  ;;  %11671 = vmatmul.mubr.bf16.vlgmr.msra.gmra.mrb[148].mxu1 %v22799_v37 }
0x10bc   :  { %12142 = vmatpush1.bf16.msra.mxu0 %v22380_v15  ;;  %12183 = vmatpush1.bf16.msra.mxu1 %v22385_v5  ;;  %v24643_v15 = vld [vmem:[#allocation13_spill] sm:$0xff] }
0x10bd   :  { %12143 = vmatprep.subr.bf16.mxu0 %v22394_v12  ;;  %12184 = vmatprep.subr.bf16.mxu1 %v22399_v28  ;;  %v24644_v5 = vld [vmem:[#allocation97_spill] sm:$0xff]  ;;  %v24645_v12 = vld [vmem:[#allocation12_spill] sm:$0xff]  ;;  %v24646_v28 = vld [vmem:[#allocation14_spill] sm:$0xff] }
0x10c0   :  { %12144 = vmatpush1.bf16.msra.mxu0 %v22404_v36  ;;  %12185 = vmatpush1.bf16.msra.mxu1 %v22409_v38  ;;  %v24647_v36 = vld [vmem:[#allocation15_spill] sm:$0xff]  ;;  %v24648_v38 = vld [vmem:[#allocation52_spill] sm:$0xff] }
0x10c1   :  { %12145 = vmatprep.subr.bf16.mxu0 %v22418_v22  ;;  %12186 = vmatprep.subr.bf16.mxu1 %v22423_v19  ;;  %v24649_v22 = vld [vmem:[#allocation53_spill] sm:$0xff]  ;;  %v24650_v19 = vld [vmem:[#allocation54_spill] sm:$0xff] }
0x10c4   :  { %12146 = vmatpush1.bf16.msra.mxu0 %v22428_v33  ;;  %12187 = vmatpush1.bf16.msra.mxu1 %v22433_v47  ;;  %v24651_v33 = vld [vmem:[#allocation55_spill] sm:$0xff]  ;;  %v24652_v47 = vld [vmem:[#allocation56_spill] sm:$0xff] }
0x10c5   :  { %12147 = vmatprep.subr.bf16.mxu0 %v22442_v11  ;;  %12188 = vmatprep.subr.bf16.mxu1 %v22447_v24  ;;  %v24653_v11 = vld [vmem:[#allocation57_spill] sm:$0xff]  ;;  %v24654_v24 = vld [vmem:[#allocation58_spill] sm:$0xff] }
0x10c8   :  { %12148 = vmatpush1.bf16.msra.mxu0 %v22452_v13  ;;  %12189 = vmatpush1.bf16.msra.mxu1 %v22457_v16  ;;  %v24655_v13 = vld [vmem:[#allocation59_spill] sm:$0xff]  ;;  %v24656_v16 = vld [vmem:[#allocation32_spill] sm:$0xff] }
0x10c9   :  { %12149 = vmatprep.subr.bf16.mxu0 %v22466_v14  ;;  %12190 = vmatprep.subr.bf16.mxu1 %v22471_v25  ;;  %v24657_v14 = vld [vmem:[#allocation33_spill] sm:$0xff]  ;;  %v24658_v25 = vld [vmem:[#allocation34_spill] sm:$0xff] }
0x10cc   :  { %12150 = vmatpush1.bf16.msra.mxu0 %v22476_v56  ;;  %12191 = vmatpush1.bf16.msra.mxu1 %v22481_v26  ;;  %v24659_v56 = vld [vmem:[#allocation60_spill] sm:$0xff]  ;;  %v24660_v26 = vld [vmem:[#allocation73_spill] sm:$0xff] }
0x10cd   :  { %12151 = vmatprep.subr.bf16.mxu0 %v22490_v39  ;;  %12192 = vmatprep.subr.bf16.mxu1 %v22495_v32  ;;  %v24661_v39 = vld [vmem:[#allocation35_spill] sm:$0xff]  ;;  %v24662_v32 = vld [vmem:[#allocation61_spill] sm:$0xff] }
0x10d0   :  { %12152 = vmatpush1.bf16.msra.mxu0 %v22500_v49  ;;  %12193 = vmatpush1.bf16.msra.mxu1 %v22505_v20  ;;  %v24663_v49 = vld [vmem:[#allocation75_spill] sm:$0xff]  ;;  %v24664_v20 = vld [vmem:[#allocation72_spill] sm:$0xff] }
0x10d1   :  { %12153 = vmatprep.subr.bf16.mxu0 %v22514_v3  ;;  %12194 = vmatprep.subr.bf16.mxu1 %v22519_v53  ;;  %v24665_v3 = vld [vmem:[#allocation74_spill] sm:$0xff]  ;;  %v24666_v53 = vld [vmem:[#allocation76_spill] sm:$0xff] }
0x10d4   :  { %12154 = vmatpush1.bf16.msra.mxu0 %v22524_v51  ;;  %12195 = vmatpush1.bf16.msra.mxu1 %v22529_v45  ;;  %v24667_v51 = vld [vmem:[#allocation77_spill] sm:$0xff]  ;;  %v24668_v45 = vld [vmem:[#allocation78_spill] sm:$0xff] }
0x10d5   :  { %12155 = vmatprep.subr.bf16.mxu0 %v22538_v9  ;;  %12196 = vmatprep.subr.bf16.mxu1 %v22543_v40  ;;  %v24669_v9 = vld [vmem:[#allocation36_spill] sm:$0xff]  ;;  %v24670_v40 = vld [vmem:[#allocation37_spill] sm:$0xff] }
0x10d8   :  { %12156 = vmatpush1.bf16.msra.mxu0 %v22548_v62  ;;  %12197 = vmatpush1.bf16.msra.mxu1 %v22553_v41  ;;  %v24671_v62 = vld [vmem:[#allocation38_spill] sm:$0xff]  ;;  %v24672_v41 = vld [vmem:[#allocation39_spill] sm:$0xff] }
0x10d9   :  { %12157 = vmatprep.subr.bf16.mxu0 %v22562_v48  ;;  %12198 = vmatprep.subr.bf16.mxu1 %v22567_v42  ;;  %v10976_v48 = vld [vmem:[%s23735_s9] sm:$0xf] }
0x10da   :  { %v24673_v42 = vld [vmem:[#allocation3_spill] sm:$0xff] }
0x10db   :  { %v10981_v37 = vrot.slane %v10976_v48, %v24673_v42 }
0x10dc   :  { %12158 = vmatpush1.bf16.msra.mxu0 %v24641_v50  ;;  %12199 = vmatpush1.bf16.msra.mxu1 %v24642_v46  ;;  %v24674_v50 = vld [vmem:[#allocation70_spill] sm:$0xff] }
0x10dd   :  { %12159 = vmatprep.subr.bf16.mxu0 %v24643_v15  ;;  %12200 = vmatprep.subr.bf16.mxu1 %v24644_v5  ;;  %v10985_v46 = vrot.slane %v10976_v48, %v24674_v50 }
0x10e0   :  { %12160 = vmatpush1.bf16.msra.mxu0 %v24645_v12  ;;  %12201 = vmatpush1.bf16.msra.mxu1 %v24646_v28 }
0x10e1   :  { %12161 = vmatprep.subr.bf16.mxu0 %v24647_v36  ;;  %12202 = vmatprep.subr.bf16.mxu1 %v24648_v38 }
0x10e4   :  { %12162 = vmatpush1.bf16.msra.mxu0 %v24649_v22  ;;  %12203 = vmatpush1.bf16.msra.mxu1 %v24650_v19 }
0x10e5   :  { %12163 = vmatprep.subr.bf16.mxu0 %v24651_v33  ;;  %12204 = vmatprep.subr.bf16.mxu1 %v24652_v47 }
0x10e8   :  { %12164 = vmatpush1.bf16.msra.mxu0 %v24653_v11  ;;  %12205 = vmatpush1.bf16.msra.mxu1 %v24654_v24 }
0x10e9   :  { %12165 = vmatprep.subr.bf16.mxu0 %v24655_v13  ;;  %12206 = vmatprep.subr.bf16.mxu1 %v24656_v16  ;;  %v10989_v13 = vrot.slane %v10976_v48, %v18152_v55  ;;  %v10993_v16 = vrot.slane %v10976_v48, %v18169_v4 }
0x10ec   :  { %12166 = vmatpush1.bf16.msra.mxu0 %v24657_v14  ;;  %12207 = vmatpush1.bf16.msra.mxu1 %v24658_v25 }
0x10ed   :  { %12167 = vmatprep.subr.bf16.mxu0 %v24659_v56  ;;  %12208 = vmatprep.subr.bf16.mxu1 %v24660_v26 }
0x10f0   :  { %12168 = vmatpush1.bf16.msra.mxu0 %v24661_v39  ;;  %12209 = vmatpush1.bf16.msra.mxu1 %v24662_v32 }
0x10f1   :  { %12169 = vmatprep.subr.bf16.mxu0 %v24663_v49  ;;  %12210 = vmatprep.subr.bf16.mxu1 %v24664_v20 }
0x10f4   :  { %12170 = vmatpush1.bf16.msra.mxu0 %v24665_v3  ;;  %12211 = vmatpush1.bf16.msra.mxu1 %v24666_v53 }
0x10f5   :  { %12171 = vmatprep.subr.bf16.mxu0 %v24667_v51  ;;  %12212 = vmatprep.subr.bf16.mxu1 %v24668_v45 }
0x10f8   :  { %12172 = vmatpush1.bf16.msra.mxu0 %v24669_v9  ;;  %12213 = vmatpush1.bf16.msra.mxu1 %v24670_v40  ;;  %v24675_v40 = vld [vmem:[#allocation48_spill] sm:$0xff] }
0x10f9   :  { %12420 = vmatprep.subr.bf16.mxu0 %v24671_v62  ;;  %12461 = vmatprep.subr.bf16.mxu1 %v24672_v41  ;;  %v825_v62 = vadd.f32 %v24675_v40, %v18149_v54  ;;  %v24676_v41 = vld [vmem:[#allocation49_spill] sm:$0xff] }
0x10fa   :  { %v938_v48 = vadd.f32 %v24676_v41, %v18157_v59 }
0x116e   :  { %v11352_v15 = vpop.f32.mrb[144].mxu0  ;;  %v11393_v5 = vpop.f32.mrb[144].mxu1 }
0x116f   :  { %v11353_v12 = vadd.f32 %v11352_v15, %v10981_v37  ;;  %v11354_v28 = vpop.f32.mrb[145].mxu0  ;;  %v11395_v36 = vpop.f32.mrb[145].mxu1  ;;  %v11394_v14 = vadd.f32 %v11393_v5, %v10989_v13  ;;  %v24678_v15 = vld [vmem:[#allocation50_spill] sm:$0xff] }
0x1170   :  { %v11355_v38 = vadd.f32 %v11354_v28, %v10985_v46  ;;  %v11356_v22 = vpop.f32.mrb[146].mxu0  ;;  %v11397_v19 = vpop.f32.mrb[146].mxu1  ;;  %v11396_v25 = vadd.f32 %v11395_v36, %v10993_v16  ;;  %v24677_v46 = vld [vmem:[#allocation71_spill] sm:$0xff] }
0x1171   :  { %v15300_v33 = vmul.f32 -1.442695, %v11353_v12  ;;  %v11357_v47 = vpop.f32.mrb[147].mxu0  ;;  %v11398_v11 = vpop.f32.mrb[147].mxu1  ;;  %v15302_v56 = vmul.f32 -1.442695, %v11394_v14  ;;  %v827_v5 = vadd.f32 %v24678_v15, %v24677_v46 }
0x1172   :  { %v15301_v24 = vmul.f32 -1.442695, %v11355_v38  ;;  %v24679_v12 = vld [vmem:[#allocation51_spill] sm:$0xff] }
0x1173   :  { %17325 = vpow2.f32 %v15300_v33  ;;  %v940_v28 = vadd.f32 %v24679_v12, %v18177_v8 }
0x1174   :  { %17327 = vpow2.f32 %v15301_v24 }
0x1175   :  { %17329 = vtanh.f32 %v11396_v25 }
0x1176   :  { %17331 = vpow2.f32 %v15302_v56 }
0x117d   :  { %v17326_v26 = vpop.eup %17325 }
0x117e   :  { %v11692_v39 = vadd.f32 1.0, %v17326_v26  ;;  %v17328_v32 = vpop.eup %17327 }
0x117f   :  { %v11693_v49 = vadd.f32 1.0, %v17328_v32  ;;  %v17330_v20 = vpop.eup %17329 }
0x1180   :  { %17333 = vrcp.f32 %v11692_v39  ;;  %v17332_v3 = vpop.eup %17331 }
0x1181   :  { %17335 = vrcp.f32 %v11693_v49  ;;  %v11694_v9 = vadd.f32 1.0, %v17332_v3 }
0x1183   :  { %17337 = vrcp.f32 %v11694_v9 }
0x118a   :  { %v17334_v53 = vpop.eup %17333 }
0x118b   :  { %v11703_v51 = vmul.f32 %v17334_v53, %v17330_v20  ;;  %v17336_v45 = vpop.eup %17335 }
0x118c   :  { %v11702_v37 = vmul.f32 %v17336_v45, %v22779_v0 }
0x118d   :  { %v17338_v39 = vpop.eup %17337 }
0x118e   :  { %v11631_v36 = vpop.f32.mrb[148].mxu0  ;;  %v11672_v38 = vpop.f32.mrb[148].mxu1  ;;  %v23059_v22 = vadd.f32 %v11703_v51, %v11702_v37 }
0x118f   :  { %v11679_v19 = vadd.f32 %v11631_v36, %v825_v62  ;;  %v11681_v33 = vadd.f32 %v11672_v38, %v938_v48  ;;  %v11633_v47 = vpop.f32.mrb[149].mxu0  ;;  %v11674_v11 = vpop.f32.mrb[149].mxu1 }
0x1190   :  { %v11680_v24 = vadd.f32 %v11633_v47, %v827_v5  ;;  %v11682_v13 = vadd.f32 %v11674_v11, %v940_v28  ;;  %v11635_v16 = vpop.f32.mrb[150].mxu0  ;;  %v11676_v14 = vpop.f32.mrb[150].mxu1  ;;  %17339 = vtanh.f32 %v23059_v22  ;;  %v23186_v47 = vld [vmem:[%s23730_s8 + $0x60] ss:$16 sps:$4 sm:$0xff]   ;;  %v23191_v11 = vld [vmem:[%s23730_s8 + $0x68] ss:$16 sps:$4 sm:$0xff]  }
0x1191   :  { %v15304_v0 = vmul.f32 -1.442695, %v11679_v19  ;;  %v11636_v25 = vpop.f32.mrb[151].mxu0  ;;  %v11677_v56 = vpop.f32.mrb[151].mxu1  ;;  %v15306_v49 = vmul.f32 -1.442695, %v11681_v33 }
0x1192   :  { %v15305_v26 = vmul.f32 -1.442695, %v11680_v24  ;;  %v23181_v33 = vld [vmem:[%s23730_s8 + $0x6c] ss:$16 sps:$4 sm:$0xff]   ;;  %v23200_v24 = vld [vmem:[%s23730_s8 + $0x84] ss:$16 sps:$4 sm:$0xff]  }
0x1193   :  { %17341 = vpow2.f32 %v15304_v0  ;;  %v23210_v16 = vld [vmem:[%s23730_s8 + $0x80] ss:$16 sps:$4 sm:$0xff]   ;;  %v23215_v14 = vld [vmem:[%s23730_s8 + $0x88] ss:$16 sps:$4 sm:$0xff]   ;;  %v23224_v0 = vld [vmem:[%s23730_s8 + $0xa4] ss:$16 sps:$4 sm:$0xff]  }
0x1194   :  { %17343 = vpow2.f32 %v15305_v26  ;;  %v23229_v25 = vld [vmem:[%s23730_s8 + $0xac] ss:$16 sps:$4 sm:$0xff]   ;;  %v23234_v56 = vld [vmem:[%s23730_s8 + $0xa0] ss:$16 sps:$4 sm:$0xff]   ;;  %v23239_v26 = vld [vmem:[%s23730_s8 + $0xa8] ss:$16 sps:$4 sm:$0xff]  }
0x1195   :  { %17345 = vtanh.f32 %v11682_v13  ;;  %v23205_v13 = vld [vmem:[%s23730_s8 + $0x8c] ss:$16 sps:$4 sm:$0xff]  }
0x1196   :  { %17347 = vpow2.f32 %v15306_v49  ;;  %v23258_v49 = vld [vmem:[%s23730_s8 + $0xc0] ss:$16 sps:$4 sm:$0xff]  }
0x119a   :  { %v17340_v32 = vpop.eup %17339 }
0x119b   :  { %v11706_v20 = vmul.f32 %v17340_v32, %v17338_v39  ;;  %v23248_v39 = vld [vmem:[%s23730_s8 + $0xc4] ss:$16 sps:$4 sm:$0xff]   ;;  %v23253_v32 = vld [vmem:[%s23730_s8 + $0xcc] ss:$16 sps:$4 sm:$0xff]  }
0x119d   :  { %v17342_v3 = vpop.eup %17341  ;;  %15303 = vst [vmem:[%s23736_s11 + $0x60] sm:$0xff] %v11706_v20  ;;  %v11734_v51 = vpack.c.bf16 %v11706_v20, %v11706_v20  ;;  %v23263_v20 = vld [vmem:[%s23730_s8 + $0xc8] ss:$16 sps:$4 sm:$0xff]  }
0x119e   :  { %v11718_v53 = vadd.f32 1.0, %v17342_v3  ;;  %v17344_v45 = vpop.eup %17343  ;;  %v23272_v3 = vld [vmem:[%s23730_s8 + $0xe4] ss:$16 sps:$4 sm:$0xff]  }
0x119f   :  { %v11719_v9 = vadd.f32 1.0, %v17344_v45  ;;  %12173 = vmatprep.mubr.bf16.mxu0 %v11734_v51  ;;  %12214 = vmatprep.mubr.bf16.mxu1 %v11734_v51  ;;  %v17346_v40 = vpop.eup %17345  ;;  %v23282_v51 = vld [vmem:[%s23730_s8 + $0xe0] ss:$16 sps:$4 sm:$0xff]   ;;  %v23287_v45 = vld [vmem:[%s23730_s8 + $0xe8] ss:$16 sps:$4 sm:$0xff]  }
0x11a0   :  { %17349 = vrcp.f32 %v11718_v53  ;;  %v17348_v62 = vpop.eup %17347  ;;  %v23277_v53 = vld [vmem:[%s23730_s8 + $0xec] ss:$16 sps:$4 sm:$0xff]  }
0x11a1   :  { %17351 = vrcp.f32 %v11719_v9  ;;  %v11720_v15 = vadd.f32 1.0, %v17348_v62  ;;  %v23296_v9 = vld [vmem:[%s23730_s8 + $0x104] ss:$16 sps:$4 sm:$0xff]   ;;  %v23306_v62 = vld [vmem:[%s23730_s8 + $0x100] ss:$16 sps:$4 sm:$0xff]  }
0x11a2   :  { %24689 = vst [vmem:[#allocation26_spill] sm:$0xff] %v23306_v62 }
0x11a3   :  { %17353 = vrcp.f32 %v11720_v15  ;;  %v23330_v15 = vld [vmem:[%s23730_s8 + $0x120] ss:$16 sps:$4 sm:$0xff]  }
0x11a4   :  { %24693 = vst [vmem:[#allocation88_spill] sm:$0xff] %v23330_v15 }
0x11aa   :  { %v17350_v41 = vpop.eup %17349 }
0x11ab   :  { %v11729_v48 = vmul.f32 %v17350_v41, %v17346_v40  ;;  %v17352_v37 = vpop.eup %17351  ;;  %v23301_v40 = vld [vmem:[%s23730_s8 + $0x10c] ss:$16 sps:$4 sm:$0xff]   ;;  %v23311_v41 = vld [vmem:[%s23730_s8 + $0x108] ss:$16 sps:$4 sm:$0xff]  }
0x11ac   :  { %v11728_v5 = vmul.f32 %v17352_v37, %v22786_v60  ;;  %v24680_v60 = vld [vmem:[#allocation79_spill] sm:$0xff]  ;;  %24690 = vst [vmem:[#allocation27_spill] sm:$0xff] %v23311_v41  ;;  %v23325_v37 = vld [vmem:[%s23730_s8 + $0x12c] ss:$16 sps:$4 sm:$0xff]  }
0x11ad   :  { %v17354_v28 = vpop.eup %17353  ;;  %24692 = vst [vmem:[#allocation87_spill] sm:$0xff] %v23325_v37 }
0x11ae   :  { %v23066_v12 = vadd.f32 %v11729_v48, %v11728_v5  ;;  %v23320_v48 = vld [vmem:[%s23730_s8 + $0x124] ss:$16 sps:$4 sm:$0xff]   ;;  %v23335_v5 = vld [vmem:[%s23730_s8 + $0x128] ss:$16 sps:$4 sm:$0xff]  }
0x11af   :  { %24691 = vst [vmem:[#allocation86_spill] sm:$0xff] %v23320_v48  ;;  %24694 = vst [vmem:[#allocation89_spill] sm:$0xff] %v23335_v5 }
0x11b0   :  { %17355 = vtanh.f32 %v23066_v12 }
0x11ba   :  { %v17356_v36 = vpop.eup %17355 }
0x11bb   :  { %v11732_v38 = vmul.f32 %v17356_v36, %v17354_v28  ;;  %v23344_v28 = vld [vmem:[%s23730_s8 + $0x144] ss:$16 sps:$4 sm:$0xff]   ;;  %v23349_v36 = vld [vmem:[%s23730_s8 + $0x14c] ss:$16 sps:$4 sm:$0xff]  }
0x11bc   :  { %24695 = vst [vmem:[#allocation90_spill] sm:$0xff] %v23344_v28  ;;  %24696 = vst [vmem:[#allocation91_spill] sm:$0xff] %v23349_v36 }
0x11bd   :  { %v11733_v19 = vpack.c.bf16 %v11732_v38, %v11732_v38  ;;  %v23354_v38 = vld [vmem:[%s23730_s8 + $0x140] ss:$16 sps:$4 sm:$0xff]  }
0x11be   :  { %24697 = vst [vmem:[#allocation92_spill] sm:$0xff] %v23354_v38 }
0x11bf   :  { %12174 = vmatmul.mubr.bf16.vlgmr.msra.gmra.mrb[152].mxu0 %v11733_v19  ;;  %12215 = vmatmul.mubr.bf16.vlgmr.msra.gmra.mrb[152].mxu1 %v11733_v19 }
0x11c0   :  { %12421 = vmatpush1.bf16.msra.mxu0 %v22792_v34  ;;  %12462 = vmatpush1.bf16.msra.mxu1 %v22797_v57  ;;  %v24681_v34 = vld [vmem:[#allocation83_spill] sm:$0xff]  ;;  %v24682_v57 = vld [vmem:[#allocation82_spill] sm:$0xff] }
0x11c1   :  { %12422 = vmatprep.subr.bf16.mxu0 %v22804_v29  ;;  %12463 = vmatprep.subr.bf16.mxu1 %v22809_v30  ;;  %v24683_v29 = vld [vmem:[#allocation81_spill] sm:$0xff]  ;;  %v24684_v30 = vld [vmem:[#allocation80_spill] sm:$0xff] }
0x11c2   :  { %12452 = vmatprep.mubr.bf16.mxu0 %v24094_v58  ;;  %12493 = vmatprep.mubr.bf16.mxu1 %v24094_v58 }
0x11c4   :  { %12423 = vmatpush1.bf16.msra.mxu0 %v22818_v63  ;;  %12464 = vmatpush1.bf16.msra.mxu1 %v22823_v6  ;;  %v24685_v63 = vld [vmem:[#allocation84_spill] sm:$0xff]  ;;  %v24686_v6 = vld [vmem:[#allocation85_spill] sm:$0xff] }
0x11c5   :  { %12424 = vmatprep.subr.bf16.mxu0 %v22830_v18  ;;  %12465 = vmatprep.subr.bf16.mxu1 %v22835_v21  ;;  %v24687_v18 = vld [vmem:[#allocation24_spill] sm:$0xff]  ;;  %v24688_v21 = vld [vmem:[#allocation25_spill] sm:$0xff] }
0x11c8   :  { %12425 = vmatpush1.bf16.msra.mxu0 %v22844_v44  ;;  %12466 = vmatpush1.bf16.msra.mxu1 %v22849_v43  ;;  %v23104_v44 = vld [vmem:[%s23730_s8 + $0x4] ss:$16 sps:$4 sm:$0xff]   ;;  %v23109_v43 = vld [vmem:[%s23730_s8 + $0xc] ss:$16 sps:$4 sm:$0xff]  }
0x11c9   :  { %12426 = vmatprep.subr.bf16.mxu0 %v22856_v52  ;;  %12467 = vmatprep.subr.bf16.mxu1 %v22861_v10  ;;  %v23114_v52 = vld [vmem:[%s23730_s8] ss:$16 sps:$4 sm:$0xff]   ;;  %v23119_v10 = vld [vmem:[%s23730_s8 + $0x8] ss:$16 sps:$4 sm:$0xff]  }
0x11cc   :  { %12427 = vmatpush1.bf16.msra.mxu0 %v22868_v2  ;;  %12468 = vmatpush1.bf16.msra.mxu1 %v22873_v61  ;;  %v23128_v2 = vld [vmem:[%s23730_s8 + $0x24] ss:$16 sps:$4 sm:$0xff]   ;;  %v23133_v61 = vld [vmem:[%s23730_s8 + $0x2c] ss:$16 sps:$4 sm:$0xff]  }
0x11cd   :  { %12428 = vmatprep.subr.bf16.mxu0 %v22880_v31  ;;  %12469 = vmatprep.subr.bf16.mxu1 %v24680_v60  ;;  %v23138_v31 = vld [vmem:[%s23730_s8 + $0x20] ss:$16 sps:$4 sm:$0xff]   ;;  %v23368_v60 = vld [vmem:[%s23730_s8 + $0x164] ss:$16 sps:$4 sm:$0xff]  }
0x11ce   :  { %24699 = vst [vmem:[#allocation29_spill] sm:$0xff] %v23368_v60 }
0x11d0   :  { %12429 = vmatpush1.bf16.msra.mxu0 %v24681_v34  ;;  %12470 = vmatpush1.bf16.msra.mxu1 %v24682_v57  ;;  %v23373_v34 = vld [vmem:[%s23730_s8 + $0x16c] ss:$16 sps:$4 sm:$0xff]   ;;  %v23378_v57 = vld [vmem:[%s23730_s8 + $0x160] ss:$16 sps:$4 sm:$0xff]  }
0x11d1   :  { %12430 = vmatprep.subr.bf16.mxu0 %v24683_v29  ;;  %12471 = vmatprep.subr.bf16.mxu1 %v24684_v30  ;;  %24700 = vst [vmem:[#allocation93_spill] sm:$0xff] %v23373_v34  ;;  %24701 = vst [vmem:[#allocation28_spill] sm:$0xff] %v23378_v57  ;;  %v23383_v29 = vld [vmem:[%s23730_s8 + $0x168] ss:$16 sps:$4 sm:$0xff]   ;;  %v23392_v30 = vld [vmem:[%s23730_s8 + $0x184] ss:$16 sps:$4 sm:$0xff]  }
0x11d2   :  { %24702 = vst [vmem:[#allocation30_spill] sm:$0xff] %v23383_v29  ;;  %24703 = vst [vmem:[#allocation31_spill] sm:$0xff] %v23392_v30 }
0x11d4   :  { %12431 = vmatpush1.bf16.msra.mxu0 %v24685_v63  ;;  %12472 = vmatpush1.bf16.msra.mxu1 %v24686_v6  ;;  %v23397_v63 = vld [vmem:[%s23730_s8 + $0x18c] ss:$16 sps:$4 sm:$0xff]   ;;  %v23402_v6 = vld [vmem:[%s23730_s8 + $0x180] ss:$16 sps:$4 sm:$0xff]  }
0x11d5   :  { %12432 = vmatprep.subr.bf16.mxu0 %v24687_v18  ;;  %12473 = vmatprep.subr.bf16.mxu1 %v24688_v21  ;;  %24704 = vst [vmem:[#allocation17_spill] sm:$0xff] %v23397_v63  ;;  %24705 = vst [vmem:[#allocation18_spill] sm:$0xff] %v23402_v6  ;;  %v23407_v18 = vld [vmem:[%s23730_s8 + $0x188] ss:$16 sps:$4 sm:$0xff]   ;;  %v23416_v21 = vld [vmem:[%s23730_s8 + $0x1a0] ss:$16 sps:$4 sm:$0xff]  }
0x11d6   :  { %24706 = vst [vmem:[#allocation19_spill] sm:$0xff] %v23407_v18  ;;  %24707 = vst [vmem:[#allocation8_spill] sm:$0xff] %v23416_v21 }
0x11d8   :  { %12433 = vmatpush1.bf16.msra.mxu0 %v22940_v27  ;;  %12474 = vmatpush1.bf16.msra.mxu1 %v22945_v1  ;;  %v23162_v27 = vld [vmem:[%s23730_s8 + $0x40] ss:$16 sps:$4 sm:$0xff]   ;;  %v23167_v1 = vld [vmem:[%s23730_s8 + $0x48] ss:$16 sps:$4 sm:$0xff]  }
0x11d9   :  { %12434 = vmatprep.subr.bf16.mxu0 %v22952_v17  ;;  %12475 = vmatprep.subr.bf16.mxu1 %v22957_v7  ;;  %v23143_v7 = vld [vmem:[%s23730_s8 + $0x28] ss:$16 sps:$4 sm:$0xff]   ;;  %v23176_v17 = vld [vmem:[%s23730_s8 + $0x64] ss:$16 sps:$4 sm:$0xff]  }
0x11dc   :  { %12435 = vmatpush1.bf16.msra.mxu0 %v22964_v23  ;;  %12476 = vmatpush1.bf16.msra.mxu1 %v22969_v35  ;;  %v23152_v23 = vld [vmem:[%s23730_s8 + $0x44] ss:$16 sps:$4 sm:$0xff]   ;;  %v23157_v35 = vld [vmem:[%s23730_s8 + $0x4c] ss:$16 sps:$4 sm:$0xff]  }
0x11dd   :  { %12964 = vmatprep.subr.bf16.mxu0 %v23104_v44  ;;  %13005 = vmatprep.subr.bf16.mxu1 %v23109_v43 }
0x11df   :  { %12453 = vmatmul.mubr.bf16.vlgmr.msra.gmra.mrb[156].mxu0 %v11733_v19  ;;  %12494 = vmatmul.mubr.bf16.vlgmr.msra.gmra.mrb[156].mxu1 %v11733_v19  ;;  %v23359_v19 = vld [vmem:[%s23730_s8 + $0x148] ss:$16 sps:$4 sm:$0xff]  }
0x11e0   :  { %12965 = vmatpush1.bf16.msra.mxu0 %v23114_v52  ;;  %13006 = vmatpush1.bf16.msra.mxu1 %v23119_v10  ;;  %24698 = vst [vmem:[#allocation16_spill] sm:$0xff] %v23359_v19 }
0x11e1   :  { %12966 = vmatprep.subr.bf16.mxu0 %v23128_v2  ;;  %13007 = vmatprep.subr.bf16.mxu1 %v23133_v61 }
0x11e4   :  { %12967 = vmatpush1.bf16.msra.mxu0 %v23138_v31  ;;  %13008 = vmatpush1.bf16.msra.mxu1 %v23143_v7 }
0x11e5   :  { %12968 = vmatprep.subr.bf16.mxu0 %v23152_v23  ;;  %13009 = vmatprep.subr.bf16.mxu1 %v23157_v35 }
0x11e8   :  { %12969 = vmatpush1.bf16.msra.mxu0 %v23162_v27  ;;  %13010 = vmatpush1.bf16.msra.mxu1 %v23167_v1 }
0x11e9   :  { %12970 = vmatprep.subr.bf16.mxu0 %v23176_v17  ;;  %13011 = vmatprep.subr.bf16.mxu1 %v23181_v33 }
0x11ec   :  { %12971 = vmatpush1.bf16.msra.mxu0 %v23186_v47  ;;  %13012 = vmatpush1.bf16.msra.mxu1 %v23191_v11 }
0x11ed   :  { %12972 = vmatprep.subr.bf16.mxu0 %v23200_v24  ;;  %13013 = vmatprep.subr.bf16.mxu1 %v23205_v13 }
0x11f0   :  { %12973 = vmatpush1.bf16.msra.mxu0 %v23210_v16  ;;  %13014 = vmatpush1.bf16.msra.mxu1 %v23215_v14 }
0x11f1   :  { %12974 = vmatprep.subr.bf16.mxu0 %v23224_v0  ;;  %13015 = vmatprep.subr.bf16.mxu1 %v23229_v25 }
0x11f4   :  { %12975 = vmatpush1.bf16.msra.mxu0 %v23234_v56  ;;  %13016 = vmatpush1.bf16.msra.mxu1 %v23239_v26 }
0x11f5   :  { %12976 = vmatprep.subr.bf16.mxu0 %v23248_v39  ;;  %13017 = vmatprep.subr.bf16.mxu1 %v23253_v32 }
0x11f8   :  { %12977 = vmatpush1.bf16.msra.mxu0 %v23258_v49  ;;  %13018 = vmatpush1.bf16.msra.mxu1 %v23263_v20 }
0x11f9   :  { %12978 = vmatprep.subr.bf16.mxu0 %v23272_v3  ;;  %13019 = vmatprep.subr.bf16.mxu1 %v23277_v53 }
0x11fc   :  { %12979 = vmatpush1.bf16.msra.mxu0 %v23282_v51  ;;  %13020 = vmatpush1.bf16.msra.mxu1 %v23287_v45 }
0x11fd   :  { %12980 = vmatprep.subr.bf16.mxu0 %v23296_v9  ;;  %13021 = vmatprep.subr.bf16.mxu1 %v23301_v40 }
0x1200   :  { %12981 = vmatpush1.bf16.msra.mxu0 %v23306_v62  ;;  %13022 = vmatpush1.bf16.msra.mxu1 %v23311_v41 }
0x1201   :  { %12982 = vmatprep.subr.bf16.mxu0 %v23320_v48  ;;  %13023 = vmatprep.subr.bf16.mxu1 %v23325_v37 }
0x1204   :  { %12983 = vmatpush1.bf16.msra.mxu0 %v23330_v15  ;;  %13024 = vmatpush1.bf16.msra.mxu1 %v23335_v5 }
0x1205   :  { %12984 = vmatprep.subr.bf16.mxu0 %v23344_v28  ;;  %13025 = vmatprep.subr.bf16.mxu1 %v23349_v36 }
0x1208   :  { %12985 = vmatpush1.bf16.msra.mxu0 %v23354_v38  ;;  %13026 = vmatpush1.bf16.msra.mxu1 %v23359_v19 }
0x1209   :  { %12986 = vmatprep.subr.bf16.mxu0 %v23368_v60  ;;  %13027 = vmatprep.subr.bf16.mxu1 %v23373_v34 }
0x120c   :  { %12987 = vmatpush1.bf16.msra.mxu0 %v23378_v57  ;;  %13028 = vmatpush1.bf16.msra.mxu1 %v23383_v29  ;;  %v23421_v29 = vld [vmem:[%s23730_s8 + $0x1a4] ss:$16 sps:$4 sm:$0xff]   ;;  %v23449_v57 = vld [vmem:[%s23730_s8 + $0x1c0] ss:$16 sps:$4 sm:$0xff]  }
0x120d   :  { %12988 = vmatprep.subr.bf16.mxu0 %v23392_v30  ;;  %13029 = vmatprep.subr.bf16.mxu1 %v23397_v63  ;;  %24708 = vst [vmem:[#allocation9_spill] sm:$0xff] %v23421_v29  ;;  %v23426_v30 = vld [vmem:[%s23730_s8 + $0x1a8] ss:$16 sps:$4 sm:$0xff]   ;;  %v23442_v63 = vld [vmem:[%s23730_s8 + $0x1cc] ss:$16 sps:$4 sm:$0xff]   ;;  %24713 = vst [vmem:[#allocation41_spill] sm:$0xff] %v23449_v57 }
0x120e   :  { %24709 = vst [vmem:[#allocation10_spill] sm:$0xff] %v23426_v30  ;;  %24712 = vst [vmem:[#allocation40_spill] sm:$0xff] %v23442_v63 }
0x1210   :  { %12989 = vmatpush1.bf16.msra.mxu0 %v23402_v6  ;;  %13030 = vmatpush1.bf16.msra.mxu1 %v23407_v18  ;;  %v23431_v6 = vld [vmem:[%s23730_s8 + $0x1ac] ss:$16 sps:$4 sm:$0xff]   ;;  %v23436_v18 = vld [vmem:[%s23730_s8 + $0x1c4] ss:$16 sps:$4 sm:$0xff]  }
0x1211   :  { %24710 = vst [vmem:[#allocation11_spill] sm:$0xff] %v23431_v6  ;;  %24711 = vst [vmem:[#allocation4_spill] sm:$0xff] %v23436_v18  ;;  %12990 = vmatprep.subr.bf16.mxu0 %v23421_v29  ;;  %13031 = vmatprep.subr.bf16.mxu1 %v23431_v6  ;;  %v23456_v29 = vld [vmem:[%s23730_s8 + $0x1c8] ss:$16 sps:$4 sm:$0xff]   ;;  %v23461_v6 = vld [vmem:[%s23730_s8 + $0x1e4] ss:$16 sps:$4 sm:$0xff]  }
0x1212   :  { %24714 = vst [vmem:[#allocation42_spill] sm:$0xff] %v23456_v29  ;;  %24715 = vst [vmem:[#allocation43_spill] sm:$0xff] %v23461_v6 }
0x1214   :  { %12991 = vmatpush1.bf16.msra.mxu0 %v23416_v21  ;;  %13032 = vmatpush1.bf16.msra.mxu1 %v23426_v30  ;;  %v23467_v21 = vld [vmem:[%s23730_s8 + $0x1ec] ss:$16 sps:$4 sm:$0xff]   ;;  %v16851_v30 = vld [vmem:[%s23733_s6 + $0x4] ss:$16 sps:$4 sm:$0xff]  }
0x1215   :  { %12992 = vmatprep.subr.bf16.mxu0 %v23436_v18  ;;  %13033 = vmatprep.subr.bf16.mxu1 %v23442_v63  ;;  %24716 = vst [vmem:[#allocation5_spill] sm:$0xff] %v23467_v21  ;;  %v23473_v18 = vld [vmem:[%s23730_s8 + $0x1e0] ss:$16 sps:$4 sm:$0xff]   ;;  %v23480_v63 = vld [vmem:[%s23730_s8 + $0x1e8] ss:$16 sps:$4 sm:$0xff]  }
0x1216   :  { %24717 = vst [vmem:[#allocation6_spill] sm:$0xff] %v23473_v18  ;;  %24718 = vst [vmem:[#allocation7_spill] sm:$0xff] %v23480_v63 }
0x1218   :  { %12993 = vmatpush1.bf16.msra.mxu0 %v23449_v57  ;;  %13034 = vmatpush1.bf16.msra.mxu1 %v23456_v29  ;;  %v16854_v57 = vld [vmem:[%s23733_s6 + $0xc] ss:$16 sps:$4 sm:$0xff]  }
0x1219   :  { %12994 = vmatprep.subr.bf16.mxu0 %v23461_v6  ;;  %13035 = vmatprep.subr.bf16.mxu1 %v23467_v21  ;;  %v11799_v6 = vld [vmem:[%s23735_s9] sm:$0xf] }
0x121a   :  { %v11804_v29 = vrot.slane %v11799_v6, %v24673_v42  ;;  %v11808_v34 = vrot.slane %v11799_v6, %v24674_v50  ;;  %v11812_v37 = vrot.slane %v11799_v6, %v18152_v55  ;;  %v11816_v42 = vrot.slane %v11799_v6, %v18169_v4 }
0x121c   :  { %12995 = vmatpush1.bf16.msra.mxu0 %v23473_v18  ;;  %13036 = vmatpush1.bf16.msra.mxu1 %v23480_v63 }
0x121d   :  { %13243 = vmatprep.subr.bf16.mxu0 %v16851_v30  ;;  %13284 = vmatprep.subr.bf16.mxu1 %v16854_v57 }
0x1292   :  { %v12175_v60 = vpop.f32.mrb[152].mxu0  ;;  %v12216_v21 = vpop.f32.mrb[152].mxu1 }
0x1293   :  { %v12176_v19 = vadd.f32 %v12175_v60, %v11804_v29  ;;  %v12177_v38 = vpop.f32.mrb[153].mxu0  ;;  %v12218_v36 = vpop.f32.mrb[153].mxu1  ;;  %v12217_v48 = vadd.f32 %v12216_v21, %v11812_v37  ;;  %v24722_v37 = vld [vmem:[#allocation65_spill] sm:$0xff] }
0x1294   :  { %v12178_v28 = vadd.f32 %v12177_v38, %v11808_v34  ;;  %v12179_v5 = vpop.f32.mrb[154].mxu0  ;;  %v12220_v18 = vpop.f32.mrb[154].mxu1  ;;  %v12219_v50 = vadd.f32 %v12218_v36, %v11816_v42  ;;  %v24720_v42 = vld [vmem:[#allocation63_spill] sm:$0xff]  ;;  %v946_v36 = vadd.f32 %v24722_v37, %v18177_v8 }
0x1295   :  { %v15403_v15 = vmul.f32 -1.442695, %v12176_v19  ;;  %v12180_v63 = vpop.f32.mrb[155].mxu0  ;;  %v12221_v30 = vpop.f32.mrb[155].mxu1  ;;  %v15405_v41 = vmul.f32 -1.442695, %v12217_v48  ;;  %v944_v48 = vadd.f32 %v24720_v42, %v18157_v59 }
0x1296   :  { %v15404_v57 = vmul.f32 -1.442695, %v12178_v28  ;;  %v24719_v18 = vld [vmem:[#allocation62_spill] sm:$0xff] }
0x1297   :  { %17357 = vpow2.f32 %v15403_v15  ;;  %v831_v6 = vadd.f32 %v24719_v18, %v18149_v54 }
0x1298   :  { %17359 = vpow2.f32 %v15404_v57 }
0x1299   :  { %17361 = vtanh.f32 %v12219_v50  ;;  %v24721_v50 = vld [vmem:[#allocation64_spill] sm:$0xff] }
0x129a   :  { %17363 = vpow2.f32 %v15405_v41  ;;  %v833_v41 = vadd.f32 %v24721_v50, %v24677_v46 }
0x12a1   :  { %v17358_v62 = vpop.eup %17357 }
0x12a2   :  { %v12515_v60 = vadd.f32 1.0, %v17358_v62  ;;  %v17360_v29 = vpop.eup %17359 }
0x12a3   :  { %v12516_v5 = vadd.f32 1.0, %v17360_v29  ;;  %v17362_v38 = vpop.eup %17361 }
0x12a4   :  { %17365 = vrcp.f32 %v12515_v60  ;;  %v17364_v19 = vpop.eup %17363 }
0x12a5   :  { %17367 = vrcp.f32 %v12516_v5  ;;  %v12517_v63 = vadd.f32 1.0, %v17364_v19 }
0x12a7   :  { %17369 = vrcp.f32 %v12517_v63 }
0x12ae   :  { %v17366_v28 = vpop.eup %17365 }
0x12af   :  { %v12526_v15 = vmul.f32 %v17366_v28, %v17362_v38  ;;  %v17368_v34 = vpop.eup %17367 }
0x12b0   :  { %v12525_v62 = vmul.f32 %v17368_v34, %v23059_v22 }
0x12b1   :  { %v17370_v37 = vpop.eup %17369 }
0x12b2   :  { %v12454_v21 = vpop.f32.mrb[156].mxu0  ;;  %v12495_v30 = vpop.f32.mrb[156].mxu1  ;;  %v23507_v57 = vadd.f32 %v12526_v15, %v12525_v62 }
0x12b3   :  { %v12502_v60 = vadd.f32 %v12454_v21, %v831_v6  ;;  %v12504_v29 = vadd.f32 %v12495_v30, %v944_v48  ;;  %v12456_v5 = vpop.f32.mrb[157].mxu0  ;;  %v12497_v38 = vpop.f32.mrb[157].mxu1 }
0x12b4   :  { %v12503_v19 = vadd.f32 %v12456_v5, %v833_v41  ;;  %v12505_v28 = vadd.f32 %v12497_v38, %v946_v36  ;;  %v12458_v18 = vpop.f32.mrb[158].mxu0  ;;  %v12499_v42 = vpop.f32.mrb[158].mxu1  ;;  %17371 = vtanh.f32 %v23507_v57 }
0x12b5   :  { %v15407_v22 = vmul.f32 -1.442695, %v12502_v60  ;;  %v12459_v34 = vpop.f32.mrb[159].mxu0  ;;  %v12500_v50 = vpop.f32.mrb[159].mxu1  ;;  %v15409_v62 = vmul.f32 -1.442695, %v12504_v29 }
0x12b6   :  { %v15408_v46 = vmul.f32 -1.442695, %v12503_v19  ;;  %v16849_v34 = vld [vmem:[%s23733_s6] ss:$16 sps:$4 sm:$0xff]   ;;  %v16852_v50 = vld [vmem:[%s23733_s6 + $0x8] ss:$16 sps:$4 sm:$0xff]  }
0x12b7   :  { %17373 = vpow2.f32 %v15407_v22 }
0x12b8   :  { %17375 = vpow2.f32 %v15408_v46 }
0x12b9   :  { %17377 = vtanh.f32 %v12505_v28 }
0x12ba   :  { %17379 = vpow2.f32 %v15409_v62  ;;  %v16855_v62 = vld [vmem:[%s23733_s6 + $0x20] ss:$16 sps:$4 sm:$0xff]  }
0x12be   :  { %v17372_v15 = vpop.eup %17371 }
0x12bf   :  { %v12529_v6 = vmul.f32 %v17372_v15, %v17370_v37  ;;  %v16860_v15 = vld [vmem:[%s23733_s6 + $0x2c] ss:$16 sps:$4 sm:$0xff]  }
0x12c1   :  { %v17374_v48 = vpop.eup %17373  ;;  %15406 = vst [vmem:[%s23736_s11 + $0x68] sm:$0xff] %v12529_v6  ;;  %v12557_v63 = vpack.c.bf16 %v12529_v6, %v12529_v6  ;;  %v16858_v6 = vld [vmem:[%s23733_s6 + $0x28] ss:$16 sps:$4 sm:$0xff]  }
0x12c2   :  { %v12541_v21 = vadd.f32 1.0, %v17374_v48  ;;  %v17376_v41 = vpop.eup %17375  ;;  %v16863_v48 = vld [vmem:[%s23733_s6 + $0x44] ss:$16 sps:$4 sm:$0xff]  }
0x12c3   :  { %v12542_v36 = vadd.f32 1.0, %v17376_v41  ;;  %12996 = vmatprep.mubr.bf16.mxu0 %v12557_v63  ;;  %13037 = vmatprep.mubr.bf16.mxu1 %v12557_v63  ;;  %v17378_v46 = vpop.eup %17377  ;;  %v16861_v63 = vld [vmem:[%s23733_s6 + $0x40] ss:$16 sps:$4 sm:$0xff]   ;;  %v16864_v41 = vld [vmem:[%s23733_s6 + $0x48] ss:$16 sps:$4 sm:$0xff]  }
0x12c4   :  { %17381 = vrcp.f32 %v12541_v21  ;;  %v17380_v30 = vpop.eup %17379  ;;  %v16866_v21 = vld [vmem:[%s23733_s6 + $0x4c] ss:$16 sps:$4 sm:$0xff]  }
0x12c5   :  { %17383 = vrcp.f32 %v12542_v36  ;;  %v12543_v38 = vadd.f32 1.0, %v17380_v30  ;;  %v16869_v36 = vld [vmem:[%s23733_s6 + $0x64] ss:$16 sps:$4 sm:$0xff]   ;;  %v16870_v30 = vld [vmem:[%s23733_s6 + $0x68] ss:$16 sps:$4 sm:$0xff]  }
0x12c7   :  { %17385 = vrcp.f32 %v12543_v38  ;;  %v16876_v38 = vld [vmem:[%s23733_s6 + $0x88] ss:$16 sps:$4 sm:$0xff]  }
0x12ce   :  { %v17382_v60 = vpop.eup %17381 }
0x12cf   :  { %v12552_v29 = vmul.f32 %v17382_v60, %v17378_v46  ;;  %v17384_v5 = vpop.eup %17383  ;;  %v16867_v46 = vld [vmem:[%s23733_s6 + $0x60] ss:$16 sps:$4 sm:$0xff]   ;;  %v16875_v60 = vld [vmem:[%s23733_s6 + $0x84] ss:$16 sps:$4 sm:$0xff]  }
0x12d0   :  { %v12551_v19 = vmul.f32 %v17384_v5, %v23066_v12  ;;  %v16857_v12 = vld [vmem:[%s23733_s6 + $0x24] ss:$16 sps:$4 sm:$0xff]   ;;  %v16873_v5 = vld [vmem:[%s23733_s6 + $0x80] ss:$16 sps:$4 sm:$0xff]  }
0x12d1   :  { %v17386_v18 = vpop.eup %17385 }
0x12d2   :  { %v23514_v28 = vadd.f32 %v12552_v29, %v12551_v19  ;;  %v16878_v29 = vld [vmem:[%s23733_s6 + $0x8c] ss:$16 sps:$4 sm:$0xff]   ;;  %v16881_v19 = vld [vmem:[%s23733_s6 + $0xa4] ss:$16 sps:$4 sm:$0xff]  }
0x12d4   :  { %17387 = vtanh.f32 %v23514_v28 }
0x12de   :  { %v17388_v42 = vpop.eup %17387 }
0x12df   :  { %v12555_v22 = vmul.f32 %v17388_v42, %v17386_v18  ;;  %v16884_v18 = vld [vmem:[%s23733_s6 + $0xac] ss:$16 sps:$4 sm:$0xff]   ;;  %v16879_v42 = vld [vmem:[%s23733_s6 + $0xa0] ss:$16 sps:$4 sm:$0xff]  }
0x12e1   :  { %v23523_v37 = vpack.c.bf16 %v12555_v22, %v12555_v22  ;;  %v16882_v22 = vld [vmem:[%s23733_s6 + $0xa8] ss:$16 sps:$4 sm:$0xff]  }
0x12e3   :  { %12997 = vmatmul.mubr.bf16.vlgmr.msra.gmra.mrb[160].mxu0 %v23523_v37  ;;  %13038 = vmatmul.mubr.bf16.vlgmr.msra.gmra.mrb[160].mxu1 %v23523_v37 }
0x12e4   :  { %13244 = vmatpush1.bf16.msra.mxu0 %v16849_v34  ;;  %13285 = vmatpush1.bf16.msra.mxu1 %v16852_v50  ;;  %v16887_v34 = vld [vmem:[%s23733_s6 + $0xc4] ss:$16 sps:$4 sm:$0xff]   ;;  %v16890_v50 = vld [vmem:[%s23733_s6 + $0xcc] ss:$16 sps:$4 sm:$0xff]  }
0x12e5   :  { %13245 = vmatprep.subr.bf16.mxu0 %v16857_v12  ;;  %13286 = vmatprep.subr.bf16.mxu1 %v16860_v15  ;;  %v16885_v12 = vld [vmem:[%s23733_s6 + $0xc0] ss:$16 sps:$4 sm:$0xff]   ;;  %v16888_v15 = vld [vmem:[%s23733_s6 + $0xc8] ss:$16 sps:$4 sm:$0xff]  }
0x12e6   :  { %13275 = vmatprep.mubr.bf16.mxu0 %v24094_v58  ;;  %13316 = vmatprep.mubr.bf16.mxu1 %v24094_v58  ;;  %v16872_v58 = vld [vmem:[%s23733_s6 + $0x6c] ss:$16 sps:$4 sm:$0xff]  }
0x12e8   :  { %13246 = vmatpush1.bf16.msra.mxu0 %v16855_v62  ;;  %13287 = vmatpush1.bf16.msra.mxu1 %v16858_v6  ;;  %v16893_v62 = vld [vmem:[%s23733_s6 + $0xe4] ss:$16 sps:$4 sm:$0xff]   ;;  %v16896_v6 = vld [vmem:[%s23733_s6 + $0xec] ss:$16 sps:$4 sm:$0xff]  }
0x12e9   :  { %13247 = vmatprep.subr.bf16.mxu0 %v16863_v48  ;;  %13288 = vmatprep.subr.bf16.mxu1 %v16866_v21  ;;  %v16891_v48 = vld [vmem:[%s23733_s6 + $0xe0] ss:$16 sps:$4 sm:$0xff]   ;;  %v16894_v21 = vld [vmem:[%s23733_s6 + $0xe8] ss:$16 sps:$4 sm:$0xff]  }
0x12ec   :  { %13248 = vmatpush1.bf16.msra.mxu0 %v16861_v63  ;;  %13289 = vmatpush1.bf16.msra.mxu1 %v16864_v41 }
0x12ed   :  { %13249 = vmatprep.subr.bf16.mxu0 %v16869_v36  ;;  %13290 = vmatprep.subr.bf16.mxu1 %v16872_v58 }
0x12f0   :  { %13250 = vmatpush1.bf16.msra.mxu0 %v16867_v46  ;;  %13291 = vmatpush1.bf16.msra.mxu1 %v16870_v30 }
0x12f1   :  { %13251 = vmatprep.subr.bf16.mxu0 %v16875_v60  ;;  %13292 = vmatprep.subr.bf16.mxu1 %v16878_v29 }
0x12f4   :  { %13252 = vmatpush1.bf16.msra.mxu0 %v16873_v5  ;;  %13293 = vmatpush1.bf16.msra.mxu1 %v16876_v38 }
0x12f5   :  { %13253 = vmatprep.subr.bf16.mxu0 %v16881_v19  ;;  %13294 = vmatprep.subr.bf16.mxu1 %v16884_v18 }
0x12f8   :  { %13254 = vmatpush1.bf16.msra.mxu0 %v16879_v42  ;;  %13295 = vmatpush1.bf16.msra.mxu1 %v16882_v22 }
0x12f9   :  { %13255 = vmatprep.subr.bf16.mxu0 %v16887_v34  ;;  %13296 = vmatprep.subr.bf16.mxu1 %v16890_v50 }
0x12fc   :  { %13256 = vmatpush1.bf16.msra.mxu0 %v16885_v12  ;;  %13297 = vmatpush1.bf16.msra.mxu1 %v16888_v15 }
0x12fd   :  { %13257 = vmatprep.subr.bf16.mxu0 %v16893_v62  ;;  %13298 = vmatprep.subr.bf16.mxu1 %v16896_v6 }
0x1300   :  { %13258 = vmatpush1.bf16.msra.mxu0 %v16891_v48  ;;  %13299 = vmatpush1.bf16.msra.mxu1 %v16894_v21 }
0x1301   :  { %13787 = vmatprep.subr.bf16.mxu0 %v23104_v44  ;;  %13828 = vmatprep.subr.bf16.mxu1 %v23109_v43  ;;  %v24723_v44 = vld [vmem:[#allocation26_spill] sm:$0xff]  ;;  %v24724_v43 = vld [vmem:[#allocation27_spill] sm:$0xff] }
0x1303   :  { %13276 = vmatmul.mubr.bf16.vlgmr.msra.gmra.mrb[164].mxu0 %v23523_v37  ;;  %13317 = vmatmul.mubr.bf16.vlgmr.msra.gmra.mrb[164].mxu1 %v23523_v37 }
0x1304   :  { %13788 = vmatpush1.bf16.msra.mxu0 %v23114_v52  ;;  %13829 = vmatpush1.bf16.msra.mxu1 %v23119_v10  ;;  %v24725_v52 = vld [vmem:[#allocation86_spill] sm:$0xff]  ;;  %v24726_v10 = vld [vmem:[#allocation87_spill] sm:$0xff] }
0x1305   :  { %13789 = vmatprep.subr.bf16.mxu0 %v23128_v2  ;;  %13830 = vmatprep.subr.bf16.mxu1 %v23133_v61  ;;  %v24727_v2 = vld [vmem:[#allocation88_spill] sm:$0xff]  ;;  %v24728_v61 = vld [vmem:[#allocation89_spill] sm:$0xff] }
0x1308   :  { %13790 = vmatpush1.bf16.msra.mxu0 %v23138_v31  ;;  %13831 = vmatpush1.bf16.msra.mxu1 %v23143_v7  ;;  %v24729_v31 = vld [vmem:[#allocation90_spill] sm:$0xff]  ;;  %v24730_v7 = vld [vmem:[#allocation91_spill] sm:$0xff] }
0x1309   :  { %13791 = vmatprep.subr.bf16.mxu0 %v23152_v23  ;;  %13832 = vmatprep.subr.bf16.mxu1 %v23157_v35  ;;  %v24731_v23 = vld [vmem:[#allocation92_spill] sm:$0xff] }
0x130a   :  { %v24732_v35 = vld [vmem:[#allocation16_spill] sm:$0xff] }
0x130c   :  { %13792 = vmatpush1.bf16.msra.mxu0 %v23162_v27  ;;  %13833 = vmatpush1.bf16.msra.mxu1 %v23167_v1  ;;  %v24733_v27 = vld [vmem:[#allocation29_spill] sm:$0xff] }
0x130d   :  { %13793 = vmatprep.subr.bf16.mxu0 %v23176_v17  ;;  %13834 = vmatprep.subr.bf16.mxu1 %v23181_v33  ;;  %v24734_v1 = vld [vmem:[#allocation93_spill] sm:$0xff]  ;;  %v24735_v17 = vld [vmem:[#allocation28_spill] sm:$0xff]  ;;  %v24736_v33 = vld [vmem:[#allocation30_spill] sm:$0xff] }
0x1310   :  { %13794 = vmatpush1.bf16.msra.mxu0 %v23186_v47  ;;  %13835 = vmatpush1.bf16.msra.mxu1 %v23191_v11  ;;  %v24737_v47 = vld [vmem:[#allocation31_spill] sm:$0xff]  ;;  %v24738_v11 = vld [vmem:[#allocation17_spill] sm:$0xff] }
0x1311   :  { %13795 = vmatprep.subr.bf16.mxu0 %v23200_v24  ;;  %13836 = vmatprep.subr.bf16.mxu1 %v23205_v13  ;;  %v24739_v24 = vld [vmem:[#allocation18_spill] sm:$0xff]  ;;  %v24740_v13 = vld [vmem:[#allocation19_spill] sm:$0xff] }
0x1314   :  { %13796 = vmatpush1.bf16.msra.mxu0 %v23210_v16  ;;  %13837 = vmatpush1.bf16.msra.mxu1 %v23215_v14  ;;  %v24741_v16 = vld [vmem:[#allocation9_spill] sm:$0xff]  ;;  %v24742_v14 = vld [vmem:[#allocation11_spill] sm:$0xff] }
0x1315   :  { %13797 = vmatprep.subr.bf16.mxu0 %v23224_v0  ;;  %13838 = vmatprep.subr.bf16.mxu1 %v23229_v25  ;;  %v24743_v0 = vld [vmem:[#allocation8_spill] sm:$0xff]  ;;  %v24744_v25 = vld [vmem:[#allocation10_spill] sm:$0xff] }
0x1318   :  { %13798 = vmatpush1.bf16.msra.mxu0 %v23234_v56  ;;  %13839 = vmatpush1.bf16.msra.mxu1 %v23239_v26  ;;  %v24745_v56 = vld [vmem:[#allocation4_spill] sm:$0xff] }
0x1319   :  { %13799 = vmatprep.subr.bf16.mxu0 %v23248_v39  ;;  %13840 = vmatprep.subr.bf16.mxu1 %v23253_v32  ;;  %v24746_v26 = vld [vmem:[#allocation40_spill] sm:$0xff]  ;;  %v24747_v39 = vld [vmem:[#allocation41_spill] sm:$0xff]  ;;  %v24748_v32 = vld [vmem:[#allocation42_spill] sm:$0xff] }
0x131c   :  { %13800 = vmatpush1.bf16.msra.mxu0 %v23258_v49  ;;  %13841 = vmatpush1.bf16.msra.mxu1 %v23263_v20  ;;  %v24749_v49 = vld [vmem:[#allocation43_spill] sm:$0xff]  ;;  %v24750_v20 = vld [vmem:[#allocation5_spill] sm:$0xff] }
0x131d   :  { %13801 = vmatprep.subr.bf16.mxu0 %v23272_v3  ;;  %13842 = vmatprep.subr.bf16.mxu1 %v23277_v53  ;;  %v24751_v3 = vld [vmem:[#allocation6_spill] sm:$0xff]  ;;  %v24752_v53 = vld [vmem:[#allocation7_spill] sm:$0xff] }
0x1320   :  { %13802 = vmatpush1.bf16.msra.mxu0 %v23282_v51  ;;  %13843 = vmatpush1.bf16.msra.mxu1 %v23287_v45  ;;  %v12622_v51 = vld [vmem:[%s23735_s9] sm:$0xf] }
0x1321   :  { %13803 = vmatprep.subr.bf16.mxu0 %v23296_v9  ;;  %13844 = vmatprep.subr.bf16.mxu1 %v23301_v40  ;;  %v24753_v45 = vld [vmem:[#allocation3_spill] sm:$0xff]  ;;  %v24754_v40 = vld [vmem:[#allocation70_spill] sm:$0xff]  ;;  %v12635_v42 = vrot.slane %v12622_v51, %v18152_v55  ;;  %v12639_v22 = vrot.slane %v12622_v51, %v18169_v4 }
0x1322   :  { %v12627_v9 = vrot.slane %v12622_v51, %v24753_v45  ;;  %v12631_v37 = vrot.slane %v12622_v51, %v24754_v40 }
0x1324   :  { %13804 = vmatpush1.bf16.msra.mxu0 %v24723_v44  ;;  %13845 = vmatpush1.bf16.msra.mxu1 %v24724_v43 }
0x1325   :  { %13805 = vmatprep.subr.bf16.mxu0 %v24725_v52  ;;  %13846 = vmatprep.subr.bf16.mxu1 %v24726_v10 }
0x1328   :  { %13806 = vmatpush1.bf16.msra.mxu0 %v24727_v2  ;;  %13847 = vmatpush1.bf16.msra.mxu1 %v24728_v61  ;;  %v24755_v61 = vld [vmem:[#allocation66_spill] sm:$0xff] }
0x1329   :  { %13807 = vmatprep.subr.bf16.mxu0 %v24729_v31  ;;  %13848 = vmatprep.subr.bf16.mxu1 %v24730_v7  ;;  %v835_v31 = vadd.f32 %v24755_v61, %v18149_v54  ;;  %v24756_v7 = vld [vmem:[#allocation67_spill] sm:$0xff] }
0x132c   :  { %13808 = vmatpush1.bf16.msra.mxu0 %v24731_v23  ;;  %13849 = vmatpush1.bf16.msra.mxu1 %v24732_v35  ;;  %v948_v23 = vadd.f32 %v24756_v7, %v18157_v59 }
0x132d   :  { %13809 = vmatprep.subr.bf16.mxu0 %v24733_v27  ;;  %13850 = vmatprep.subr.bf16.mxu1 %v24734_v1  ;;  %v24757_v27 = vld [vmem:[#allocation71_spill] sm:$0xff]  ;;  %v24758_v1 = vld [vmem:[#allocation68_spill] sm:$0xff] }
0x1330   :  { %13810 = vmatpush1.bf16.msra.mxu0 %v24735_v17  ;;  %13851 = vmatpush1.bf16.msra.mxu1 %v24736_v33  ;;  %v837_v17 = vadd.f32 %v24758_v1, %v24757_v27  ;;  %v24759_v33 = vld [vmem:[#allocation69_spill] sm:$0xff] }
0x1331   :  { %13811 = vmatprep.subr.bf16.mxu0 %v24737_v47  ;;  %13852 = vmatprep.subr.bf16.mxu1 %v24738_v11  ;;  %v950_v47 = vadd.f32 %v24759_v33, %v18177_v8 }
0x1334   :  { %13812 = vmatpush1.bf16.msra.mxu0 %v24739_v24  ;;  %13853 = vmatpush1.bf16.msra.mxu1 %v24740_v13 }
0x1335   :  { %13813 = vmatprep.subr.bf16.mxu0 %v24741_v16  ;;  %13854 = vmatprep.subr.bf16.mxu1 %v24742_v14 }
0x1338   :  { %13814 = vmatpush1.bf16.msra.mxu0 %v24743_v0  ;;  %13855 = vmatpush1.bf16.msra.mxu1 %v24744_v25 }
0x1339   :  { %13815 = vmatprep.subr.bf16.mxu0 %v24745_v56  ;;  %13856 = vmatprep.subr.bf16.mxu1 %v24746_v26 }
0x133c   :  { %13816 = vmatpush1.bf16.msra.mxu0 %v24747_v39  ;;  %13857 = vmatpush1.bf16.msra.mxu1 %v24748_v32 }
0x133d   :  { %13817 = vmatprep.subr.bf16.mxu0 %v24749_v49  ;;  %13858 = vmatprep.subr.bf16.mxu1 %v24750_v20 }
0x1340   :  { %13818 = vmatpush1.bf16.msra.mxu0 %v24751_v3  ;;  %13859 = vmatpush1.bf16.msra.mxu1 %v24752_v53 }
0x13b6   :  { %v12998_v63 = vpop.f32.mrb[160].mxu0  ;;  %v13039_v41 = vpop.f32.mrb[160].mxu1 }
0x13b7   :  { %v12999_v36 = vadd.f32 %v12998_v63, %v12627_v9  ;;  %v13000_v58 = vpop.f32.mrb[161].mxu0  ;;  %v13041_v46 = vpop.f32.mrb[161].mxu1  ;;  %v13040_v34 = vadd.f32 %v13039_v41, %v12635_v42 }
0x13b8   :  { %v13001_v30 = vadd.f32 %v13000_v58, %v12631_v37  ;;  %v13002_v60 = vpop.f32.mrb[162].mxu0  ;;  %v13043_v29 = vpop.f32.mrb[162].mxu1  ;;  %v13042_v50 = vadd.f32 %v13041_v46, %v12639_v22 }
0x13b9   :  { %v15506_v5 = vmul.f32 -1.442695, %v12999_v36  ;;  %v13003_v38 = vpop.f32.mrb[163].mxu0  ;;  %v13044_v19 = vpop.f32.mrb[163].mxu1  ;;  %v15508_v12 = vmul.f32 -1.442695, %v13040_v34 }
0x13ba   :  { %v15507_v18 = vmul.f32 -1.442695, %v13001_v30 }
0x13bb   :  { %17389 = vpow2.f32 %v15506_v5 }
0x13bc   :  { %17391 = vpow2.f32 %v15507_v18 }
0x13bd   :  { %17393 = vtanh.f32 %v13042_v50 }
0x13be   :  { %17395 = vpow2.f32 %v15508_v12 }
0x13c5   :  { %v17390_v15 = vpop.eup %17389 }
0x13c6   :  { %v13338_v62 = vadd.f32 1.0, %v17390_v15  ;;  %v17392_v6 = vpop.eup %17391 }
0x13c7   :  { %v13339_v48 = vadd.f32 1.0, %v17392_v6  ;;  %v17394_v21 = vpop.eup %17393 }
0x13c8   :  { %17397 = vrcp.f32 %v13338_v62  ;;  %v17396_v44 = vpop.eup %17395 }
0x13c9   :  { %17399 = vrcp.f32 %v13339_v48  ;;  %v13340_v2 = vadd.f32 1.0, %v17396_v44 }
0x13cb   :  { %17401 = vrcp.f32 %v13340_v2 }
0x13d2   :  { %v17398_v43 = vpop.eup %17397 }
0x13d3   :  { %v13349_v52 = vmul.f32 %v17398_v43, %v17394_v21  ;;  %v17400_v10 = vpop.eup %17399 }
0x13d4   :  { %v13348_v35 = vmul.f32 %v17400_v10, %v23507_v57 }
0x13d5   :  { %v17402_v8 = vpop.eup %17401 }
0x13d6   :  { %v13277_v11 = vpop.f32.mrb[164].mxu0  ;;  %v13318_v24 = vpop.f32.mrb[164].mxu1  ;;  %v23695_v13 = vadd.f32 %v13349_v52, %v13348_v35 }
0x13d7   :  { %v13325_v16 = vadd.f32 %v13277_v11, %v835_v31  ;;  %v13327_v14 = vadd.f32 %v13318_v24, %v948_v23  ;;  %v13279_v0 = vpop.f32.mrb[165].mxu0  ;;  %v13320_v25 = vpop.f32.mrb[165].mxu1 }
0x13d8   :  { %v13326_v54 = vadd.f32 %v13279_v0, %v837_v17  ;;  %v13328_v56 = vadd.f32 %v13320_v25, %v950_v47  ;;  %v13281_v59 = vpop.f32.mrb[166].mxu0  ;;  %v13322_v26 = vpop.f32.mrb[166].mxu1  ;;  %17403 = vtanh.f32 %v23695_v13 }
0x13d9   :  { %v15510_v57 = vmul.f32 -1.442695, %v13325_v16  ;;  %v13282_v39 = vpop.f32.mrb[167].mxu0  ;;  %v13323_v32 = vpop.f32.mrb[167].mxu1  ;;  %v15512_v3 = vmul.f32 -1.442695, %v13327_v14 }
0x13da   :  { %v15511_v49 = vmul.f32 -1.442695, %v13326_v54 }
0x13db   :  { %17405 = vpow2.f32 %v15510_v57 }
0x13dc   :  { %17407 = vpow2.f32 %v15511_v49 }
0x13dd   :  { %17409 = vtanh.f32 %v13328_v56 }
0x13de   :  { %17411 = vpow2.f32 %v15512_v3 }
0x13e2   :  { %v17404_v20 = vpop.eup %17403 }
0x13e3   :  { %v13352_v53 = vmul.f32 %v17404_v20, %v17402_v8 }
0x13e5   :  { %v17406_v51 = vpop.eup %17405  ;;  %15509 = vst [vmem:[%s23736_s11 + $0x70] sm:$0xff] %v13352_v53  ;;  %v13380_v37 = vpack.c.bf16 %v13352_v53, %v13352_v53 }
0x13e6   :  { %v13364_v9 = vadd.f32 1.0, %v17406_v51  ;;  %v17408_v63 = vpop.eup %17407 }
0x13e7   :  { %v13365_v41 = vadd.f32 1.0, %v17408_v63  ;;  %13819 = vmatprep.mubr.bf16.mxu0 %v13380_v37  ;;  %13860 = vmatprep.mubr.bf16.mxu1 %v13380_v37  ;;  %v17410_v36 = vpop.eup %17409 }
0x13e8   :  { %17413 = vrcp.f32 %v13364_v9  ;;  %v17412_v58 = vpop.eup %17411 }
0x13e9   :  { %17415 = vrcp.f32 %v13365_v41  ;;  %v13366_v29 = vadd.f32 1.0, %v17412_v58 }
0x13eb   :  { %17417 = vrcp.f32 %v13366_v29 }
0x13f2   :  { %v17414_v46 = vpop.eup %17413 }
0x13f3   :  { %v13375_v30 = vmul.f32 %v17414_v46, %v17410_v36  ;;  %v17416_v60 = vpop.eup %17415 }
0x13f4   :  { %v13374_v5 = vmul.f32 %v17416_v60, %v23514_v28  ;;  %v13445_v28 = vld [vmem:[%s23735_s9] sm:$0xf] }
0x13f5   :  { %v17418_v19 = vpop.eup %17417  ;;  %v13450_v34 = vrot.slane %v13445_v28, %v24753_v45  ;;  %v13454_v50 = vrot.slane %v13445_v28, %v24754_v40  ;;  %v13458_v31 = vrot.slane %v13445_v28, %v18152_v55  ;;  %v13462_v45 = vrot.slane %v13445_v28, %v18169_v4 }
0x13f6   :  { %v13376_v38 = vadd.f32 %v13375_v30, %v13374_v5 }
0x13f8   :  { %17419 = vtanh.f32 %v13376_v38  ;;  %13896 = vst [vmem:[%s23737_s13] sm:$0xff] %v13376_v38 }
0x1402   :  { %v17420_v18 = vpop.eup %17419 }
0x1403   :  { %v13378_v42 = vmul.f32 %v17420_v18, %v17418_v19 }
0x1405   :  { %v13379_v22 = vpack.c.bf16 %v13378_v42, %v13378_v42  ;;  %13895 = vst [vmem:[%s23738_s12] sm:$0xff] %v13378_v42 }
0x1407   :  { %13820 = vmatmul.mubr.bf16.vlgmr.msra.gmra.mrb[168].mxu0 %v13379_v22  ;;  %13861 = vmatmul.mubr.bf16.vlgmr.msra.gmra.mrb[168].mxu1 %v13379_v22 }
0x14da   :  { %v13821_v12 = vpop.f32.mrb[168].mxu0  ;;  %v13862_v15 = vpop.f32.mrb[168].mxu1 }
0x14db   :  { %v13822_v62 = vadd.f32 %v13821_v12, %v13450_v34  ;;  %v13823_v6 = vpop.f32.mrb[169].mxu0  ;;  %v13864_v48 = vpop.f32.mrb[169].mxu1  ;;  %v13863_v7 = vadd.f32 %v13862_v15, %v13458_v31 }
0x14dc   :  { %v13824_v21 = vadd.f32 %v13823_v6, %v13454_v50  ;;  %v13825_v44 = vpop.f32.mrb[170].mxu0  ;;  %v13866_v43 = vpop.f32.mrb[170].mxu1  ;;  %v13865_v40 = vadd.f32 %v13864_v48, %v13462_v45 }
0x14dd   :  { %v15577_v52 = vmul.f32 -1.442695, %v13822_v62  ;;  %v13826_v10 = vpop.f32.mrb[171].mxu0  ;;  %v13867_v2 = vpop.f32.mrb[171].mxu1  ;;  %v15579_v23 = vmul.f32 -1.442695, %v13863_v7 }
0x14de   :  { %v15578_v61 = vmul.f32 -1.442695, %v13824_v21 }
0x14df   :  { %17421 = vpow2.f32 %v15577_v52 }
0x14e0   :  { %17423 = vpow2.f32 %v15578_v61 }
0x14e1   :  { %17425 = vtanh.f32 %v13865_v40 }
0x14e2   :  { %17427 = vpow2.f32 %v15579_v23 }
0x14e9   :  { %v17422_v35 = vpop.eup %17421 }
0x14ea   :  { %v13878_v27 = vadd.f32 1.0, %v17422_v35  ;;  %v17424_v1 = vpop.eup %17423 }
0x14eb   :  { %v13879_v17 = vadd.f32 1.0, %v17424_v1  ;;  %v17426_v33 = vpop.eup %17425 }
0x14ec   :  { %17429 = vrcp.f32 %v13878_v27  ;;  %v17428_v47 = vpop.eup %17427 }
0x14ed   :  { %17431 = vrcp.f32 %v13879_v17  ;;  %v13880_v55 = vadd.f32 1.0, %v17428_v47 }
0x14ef   :  { %17433 = vrcp.f32 %v13880_v55 }
0x14f6   :  { %v17430_v11 = vpop.eup %17429 }
0x14f7   :  { %v13889_v24 = vmul.f32 %v17430_v11, %v17426_v33  ;;  %v17432_v16 = vpop.eup %17431 }
0x14f8   :  { %v13888_v14 = vmul.f32 %v17432_v16, %v23695_v13 }
0x14f9   :  { %v17434_v0 = vpop.eup %17433 }
0x14fa   :  { %v13890_v4 = vadd.f32 %v13889_v24, %v13888_v14 }
0x14fc   :  { %17435 = vtanh.f32 %v13890_v4  ;;  %15582 = vst [vmem:[%s23737_s13 + $0x8] sm:$0xff] %v13890_v4 }
0x1506   :  { %v17436_v25 = vpop.eup %17435 }
0x1507   :  { %v13892_v54 = vmul.f32 %v17436_v25, %v17434_v0 }
0x1509   :  { %15580 = vst [vmem:[%s23736_s11 + $0x78] sm:$0xff] %v13892_v54  ;;  %15581 = vst [vmem:[%s23738_s12 + $0x8] sm:$0xff] %v13892_v54 }

</bundles_post_ra>
